<compile_context>
chip_gen: v5e
topology: v5e:2x2
jax: 0.10.0
libtpu: 0.0.40
codegen_flags: <defaults>
</compile_context>

<pallas_src>
import jax
import jax.numpy as jnp
from jax.experimental import pallas as pl
from jax.experimental.pallas import tpu as pltpu

BN_EPS = 1e-5
_VMEM = pl.BlockSpec(memory_space=pltpu.MemorySpace.VMEM)


# ----------------------------- architecture ---------------------------------
def layer_configs(window_size, latent_size):
    W, L = window_size, latent_size
    # (Cin, Cout, kernel, stride, padding) -- mirrors the PyTorch Decoder
    return [
        (L,      16 * W, 10, 1, 0),
        (16 * W, 8 * W,  4,  2, 1),
        (8 * W,  4 * W,  4,  2, 1),
        (4 * W,  2 * W,  4,  2, 1),
        (2 * W,  W,      7,  1, 0),
    ]


def _out_len(t_in, k, s, p):
    return (t_in - 1) * s - 2 * p + k


def _consumer_pad(k, s, p):
    # Zero rows a layer needs around its *input* slab so it can read shifted
    # windows with no runtime padding / zero-insertion.
    if s == 1:
        return k - 1 - p                      # conv with flipped kernel
    assert (s, k, p) == (2, 4, 1), "polyphase path specialised to k=4,s=2,p=1"
    return 1                                  # polyphase needs x[m-1] .. x[m+1]


# ------------------------------ fused kernel --------------------------------
def _make_decoder_kernel(N, t_list, k_first, k_last, pads):
    T0, T1, T2, T3, T4 = t_list[1], t_list[2], t_list[3], t_list[4], t_list[5]

    def bn_relu(pieces, gamma, beta, count):
        # Single-pass batch statistics: E[x^2] - E[x]^2 (biased variance),
        # matching PyTorch BatchNorm1d training-mode normalisation.
        s_acc = None
        q_acc = None
        for y in pieces:
            cs = jnp.sum(y, axis=0, keepdims=True)
            cq = jnp.sum(y * y, axis=0, keepdims=True)
            s_acc = cs if s_acc is None else s_acc + cs
            q_acc = cq if q_acc is None else q_acc + cq
        inv_n = 1.0 / float(count)
        mean = s_acc * inv_n
        var = q_acc * inv_n - mean * mean
        scale = gamma * jax.lax.rsqrt(var + BN_EPS)
        shift = beta - mean * scale
        return [jnp.maximum(y * scale + shift, 0.0) for y in pieces]

    def conv_s1(x2d, w_ref, k, t_out):
        # stride-1 ConvTranspose == conv with flipped taps over a padded slab
        acc = None
        for j in range(k):
            lhs = x2d[j:j + t_out, :].astype(jnp.bfloat16)
            d = jnp.dot(lhs, w_ref[j], preferred_element_type=jnp.float32)
            acc = d if acc is None else acc + d
        return acc

    def kernel(x_ref,
               w0_ref, g0_ref, b0_ref,
               w1_ref, se1_ref, so1_ref, g1_ref, b1_ref,
               w2_ref, se2_ref, so2_ref, g2_ref, b2_ref,
               w3_ref, se3_ref, so3_ref, g3_ref, b3_ref,
               w4_ref, bias4_ref,
               out_ref,
               a0, a1, a2, a3):
        # Zero the activation slabs once so their padding rows are valid zeros.
        a0[...] = jnp.zeros_like(a0)
        a1[...] = jnp.zeros_like(a1)
        a2[...] = jnp.zeros_like(a2)
        a3[...] = jnp.zeros_like(a3)

        # ---- layer 0: ConvT1d(k=10, s=1) -> BN -> ReLU ----
        # (conv bias omitted: exactly cancelled by the BN mean subtraction)
        pieces = [conv_s1(x_ref[n], w0_ref, k_first, T0) for n in range(N)]
        pieces = bn_relu(pieces, g0_ref[...], b0_ref[...], N * T0)
        for n in range(N):
            a0[n, pads[1]:pads[1] + T0, :] = pieces[n]

        # ---- layers 1..3: polyphase ConvT1d(k=4, s=2, p=1) -> BN -> ReLU ----
        stride2 = [
            (a0, a1, w1_ref, se1_ref, so1_ref, g1_ref, b1_ref, T0, pads[2]),
            (a1, a2, w2_ref, se2_ref, so2_ref, g2_ref, b2_ref, T1, pads[3]),
            (a2, a3, w3_ref, se3_ref, so3_ref, g3_ref, b3_ref, T2, pads[4]),
        ]
        for src, dst, w_ref, se_ref, so_ref, g_ref, bt_ref, th, off in stride2:
            w_k0, w_k1, w_k2, w_k3 = w_ref[0], w_ref[1], w_ref[2], w_ref[3]
            phases = []
            for n in range(N):
                xn = src[n]                                    # (th + 2, Cin) f32
                x_lo = xn[0:th, :].astype(jnp.bfloat16)        # x[m-1]
                x_mid = xn[1:1 + th, :].astype(jnp.bfloat16)   # x[m]
                x_hi = xn[2:2 + th, :].astype(jnp.bfloat16)    # x[m+1]
                # y[2m]   = x[m]   @ W1 + x[m-1] @ W3
                # y[2m+1] = x[m+1] @ W0 + x[m]   @ W2
                ev = (jnp.dot(x_mid, w_k1, preferred_element_type=jnp.float32)
                      + jnp.dot(x_lo, w_k3, preferred_element_type=jnp.float32))
                od = (jnp.dot(x_hi, w_k0, preferred_element_type=jnp.float32)
                      + jnp.dot(x_mid, w_k2, preferred_element_type=jnp.float32))
                phases += [ev, od]
            phases = bn_relu(phases, g_ref[...], bt_ref[...], N * 2 * th)
            se = se_ref[...]
            so = so_ref[...]
            for n in range(N):
                ev_b = phases[2 * n].astype(jnp.bfloat16)
                od_b = phases[2 * n + 1].astype(jnp.bfloat16)
                # even/odd time interleave done on the MXU with 0/1 matrices
                inter = (jnp.dot(se, ev_b, preferred_element_type=jnp.float32)
                         + jnp.dot(so, od_b, preferred_element_type=jnp.float32))
                dst[n, off:off + 2 * th, :] = inter

        # ---- layer 4: ConvT1d(k=7, s=1) + bias -> Tanh ----
        for n in range(N):
            acc = conv_s1(a3[n], w4_ref, k_last, T4)
            out_ref[n] = jnp.tanh(acc + bias4_ref[...])

    return kernel


# ------------------------------- JAX wrapper ---------------------------------
def _prep_s1_taps(w):
    # PyTorch ConvTranspose1d weight (Cin, Cout, k): stride-1 transposed conv is
    # a conv with flipped taps -> tap j multiplies w[:, :, k-1-j].
    return jnp.transpose(jnp.flip(w, axis=2), (2, 0, 1)).astype(jnp.bfloat16)


def _prep_s2_taps(w):
    # polyphase path uses the raw tap order w[:, :, kk]
    return jnp.transpose(w, (2, 0, 1)).astype(jnp.bfloat16)


def _interleave_mats(t_half):
    i = jnp.arange(t_half)
    se = jnp.zeros((2 * t_half, t_half), jnp.float32).at[2 * i, i].set(1.0)
    so = jnp.zeros((2 * t_half, t_half), jnp.float32).at[2 * i + 1, i].set(1.0)
    return se.astype(jnp.bfloat16), so.astype(jnp.bfloat16)


def decoder_forward(x_ncl, params):
    """x_ncl: (N, latent_size, T) float32, PyTorch NCL layout."""
    N, _, t_in = x_ncl.shape
    cfgs = [(l["w"].shape[0], l["w"].shape[1], l["k"], l["s"], l["p"])
            for l in params]
    t_list = [t_in]
    for (_, _, k, s, p) in cfgs:
        t_list.append(_out_len(t_list[-1], k, s, p))
    pads = [_consumer_pad(k, s, p) for (_, _, k, s, p) in cfgs]

    # ----- host-side prep (tiny, folded into jit): layout + weight re-arrange
    x_cl = jnp.transpose(x_ncl, (0, 2, 1)).astype(jnp.float32)     # channels-last
    x_pad = jnp.pad(x_cl, ((0, 0), (pads[0], pads[0]), (0, 0)))

    inputs = [x_pad,
              _prep_s1_taps(params[0]["w"]),
              params[0]["gamma"].reshape(1, -1).astype(jnp.float32),
              params[0]["beta"].reshape(1, -1).astype(jnp.float32)]
    for l in range(1, 4):
        se, so = _interleave_mats(t_list[l])
        inputs += [_prep_s2_taps(params[l]["w"]), se, so,
                   params[l]["gamma"].reshape(1, -1).astype(jnp.float32),
                   params[l]["beta"].reshape(1, -1).astype(jnp.float32)]
    inputs += [_prep_s1_taps(params[4]["w"]),
               params[4]["b"].reshape(1, -1).astype(jnp.float32)]
    # Biases of layers 0-3 are intentionally unused: adding a per-channel
    # constant before training-mode BatchNorm has no effect on the output.

    scratch = [
        pltpu.VMEM((N, t_list[l + 1] + 2 * pads[l + 1], cfgs[l][1]), jnp.float32)
        for l in range(4)
    ]

    kernel = _make_decoder_kernel(N, t_list, cfgs[0][2], cfgs[4][2], pads)

    out_cl = pl.pallas_call(
        kernel,
        out_shape=jax.ShapeDtypeStruct((N, t_list[5], cfgs[4][1]), jnp.float32),
        in_specs=[_VMEM] * len(inputs),
        out_specs=_VMEM,
        scratch_shapes=scratch,
        compiler_params=pltpu.CompilerParams(vmem_limit_bytes=32 * 1024 * 1024),
    )(*inputs)

    return jnp.transpose(out_cl, (0, 2, 1))          # back to PyTorch NCL


# ------------------------------- init / main ---------------------------------
def init_decoder_params(key, window_size, latent_size):
    params = []
    for i, (cin, cout, k, s, p) in enumerate(layer_configs(window_size, latent_size)):
        kw, kb = jax.random.split(jax.random.fold_in(key, i))
        fan_in = cin * k
        weight = jax.random.normal(kw, (cin, cout, k), jnp.float32) / jnp.sqrt(fan_in)
        bias = 0.01 * jax.random.normal(kb, (cout,), jnp.float32)
        layer = {"w": weight, "b": bias, "k": k, "s": s, "p": p}
        if i < 4:   # followed by BatchNorm1d (fresh init: gamma=1, beta=0)
            layer["gamma"] = jnp.ones((cout,), jnp.float32)
            layer["beta"] = jnp.zeros((cout,), jnp.float32)
        params.append(layer)
    return params


if __name__ == "__main__":
    window_size = 4
    latent_size = 8
    N, T = 2, 8

    key = jax.random.PRNGKey(0)
    kx, kp = jax.random.split(key)
    x = jax.random.normal(kx, (N, latent_size, T), jnp.float32)
    params = init_decoder_params(kp, window_size, latent_size)

    fwd = jax.jit(lambda xx: decoder_forward(xx, params))
    out = fwd(x)
    jax.block_until_ready(out)

    # Expected length chain: 8 -> 17 -> 34 -> 68 -> 136 -> 142
    assert out.shape == (N, window_size, 142), out.shape
    assert out.dtype == jnp.float32
    assert bool(jnp.all(jnp.isfinite(out)))
    assert bool(jnp.all(jnp.abs(out) <= 1.0))   # tanh range
    print("KERNEL_OK")
</pallas_src>

<mosaic_0001>
module attributes {stable_mosaic.version = 11 : i64} {
  func.func @kernel(%arg0: memref<2x26x8xf32, #tpu.memory_space<vmem>>, %arg1: memref<10x8x64xbf16, #tpu.memory_space<vmem>>, %arg2: memref<1x64xf32, #tpu.memory_space<vmem>>, %arg3: memref<1x64xf32, #tpu.memory_space<vmem>>, %arg4: memref<4x64x32xbf16, #tpu.memory_space<vmem>>, %arg5: memref<34x17xbf16, #tpu.memory_space<vmem>>, %arg6: memref<34x17xbf16, #tpu.memory_space<vmem>>, %arg7: memref<1x32xf32, #tpu.memory_space<vmem>>, %arg8: memref<1x32xf32, #tpu.memory_space<vmem>>, %arg9: memref<4x32x16xbf16, #tpu.memory_space<vmem>>, %arg10: memref<68x34xbf16, #tpu.memory_space<vmem>>, %arg11: memref<68x34xbf16, #tpu.memory_space<vmem>>, %arg12: memref<1x16xf32, #tpu.memory_space<vmem>>, %arg13: memref<1x16xf32, #tpu.memory_space<vmem>>, %arg14: memref<4x16x8xbf16, #tpu.memory_space<vmem>>, %arg15: memref<136x68xbf16, #tpu.memory_space<vmem>>, %arg16: memref<136x68xbf16, #tpu.memory_space<vmem>>, %arg17: memref<1x8xf32, #tpu.memory_space<vmem>>, %arg18: memref<1x8xf32, #tpu.memory_space<vmem>>, %arg19: memref<7x8x4xbf16, #tpu.memory_space<vmem>>, %arg20: memref<1x4xf32, #tpu.memory_space<vmem>>, %arg21: memref<2x142x4xf32, #tpu.memory_space<vmem>>, %arg22: memref<2x19x64xf32, #tpu.memory_space<vmem>>, %arg23: memref<2x36x32xf32, #tpu.memory_space<vmem>>, %arg24: memref<2x70x16xf32, #tpu.memory_space<vmem>>, %arg25: memref<2x148x8xf32, #tpu.memory_space<vmem>>) attributes {dimension_semantics = [], scalar_prefetch = 0 : i64, scratch_operands = 4 : i64, tpu.core_type = #tpu.core_type<tc>} {
    %cst = arith.constant 0.000000e+00 : f32
    %0 = vector.broadcast %cst : f32 to vector<2x19x64xf32>
    %c0 = arith.constant 0 : index
    %c0_0 = arith.constant 0 : index
    %c0_1 = arith.constant 0 : index
    %1 = vector.load %arg22[%c0, %c0_0, %c0_1] : memref<2x19x64xf32, #tpu.memory_space<vmem>>, vector<2x19x64xf32>
    tpu.vector_store %arg22[%c0, %c0_0, %c0_1], %0 {strides = array<i32>} : memref<2x19x64xf32, #tpu.memory_space<vmem>>, vector<2x19x64xf32>,
    %cst_2 = arith.constant 0.000000e+00 : f32
    %2 = vector.broadcast %cst_2 : f32 to vector<2x36x32xf32>
    %c0_3 = arith.constant 0 : index
    %c0_4 = arith.constant 0 : index
    %c0_5 = arith.constant 0 : index
    %3 = vector.load %arg23[%c0_3, %c0_4, %c0_5] : memref<2x36x32xf32, #tpu.memory_space<vmem>>, vector<2x36x32xf32>
    tpu.vector_store %arg23[%c0_3, %c0_4, %c0_5], %2 {strides = array<i32>} : memref<2x36x32xf32, #tpu.memory_space<vmem>>, vector<2x36x32xf32>,
    %cst_6 = arith.constant 0.000000e+00 : f32
    %4 = vector.broadcast %cst_6 : f32 to vector<2x70x16xf32>
    %c0_7 = arith.constant 0 : index
    %c0_8 = arith.constant 0 : index
    %c0_9 = arith.constant 0 : index
    %5 = vector.load %arg24[%c0_7, %c0_8, %c0_9] : memref<2x70x16xf32, #tpu.memory_space<vmem>>, vector<2x70x16xf32>
    tpu.vector_store %arg24[%c0_7, %c0_8, %c0_9], %4 {strides = array<i32>} : memref<2x70x16xf32, #tpu.memory_space<vmem>>, vector<2x70x16xf32>,
    %cst_10 = arith.constant 0.000000e+00 : f32
    %6 = vector.broadcast %cst_10 : f32 to vector<2x148x8xf32>
    %c0_11 = arith.constant 0 : index
    %c0_12 = arith.constant 0 : index
    %c0_13 = arith.constant 0 : index
    %7 = vector.load %arg25[%c0_11, %c0_12, %c0_13] : memref<2x148x8xf32, #tpu.memory_space<vmem>>, vector<2x148x8xf32>
    tpu.vector_store %arg25[%c0_11, %c0_12, %c0_13], %6 {strides = array<i32>} : memref<2x148x8xf32, #tpu.memory_space<vmem>>, vector<2x148x8xf32>,
    %c0_14 = arith.constant 0 : index
    %c0_15 = arith.constant 0 : index
    %c0_16 = arith.constant 0 : index
    %8 = vector.load %arg0[%c0_14, %c0_15, %c0_16] : memref<2x26x8xf32, #tpu.memory_space<vmem>>, vector<1x26x8xf32>
    %9 = vector.shape_cast %8 : vector<1x26x8xf32> to vector<26x8xf32>
    %10 = vector.extract_strided_slice %9 {offsets = [0, 0], sizes = [17, 8], strides = [1, 1]} : vector<26x8xf32> to vector<17x8xf32>
    %11 = arith.truncf %10 : vector<17x8xf32> to vector<17x8xbf16>
    %c0_17 = arith.constant 0 : index
    %c0_18 = arith.constant 0 : index
    %c0_19 = arith.constant 0 : index
    %12 = vector.load %arg1[%c0_17, %c0_18, %c0_19] : memref<10x8x64xbf16, #tpu.memory_space<vmem>>, vector<1x8x64xbf16>
    %13 = vector.shape_cast %12 : vector<1x8x64xbf16> to vector<8x64xbf16>
    %cst_20 = arith.constant dense<0.000000e+00> : vector<17x64xf32>
    %14 = tpu.matmul %11, %13, %cst_20 {dimension_numbers = #tpu.dot_dimension_numbers<[1], [0], [0], [1], [0, 0, 1, 1], [], []>} : vector<17x8xbf16>, vector<8x64xbf16>, vector<17x64xf32> -> vector<17x64xf32>
    %15 = vector.extract_strided_slice %9 {offsets = [1, 0], sizes = [17, 8], strides = [1, 1]} : vector<26x8xf32> to vector<17x8xf32>
    %16 = arith.truncf %15 : vector<17x8xf32> to vector<17x8xbf16>
    %c1 = arith.constant 1 : index
    %c0_21 = arith.constant 0 : index
    %c0_22 = arith.constant 0 : index
    %17 = vector.load %arg1[%c1, %c0_21, %c0_22] : memref<10x8x64xbf16, #tpu.memory_space<vmem>>, vector<1x8x64xbf16>
    %18 = vector.shape_cast %17 : vector<1x8x64xbf16> to vector<8x64xbf16>
    %cst_23 = arith.constant dense<0.000000e+00> : vector<17x64xf32>
    %19 = tpu.matmul %16, %18, %cst_23 {dimension_numbers = #tpu.dot_dimension_numbers<[1], [0], [0], [1], [0, 0, 1, 1], [], []>} : vector<17x8xbf16>, vector<8x64xbf16>, vector<17x64xf32> -> vector<17x64xf32>
    %20 = arith.addf %14, %19 : vector<17x64xf32>
    %21 = vector.extract_strided_slice %9 {offsets = [2, 0], sizes = [17, 8], strides = [1, 1]} : vector<26x8xf32> to vector<17x8xf32>
    %22 = arith.truncf %21 : vector<17x8xf32> to vector<17x8xbf16>
    %c2 = arith.constant 2 : index
    %c0_24 = arith.constant 0 : index
    %c0_25 = arith.constant 0 : index
    %23 = vector.load %arg1[%c2, %c0_24, %c0_25] : memref<10x8x64xbf16, #tpu.memory_space<vmem>>, vector<1x8x64xbf16>
    %24 = vector.shape_cast %23 : vector<1x8x64xbf16> to vector<8x64xbf16>
    %cst_26 = arith.constant dense<0.000000e+00> : vector<17x64xf32>
    %25 = tpu.matmul %22, %24, %cst_26 {dimension_numbers = #tpu.dot_dimension_numbers<[1], [0], [0], [1], [0, 0, 1, 1], [], []>} : vector<17x8xbf16>, vector<8x64xbf16>, vector<17x64xf32> -> vector<17x64xf32>
    %26 = arith.addf %20, %25 : vector<17x64xf32>
    %27 = vector.extract_strided_slice %9 {offsets = [3, 0], sizes = [17, 8], strides = [1, 1]} : vector<26x8xf32> to vector<17x8xf32>
    %28 = arith.truncf %27 : vector<17x8xf32> to vector<17x8xbf16>
    %c3 = arith.constant 3 : index
    %c0_27 = arith.constant 0 : index
    %c0_28 = arith.constant 0 : index
    %29 = vector.load %arg1[%c3, %c0_27, %c0_28] : memref<10x8x64xbf16, #tpu.memory_space<vmem>>, vector<1x8x64xbf16>
    %30 = vector.shape_cast %29 : vector<1x8x64xbf16> to vector<8x64xbf16>
    %cst_29 = arith.constant dense<0.000000e+00> : vector<17x64xf32>
    %31 = tpu.matmul %28, %30, %cst_29 {dimension_numbers = #tpu.dot_dimension_numbers<[1], [0], [0], [1], [0, 0, 1, 1], [], []>} : vector<17x8xbf16>, vector<8x64xbf16>, vector<17x64xf32> -> vector<17x64xf32>
    %32 = arith.addf %26, %31 : vector<17x64xf32>
    %33 = vector.extract_strided_slice %9 {offsets = [4, 0], sizes = [17, 8], strides = [1, 1]} : vector<26x8xf32> to vector<17x8xf32>
    %34 = arith.truncf %33 : vector<17x8xf32> to vector<17x8xbf16>
    %c4 = arith.constant 4 : index
    %c0_30 = arith.constant 0 : index
    %c0_31 = arith.constant 0 : index
    %35 = vector.load %arg1[%c4, %c0_30, %c0_31] : memref<10x8x64xbf16, #tpu.memory_space<vmem>>, vector<1x8x64xbf16>
    %36 = vector.shape_cast %35 : vector<1x8x64xbf16> to vector<8x64xbf16>
    %cst_32 = arith.constant dense<0.000000e+00> : vector<17x64xf32>
    %37 = tpu.matmul %34, %36, %cst_32 {dimension_numbers = #tpu.dot_dimension_numbers<[1], [0], [0], [1], [0, 0, 1, 1], [], []>} : vector<17x8xbf16>, vector<8x64xbf16>, vector<17x64xf32> -> vector<17x64xf32>
    %38 = arith.addf %32, %37 : vector<17x64xf32>
    %39 = vector.extract_strided_slice %9 {offsets = [5, 0], sizes = [17, 8], strides = [1, 1]} : vector<26x8xf32> to vector<17x8xf32>
    %40 = arith.truncf %39 : vector<17x8xf32> to vector<17x8xbf16>
    %c5 = arith.constant 5 : index
    %c0_33 = arith.constant 0 : index
    %c0_34 = arith.constant 0 : index
    %41 = vector.load %arg1[%c5, %c0_33, %c0_34] : memref<10x8x64xbf16, #tpu.memory_space<vmem>>, vector<1x8x64xbf16>
    %42 = vector.shape_cast %41 : vector<1x8x64xbf16> to vector<8x64xbf16>
    %cst_35 = arith.constant dense<0.000000e+00> : vector<17x64xf32>
    %43 = tpu.matmul %40, %42, %cst_35 {dimension_numbers = #tpu.dot_dimension_numbers<[1], [0], [0], [1], [0, 0, 1, 1], [], []>} : vector<17x8xbf16>, vector<8x64xbf16>, vector<17x64xf32> -> vector<17x64xf32>
    %44 = arith.addf %38, %43 : vector<17x64xf32>
    %45 = vector.extract_strided_slice %9 {offsets = [6, 0], sizes = [17, 8], strides = [1, 1]} : vector<26x8xf32> to vector<17x8xf32>
    %46 = arith.truncf %45 : vector<17x8xf32> to vector<17x8xbf16>
    %c6 = arith.constant 6 : index
    %c0_36 = arith.constant 0 : index
    %c0_37 = arith.constant 0 : index
    %47 = vector.load %arg1[%c6, %c0_36, %c0_37] : memref<10x8x64xbf16, #tpu.memory_space<vmem>>, vector<1x8x64xbf16>
    %48 = vector.shape_cast %47 : vector<1x8x64xbf16> to vector<8x64xbf16>
    %cst_38 = arith.constant dense<0.000000e+00> : vector<17x64xf32>
    %49 = tpu.matmul %46, %48, %cst_38 {dimension_numbers = #tpu.dot_dimension_numbers<[1], [0], [0], [1], [0, 0, 1, 1], [], []>} : vector<17x8xbf16>, vector<8x64xbf16>, vector<17x64xf32> -> vector<17x64xf32>
    %50 = arith.addf %44, %49 : vector<17x64xf32>
    %51 = vector.extract_strided_slice %9 {offsets = [7, 0], sizes = [17, 8], strides = [1, 1]} : vector<26x8xf32> to vector<17x8xf32>
    %52 = arith.truncf %51 : vector<17x8xf32> to vector<17x8xbf16>
    %c7 = arith.constant 7 : index
    %c0_39 = arith.constant 0 : index
    %c0_40 = arith.constant 0 : index
    %53 = vector.load %arg1[%c7, %c0_39, %c0_40] : memref<10x8x64xbf16, #tpu.memory_space<vmem>>, vector<1x8x64xbf16>
    %54 = vector.shape_cast %53 : vector<1x8x64xbf16> to vector<8x64xbf16>
    %cst_41 = arith.constant dense<0.000000e+00> : vector<17x64xf32>
    %55 = tpu.matmul %52, %54, %cst_41 {dimension_numbers = #tpu.dot_dimension_numbers<[1], [0], [0], [1], [0, 0, 1, 1], [], []>} : vector<17x8xbf16>, vector<8x64xbf16>, vector<17x64xf32> -> vector<17x64xf32>
    %56 = arith.addf %50, %55 : vector<17x64xf32>
    %57 = vector.extract_strided_slice %9 {offsets = [8, 0], sizes = [17, 8], strides = [1, 1]} : vector<26x8xf32> to vector<17x8xf32>
    %58 = arith.truncf %57 : vector<17x8xf32> to vector<17x8xbf16>
    %c8 = arith.constant 8 : index
    %c0_42 = arith.constant 0 : index
    %c0_43 = arith.constant 0 : index
    %59 = vector.load %arg1[%c8, %c0_42, %c0_43] : memref<10x8x64xbf16, #tpu.memory_space<vmem>>, vector<1x8x64xbf16>
    %60 = vector.shape_cast %59 : vector<1x8x64xbf16> to vector<8x64xbf16>
    %cst_44 = arith.constant dense<0.000000e+00> : vector<17x64xf32>
    %61 = tpu.matmul %58, %60, %cst_44 {dimension_numbers = #tpu.dot_dimension_numbers<[1], [0], [0], [1], [0, 0, 1, 1], [], []>} : vector<17x8xbf16>, vector<8x64xbf16>, vector<17x64xf32> -> vector<17x64xf32>
    %62 = arith.addf %56, %61 : vector<17x64xf32>
    %63 = vector.extract_strided_slice %9 {offsets = [9, 0], sizes = [17, 8], strides = [1, 1]} : vector<26x8xf32> to vector<17x8xf32>
    %64 = arith.truncf %63 : vector<17x8xf32> to vector<17x8xbf16>
    %c9 = arith.constant 9 : index
    %c0_45 = arith.constant 0 : index
    %c0_46 = arith.constant 0 : index
    %65 = vector.load %arg1[%c9, %c0_45, %c0_46] : memref<10x8x64xbf16, #tpu.memory_space<vmem>>, vector<1x8x64xbf16>
    %66 = vector.shape_cast %65 : vector<1x8x64xbf16> to vector<8x64xbf16>
    %cst_47 = arith.constant dense<0.000000e+00> : vector<17x64xf32>
    %67 = tpu.matmul %64, %66, %cst_47 {dimension_numbers = #tpu.dot_dimension_numbers<[1], [0], [0], [1], [0, 0, 1, 1], [], []>} : vector<17x8xbf16>, vector<8x64xbf16>, vector<17x64xf32> -> vector<17x64xf32>
    %68 = arith.addf %62, %67 : vector<17x64xf32>
    %c1_48 = arith.constant 1 : index
    %c0_49 = arith.constant 0 : index
    %c0_50 = arith.constant 0 : index
    %69 = vector.load %arg0[%c1_48, %c0_49, %c0_50] : memref<2x26x8xf32, #tpu.memory_space<vmem>>, vector<1x26x8xf32>
    %70 = vector.shape_cast %69 : vector<1x26x8xf32> to vector<26x8xf32>
    %71 = vector.extract_strided_slice %70 {offsets = [0, 0], sizes = [17, 8], strides = [1, 1]} : vector<26x8xf32> to vector<17x8xf32>
    %72 = arith.truncf %71 : vector<17x8xf32> to vector<17x8xbf16>
    %c0_51 = arith.constant 0 : index
    %c0_52 = arith.constant 0 : index
    %c0_53 = arith.constant 0 : index
    %73 = vector.load %arg1[%c0_51, %c0_52, %c0_53] : memref<10x8x64xbf16, #tpu.memory_space<vmem>>, vector<1x8x64xbf16>
    %74 = vector.shape_cast %73 : vector<1x8x64xbf16> to vector<8x64xbf16>
    %cst_54 = arith.constant dense<0.000000e+00> : vector<17x64xf32>
    %75 = tpu.matmul %72, %74, %cst_54 {dimension_numbers = #tpu.dot_dimension_numbers<[1], [0], [0], [1], [0, 0, 1, 1], [], []>} : vector<17x8xbf16>, vector<8x64xbf16>, vector<17x64xf32> -> vector<17x64xf32>
    %76 = vector.extract_strided_slice %70 {offsets = [1, 0], sizes = [17, 8], strides = [1, 1]} : vector<26x8xf32> to vector<17x8xf32>
    %77 = arith.truncf %76 : vector<17x8xf32> to vector<17x8xbf16>
    %c1_55 = arith.constant 1 : index
    %c0_56 = arith.constant 0 : index
    %c0_57 = arith.constant 0 : index
    %78 = vector.load %arg1[%c1_55, %c0_56, %c0_57] : memref<10x8x64xbf16, #tpu.memory_space<vmem>>, vector<1x8x64xbf16>
    %79 = vector.shape_cast %78 : vector<1x8x64xbf16> to vector<8x64xbf16>
    %cst_58 = arith.constant dense<0.000000e+00> : vector<17x64xf32>
    %80 = tpu.matmul %77, %79, %cst_58 {dimension_numbers = #tpu.dot_dimension_numbers<[1], [0], [0], [1], [0, 0, 1, 1], [], []>} : vector<17x8xbf16>, vector<8x64xbf16>, vector<17x64xf32> -> vector<17x64xf32>
    %81 = arith.addf %75, %80 : vector<17x64xf32>
    %82 = vector.extract_strided_slice %70 {offsets = [2, 0], sizes = [17, 8], strides = [1, 1]} : vector<26x8xf32> to vector<17x8xf32>
    %83 = arith.truncf %82 : vector<17x8xf32> to vector<17x8xbf16>
    %c2_59 = arith.constant 2 : index
    %c0_60 = arith.constant 0 : index
    %c0_61 = arith.constant 0 : index
    %84 = vector.load %arg1[%c2_59, %c0_60, %c0_61] : memref<10x8x64xbf16, #tpu.memory_space<vmem>>, vector<1x8x64xbf16>
    %85 = vector.shape_cast %84 : vector<1x8x64xbf16> to vector<8x64xbf16>
    %cst_62 = arith.constant dense<0.000000e+00> : vector<17x64xf32>
    %86 = tpu.matmul %83, %85, %cst_62 {dimension_numbers = #tpu.dot_dimension_numbers<[1], [0], [0], [1], [0, 0, 1, 1], [], []>} : vector<17x8xbf16>, vector<8x64xbf16>, vector<17x64xf32> -> vector<17x64xf32>
    %87 = arith.addf %81, %86 : vector<17x64xf32>
    %88 = vector.extract_strided_slice %70 {offsets = [3, 0], sizes = [17, 8], strides = [1, 1]} : vector<26x8xf32> to vector<17x8xf32>
    %89 = arith.truncf %88 : vector<17x8xf32> to vector<17x8xbf16>
    %c3_63 = arith.constant 3 : index
    %c0_64 = arith.constant 0 : index
    %c0_65 = arith.constant 0 : index
    %90 = vector.load %arg1[%c3_63, %c0_64, %c0_65] : memref<10x8x64xbf16, #tpu.memory_space<vmem>>, vector<1x8x64xbf16>
    %91 = vector.shape_cast %90 : vector<1x8x64xbf16> to vector<8x64xbf16>
    %cst_66 = arith.constant dense<0.000000e+00> : vector<17x64xf32>
    %92 = tpu.matmul %89, %91, %cst_66 {dimension_numbers = #tpu.dot_dimension_numbers<[1], [0], [0], [1], [0, 0, 1, 1], [], []>} : vector<17x8xbf16>, vector<8x64xbf16>, vector<17x64xf32> -> vector<17x64xf32>
    %93 = arith.addf %87, %92 : vector<17x64xf32>
    %94 = vector.extract_strided_slice %70 {offsets = [4, 0], sizes = [17, 8], strides = [1, 1]} : vector<26x8xf32> to vector<17x8xf32>
    %95 = arith.truncf %94 : vector<17x8xf32> to vector<17x8xbf16>
    %c4_67 = arith.constant 4 : index
    %c0_68 = arith.constant 0 : index
    %c0_69 = arith.constant 0 : index
    %96 = vector.load %arg1[%c4_67, %c0_68, %c0_69] : memref<10x8x64xbf16, #tpu.memory_space<vmem>>, vector<1x8x64xbf16>
    %97 = vector.shape_cast %96 : vector<1x8x64xbf16> to vector<8x64xbf16>
    %cst_70 = arith.constant dense<0.000000e+00> : vector<17x64xf32>
    %98 = tpu.matmul %95, %97, %cst_70 {dimension_numbers = #tpu.dot_dimension_numbers<[1], [0], [0], [1], [0, 0, 1, 1], [], []>} : vector<17x8xbf16>, vector<8x64xbf16>, vector<17x64xf32> -> vector<17x64xf32>
    %99 = arith.addf %93, %98 : vector<17x64xf32>
    %100 = vector.extract_strided_slice %70 {offsets = [5, 0], sizes = [17, 8], strides = [1, 1]} : vector<26x8xf32> to vector<17x8xf32>
    %101 = arith.truncf %100 : vector<17x8xf32> to vector<17x8xbf16>
    %c5_71 = arith.constant 5 : index
    %c0_72 = arith.constant 0 : index
    %c0_73 = arith.constant 0 : index
    %102 = vector.load %arg1[%c5_71, %c0_72, %c0_73] : memref<10x8x64xbf16, #tpu.memory_space<vmem>>, vector<1x8x64xbf16>
    %103 = vector.shape_cast %102 : vector<1x8x64xbf16> to vector<8x64xbf16>
    %cst_74 = arith.constant dense<0.000000e+00> : vector<17x64xf32>
    %104 = tpu.matmul %101, %103, %cst_74 {dimension_numbers = #tpu.dot_dimension_numbers<[1], [0], [0], [1], [0, 0, 1, 1], [], []>} : vector<17x8xbf16>, vector<8x64xbf16>, vector<17x64xf32> -> vector<17x64xf32>
    %105 = arith.addf %99, %104 : vector<17x64xf32>
    %106 = vector.extract_strided_slice %70 {offsets = [6, 0], sizes = [17, 8], strides = [1, 1]} : vector<26x8xf32> to vector<17x8xf32>
    %107 = arith.truncf %106 : vector<17x8xf32> to vector<17x8xbf16>
    %c6_75 = arith.constant 6 : index
    %c0_76 = arith.constant 0 : index
    %c0_77 = arith.constant 0 : index
    %108 = vector.load %arg1[%c6_75, %c0_76, %c0_77] : memref<10x8x64xbf16, #tpu.memory_space<vmem>>, vector<1x8x64xbf16>
    %109 = vector.shape_cast %108 : vector<1x8x64xbf16> to vector<8x64xbf16>
    %cst_78 = arith.constant dense<0.000000e+00> : vector<17x64xf32>
    %110 = tpu.matmul %107, %109, %cst_78 {dimension_numbers = #tpu.dot_dimension_numbers<[1], [0], [0], [1], [0, 0, 1, 1], [], []>} : vector<17x8xbf16>, vector<8x64xbf16>, vector<17x64xf32> -> vector<17x64xf32>
    %111 = arith.addf %105, %110 : vector<17x64xf32>
    %112 = vector.extract_strided_slice %70 {offsets = [7, 0], sizes = [17, 8], strides = [1, 1]} : vector<26x8xf32> to vector<17x8xf32>
    %113 = arith.truncf %112 : vector<17x8xf32> to vector<17x8xbf16>
    %c7_79 = arith.constant 7 : index
    %c0_80 = arith.constant 0 : index
    %c0_81 = arith.constant 0 : index
    %114 = vector.load %arg1[%c7_79, %c0_80, %c0_81] : memref<10x8x64xbf16, #tpu.memory_space<vmem>>, vector<1x8x64xbf16>
    %115 = vector.shape_cast %114 : vector<1x8x64xbf16> to vector<8x64xbf16>
    %cst_82 = arith.constant dense<0.000000e+00> : vector<17x64xf32>
    %116 = tpu.matmul %113, %115, %cst_82 {dimension_numbers = #tpu.dot_dimension_numbers<[1], [0], [0], [1], [0, 0, 1, 1], [], []>} : vector<17x8xbf16>, vector<8x64xbf16>, vector<17x64xf32> -> vector<17x64xf32>
    %117 = arith.addf %111, %116 : vector<17x64xf32>
    %118 = vector.extract_strided_slice %70 {offsets = [8, 0], sizes = [17, 8], strides = [1, 1]} : vector<26x8xf32> to vector<17x8xf32>
    %119 = arith.truncf %118 : vector<17x8xf32> to vector<17x8xbf16>
    %c8_83 = arith.constant 8 : index
    %c0_84 = arith.constant 0 : index
    %c0_85 = arith.constant 0 : index
    %120 = vector.load %arg1[%c8_83, %c0_84, %c0_85] : memref<10x8x64xbf16, #tpu.memory_space<vmem>>, vector<1x8x64xbf16>
    %121 = vector.shape_cast %120 : vector<1x8x64xbf16> to vector<8x64xbf16>
    %cst_86 = arith.constant dense<0.000000e+00> : vector<17x64xf32>
    %122 = tpu.matmul %119, %121, %cst_86 {dimension_numbers = #tpu.dot_dimension_numbers<[1], [0], [0], [1], [0, 0, 1, 1], [], []>} : vector<17x8xbf16>, vector<8x64xbf16>, vector<17x64xf32> -> vector<17x64xf32>
    %123 = arith.addf %117, %122 : vector<17x64xf32>
    %124 = vector.extract_strided_slice %70 {offsets = [9, 0], sizes = [17, 8], strides = [1, 1]} : vector<26x8xf32> to vector<17x8xf32>
    %125 = arith.truncf %124 : vector<17x8xf32> to vector<17x8xbf16>
    %c9_87 = arith.constant 9 : index
    %c0_88 = arith.constant 0 : index
    %c0_89 = arith.constant 0 : index
    %126 = vector.load %arg1[%c9_87, %c0_88, %c0_89] : memref<10x8x64xbf16, #tpu.memory_space<vmem>>, vector<1x8x64xbf16>
    %127 = vector.shape_cast %126 : vector<1x8x64xbf16> to vector<8x64xbf16>
    %cst_90 = arith.constant dense<0.000000e+00> : vector<17x64xf32>
    %128 = tpu.matmul %125, %127, %cst_90 {dimension_numbers = #tpu.dot_dimension_numbers<[1], [0], [0], [1], [0, 0, 1, 1], [], []>} : vector<17x8xbf16>, vector<8x64xbf16>, vector<17x64xf32> -> vector<17x64xf32>
    %129 = arith.addf %123, %128 : vector<17x64xf32>
    %c0_91 = arith.constant 0 : index
    %c0_92 = arith.constant 0 : index
    %130 = vector.load %arg2[%c0_91, %c0_92] : memref<1x64xf32, #tpu.memory_space<vmem>>, vector<1x64xf32>
    %c0_93 = arith.constant 0 : index
    %c0_94 = arith.constant 0 : index
    %131 = vector.load %arg3[%c0_93, %c0_94] : memref<1x64xf32, #tpu.memory_space<vmem>>, vector<1x64xf32>
    %cst_95 = arith.constant dense<0.000000e+00> : vector<64xf32>
    %132 = vector.multi_reduction <add>, %68, %cst_95 [0] : vector<17x64xf32> to vector<64xf32>
    %133 = vector.shape_cast %132 : vector<64xf32> to vector<1x64xf32>
    %134 = arith.mulf %68, %68 : vector<17x64xf32>
    %cst_96 = arith.constant dense<0.000000e+00> : vector<64xf32>
    %135 = vector.multi_reduction <add>, %134, %cst_96 [0] : vector<17x64xf32> to vector<64xf32>
    %136 = vector.shape_cast %135 : vector<64xf32> to vector<1x64xf32>
    %cst_97 = arith.constant dense<0.000000e+00> : vector<64xf32>
    %137 = vector.multi_reduction <add>, %129, %cst_97 [0] : vector<17x64xf32> to vector<64xf32>
    %138 = vector.shape_cast %137 : vector<64xf32> to vector<1x64xf32>
    %139 = arith.mulf %129, %129 : vector<17x64xf32>
    %cst_98 = arith.constant dense<0.000000e+00> : vector<64xf32>
    %140 = vector.multi_reduction <add>, %139, %cst_98 [0] : vector<17x64xf32> to vector<64xf32>
    %141 = vector.shape_cast %140 : vector<64xf32> to vector<1x64xf32>
    %142 = arith.addf %133, %138 : vector<1x64xf32>
    %143 = arith.addf %136, %141 : vector<1x64xf32>
    %cst_99 = arith.constant 0.0294117648 : f32
    %144 = vector.broadcast %cst_99 : f32 to vector<1x64xf32>
    %145 = arith.mulf %142, %144 : vector<1x64xf32>
    %cst_100 = arith.constant 0.0294117648 : f32
    %146 = vector.broadcast %cst_100 : f32 to vector<1x64xf32>
    %147 = arith.mulf %143, %146 : vector<1x64xf32>
    %148 = arith.mulf %145, %145 : vector<1x64xf32>
    %149 = arith.subf %147, %148 : vector<1x64xf32>
    %cst_101 = arith.constant 9.99999974E-6 : f32
    %150 = vector.broadcast %cst_101 : f32 to vector<1x64xf32>
    %151 = arith.addf %149, %150 : vector<1x64xf32>
    %152 = math.rsqrt %151 : vector<1x64xf32>
    %153 = arith.mulf %130, %152 : vector<1x64xf32>
    %154 = arith.mulf %145, %153 : vector<1x64xf32>
    %155 = arith.subf %131, %154 : vector<1x64xf32>
    %156 = vector.broadcast %153 : vector<1x64xf32> to vector<17x64xf32>
    %157 = arith.mulf %68, %156 : vector<17x64xf32>
    %158 = vector.broadcast %155 : vector<1x64xf32> to vector<17x64xf32>
    %159 = arith.addf %157, %158 : vector<17x64xf32>
    %cst_102 = arith.constant 0.000000e+00 : f32
    %160 = vector.broadcast %cst_102 : f32 to vector<17x64xf32>
    %161 = arith.maximumf %159, %160 : vector<17x64xf32>
    %162 = vector.broadcast %153 : vector<1x64xf32> to vector<17x64xf32>
    %163 = arith.mulf %129, %162 : vector<17x64xf32>
    %164 = vector.broadcast %155 : vector<1x64xf32> to vector<17x64xf32>
    %165 = arith.addf %163, %164 : vector<17x64xf32>
    %cst_103 = arith.constant 0.000000e+00 : f32
    %166 = vector.broadcast %cst_103 : f32 to vector<17x64xf32>
    %167 = arith.maximumf %165, %166 : vector<17x64xf32>
    %c0_104 = arith.constant 0 : index
    %c1_105 = arith.constant 1 : index
    %c0_106 = arith.constant 0 : index
    %168 = vector.load %arg22[%c0_104, %c1_105, %c0_106] : memref<2x19x64xf32, #tpu.memory_space<vmem>>, vector<1x17x64xf32>
    %169 = vector.shape_cast %168 : vector<1x17x64xf32> to vector<17x64xf32>
    %170 = vector.shape_cast %161 : vector<17x64xf32> to vector<1x17x64xf32>
    tpu.vector_store %arg22[%c0_104, %c1_105, %c0_106], %170 {strides = array<i32>} : memref<2x19x64xf32, #tpu.memory_space<vmem>>, vector<1x17x64xf32>,
    %c1_107 = arith.constant 1 : index
    %c1_108 = arith.constant 1 : index
    %c0_109 = arith.constant 0 : index
    %171 = vector.load %arg22[%c1_107, %c1_108, %c0_109] : memref<2x19x64xf32, #tpu.memory_space<vmem>>, vector<1x17x64xf32>
    %172 = vector.shape_cast %171 : vector<1x17x64xf32> to vector<17x64xf32>
    %173 = vector.shape_cast %167 : vector<17x64xf32> to vector<1x17x64xf32>
    tpu.vector_store %arg22[%c1_107, %c1_108, %c0_109], %173 {strides = array<i32>} : memref<2x19x64xf32, #tpu.memory_space<vmem>>, vector<1x17x64xf32>,
    %c0_110 = arith.constant 0 : index
    %c0_111 = arith.constant 0 : index
    %c0_112 = arith.constant 0 : index
    %174 = vector.load %arg4[%c0_110, %c0_111, %c0_112] : memref<4x64x32xbf16, #tpu.memory_space<vmem>>, vector<1x64x32xbf16>
    %175 = vector.shape_cast %174 : vector<1x64x32xbf16> to vector<64x32xbf16>
    %c1_113 = arith.constant 1 : index
    %c0_114 = arith.constant 0 : index
    %c0_115 = arith.constant 0 : index
    %176 = vector.load %arg4[%c1_113, %c0_114, %c0_115] : memref<4x64x32xbf16, #tpu.memory_space<vmem>>, vector<1x64x32xbf16>
    %177 = vector.shape_cast %176 : vector<1x64x32xbf16> to vector<64x32xbf16>
    %c2_116 = arith.constant 2 : index
    %c0_117 = arith.constant 0 : index
    %c0_118 = arith.constant 0 : index
    %178 = vector.load %arg4[%c2_116, %c0_117, %c0_118] : memref<4x64x32xbf16, #tpu.memory_space<vmem>>, vector<1x64x32xbf16>
    %179 = vector.shape_cast %178 : vector<1x64x32xbf16> to vector<64x32xbf16>
    %c3_119 = arith.constant 3 : index
    %c0_120 = arith.constant 0 : index
    %c0_121 = arith.constant 0 : index
    %180 = vector.load %arg4[%c3_119, %c0_120, %c0_121] : memref<4x64x32xbf16, #tpu.memory_space<vmem>>, vector<1x64x32xbf16>
    %181 = vector.shape_cast %180 : vector<1x64x32xbf16> to vector<64x32xbf16>
    %c0_122 = arith.constant 0 : index
    %c0_123 = arith.constant 0 : index
    %c0_124 = arith.constant 0 : index
    %182 = vector.load %arg22[%c0_122, %c0_123, %c0_124] : memref<2x19x64xf32, #tpu.memory_space<vmem>>, vector<1x19x64xf32>
    %183 = vector.shape_cast %182 : vector<1x19x64xf32> to vector<19x64xf32>
    %184 = vector.extract_strided_slice %183 {offsets = [0, 0], sizes = [17, 64], strides = [1, 1]} : vector<19x64xf32> to vector<17x64xf32>
    %185 = arith.truncf %184 : vector<17x64xf32> to vector<17x64xbf16>
    %186 = vector.extract_strided_slice %183 {offsets = [1, 0], sizes = [17, 64], strides = [1, 1]} : vector<19x64xf32> to vector<17x64xf32>
    %187 = arith.truncf %186 : vector<17x64xf32> to vector<17x64xbf16>
    %188 = vector.extract_strided_slice %183 {offsets = [2, 0], sizes = [17, 64], strides = [1, 1]} : vector<19x64xf32> to vector<17x64xf32>
    %189 = arith.truncf %188 : vector<17x64xf32> to vector<17x64xbf16>
    %cst_125 = arith.constant dense<0.000000e+00> : vector<17x32xf32>
    %190 = tpu.matmul %187, %177, %cst_125 {dimension_numbers = #tpu.dot_dimension_numbers<[1], [0], [0], [1], [0, 0, 1, 1], [], []>} : vector<17x64xbf16>, vector<64x32xbf16>, vector<17x32xf32> -> vector<17x32xf32>
    %cst_126 = arith.constant dense<0.000000e+00> : vector<17x32xf32>
    %191 = tpu.matmul %185, %181, %cst_126 {dimension_numbers = #tpu.dot_dimension_numbers<[1], [0], [0], [1], [0, 0, 1, 1], [], []>} : vector<17x64xbf16>, vector<64x32xbf16>, vector<17x32xf32> -> vector<17x32xf32>
    %192 = arith.addf %190, %191 : vector<17x32xf32>
    %cst_127 = arith.constant dense<0.000000e+00> : vector<17x32xf32>
    %193 = tpu.matmul %189, %175, %cst_127 {dimension_numbers = #tpu.dot_dimension_numbers<[1], [0], [0], [1], [0, 0, 1, 1], [], []>} : vector<17x64xbf16>, vector<64x32xbf16>, vector<17x32xf32> -> vector<17x32xf32>
    %cst_128 = arith.constant dense<0.000000e+00> : vector<17x32xf32>
    %194 = tpu.matmul %187, %179, %cst_128 {dimension_numbers = #tpu.dot_dimension_numbers<[1], [0], [0], [1], [0, 0, 1, 1], [], []>} : vector<17x64xbf16>, vector<64x32xbf16>, vector<17x32xf32> -> vector<17x32xf32>
    %195 = arith.addf %193, %194 : vector<17x32xf32>
    %c1_129 = arith.constant 1 : index
    %c0_130 = arith.constant 0 : index
    %c0_131 = arith.constant 0 : index
    %196 = vector.load %arg22[%c1_129, %c0_130, %c0_131] : memref<2x19x64xf32, #tpu.memory_space<vmem>>, vector<1x19x64xf32>
    %197 = vector.shape_cast %196 : vector<1x19x64xf32> to vector<19x64xf32>
    %198 = vector.extract_strided_slice %197 {offsets = [0, 0], sizes = [17, 64], strides = [1, 1]} : vector<19x64xf32> to vector<17x64xf32>
    %199 = arith.truncf %198 : vector<17x64xf32> to vector<17x64xbf16>
    %200 = vector.extract_strided_slice %197 {offsets = [1, 0], sizes = [17, 64], strides = [1, 1]} : vector<19x64xf32> to vector<17x64xf32>
    %201 = arith.truncf %200 : vector<17x64xf32> to vector<17x64xbf16>
    %202 = vector.extract_strided_slice %197 {offsets = [2, 0], sizes = [17, 64], strides = [1, 1]} : vector<19x64xf32> to vector<17x64xf32>
    %203 = arith.truncf %202 : vector<17x64xf32> to vector<17x64xbf16>
    %cst_132 = arith.constant dense<0.000000e+00> : vector<17x32xf32>
    %204 = tpu.matmul %201, %177, %cst_132 {dimension_numbers = #tpu.dot_dimension_numbers<[1], [0], [0], [1], [0, 0, 1, 1], [], []>} : vector<17x64xbf16>, vector<64x32xbf16>, vector<17x32xf32> -> vector<17x32xf32>
    %cst_133 = arith.constant dense<0.000000e+00> : vector<17x32xf32>
    %205 = tpu.matmul %199, %181, %cst_133 {dimension_numbers = #tpu.dot_dimension_numbers<[1], [0], [0], [1], [0, 0, 1, 1], [], []>} : vector<17x64xbf16>, vector<64x32xbf16>, vector<17x32xf32> -> vector<17x32xf32>
    %206 = arith.addf %204, %205 : vector<17x32xf32>
    %cst_134 = arith.constant dense<0.000000e+00> : vector<17x32xf32>
    %207 = tpu.matmul %203, %175, %cst_134 {dimension_numbers = #tpu.dot_dimension_numbers<[1], [0], [0], [1], [0, 0, 1, 1], [], []>} : vector<17x64xbf16>, vector<64x32xbf16>, vector<17x32xf32> -> vector<17x32xf32>
    %cst_135 = arith.constant dense<0.000000e+00> : vector<17x32xf32>
    %208 = tpu.matmul %201, %179, %cst_135 {dimension_numbers = #tpu.dot_dimension_numbers<[1], [0], [0], [1], [0, 0, 1, 1], [], []>} : vector<17x64xbf16>, vector<64x32xbf16>, vector<17x32xf32> -> vector<17x32xf32>
    %209 = arith.addf %207, %208 : vector<17x32xf32>
    %c0_136 = arith.constant 0 : index
    %c0_137 = arith.constant 0 : index
    %210 = vector.load %arg7[%c0_136, %c0_137] : memref<1x32xf32, #tpu.memory_space<vmem>>, vector<1x32xf32>
    %c0_138 = arith.constant 0 : index
    %c0_139 = arith.constant 0 : index
    %211 = vector.load %arg8[%c0_138, %c0_139] : memref<1x32xf32, #tpu.memory_space<vmem>>, vector<1x32xf32>
    %cst_140 = arith.constant dense<0.000000e+00> : vector<32xf32>
    %212 = vector.multi_reduction <add>, %192, %cst_140 [0] : vector<17x32xf32> to vector<32xf32>
    %213 = vector.shape_cast %212 : vector<32xf32> to vector<1x32xf32>
    %214 = arith.mulf %192, %192 : vector<17x32xf32>
    %cst_141 = arith.constant dense<0.000000e+00> : vector<32xf32>
    %215 = vector.multi_reduction <add>, %214, %cst_141 [0] : vector<17x32xf32> to vector<32xf32>
    %216 = vector.shape_cast %215 : vector<32xf32> to vector<1x32xf32>
    %cst_142 = arith.constant dense<0.000000e+00> : vector<32xf32>
    %217 = vector.multi_reduction <add>, %195, %cst_142 [0] : vector<17x32xf32> to vector<32xf32>
    %218 = vector.shape_cast %217 : vector<32xf32> to vector<1x32xf32>
    %219 = arith.mulf %195, %195 : vector<17x32xf32>
    %cst_143 = arith.constant dense<0.000000e+00> : vector<32xf32>
    %220 = vector.multi_reduction <add>, %219, %cst_143 [0] : vector<17x32xf32> to vector<32xf32>
    %221 = vector.shape_cast %220 : vector<32xf32> to vector<1x32xf32>
    %222 = arith.addf %213, %218 : vector<1x32xf32>
    %223 = arith.addf %216, %221 : vector<1x32xf32>
    %cst_144 = arith.constant dense<0.000000e+00> : vector<32xf32>
    %224 = vector.multi_reduction <add>, %206, %cst_144 [0] : vector<17x32xf32> to vector<32xf32>
    %225 = vector.shape_cast %224 : vector<32xf32> to vector<1x32xf32>
    %226 = arith.mulf %206, %206 : vector<17x32xf32>
    %cst_145 = arith.constant dense<0.000000e+00> : vector<32xf32>
    %227 = vector.multi_reduction <add>, %226, %cst_145 [0] : vector<17x32xf32> to vector<32xf32>
    %228 = vector.shape_cast %227 : vector<32xf32> to vector<1x32xf32>
    %229 = arith.addf %222, %225 : vector<1x32xf32>
    %230 = arith.addf %223, %228 : vector<1x32xf32>
    %cst_146 = arith.constant dense<0.000000e+00> : vector<32xf32>
    %231 = vector.multi_reduction <add>, %209, %cst_146 [0] : vector<17x32xf32> to vector<32xf32>
    %232 = vector.shape_cast %231 : vector<32xf32> to vector<1x32xf32>
    %233 = arith.mulf %209, %209 : vector<17x32xf32>
    %cst_147 = arith.constant dense<0.000000e+00> : vector<32xf32>
    %234 = vector.multi_reduction <add>, %233, %cst_147 [0] : vector<17x32xf32> to vector<32xf32>
    %235 = vector.shape_cast %234 : vector<32xf32> to vector<1x32xf32>
    %236 = arith.addf %229, %232 : vector<1x32xf32>
    %237 = arith.addf %230, %235 : vector<1x32xf32>
    %cst_148 = arith.constant 0.0147058824 : f32
    %238 = vector.broadcast %cst_148 : f32 to vector<1x32xf32>
    %239 = arith.mulf %236, %238 : vector<1x32xf32>
    %cst_149 = arith.constant 0.0147058824 : f32
    %240 = vector.broadcast %cst_149 : f32 to vector<1x32xf32>
    %241 = arith.mulf %237, %240 : vector<1x32xf32>
    %242 = arith.mulf %239, %239 : vector<1x32xf32>
    %243 = arith.subf %241, %242 : vector<1x32xf32>
    %cst_150 = arith.constant 9.99999974E-6 : f32
    %244 = vector.broadcast %cst_150 : f32 to vector<1x32xf32>
    %245 = arith.addf %243, %244 : vector<1x32xf32>
    %246 = math.rsqrt %245 : vector<1x32xf32>
    %247 = arith.mulf %210, %246 : vector<1x32xf32>
    %248 = arith.mulf %239, %247 : vector<1x32xf32>
    %249 = arith.subf %211, %248 : vector<1x32xf32>
    %250 = vector.broadcast %247 : vector<1x32xf32> to vector<17x32xf32>
    %251 = arith.mulf %192, %250 : vector<17x32xf32>
    %252 = vector.broadcast %249 : vector<1x32xf32> to vector<17x32xf32>
    %253 = arith.addf %251, %252 : vector<17x32xf32>
    %cst_151 = arith.constant 0.000000e+00 : f32
    %254 = vector.broadcast %cst_151 : f32 to vector<17x32xf32>
    %255 = arith.maximumf %253, %254 : vector<17x32xf32>
    %256 = vector.broadcast %247 : vector<1x32xf32> to vector<17x32xf32>
    %257 = arith.mulf %195, %256 : vector<17x32xf32>
    %258 = vector.broadcast %249 : vector<1x32xf32> to vector<17x32xf32>
    %259 = arith.addf %257, %258 : vector<17x32xf32>
    %cst_152 = arith.constant 0.000000e+00 : f32
    %260 = vector.broadcast %cst_152 : f32 to vector<17x32xf32>
    %261 = arith.maximumf %259, %260 : vector<17x32xf32>
    %262 = vector.broadcast %247 : vector<1x32xf32> to vector<17x32xf32>
    %263 = arith.mulf %206, %262 : vector<17x32xf32>
    %264 = vector.broadcast %249 : vector<1x32xf32> to vector<17x32xf32>
    %265 = arith.addf %263, %264 : vector<17x32xf32>
    %cst_153 = arith.constant 0.000000e+00 : f32
    %266 = vector.broadcast %cst_153 : f32 to vector<17x32xf32>
    %267 = arith.maximumf %265, %266 : vector<17x32xf32>
    %268 = vector.broadcast %247 : vector<1x32xf32> to vector<17x32xf32>
    %269 = arith.mulf %209, %268 : vector<17x32xf32>
    %270 = vector.broadcast %249 : vector<1x32xf32> to vector<17x32xf32>
    %271 = arith.addf %269, %270 : vector<17x32xf32>
    %cst_154 = arith.constant 0.000000e+00 : f32
    %272 = vector.broadcast %cst_154 : f32 to vector<17x32xf32>
    %273 = arith.maximumf %271, %272 : vector<17x32xf32>
    %c0_155 = arith.constant 0 : index
    %c0_156 = arith.constant 0 : index
    %274 = vector.load %arg5[%c0_155, %c0_156] : memref<34x17xbf16, #tpu.memory_space<vmem>>, vector<34x17xbf16>
    %c0_157 = arith.constant 0 : index
    %c0_158 = arith.constant 0 : index
    %275 = vector.load %arg6[%c0_157, %c0_158] : memref<34x17xbf16, #tpu.memory_space<vmem>>, vector<34x17xbf16>
    %276 = arith.truncf %255 : vector<17x32xf32> to vector<17x32xbf16>
    %277 = arith.truncf %261 : vector<17x32xf32> to vector<17x32xbf16>
    %cst_159 = arith.constant dense<0.000000e+00> : vector<34x32xf32>
    %278 = tpu.matmul %274, %276, %cst_159 {dimension_numbers = #tpu.dot_dimension_numbers<[1], [0], [0], [1], [0, 0, 1, 1], [], []>} : vector<34x17xbf16>, vector<17x32xbf16>, vector<34x32xf32> -> vector<34x32xf32>
    %cst_160 = arith.constant dense<0.000000e+00> : vector<34x32xf32>
    %279 = tpu.matmul %275, %277, %cst_160 {dimension_numbers = #tpu.dot_dimension_numbers<[1], [0], [0], [1], [0, 0, 1, 1], [], []>} : vector<34x17xbf16>, vector<17x32xbf16>, vector<34x32xf32> -> vector<34x32xf32>
    %280 = arith.addf %278, %279 : vector<34x32xf32>
    %c0_161 = arith.constant 0 : index
    %c1_162 = arith.constant 1 : index
    %c0_163 = arith.constant 0 : index
    %281 = vector.load %arg23[%c0_161, %c1_162, %c0_163] : memref<2x36x32xf32, #tpu.memory_space<vmem>>, vector<1x34x32xf32>
    %282 = vector.shape_cast %281 : vector<1x34x32xf32> to vector<34x32xf32>
    %283 = vector.shape_cast %280 : vector<34x32xf32> to vector<1x34x32xf32>
    tpu.vector_store %arg23[%c0_161, %c1_162, %c0_163], %283 {strides = array<i32>} : memref<2x36x32xf32, #tpu.memory_space<vmem>>, vector<1x34x32xf32>,
    %284 = arith.truncf %267 : vector<17x32xf32> to vector<17x32xbf16>
    %285 = arith.truncf %273 : vector<17x32xf32> to vector<17x32xbf16>
    %cst_164 = arith.constant dense<0.000000e+00> : vector<34x32xf32>
    %286 = tpu.matmul %274, %284, %cst_164 {dimension_numbers = #tpu.dot_dimension_numbers<[1], [0], [0], [1], [0, 0, 1, 1], [], []>} : vector<34x17xbf16>, vector<17x32xbf16>, vector<34x32xf32> -> vector<34x32xf32>
    %cst_165 = arith.constant dense<0.000000e+00> : vector<34x32xf32>
    %287 = tpu.matmul %275, %285, %cst_165 {dimension_numbers = #tpu.dot_dimension_numbers<[1], [0], [0], [1], [0, 0, 1, 1], [], []>} : vector<34x17xbf16>, vector<17x32xbf16>, vector<34x32xf32> -> vector<34x32xf32>
    %288 = arith.addf %286, %287 : vector<34x32xf32>
    %c1_166 = arith.constant 1 : index
    %c1_167 = arith.constant 1 : index
    %c0_168 = arith.constant 0 : index
    %289 = vector.load %arg23[%c1_166, %c1_167, %c0_168] : memref<2x36x32xf32, #tpu.memory_space<vmem>>, vector<1x34x32xf32>
    %290 = vector.shape_cast %289 : vector<1x34x32xf32> to vector<34x32xf32>
    %291 = vector.shape_cast %288 : vector<34x32xf32> to vector<1x34x32xf32>
    tpu.vector_store %arg23[%c1_166, %c1_167, %c0_168], %291 {strides = array<i32>} : memref<2x36x32xf32, #tpu.memory_space<vmem>>, vector<1x34x32xf32>,
    %c0_169 = arith.constant 0 : index
    %c0_170 = arith.constant 0 : index
    %c0_171 = arith.constant 0 : index
    %292 = vector.load %arg9[%c0_169, %c0_170, %c0_171] : memref<4x32x16xbf16, #tpu.memory_space<vmem>>, vector<1x32x16xbf16>
    %293 = vector.shape_cast %292 : vector<1x32x16xbf16> to vector<32x16xbf16>
    %c1_172 = arith.constant 1 : index
    %c0_173 = arith.constant 0 : index
    %c0_174 = arith.constant 0 : index
    %294 = vector.load %arg9[%c1_172, %c0_173, %c0_174] : memref<4x32x16xbf16, #tpu.memory_space<vmem>>, vector<1x32x16xbf16>
    %295 = vector.shape_cast %294 : vector<1x32x16xbf16> to vector<32x16xbf16>
    %c2_175 = arith.constant 2 : index
    %c0_176 = arith.constant 0 : index
    %c0_177 = arith.constant 0 : index
    %296 = vector.load %arg9[%c2_175, %c0_176, %c0_177] : memref<4x32x16xbf16, #tpu.memory_space<vmem>>, vector<1x32x16xbf16>
    %297 = vector.shape_cast %296 : vector<1x32x16xbf16> to vector<32x16xbf16>
    %c3_178 = arith.constant 3 : index
    %c0_179 = arith.constant 0 : index
    %c0_180 = arith.constant 0 : index
    %298 = vector.load %arg9[%c3_178, %c0_179, %c0_180] : memref<4x32x16xbf16, #tpu.memory_space<vmem>>, vector<1x32x16xbf16>
    %299 = vector.shape_cast %298 : vector<1x32x16xbf16> to vector<32x16xbf16>
    %c0_181 = arith.constant 0 : index
    %c0_182 = arith.constant 0 : index
    %c0_183 = arith.constant 0 : index
    %300 = vector.load %arg23[%c0_181, %c0_182, %c0_183] : memref<2x36x32xf32, #tpu.memory_space<vmem>>, vector<1x36x32xf32>
    %301 = vector.shape_cast %300 : vector<1x36x32xf32> to vector<36x32xf32>
    %302 = vector.extract_strided_slice %301 {offsets = [0, 0], sizes = [34, 32], strides = [1, 1]} : vector<36x32xf32> to vector<34x32xf32>
    %303 = arith.truncf %302 : vector<34x32xf32> to vector<34x32xbf16>
    %304 = vector.extract_strided_slice %301 {offsets = [1, 0], sizes = [34, 32], strides = [1, 1]} : vector<36x32xf32> to vector<34x32xf32>
    %305 = arith.truncf %304 : vector<34x32xf32> to vector<34x32xbf16>
    %306 = vector.extract_strided_slice %301 {offsets = [2, 0], sizes = [34, 32], strides = [1, 1]} : vector<36x32xf32> to vector<34x32xf32>
    %307 = arith.truncf %306 : vector<34x32xf32> to vector<34x32xbf16>
    %cst_184 = arith.constant dense<0.000000e+00> : vector<34x16xf32>
    %308 = tpu.matmul %305, %295, %cst_184 {dimension_numbers = #tpu.dot_dimension_numbers<[1], [0], [0], [1], [0, 0, 1, 1], [], []>} : vector<34x32xbf16>, vector<32x16xbf16>, vector<34x16xf32> -> vector<34x16xf32>
    %cst_185 = arith.constant dense<0.000000e+00> : vector<34x16xf32>
    %309 = tpu.matmul %303, %299, %cst_185 {dimension_numbers = #tpu.dot_dimension_numbers<[1], [0], [0], [1], [0, 0, 1, 1], [], []>} : vector<34x32xbf16>, vector<32x16xbf16>, vector<34x16xf32> -> vector<34x16xf32>
    %310 = arith.addf %308, %309 : vector<34x16xf32>
    %cst_186 = arith.constant dense<0.000000e+00> : vector<34x16xf32>
    %311 = tpu.matmul %307, %293, %cst_186 {dimension_numbers = #tpu.dot_dimension_numbers<[1], [0], [0], [1], [0, 0, 1, 1], [], []>} : vector<34x32xbf16>, vector<32x16xbf16>, vector<34x16xf32> -> vector<34x16xf32>
    %cst_187 = arith.constant dense<0.000000e+00> : vector<34x16xf32>
    %312 = tpu.matmul %305, %297, %cst_187 {dimension_numbers = #tpu.dot_dimension_numbers<[1], [0], [0], [1], [0, 0, 1, 1], [], []>} : vector<34x32xbf16>, vector<32x16xbf16>, vector<34x16xf32> -> vector<34x16xf32>
    %313 = arith.addf %311, %312 : vector<34x16xf32>
    %c1_188 = arith.constant 1 : index
    %c0_189 = arith.constant 0 : index
    %c0_190 = arith.constant 0 : index
    %314 = vector.load %arg23[%c1_188, %c0_189, %c0_190] : memref<2x36x32xf32, #tpu.memory_space<vmem>>, vector<1x36x32xf32>
    %315 = vector.shape_cast %314 : vector<1x36x32xf32> to vector<36x32xf32>
    %316 = vector.extract_strided_slice %315 {offsets = [0, 0], sizes = [34, 32], strides = [1, 1]} : vector<36x32xf32> to vector<34x32xf32>
    %317 = arith.truncf %316 : vector<34x32xf32> to vector<34x32xbf16>
    %318 = vector.extract_strided_slice %315 {offsets = [1, 0], sizes = [34, 32], strides = [1, 1]} : vector<36x32xf32> to vector<34x32xf32>
    %319 = arith.truncf %318 : vector<34x32xf32> to vector<34x32xbf16>
    %320 = vector.extract_strided_slice %315 {offsets = [2, 0], sizes = [34, 32], strides = [1, 1]} : vector<36x32xf32> to vector<34x32xf32>
    %321 = arith.truncf %320 : vector<34x32xf32> to vector<34x32xbf16>
    %cst_191 = arith.constant dense<0.000000e+00> : vector<34x16xf32>
    %322 = tpu.matmul %319, %295, %cst_191 {dimension_numbers = #tpu.dot_dimension_numbers<[1], [0], [0], [1], [0, 0, 1, 1], [], []>} : vector<34x32xbf16>, vector<32x16xbf16>, vector<34x16xf32> -> vector<34x16xf32>
    %cst_192 = arith.constant dense<0.000000e+00> : vector<34x16xf32>
    %323 = tpu.matmul %317, %299, %cst_192 {dimension_numbers = #tpu.dot_dimension_numbers<[1], [0], [0], [1], [0, 0, 1, 1], [], []>} : vector<34x32xbf16>, vector<32x16xbf16>, vector<34x16xf32> -> vector<34x16xf32>
    %324 = arith.addf %322, %323 : vector<34x16xf32>
    %cst_193 = arith.constant dense<0.000000e+00> : vector<34x16xf32>
    %325 = tpu.matmul %321, %293, %cst_193 {dimension_numbers = #tpu.dot_dimension_numbers<[1], [0], [0], [1], [0, 0, 1, 1], [], []>} : vector<34x32xbf16>, vector<32x16xbf16>, vector<34x16xf32> -> vector<34x16xf32>
    %cst_194 = arith.constant dense<0.000000e+00> : vector<34x16xf32>
    %326 = tpu.matmul %319, %297, %cst_194 {dimension_numbers = #tpu.dot_dimension_numbers<[1], [0], [0], [1], [0, 0, 1, 1], [], []>} : vector<34x32xbf16>, vector<32x16xbf16>, vector<34x16xf32> -> vector<34x16xf32>
    %327 = arith.addf %325, %326 : vector<34x16xf32>
    %c0_195 = arith.constant 0 : index
    %c0_196 = arith.constant 0 : index
    %328 = vector.load %arg12[%c0_195, %c0_196] : memref<1x16xf32, #tpu.memory_space<vmem>>, vector<1x16xf32>
    %c0_197 = arith.constant 0 : index
    %c0_198 = arith.constant 0 : index
    %329 = vector.load %arg13[%c0_197, %c0_198] : memref<1x16xf32, #tpu.memory_space<vmem>>, vector<1x16xf32>
    %cst_199 = arith.constant dense<0.000000e+00> : vector<16xf32>
    %330 = vector.multi_reduction <add>, %310, %cst_199 [0] : vector<34x16xf32> to vector<16xf32>
    %331 = vector.shape_cast %330 : vector<16xf32> to vector<1x16xf32>
    %332 = arith.mulf %310, %310 : vector<34x16xf32>
    %cst_200 = arith.constant dense<0.000000e+00> : vector<16xf32>
    %333 = vector.multi_reduction <add>, %332, %cst_200 [0] : vector<34x16xf32> to vector<16xf32>
    %334 = vector.shape_cast %333 : vector<16xf32> to vector<1x16xf32>
    %cst_201 = arith.constant dense<0.000000e+00> : vector<16xf32>
    %335 = vector.multi_reduction <add>, %313, %cst_201 [0] : vector<34x16xf32> to vector<16xf32>
    %336 = vector.shape_cast %335 : vector<16xf32> to vector<1x16xf32>
    %337 = arith.mulf %313, %313 : vector<34x16xf32>
    %cst_202 = arith.constant dense<0.000000e+00> : vector<16xf32>
    %338 = vector.multi_reduction <add>, %337, %cst_202 [0] : vector<34x16xf32> to vector<16xf32>
    %339 = vector.shape_cast %338 : vector<16xf32> to vector<1x16xf32>
    %340 = arith.addf %331, %336 : vector<1x16xf32>
    %341 = arith.addf %334, %339 : vector<1x16xf32>
    %cst_203 = arith.constant dense<0.000000e+00> : vector<16xf32>
    %342 = vector.multi_reduction <add>, %324, %cst_203 [0] : vector<34x16xf32> to vector<16xf32>
    %343 = vector.shape_cast %342 : vector<16xf32> to vector<1x16xf32>
    %344 = arith.mulf %324, %324 : vector<34x16xf32>
    %cst_204 = arith.constant dense<0.000000e+00> : vector<16xf32>
    %345 = vector.multi_reduction <add>, %344, %cst_204 [0] : vector<34x16xf32> to vector<16xf32>
    %346 = vector.shape_cast %345 : vector<16xf32> to vector<1x16xf32>
    %347 = arith.addf %340, %343 : vector<1x16xf32>
    %348 = arith.addf %341, %346 : vector<1x16xf32>
    %cst_205 = arith.constant dense<0.000000e+00> : vector<16xf32>
    %349 = vector.multi_reduction <add>, %327, %cst_205 [0] : vector<34x16xf32> to vector<16xf32>
    %350 = vector.shape_cast %349 : vector<16xf32> to vector<1x16xf32>
    %351 = arith.mulf %327, %327 : vector<34x16xf32>
    %cst_206 = arith.constant dense<0.000000e+00> : vector<16xf32>
    %352 = vector.multi_reduction <add>, %351, %cst_206 [0] : vector<34x16xf32> to vector<16xf32>
    %353 = vector.shape_cast %352 : vector<16xf32> to vector<1x16xf32>
    %354 = arith.addf %347, %350 : vector<1x16xf32>
    %355 = arith.addf %348, %353 : vector<1x16xf32>
    %cst_207 = arith.constant 0.0073529412 : f32
    %356 = vector.broadcast %cst_207 : f32 to vector<1x16xf32>
    %357 = arith.mulf %354, %356 : vector<1x16xf32>
    %cst_208 = arith.constant 0.0073529412 : f32
    %358 = vector.broadcast %cst_208 : f32 to vector<1x16xf32>
    %359 = arith.mulf %355, %358 : vector<1x16xf32>
    %360 = arith.mulf %357, %357 : vector<1x16xf32>
    %361 = arith.subf %359, %360 : vector<1x16xf32>
    %cst_209 = arith.constant 9.99999974E-6 : f32
    %362 = vector.broadcast %cst_209 : f32 to vector<1x16xf32>
    %363 = arith.addf %361, %362 : vector<1x16xf32>
    %364 = math.rsqrt %363 : vector<1x16xf32>
    %365 = arith.mulf %328, %364 : vector<1x16xf32>
    %366 = arith.mulf %357, %365 : vector<1x16xf32>
    %367 = arith.subf %329, %366 : vector<1x16xf32>
    %368 = vector.broadcast %365 : vector<1x16xf32> to vector<34x16xf32>
    %369 = arith.mulf %310, %368 : vector<34x16xf32>
    %370 = vector.broadcast %367 : vector<1x16xf32> to vector<34x16xf32>
    %371 = arith.addf %369, %370 : vector<34x16xf32>
    %cst_210 = arith.constant 0.000000e+00 : f32
    %372 = vector.broadcast %cst_210 : f32 to vector<34x16xf32>
    %373 = arith.maximumf %371, %372 : vector<34x16xf32>
    %374 = vector.broadcast %365 : vector<1x16xf32> to vector<34x16xf32>
    %375 = arith.mulf %313, %374 : vector<34x16xf32>
    %376 = vector.broadcast %367 : vector<1x16xf32> to vector<34x16xf32>
    %377 = arith.addf %375, %376 : vector<34x16xf32>
    %cst_211 = arith.constant 0.000000e+00 : f32
    %378 = vector.broadcast %cst_211 : f32 to vector<34x16xf32>
    %379 = arith.maximumf %377, %378 : vector<34x16xf32>
    %380 = vector.broadcast %365 : vector<1x16xf32> to vector<34x16xf32>
    %381 = arith.mulf %324, %380 : vector<34x16xf32>
    %382 = vector.broadcast %367 : vector<1x16xf32> to vector<34x16xf32>
    %383 = arith.addf %381, %382 : vector<34x16xf32>
    %cst_212 = arith.constant 0.000000e+00 : f32
    %384 = vector.broadcast %cst_212 : f32 to vector<34x16xf32>
    %385 = arith.maximumf %383, %384 : vector<34x16xf32>
    %386 = vector.broadcast %365 : vector<1x16xf32> to vector<34x16xf32>
    %387 = arith.mulf %327, %386 : vector<34x16xf32>
    %388 = vector.broadcast %367 : vector<1x16xf32> to vector<34x16xf32>
    %389 = arith.addf %387, %388 : vector<34x16xf32>
    %cst_213 = arith.constant 0.000000e+00 : f32
    %390 = vector.broadcast %cst_213 : f32 to vector<34x16xf32>
    %391 = arith.maximumf %389, %390 : vector<34x16xf32>
    %c0_214 = arith.constant 0 : index
    %c0_215 = arith.constant 0 : index
    %392 = vector.load %arg10[%c0_214, %c0_215] : memref<68x34xbf16, #tpu.memory_space<vmem>>, vector<68x34xbf16>
    %c0_216 = arith.constant 0 : index
    %c0_217 = arith.constant 0 : index
    %393 = vector.load %arg11[%c0_216, %c0_217] : memref<68x34xbf16, #tpu.memory_space<vmem>>, vector<68x34xbf16>
    %394 = arith.truncf %373 : vector<34x16xf32> to vector<34x16xbf16>
    %395 = arith.truncf %379 : vector<34x16xf32> to vector<34x16xbf16>
    %cst_218 = arith.constant dense<0.000000e+00> : vector<68x16xf32>
    %396 = tpu.matmul %392, %394, %cst_218 {dimension_numbers = #tpu.dot_dimension_numbers<[1], [0], [0], [1], [0, 0, 1, 1], [], []>} : vector<68x34xbf16>, vector<34x16xbf16>, vector<68x16xf32> -> vector<68x16xf32>
    %cst_219 = arith.constant dense<0.000000e+00> : vector<68x16xf32>
    %397 = tpu.matmul %393, %395, %cst_219 {dimension_numbers = #tpu.dot_dimension_numbers<[1], [0], [0], [1], [0, 0, 1, 1], [], []>} : vector<68x34xbf16>, vector<34x16xbf16>, vector<68x16xf32> -> vector<68x16xf32>
    %398 = arith.addf %396, %397 : vector<68x16xf32>
    %c0_220 = arith.constant 0 : index
    %c1_221 = arith.constant 1 : index
    %c0_222 = arith.constant 0 : index
    %399 = vector.load %arg24[%c0_220, %c1_221, %c0_222] : memref<2x70x16xf32, #tpu.memory_space<vmem>>, vector<1x68x16xf32>
    %400 = vector.shape_cast %399 : vector<1x68x16xf32> to vector<68x16xf32>
    %401 = vector.shape_cast %398 : vector<68x16xf32> to vector<1x68x16xf32>
    tpu.vector_store %arg24[%c0_220, %c1_221, %c0_222], %401 {strides = array<i32>} : memref<2x70x16xf32, #tpu.memory_space<vmem>>, vector<1x68x16xf32>,
    %402 = arith.truncf %385 : vector<34x16xf32> to vector<34x16xbf16>
    %403 = arith.truncf %391 : vector<34x16xf32> to vector<34x16xbf16>
    %cst_223 = arith.constant dense<0.000000e+00> : vector<68x16xf32>
    %404 = tpu.matmul %392, %402, %cst_223 {dimension_numbers = #tpu.dot_dimension_numbers<[1], [0], [0], [1], [0, 0, 1, 1], [], []>} : vector<68x34xbf16>, vector<34x16xbf16>, vector<68x16xf32> -> vector<68x16xf32>
    %cst_224 = arith.constant dense<0.000000e+00> : vector<68x16xf32>
    %405 = tpu.matmul %393, %403, %cst_224 {dimension_numbers = #tpu.dot_dimension_numbers<[1], [0], [0], [1], [0, 0, 1, 1], [], []>} : vector<68x34xbf16>, vector<34x16xbf16>, vector<68x16xf32> -> vector<68x16xf32>
    %406 = arith.addf %404, %405 : vector<68x16xf32>
    %c1_225 = arith.constant 1 : index
    %c1_226 = arith.constant 1 : index
    %c0_227 = arith.constant 0 : index
    %407 = vector.load %arg24[%c1_225, %c1_226, %c0_227] : memref<2x70x16xf32, #tpu.memory_space<vmem>>, vector<1x68x16xf32>
    %408 = vector.shape_cast %407 : vector<1x68x16xf32> to vector<68x16xf32>
    %409 = vector.shape_cast %406 : vector<68x16xf32> to vector<1x68x16xf32>
    tpu.vector_store %arg24[%c1_225, %c1_226, %c0_227], %409 {strides = array<i32>} : memref<2x70x16xf32, #tpu.memory_space<vmem>>, vector<1x68x16xf32>,
    %c0_228 = arith.constant 0 : index
    %c0_229 = arith.constant 0 : index
    %c0_230 = arith.constant 0 : index
    %410 = vector.load %arg14[%c0_228, %c0_229, %c0_230] : memref<4x16x8xbf16, #tpu.memory_space<vmem>>, vector<1x16x8xbf16>
    %411 = vector.shape_cast %410 : vector<1x16x8xbf16> to vector<16x8xbf16>
    %c1_231 = arith.constant 1 : index
    %c0_232 = arith.constant 0 : index
    %c0_233 = arith.constant 0 : index
    %412 = vector.load %arg14[%c1_231, %c0_232, %c0_233] : memref<4x16x8xbf16, #tpu.memory_space<vmem>>, vector<1x16x8xbf16>
    %413 = vector.shape_cast %412 : vector<1x16x8xbf16> to vector<16x8xbf16>
    %c2_234 = arith.constant 2 : index
    %c0_235 = arith.constant 0 : index
    %c0_236 = arith.constant 0 : index
    %414 = vector.load %arg14[%c2_234, %c0_235, %c0_236] : memref<4x16x8xbf16, #tpu.memory_space<vmem>>, vector<1x16x8xbf16>
    %415 = vector.shape_cast %414 : vector<1x16x8xbf16> to vector<16x8xbf16>
    %c3_237 = arith.constant 3 : index
    %c0_238 = arith.constant 0 : index
    %c0_239 = arith.constant 0 : index
    %416 = vector.load %arg14[%c3_237, %c0_238, %c0_239] : memref<4x16x8xbf16, #tpu.memory_space<vmem>>, vector<1x16x8xbf16>
    %417 = vector.shape_cast %416 : vector<1x16x8xbf16> to vector<16x8xbf16>
    %c0_240 = arith.constant 0 : index
    %c0_241 = arith.constant 0 : index
    %c0_242 = arith.constant 0 : index
    %418 = vector.load %arg24[%c0_240, %c0_241, %c0_242] : memref<2x70x16xf32, #tpu.memory_space<vmem>>, vector<1x70x16xf32>
    %419 = vector.shape_cast %418 : vector<1x70x16xf32> to vector<70x16xf32>
    %420 = vector.extract_strided_slice %419 {offsets = [0, 0], sizes = [68, 16], strides = [1, 1]} : vector<70x16xf32> to vector<68x16xf32>
    %421 = arith.truncf %420 : vector<68x16xf32> to vector<68x16xbf16>
    %422 = vector.extract_strided_slice %419 {offsets = [1, 0], sizes = [68, 16], strides = [1, 1]} : vector<70x16xf32> to vector<68x16xf32>
    %423 = arith.truncf %422 : vector<68x16xf32> to vector<68x16xbf16>
    %424 = vector.extract_strided_slice %419 {offsets = [2, 0], sizes = [68, 16], strides = [1, 1]} : vector<70x16xf32> to vector<68x16xf32>
    %425 = arith.truncf %424 : vector<68x16xf32> to vector<68x16xbf16>
    %cst_243 = arith.constant dense<0.000000e+00> : vector<68x8xf32>
    %426 = tpu.matmul %423, %413, %cst_243 {dimension_numbers = #tpu.dot_dimension_numbers<[1], [0], [0], [1], [0, 0, 1, 1], [], []>} : vector<68x16xbf16>, vector<16x8xbf16>, vector<68x8xf32> -> vector<68x8xf32>
    %cst_244 = arith.constant dense<0.000000e+00> : vector<68x8xf32>
    %427 = tpu.matmul %421, %417, %cst_244 {dimension_numbers = #tpu.dot_dimension_numbers<[1], [0], [0], [1], [0, 0, 1, 1], [], []>} : vector<68x16xbf16>, vector<16x8xbf16>, vector<68x8xf32> -> vector<68x8xf32>
    %428 = arith.addf %426, %427 : vector<68x8xf32>
    %cst_245 = arith.constant dense<0.000000e+00> : vector<68x8xf32>
    %429 = tpu.matmul %425, %411, %cst_245 {dimension_numbers = #tpu.dot_dimension_numbers<[1], [0], [0], [1], [0, 0, 1, 1], [], []>} : vector<68x16xbf16>, vector<16x8xbf16>, vector<68x8xf32> -> vector<68x8xf32>
    %cst_246 = arith.constant dense<0.000000e+00> : vector<68x8xf32>
    %430 = tpu.matmul %423, %415, %cst_246 {dimension_numbers = #tpu.dot_dimension_numbers<[1], [0], [0], [1], [0, 0, 1, 1], [], []>} : vector<68x16xbf16>, vector<16x8xbf16>, vector<68x8xf32> -> vector<68x8xf32>
    %431 = arith.addf %429, %430 : vector<68x8xf32>
    %c1_247 = arith.constant 1 : index
    %c0_248 = arith.constant 0 : index
    %c0_249 = arith.constant 0 : index
    %432 = vector.load %arg24[%c1_247, %c0_248, %c0_249] : memref<2x70x16xf32, #tpu.memory_space<vmem>>, vector<1x70x16xf32>
    %433 = vector.shape_cast %432 : vector<1x70x16xf32> to vector<70x16xf32>
    %434 = vector.extract_strided_slice %433 {offsets = [0, 0], sizes = [68, 16], strides = [1, 1]} : vector<70x16xf32> to vector<68x16xf32>
    %435 = arith.truncf %434 : vector<68x16xf32> to vector<68x16xbf16>
    %436 = vector.extract_strided_slice %433 {offsets = [1, 0], sizes = [68, 16], strides = [1, 1]} : vector<70x16xf32> to vector<68x16xf32>
    %437 = arith.truncf %436 : vector<68x16xf32> to vector<68x16xbf16>
    %438 = vector.extract_strided_slice %433 {offsets = [2, 0], sizes = [68, 16], strides = [1, 1]} : vector<70x16xf32> to vector<68x16xf32>
    %439 = arith.truncf %438 : vector<68x16xf32> to vector<68x16xbf16>
    %cst_250 = arith.constant dense<0.000000e+00> : vector<68x8xf32>
    %440 = tpu.matmul %437, %413, %cst_250 {dimension_numbers = #tpu.dot_dimension_numbers<[1], [0], [0], [1], [0, 0, 1, 1], [], []>} : vector<68x16xbf16>, vector<16x8xbf16>, vector<68x8xf32> -> vector<68x8xf32>
    %cst_251 = arith.constant dense<0.000000e+00> : vector<68x8xf32>
    %441 = tpu.matmul %435, %417, %cst_251 {dimension_numbers = #tpu.dot_dimension_numbers<[1], [0], [0], [1], [0, 0, 1, 1], [], []>} : vector<68x16xbf16>, vector<16x8xbf16>, vector<68x8xf32> -> vector<68x8xf32>
    %442 = arith.addf %440, %441 : vector<68x8xf32>
    %cst_252 = arith.constant dense<0.000000e+00> : vector<68x8xf32>
    %443 = tpu.matmul %439, %411, %cst_252 {dimension_numbers = #tpu.dot_dimension_numbers<[1], [0], [0], [1], [0, 0, 1, 1], [], []>} : vector<68x16xbf16>, vector<16x8xbf16>, vector<68x8xf32> -> vector<68x8xf32>
    %cst_253 = arith.constant dense<0.000000e+00> : vector<68x8xf32>
    %444 = tpu.matmul %437, %415, %cst_253 {dimension_numbers = #tpu.dot_dimension_numbers<[1], [0], [0], [1], [0, 0, 1, 1], [], []>} : vector<68x16xbf16>, vector<16x8xbf16>, vector<68x8xf32> -> vector<68x8xf32>
    %445 = arith.addf %443, %444 : vector<68x8xf32>
    %c0_254 = arith.constant 0 : index
    %c0_255 = arith.constant 0 : index
    %446 = vector.load %arg17[%c0_254, %c0_255] : memref<1x8xf32, #tpu.memory_space<vmem>>, vector<1x8xf32>
    %c0_256 = arith.constant 0 : index
    %c0_257 = arith.constant 0 : index
    %447 = vector.load %arg18[%c0_256, %c0_257] : memref<1x8xf32, #tpu.memory_space<vmem>>, vector<1x8xf32>
    %cst_258 = arith.constant dense<0.000000e+00> : vector<8xf32>
    %448 = vector.multi_reduction <add>, %428, %cst_258 [0] : vector<68x8xf32> to vector<8xf32>
    %449 = vector.shape_cast %448 : vector<8xf32> to vector<1x8xf32>
    %450 = arith.mulf %428, %428 : vector<68x8xf32>
    %cst_259 = arith.constant dense<0.000000e+00> : vector<8xf32>
    %451 = vector.multi_reduction <add>, %450, %cst_259 [0] : vector<68x8xf32> to vector<8xf32>
    %452 = vector.shape_cast %451 : vector<8xf32> to vector<1x8xf32>
    %cst_260 = arith.constant dense<0.000000e+00> : vector<8xf32>
    %453 = vector.multi_reduction <add>, %431, %cst_260 [0] : vector<68x8xf32> to vector<8xf32>
    %454 = vector.shape_cast %453 : vector<8xf32> to vector<1x8xf32>
    %455 = arith.mulf %431, %431 : vector<68x8xf32>
    %cst_261 = arith.constant dense<0.000000e+00> : vector<8xf32>
    %456 = vector.multi_reduction <add>, %455, %cst_261 [0] : vector<68x8xf32> to vector<8xf32>
    %457 = vector.shape_cast %456 : vector<8xf32> to vector<1x8xf32>
    %458 = arith.addf %449, %454 : vector<1x8xf32>
    %459 = arith.addf %452, %457 : vector<1x8xf32>
    %cst_262 = arith.constant dense<0.000000e+00> : vector<8xf32>
    %460 = vector.multi_reduction <add>, %442, %cst_262 [0] : vector<68x8xf32> to vector<8xf32>
    %461 = vector.shape_cast %460 : vector<8xf32> to vector<1x8xf32>
    %462 = arith.mulf %442, %442 : vector<68x8xf32>
    %cst_263 = arith.constant dense<0.000000e+00> : vector<8xf32>
    %463 = vector.multi_reduction <add>, %462, %cst_263 [0] : vector<68x8xf32> to vector<8xf32>
    %464 = vector.shape_cast %463 : vector<8xf32> to vector<1x8xf32>
    %465 = arith.addf %458, %461 : vector<1x8xf32>
    %466 = arith.addf %459, %464 : vector<1x8xf32>
    %cst_264 = arith.constant dense<0.000000e+00> : vector<8xf32>
    %467 = vector.multi_reduction <add>, %445, %cst_264 [0] : vector<68x8xf32> to vector<8xf32>
    %468 = vector.shape_cast %467 : vector<8xf32> to vector<1x8xf32>
    %469 = arith.mulf %445, %445 : vector<68x8xf32>
    %cst_265 = arith.constant dense<0.000000e+00> : vector<8xf32>
    %470 = vector.multi_reduction <add>, %469, %cst_265 [0] : vector<68x8xf32> to vector<8xf32>
    %471 = vector.shape_cast %470 : vector<8xf32> to vector<1x8xf32>
    %472 = arith.addf %465, %468 : vector<1x8xf32>
    %473 = arith.addf %466, %471 : vector<1x8xf32>
    %cst_266 = arith.constant 0.0036764706 : f32
    %474 = vector.broadcast %cst_266 : f32 to vector<1x8xf32>
    %475 = arith.mulf %472, %474 : vector<1x8xf32>
    %cst_267 = arith.constant 0.0036764706 : f32
    %476 = vector.broadcast %cst_267 : f32 to vector<1x8xf32>
    %477 = arith.mulf %473, %476 : vector<1x8xf32>
    %478 = arith.mulf %475, %475 : vector<1x8xf32>
    %479 = arith.subf %477, %478 : vector<1x8xf32>
    %cst_268 = arith.constant 9.99999974E-6 : f32
    %480 = vector.broadcast %cst_268 : f32 to vector<1x8xf32>
    %481 = arith.addf %479, %480 : vector<1x8xf32>
    %482 = math.rsqrt %481 : vector<1x8xf32>
    %483 = arith.mulf %446, %482 : vector<1x8xf32>
    %484 = arith.mulf %475, %483 : vector<1x8xf32>
    %485 = arith.subf %447, %484 : vector<1x8xf32>
    %486 = vector.broadcast %483 : vector<1x8xf32> to vector<68x8xf32>
    %487 = arith.mulf %428, %486 : vector<68x8xf32>
    %488 = vector.broadcast %485 : vector<1x8xf32> to vector<68x8xf32>
    %489 = arith.addf %487, %488 : vector<68x8xf32>
    %cst_269 = arith.constant 0.000000e+00 : f32
    %490 = vector.broadcast %cst_269 : f32 to vector<68x8xf32>
    %491 = arith.maximumf %489, %490 : vector<68x8xf32>
    %492 = vector.broadcast %483 : vector<1x8xf32> to vector<68x8xf32>
    %493 = arith.mulf %431, %492 : vector<68x8xf32>
    %494 = vector.broadcast %485 : vector<1x8xf32> to vector<68x8xf32>
    %495 = arith.addf %493, %494 : vector<68x8xf32>
    %cst_270 = arith.constant 0.000000e+00 : f32
    %496 = vector.broadcast %cst_270 : f32 to vector<68x8xf32>
    %497 = arith.maximumf %495, %496 : vector<68x8xf32>
    %498 = vector.broadcast %483 : vector<1x8xf32> to vector<68x8xf32>
    %499 = arith.mulf %442, %498 : vector<68x8xf32>
    %500 = vector.broadcast %485 : vector<1x8xf32> to vector<68x8xf32>
    %501 = arith.addf %499, %500 : vector<68x8xf32>
    %cst_271 = arith.constant 0.000000e+00 : f32
    %502 = vector.broadcast %cst_271 : f32 to vector<68x8xf32>
    %503 = arith.maximumf %501, %502 : vector<68x8xf32>
    %504 = vector.broadcast %483 : vector<1x8xf32> to vector<68x8xf32>
    %505 = arith.mulf %445, %504 : vector<68x8xf32>
    %506 = vector.broadcast %485 : vector<1x8xf32> to vector<68x8xf32>
    %507 = arith.addf %505, %506 : vector<68x8xf32>
    %cst_272 = arith.constant 0.000000e+00 : f32
    %508 = vector.broadcast %cst_272 : f32 to vector<68x8xf32>
    %509 = arith.maximumf %507, %508 : vector<68x8xf32>
    %c0_273 = arith.constant 0 : index
    %c0_274 = arith.constant 0 : index
    %510 = vector.load %arg15[%c0_273, %c0_274] : memref<136x68xbf16, #tpu.memory_space<vmem>>, vector<136x68xbf16>
    %c0_275 = arith.constant 0 : index
    %c0_276 = arith.constant 0 : index
    %511 = vector.load %arg16[%c0_275, %c0_276] : memref<136x68xbf16, #tpu.memory_space<vmem>>, vector<136x68xbf16>
    %512 = arith.truncf %491 : vector<68x8xf32> to vector<68x8xbf16>
    %513 = arith.truncf %497 : vector<68x8xf32> to vector<68x8xbf16>
    %cst_277 = arith.constant dense<0.000000e+00> : vector<136x8xf32>
    %514 = tpu.matmul %510, %512, %cst_277 {dimension_numbers = #tpu.dot_dimension_numbers<[1], [0], [0], [1], [0, 0, 1, 1], [], []>} : vector<136x68xbf16>, vector<68x8xbf16>, vector<136x8xf32> -> vector<136x8xf32>
    %cst_278 = arith.constant dense<0.000000e+00> : vector<136x8xf32>
    %515 = tpu.matmul %511, %513, %cst_278 {dimension_numbers = #tpu.dot_dimension_numbers<[1], [0], [0], [1], [0, 0, 1, 1], [], []>} : vector<136x68xbf16>, vector<68x8xbf16>, vector<136x8xf32> -> vector<136x8xf32>
    %516 = arith.addf %514, %515 : vector<136x8xf32>
    %c0_279 = arith.constant 0 : index
    %c6_280 = arith.constant 6 : index
    %c0_281 = arith.constant 0 : index
    %517 = vector.load %arg25[%c0_279, %c6_280, %c0_281] : memref<2x148x8xf32, #tpu.memory_space<vmem>>, vector<1x136x8xf32>
    %518 = vector.shape_cast %517 : vector<1x136x8xf32> to vector<136x8xf32>
    %519 = vector.shape_cast %516 : vector<136x8xf32> to vector<1x136x8xf32>
    tpu.vector_store %arg25[%c0_279, %c6_280, %c0_281], %519 {strides = array<i32>} : memref<2x148x8xf32, #tpu.memory_space<vmem>>, vector<1x136x8xf32>,
    %520 = arith.truncf %503 : vector<68x8xf32> to vector<68x8xbf16>
    %521 = arith.truncf %509 : vector<68x8xf32> to vector<68x8xbf16>
    %cst_282 = arith.constant dense<0.000000e+00> : vector<136x8xf32>
    %522 = tpu.matmul %510, %520, %cst_282 {dimension_numbers = #tpu.dot_dimension_numbers<[1], [0], [0], [1], [0, 0, 1, 1], [], []>} : vector<136x68xbf16>, vector<68x8xbf16>, vector<136x8xf32> -> vector<136x8xf32>
    %cst_283 = arith.constant dense<0.000000e+00> : vector<136x8xf32>
    %523 = tpu.matmul %511, %521, %cst_283 {dimension_numbers = #tpu.dot_dimension_numbers<[1], [0], [0], [1], [0, 0, 1, 1], [], []>} : vector<136x68xbf16>, vector<68x8xbf16>, vector<136x8xf32> -> vector<136x8xf32>
    %524 = arith.addf %522, %523 : vector<136x8xf32>
    %c1_284 = arith.constant 1 : index
    %c6_285 = arith.constant 6 : index
    %c0_286 = arith.constant 0 : index
    %525 = vector.load %arg25[%c1_284, %c6_285, %c0_286] : memref<2x148x8xf32, #tpu.memory_space<vmem>>, vector<1x136x8xf32>
    %526 = vector.shape_cast %525 : vector<1x136x8xf32> to vector<136x8xf32>
    %527 = vector.shape_cast %524 : vector<136x8xf32> to vector<1x136x8xf32>
    tpu.vector_store %arg25[%c1_284, %c6_285, %c0_286], %527 {strides = array<i32>} : memref<2x148x8xf32, #tpu.memory_space<vmem>>, vector<1x136x8xf32>,
    %c0_287 = arith.constant 0 : index
    %c0_288 = arith.constant 0 : index
    %c0_289 = arith.constant 0 : index
    %528 = vector.load %arg25[%c0_287, %c0_288, %c0_289] : memref<2x148x8xf32, #tpu.memory_space<vmem>>, vector<1x148x8xf32>
    %529 = vector.shape_cast %528 : vector<1x148x8xf32> to vector<148x8xf32>
    %530 = vector.extract_strided_slice %529 {offsets = [0, 0], sizes = [142, 8], strides = [1, 1]} : vector<148x8xf32> to vector<142x8xf32>
    %531 = arith.truncf %530 : vector<142x8xf32> to vector<142x8xbf16>
    %c0_290 = arith.constant 0 : index
    %c0_291 = arith.constant 0 : index
    %c0_292 = arith.constant 0 : index
    %532 = vector.load %arg19[%c0_290, %c0_291, %c0_292] : memref<7x8x4xbf16, #tpu.memory_space<vmem>>, vector<1x8x4xbf16>
    %533 = vector.shape_cast %532 : vector<1x8x4xbf16> to vector<8x4xbf16>
    %cst_293 = arith.constant dense<0.000000e+00> : vector<142x4xf32>
    %534 = tpu.matmul %531, %533, %cst_293 {dimension_numbers = #tpu.dot_dimension_numbers<[1], [0], [0], [1], [0, 0, 1, 1], [], []>} : vector<142x8xbf16>, vector<8x4xbf16>, vector<142x4xf32> -> vector<142x4xf32>
    %535 = vector.extract_strided_slice %529 {offsets = [1, 0], sizes = [142, 8], strides = [1, 1]} : vector<148x8xf32> to vector<142x8xf32>
    %536 = arith.truncf %535 : vector<142x8xf32> to vector<142x8xbf16>
    %c1_294 = arith.constant 1 : index
    %c0_295 = arith.constant 0 : index
    %c0_296 = arith.constant 0 : index
    %537 = vector.load %arg19[%c1_294, %c0_295, %c0_296] : memref<7x8x4xbf16, #tpu.memory_space<vmem>>, vector<1x8x4xbf16>
    %538 = vector.shape_cast %537 : vector<1x8x4xbf16> to vector<8x4xbf16>
    %cst_297 = arith.constant dense<0.000000e+00> : vector<142x4xf32>
    %539 = tpu.matmul %536, %538, %cst_297 {dimension_numbers = #tpu.dot_dimension_numbers<[1], [0], [0], [1], [0, 0, 1, 1], [], []>} : vector<142x8xbf16>, vector<8x4xbf16>, vector<142x4xf32> -> vector<142x4xf32>
    %540 = arith.addf %534, %539 : vector<142x4xf32>
    %541 = vector.extract_strided_slice %529 {offsets = [2, 0], sizes = [142, 8], strides = [1, 1]} : vector<148x8xf32> to vector<142x8xf32>
    %542 = arith.truncf %541 : vector<142x8xf32> to vector<142x8xbf16>
    %c2_298 = arith.constant 2 : index
    %c0_299 = arith.constant 0 : index
    %c0_300 = arith.constant 0 : index
    %543 = vector.load %arg19[%c2_298, %c0_299, %c0_300] : memref<7x8x4xbf16, #tpu.memory_space<vmem>>, vector<1x8x4xbf16>
    %544 = vector.shape_cast %543 : vector<1x8x4xbf16> to vector<8x4xbf16>
    %cst_301 = arith.constant dense<0.000000e+00> : vector<142x4xf32>
    %545 = tpu.matmul %542, %544, %cst_301 {dimension_numbers = #tpu.dot_dimension_numbers<[1], [0], [0], [1], [0, 0, 1, 1], [], []>} : vector<142x8xbf16>, vector<8x4xbf16>, vector<142x4xf32> -> vector<142x4xf32>
    %546 = arith.addf %540, %545 : vector<142x4xf32>
    %547 = vector.extract_strided_slice %529 {offsets = [3, 0], sizes = [142, 8], strides = [1, 1]} : vector<148x8xf32> to vector<142x8xf32>
    %548 = arith.truncf %547 : vector<142x8xf32> to vector<142x8xbf16>
    %c3_302 = arith.constant 3 : index
    %c0_303 = arith.constant 0 : index
    %c0_304 = arith.constant 0 : index
    %549 = vector.load %arg19[%c3_302, %c0_303, %c0_304] : memref<7x8x4xbf16, #tpu.memory_space<vmem>>, vector<1x8x4xbf16>
    %550 = vector.shape_cast %549 : vector<1x8x4xbf16> to vector<8x4xbf16>
    %cst_305 = arith.constant dense<0.000000e+00> : vector<142x4xf32>
    %551 = tpu.matmul %548, %550, %cst_305 {dimension_numbers = #tpu.dot_dimension_numbers<[1], [0], [0], [1], [0, 0, 1, 1], [], []>} : vector<142x8xbf16>, vector<8x4xbf16>, vector<142x4xf32> -> vector<142x4xf32>
    %552 = arith.addf %546, %551 : vector<142x4xf32>
    %553 = vector.extract_strided_slice %529 {offsets = [4, 0], sizes = [142, 8], strides = [1, 1]} : vector<148x8xf32> to vector<142x8xf32>
    %554 = arith.truncf %553 : vector<142x8xf32> to vector<142x8xbf16>
    %c4_306 = arith.constant 4 : index
    %c0_307 = arith.constant 0 : index
    %c0_308 = arith.constant 0 : index
    %555 = vector.load %arg19[%c4_306, %c0_307, %c0_308] : memref<7x8x4xbf16, #tpu.memory_space<vmem>>, vector<1x8x4xbf16>
    %556 = vector.shape_cast %555 : vector<1x8x4xbf16> to vector<8x4xbf16>
    %cst_309 = arith.constant dense<0.000000e+00> : vector<142x4xf32>
    %557 = tpu.matmul %554, %556, %cst_309 {dimension_numbers = #tpu.dot_dimension_numbers<[1], [0], [0], [1], [0, 0, 1, 1], [], []>} : vector<142x8xbf16>, vector<8x4xbf16>, vector<142x4xf32> -> vector<142x4xf32>
    %558 = arith.addf %552, %557 : vector<142x4xf32>
    %559 = vector.extract_strided_slice %529 {offsets = [5, 0], sizes = [142, 8], strides = [1, 1]} : vector<148x8xf32> to vector<142x8xf32>
    %560 = arith.truncf %559 : vector<142x8xf32> to vector<142x8xbf16>
    %c5_310 = arith.constant 5 : index
    %c0_311 = arith.constant 0 : index
    %c0_312 = arith.constant 0 : index
    %561 = vector.load %arg19[%c5_310, %c0_311, %c0_312] : memref<7x8x4xbf16, #tpu.memory_space<vmem>>, vector<1x8x4xbf16>
    %562 = vector.shape_cast %561 : vector<1x8x4xbf16> to vector<8x4xbf16>
    %cst_313 = arith.constant dense<0.000000e+00> : vector<142x4xf32>
    %563 = tpu.matmul %560, %562, %cst_313 {dimension_numbers = #tpu.dot_dimension_numbers<[1], [0], [0], [1], [0, 0, 1, 1], [], []>} : vector<142x8xbf16>, vector<8x4xbf16>, vector<142x4xf32> -> vector<142x4xf32>
    %564 = arith.addf %558, %563 : vector<142x4xf32>
    %565 = vector.extract_strided_slice %529 {offsets = [6, 0], sizes = [142, 8], strides = [1, 1]} : vector<148x8xf32> to vector<142x8xf32>
    %566 = arith.truncf %565 : vector<142x8xf32> to vector<142x8xbf16>
    %c6_314 = arith.constant 6 : index
    %c0_315 = arith.constant 0 : index
    %c0_316 = arith.constant 0 : index
    %567 = vector.load %arg19[%c6_314, %c0_315, %c0_316] : memref<7x8x4xbf16, #tpu.memory_space<vmem>>, vector<1x8x4xbf16>
    %568 = vector.shape_cast %567 : vector<1x8x4xbf16> to vector<8x4xbf16>
    %cst_317 = arith.constant dense<0.000000e+00> : vector<142x4xf32>
    %569 = tpu.matmul %566, %568, %cst_317 {dimension_numbers = #tpu.dot_dimension_numbers<[1], [0], [0], [1], [0, 0, 1, 1], [], []>} : vector<142x8xbf16>, vector<8x4xbf16>, vector<142x4xf32> -> vector<142x4xf32>
    %570 = arith.addf %564, %569 : vector<142x4xf32>
    %c0_318 = arith.constant 0 : index
    %c0_319 = arith.constant 0 : index
    %571 = vector.load %arg20[%c0_318, %c0_319] : memref<1x4xf32, #tpu.memory_space<vmem>>, vector<1x4xf32>
    %572 = vector.broadcast %571 : vector<1x4xf32> to vector<142x4xf32>
    %573 = arith.addf %570, %572 : vector<142x4xf32>
    %574 = math.tanh %573 : vector<142x4xf32>
    %c0_320 = arith.constant 0 : index
    %c0_321 = arith.constant 0 : index
    %c0_322 = arith.constant 0 : index
    %575 = vector.load %arg21[%c0_320, %c0_321, %c0_322] : memref<2x142x4xf32, #tpu.memory_space<vmem>>, vector<1x142x4xf32>
    %576 = vector.shape_cast %575 : vector<1x142x4xf32> to vector<142x4xf32>
    %577 = vector.shape_cast %574 : vector<142x4xf32> to vector<1x142x4xf32>
    tpu.vector_store %arg21[%c0_320, %c0_321, %c0_322], %577 {strides = array<i32>} : memref<2x142x4xf32, #tpu.memory_space<vmem>>, vector<1x142x4xf32>,
    %c1_323 = arith.constant 1 : index
    %c0_324 = arith.constant 0 : index
    %c0_325 = arith.constant 0 : index
    %578 = vector.load %arg25[%c1_323, %c0_324, %c0_325] : memref<2x148x8xf32, #tpu.memory_space<vmem>>, vector<1x148x8xf32>
    %579 = vector.shape_cast %578 : vector<1x148x8xf32> to vector<148x8xf32>
    %580 = vector.extract_strided_slice %579 {offsets = [0, 0], sizes = [142, 8], strides = [1, 1]} : vector<148x8xf32> to vector<142x8xf32>
    %581 = arith.truncf %580 : vector<142x8xf32> to vector<142x8xbf16>
    %c0_326 = arith.constant 0 : index
    %c0_327 = arith.constant 0 : index
    %c0_328 = arith.constant 0 : index
    %582 = vector.load %arg19[%c0_326, %c0_327, %c0_328] : memref<7x8x4xbf16, #tpu.memory_space<vmem>>, vector<1x8x4xbf16>
    %583 = vector.shape_cast %582 : vector<1x8x4xbf16> to vector<8x4xbf16>
    %cst_329 = arith.constant dense<0.000000e+00> : vector<142x4xf32>
    %584 = tpu.matmul %581, %583, %cst_329 {dimension_numbers = #tpu.dot_dimension_numbers<[1], [0], [0], [1], [0, 0, 1, 1], [], []>} : vector<142x8xbf16>, vector<8x4xbf16>, vector<142x4xf32> -> vector<142x4xf32>
    %585 = vector.extract_strided_slice %579 {offsets = [1, 0], sizes = [142, 8], strides = [1, 1]} : vector<148x8xf32> to vector<142x8xf32>
    %586 = arith.truncf %585 : vector<142x8xf32> to vector<142x8xbf16>
    %c1_330 = arith.constant 1 : index
    %c0_331 = arith.constant 0 : index
    %c0_332 = arith.constant 0 : index
    %587 = vector.load %arg19[%c1_330, %c0_331, %c0_332] : memref<7x8x4xbf16, #tpu.memory_space<vmem>>, vector<1x8x4xbf16>
    %588 = vector.shape_cast %587 : vector<1x8x4xbf16> to vector<8x4xbf16>
    %cst_333 = arith.constant dense<0.000000e+00> : vector<142x4xf32>
    %589 = tpu.matmul %586, %588, %cst_333 {dimension_numbers = #tpu.dot_dimension_numbers<[1], [0], [0], [1], [0, 0, 1, 1], [], []>} : vector<142x8xbf16>, vector<8x4xbf16>, vector<142x4xf32> -> vector<142x4xf32>
    %590 = arith.addf %584, %589 : vector<142x4xf32>
    %591 = vector.extract_strided_slice %579 {offsets = [2, 0], sizes = [142, 8], strides = [1, 1]} : vector<148x8xf32> to vector<142x8xf32>
    %592 = arith.truncf %591 : vector<142x8xf32> to vector<142x8xbf16>
    %c2_334 = arith.constant 2 : index
    %c0_335 = arith.constant 0 : index
    %c0_336 = arith.constant 0 : index
    %593 = vector.load %arg19[%c2_334, %c0_335, %c0_336] : memref<7x8x4xbf16, #tpu.memory_space<vmem>>, vector<1x8x4xbf16>
    %594 = vector.shape_cast %593 : vector<1x8x4xbf16> to vector<8x4xbf16>
    %cst_337 = arith.constant dense<0.000000e+00> : vector<142x4xf32>
    %595 = tpu.matmul %592, %594, %cst_337 {dimension_numbers = #tpu.dot_dimension_numbers<[1], [0], [0], [1], [0, 0, 1, 1], [], []>} : vector<142x8xbf16>, vector<8x4xbf16>, vector<142x4xf32> -> vector<142x4xf32>
    %596 = arith.addf %590, %595 : vector<142x4xf32>
    %597 = vector.extract_strided_slice %579 {offsets = [3, 0], sizes = [142, 8], strides = [1, 1]} : vector<148x8xf32> to vector<142x8xf32>
    %598 = arith.truncf %597 : vector<142x8xf32> to vector<142x8xbf16>
    %c3_338 = arith.constant 3 : index
    %c0_339 = arith.constant 0 : index
    %c0_340 = arith.constant 0 : index
    %599 = vector.load %arg19[%c3_338, %c0_339, %c0_340] : memref<7x8x4xbf16, #tpu.memory_space<vmem>>, vector<1x8x4xbf16>
    %600 = vector.shape_cast %599 : vector<1x8x4xbf16> to vector<8x4xbf16>
    %cst_341 = arith.constant dense<0.000000e+00> : vector<142x4xf32>
    %601 = tpu.matmul %598, %600, %cst_341 {dimension_numbers = #tpu.dot_dimension_numbers<[1], [0], [0], [1], [0, 0, 1, 1], [], []>} : vector<142x8xbf16>, vector<8x4xbf16>, vector<142x4xf32> -> vector<142x4xf32>
    %602 = arith.addf %596, %601 : vector<142x4xf32>
    %603 = vector.extract_strided_slice %579 {offsets = [4, 0], sizes = [142, 8], strides = [1, 1]} : vector<148x8xf32> to vector<142x8xf32>
    %604 = arith.truncf %603 : vector<142x8xf32> to vector<142x8xbf16>
    %c4_342 = arith.constant 4 : index
    %c0_343 = arith.constant 0 : index
    %c0_344 = arith.constant 0 : index
    %605 = vector.load %arg19[%c4_342, %c0_343, %c0_344] : memref<7x8x4xbf16, #tpu.memory_space<vmem>>, vector<1x8x4xbf16>
    %606 = vector.shape_cast %605 : vector<1x8x4xbf16> to vector<8x4xbf16>
    %cst_345 = arith.constant dense<0.000000e+00> : vector<142x4xf32>
    %607 = tpu.matmul %604, %606, %cst_345 {dimension_numbers = #tpu.dot_dimension_numbers<[1], [0], [0], [1], [0, 0, 1, 1], [], []>} : vector<142x8xbf16>, vector<8x4xbf16>, vector<142x4xf32> -> vector<142x4xf32>
    %608 = arith.addf %602, %607 : vector<142x4xf32>
    %609 = vector.extract_strided_slice %579 {offsets = [5, 0], sizes = [142, 8], strides = [1, 1]} : vector<148x8xf32> to vector<142x8xf32>
    %610 = arith.truncf %609 : vector<142x8xf32> to vector<142x8xbf16>
    %c5_346 = arith.constant 5 : index
    %c0_347 = arith.constant 0 : index
    %c0_348 = arith.constant 0 : index
    %611 = vector.load %arg19[%c5_346, %c0_347, %c0_348] : memref<7x8x4xbf16, #tpu.memory_space<vmem>>, vector<1x8x4xbf16>
    %612 = vector.shape_cast %611 : vector<1x8x4xbf16> to vector<8x4xbf16>
    %cst_349 = arith.constant dense<0.000000e+00> : vector<142x4xf32>
    %613 = tpu.matmul %610, %612, %cst_349 {dimension_numbers = #tpu.dot_dimension_numbers<[1], [0], [0], [1], [0, 0, 1, 1], [], []>} : vector<142x8xbf16>, vector<8x4xbf16>, vector<142x4xf32> -> vector<142x4xf32>
    %614 = arith.addf %608, %613 : vector<142x4xf32>
    %615 = vector.extract_strided_slice %579 {offsets = [6, 0], sizes = [142, 8], strides = [1, 1]} : vector<148x8xf32> to vector<142x8xf32>
    %616 = arith.truncf %615 : vector<142x8xf32> to vector<142x8xbf16>
    %c6_350 = arith.constant 6 : index
    %c0_351 = arith.constant 0 : index
    %c0_352 = arith.constant 0 : index
    %617 = vector.load %arg19[%c6_350, %c0_351, %c0_352] : memref<7x8x4xbf16, #tpu.memory_space<vmem>>, vector<1x8x4xbf16>
    %618 = vector.shape_cast %617 : vector<1x8x4xbf16> to vector<8x4xbf16>
    %cst_353 = arith.constant dense<0.000000e+00> : vector<142x4xf32>
    %619 = tpu.matmul %616, %618, %cst_353 {dimension_numbers = #tpu.dot_dimension_numbers<[1], [0], [0], [1], [0, 0, 1, 1], [], []>} : vector<142x8xbf16>, vector<8x4xbf16>, vector<142x4xf32> -> vector<142x4xf32>
    %620 = arith.addf %614, %619 : vector<142x4xf32>
    %c0_354 = arith.constant 0 : index
    %c0_355 = arith.constant 0 : index
    %621 = vector.load %arg20[%c0_354, %c0_355] : memref<1x4xf32, #tpu.memory_space<vmem>>, vector<1x4xf32>
    %622 = vector.broadcast %621 : vector<1x4xf32> to vector<142x4xf32>
    %623 = arith.addf %620, %622 : vector<142x4xf32>
    %624 = math.tanh %623 : vector<142x4xf32>
    %c1_356 = arith.constant 1 : index
    %c0_357 = arith.constant 0 : index
    %c0_358 = arith.constant 0 : index
    %625 = vector.load %arg21[%c1_356, %c0_357, %c0_358] : memref<2x142x4xf32, #tpu.memory_space<vmem>>, vector<1x142x4xf32>
    %626 = vector.shape_cast %625 : vector<1x142x4xf32> to vector<142x4xf32>
    %627 = vector.shape_cast %624 : vector<142x4xf32> to vector<1x142x4xf32>
    tpu.vector_store %arg21[%c1_356, %c0_357, %c0_358], %627 {strides = array<i32>} : memref<2x142x4xf32, #tpu.memory_space<vmem>>, vector<1x142x4xf32>,
    return
  }
}

</mosaic_0001>

<bundles_post_ra>
// kernel: _lambda_.1
= control target key start
LH: loop header
LB: loop body
LE: loop exit
PB: predicated region body
PF: predicated region fallthrough
CT: control target
= control target key end

     0   :  { %vm179_vm0 = vcmask 1043456   ;;  %vm109_vm1 = vcmask 64512   ;;  %vm230_vm2 = vcmask 1046528   ;;  %vm158_vm3 = vsmask.f32 7424  ;;  %s9313_s1 = inlined_call_operand.vmem [shape: bf16[10,8,64], index: 1, kind: input, shape index: {}]   ;;  %s9314_s0 = inlined_call_operand.vmem [shape: f32[2,26,8], index: 0, kind: input, shape index: {}]   ;;  %s9315_s4 = inlined_call_operand.vmem [shape: bf16[4,64,32], index: 4, kind: input, shape index: {}]   ;;  %s9316_s2 = inlined_call_operand.vmem [shape: f32[1,64], index: 2, kind: input, shape index: {}]   ;;  %s9317_s3 = inlined_call_operand.vmem [shape: f32[1,64], index: 3, kind: input, shape index: {}]   ;;  %s9318_s7 = inlined_call_operand.vmem [shape: f32[1,32], index: 7, kind: input, shape index: {}]   ;;  %s9319_s8 = inlined_call_operand.vmem [shape: f32[1,32], index: 8, kind: input, shape index: {}]   ;;  %s9320_s6 = inlined_call_operand.vmem [shape: bf16[34,17], index: 6, kind: input, shape index: {}]   ;;  %s9321_s5 = inlined_call_operand.vmem [shape: bf16[34,17], index: 5, kind: input, shape index: {}]   ;;  %s9322_s9 = inlined_call_operand.vmem [shape: bf16[4,32,16], index: 9, kind: input, shape index: {}]   ;;  %s9323_s12 = inlined_call_operand.vmem [shape: f32[1,16], index: 12, kind: input, shape index: {}]   ;;  %s9324_s13 = inlined_call_operand.vmem [shape: f32[1,16], index: 13, kind: input, shape index: {}]   ;;  %s9325_s11 = inlined_call_operand.vmem [shape: bf16[68,34], index: 11, kind: input, shape index: {}]   ;;  %s9326_s10 = inlined_call_operand.vmem [shape: bf16[68,34], index: 10, kind: input, shape index: {}]   ;;  %s9327_s14 = inlined_call_operand.vmem [shape: bf16[4,16,8], index: 14, kind: input, shape index: {}]   ;;  %s9328_s17 = inlined_call_operand.vmem [shape: f32[1,8], index: 17, kind: input, shape index: {}]   ;;  %s9329_s18 = inlined_call_operand.vmem [shape: f32[1,8], index: 18, kind: input, shape index: {}]   ;;  %s9330_s16 = inlined_call_operand.vmem [shape: bf16[136,68], index: 16, kind: input, shape index: {}]   ;;  %s9331_s15 = inlined_call_operand.vmem [shape: bf16[136,68], index: 15, kind: input, shape index: {}]   ;;  %s9332_s19 = inlined_call_operand.vmem [shape: bf16[7,8,4], index: 19, kind: input, shape index: {}]   ;;  %s9333_s20 = inlined_call_operand.vmem [shape: f32[1,4], index: 20, kind: input, shape index: {}]   ;;  %s9334_s21 = inlined_call_operand.vmem [shape: f32[2,142,4], index: 21, kind: output, shape index: {}]  }
   0x1   :  { %9340 = sst [smem:[#allocation14_spill]] %s9313_s1  ;;  %vm266_vm4 = vsmask.f32 6400  ;;  %vm342_vm5 = vsmask.f32 5376  ;;  %vm382_vm6 = vcmask 1044480  }
   0x2   :  { %9341 = sst [smem:[#allocation15_spill]] %s9314_s0  ;;  %vm306_vm7 = vcmask 1045504   ;;  %vm418_vm8 = vsmask.f32 4352  ;;  %vm69_vm9 = vcmask 523264   ;;  %vm868_vm10 = vcmask 516096  }
   0x3   :  { %9342 = sst [smem:[#allocation16_spill]] %s9315_s4  ;;  %vm72_vm11 = vcmask 518144   ;;  %vm77_vm15 = vcmask 261120  }
   0x4   :  { %9343 = sst [smem:[#allocation17_spill]] %s9316_s2 }
   0x5   :  { %9344 = sst [smem:[#allocation18_spill]] %s9317_s3 }
   0x6   :  { %9345 = sst [smem:[#allocation19_spill]] %s9318_s7 }
   0x7   :  { %s9346_s26 = sld [smem:[#allocation14_spill]] }
   0x8   :  { %s9347_s1 = sld [smem:[#allocation15_spill]] }
   0x9   :  { %s9348_s23 = sld [smem:[#allocation16_spill]] }
   0xa   :  { %s9350_s28 = sld [smem:[#allocation18_spill]] }
   0xb   :  { %s9351_s3 = sld [smem:[#allocation19_spill]] }
   0xd   :  { %v155_v0 = vld [vmem:[%s9346_s26] sm:$0xf]  ;;  %v5860_v1 = vld [vmem:[%s9346_s26 + $0x8] sm:$0xf]  ;;  %v5855_v7 = vld [vmem:[%s9346_s26 + $0x4] sm:$0xf] }
   0xe   :  { %v149_v2 = vld [vmem:[%s9347_s1] sm:$0xff]  ;;  %v206_v3 = vsel %vm179_vm0, %v155_v0, 0  ;;  %v6741_v4 = vsel %vm179_vm0, %v5860_v1, 0  ;;  %v6746_v5 = vld [vmem:[%s9347_s1 + $0x8] sm:$0xff]  ;;  %v6751_v6 = vld [vmem:[%s9347_s1 + $0x10] sm:$0xff]  ;;  %v181_v10 = vsel %vm179_vm0, %v5855_v7, 0 }
   0xf   :  { %215 = vmatpush.bf16.msra.mxu1 %v206_v3  ;;  %250 = vmatpush.bf16.msra.mxu2 %v6741_v4  ;;  %v6758_v8 = vpack.c.bf16 %v6746_v5, %v149_v2  ;;  %v6762_v9 = vpack.c.bf16 %v6751_v6, %v6751_v6  ;;  %v5863_v11 = vld [vmem:[%s9346_s26 + $0xc] sm:$0xf]  ;;  %v5869_v13 = vld [vmem:[%s9346_s26 + $0x14] sm:$0xf]  ;;  %v5872_v14 = vld [vmem:[%s9346_s26 + $0x18] sm:$0xf]  ;;  %v456_v1 = vpack.c.bf16 %v6751_v6, %v6746_v5 }
  0x10   :  { %190 = vmatpush.bf16.msra.mxu0 %v181_v10  ;;  %v6769_v12 = vsel %vm179_vm0, %v5863_v11, 0  ;;  %v6789_v21 = vsel %vm179_vm0, %v5869_v13, 0  ;;  %v6792_v22 = vsel %vm179_vm0, %v5872_v14, 0  ;;  %v5866_v32 = vld [vmem:[%s9346_s26 + $0x10] sm:$0xf]  ;;  %v5884_v63 = vld [vmem:[%s9347_s1 + $0x20] sm:$0xff] }
  0x11   :  { %v231_v15 = vrot.slane %v6758_v8, 1  ;;  %v232_v16 = vrot.slane %v6762_v9, 1  ;;  %290 = vmatpush.bf16.msra.mxu3 %v6769_v12  ;;  %v160_v17 = vshrl.u32 %v6758_v8, 16  ;;  %v162_v18 = vshll.u32 %v6758_v8, 16  ;;  %v5875_v33 = vld [vmem:[%s9346_s26 + $0x1c] sm:$0xf] }
  0x12   :  { %5858 = vmatmul.msk.bf16.vlgmr.msra.gmra.mxu1 %vm109_vm1, %v6758_v8  ;;  %v167_v19 = vshll.u32 %v6762_v9, 16  ;;  %v6786_v20 = vshrl.u32 %v6762_v9, 16  ;;  %v317_v37 = vsel %vm179_vm0, %v5866_v32, 0  ;;  %v6810_v38 = vsel %vm179_vm0, %v5875_v33, 0  ;;  %v5881_v43 = vld [vmem:[%s9346_s26 + $0x24] sm:$0xf] }
  0x13   :  { %v233_v23 = vsel %vm230_vm2, %v231_v15, %v232_v16  ;;  %v164_v24 = vrot.slane %v162_v18, 1  ;;  %v267_v25 = vrot.slane %v160_v17, 1  ;;  %v268_v26 = vrot.slane %v162_v18, 2  ;;  %366 = vmatpush.bf16.msrb.mxu1 %v6789_v21  ;;  %402 = vmatpush.bf16.msrb.mxu2 %v6792_v22  ;;  %v5878_v59 = vld [vmem:[%s9346_s26 + $0x20] sm:$0xf]  ;;  %v6854_v0 = vld [vmem:[%s9347_s1 + $0x28] sm:$0xff] }
  0x14   :  { %5861 = vmatmul.msk.bf16.vlgmr.msra.gmra.mxu2 %vm109_vm1, %v233_v23  ;;  %v169_v27 = vrot.slane %v167_v19, 1  ;;  %v270_v28 = vrot.slane %v6786_v20, 1  ;;  %v271_v29 = vrot.slane %v167_v19, 2  ;;  %326 = vmatpush.bf16.msrb.mxu0 %v317_v37  ;;  %v343_v39 = vrot.slane %v160_v17, 2  ;;  %v152_v2 = vld [vmem:[%s9347_s1 + $0x18] sm:$0x3] }
  0x15   :  { %v165_v30 = vor.u32 %v164_v24, %v160_v17  ;;  %v269_v31 = vor.u32 %v268_v26, %v267_v25  ;;  %442 = vmatpush.bf16.msrb.mxu3 %v6810_v38  ;;  %v344_v40 = vrot.slane %v162_v18, 3  ;;  %v346_v41 = vrot.slane %v6786_v20, 2  ;;  %s9349_s26 = sld [smem:[#allocation17_spill]] }
  0x16   :  { %v272_v34 = vor.u32 %v271_v29, %v270_v28  ;;  %v347_v42 = vrot.slane %v167_v19, 3  ;;  %v6825_v44 = vsel %vm179_vm0, %v5881_v43, 0  ;;  %v383_v47 = vrot.slane %v6758_v8, 3 }
  0x17   :  { %568 = vmatpush.bf16.msra.mxu2 %v181_v10  ;;  %v170_v35 = vsel %vm158_vm3, %v165_v30, %v169_v27  ;;  %v345_v45 = vor.u32 %v344_v40, %v343_v39  ;;  %520 = vmatpush.bf16.msra.mxu1 %v6825_v44  ;;  %v384_v48 = vrot.slane %v6762_v9, 3  ;;  %v419_v49 = vrot.slane %v160_v17, 3 }
  0x18   :  { %5856 = vmatmul.msk.bf16.vlgmr.msra.gmra.mxu0 %vm109_vm1, %v170_v35  ;;  %v273_v36 = vsel %vm266_vm4, %v269_v31, %v272_v34  ;;  %v348_v46 = vor.u32 %v347_v42, %v346_v41  ;;  %v420_v50 = vrot.slane %v162_v18, 4  ;;  %v422_v51 = vrot.slane %v6786_v20, 3 }
  0x19   :  { %5864 = vmatmul.msk.bf16.vlgmr.msra.gmra.mxu3 %vm109_vm1, %v273_v36  ;;  %v423_v52 = vrot.slane %v167_v19, 4  ;;  %v385_v54 = vsel %vm382_vm6, %v383_v47, %v384_v48  ;;  %v307_v55 = vrot.slane %v6758_v8, 2  ;;  %v308_v56 = vrot.slane %v6762_v9, 2 }
  0x1a   :  { %590 = vmatpush.bf16.msra.mxu3 %v206_v3  ;;  %v349_v53 = vsel %vm342_vm5, %v345_v45, %v348_v46  ;;  %v421_v57 = vor.u32 %v420_v50, %v419_v49  ;;  %v467_v61 = vsel %vm179_vm0, %v5878_v59, 0  ;;  %v6862_v3 = vpack.c.bf16 %v6854_v0, %v5884_v63 }
  0x1b   :  { %v424_v58 = vor.u32 %v423_v52, %v422_v51  ;;  %v309_v60 = vsel %vm306_vm7, %v307_v55, %v308_v56  ;;  %476 = vmatpush.bf16.msra.mxu0 %v467_v61  ;;  %v457_v7 = vpack.c.bf16 %v152_v2, %v152_v2  ;;  %v494_v8 = vshll.u32 %v456_v1, 16 }
  0x1c   :  { %v6872_v5 = vshll.u32 %v6862_v3, 16  ;;  %v492_v6 = vshrl.u32 %v456_v1, 16  ;;  %v667_v29 = vrot.slane %v6862_v3, 2 }
  0x1d   :  { %v425_v62 = vsel %vm418_vm8, %v421_v57, %v424_v58  ;;  %v496_v10 = vrot.slane %v494_v8, 1  ;;  %v498_v11 = vshll.u32 %v457_v7, 16  ;;  %v731_v58 = vrot.slane %v6862_v3, 3 }
  0x1e   :  { %v546_v13 = vrot.slane %v6872_v5, 1  ;;  %v634_v25 = vrot.slane %v6872_v5, 2  ;;  %v698_v32 = vrot.slane %v6872_v5, 3  ;;  %v762_v45 = vrot.slane %v6872_v5, 4 }
  0x1f   :  { %v497_v15 = vor.u32 %v496_v10, %v492_v6 }
  0x22   :  { %5859 = vmatmul.msk.bf16.gmra.mxu1 %vm109_vm1, %v6762_v9 }
  0x24   :  { %5862 = vmatmul.msk.bf16.gmra.mxu2 %vm109_vm1, %v232_v16  ;;  %v500_v16 = vrot.slane %v498_v11, 1 }
  0x26   :  { %v501_v19 = vsel %vm158_vm3, %v497_v15, %v500_v16 }
  0x28   :  { %5857 = vmatmul.msk.bf16.gmra.mxu0 %vm109_vm1, %v6786_v20 }
  0x29   :  { %5865 = vmatmul.msk.bf16.gmra.mxu3 %vm109_vm1, %v270_v28 }
  0x32   :  { %5870 = vmatmul.msk.bf16.vlgmr.msrb.gmra.mxu1 %vm109_vm1, %v349_v53 }
  0x33   :  { %653 = vmatpush.bf16.msrb.mxu1 %v6769_v12  ;;  %v542_v12 = vshrl.u32 %v6862_v3, 16 }
  0x34   :  { %5873 = vmatmul.msk.bf16.vlgmr.msrb.gmra.mxu2 %vm109_vm1, %v385_v54 }
  0x35   :  { %683 = vmatpush.bf16.msrb.mxu2 %v317_v37  ;;  %v547_v17 = vor.u32 %v546_v13, %v542_v12  ;;  %v633_v24 = vrot.slane %v542_v12, 1  ;;  %v697_v31 = vrot.slane %v542_v12, 2  ;;  %v603_v37 = vrot.slane %v6862_v3, 1 }
  0x37   :  { %v699_v39 = vor.u32 %v698_v32, %v697_v31 }
  0x38   :  { %5867 = vmatmul.msk.bf16.vlgmr.msrb.gmra.mxu0 %vm109_vm1, %v309_v60 }
  0x39   :  { %5876 = vmatmul.msk.bf16.vlgmr.msrb.gmra.mxu3 %vm109_vm1, %v425_v62  ;;  %619 = vmatpush.bf16.msrb.mxu0 %v6741_v4  ;;  %v5886_v4 = vld [vmem:[%s9347_s1 + $0x30] sm:$0xff] }
  0x3a   :  { %717 = vmatpush.bf16.msrb.mxu3 %v6789_v21  ;;  %v6869_v9 = vpack.c.bf16 %v5886_v4, %v5886_v4  ;;  %v502_v21 = vshrl.u32 %v457_v7, 16  ;;  %v795_v43 = vpack.c.bf16 %v5886_v4, %v6854_v0 }
  0x3c   :  { %v549_v14 = vshll.u32 %v6869_v9, 16  ;;  %v6890_v23 = vshrl.u32 %v6869_v9, 16  ;;  %v668_v30 = vrot.slane %v6869_v9, 2  ;;  %v826_v50 = vshll.u32 %v795_v43, 16 }
  0x3d   :  { %v824_v53 = vshrl.u32 %v795_v43, 16  ;;  %v732_v59 = vrot.slane %v6869_v9, 3 }
  0x3e   :  { %v551_v18 = vrot.slane %v549_v14, 1  ;;  %v636_v26 = vrot.slane %v6890_v23, 1  ;;  %v637_v27 = vrot.slane %v549_v14, 2  ;;  %v700_v33 = vrot.slane %v6890_v23, 2 }
  0x3f   :  { %v701_v34 = vrot.slane %v549_v14, 3  ;;  %v669_v36 = vsel %vm306_vm7, %v667_v29, %v668_v30  ;;  %v764_v46 = vrot.slane %v6890_v23, 3  ;;  %v765_v47 = vrot.slane %v549_v14, 4 }
  0x40   :  { %v552_v20 = vsel %vm158_vm3, %v547_v17, %v551_v18  ;;  %v638_v28 = vor.u32 %v637_v27, %v636_v26  ;;  %v828_v54 = vrot.slane %v826_v50, 1  ;;  %v733_v63 = vsel %vm382_vm6, %v731_v58, %v732_v59 }
  0x41   :  { %v702_v40 = vor.u32 %v701_v34, %v700_v33  ;;  %v766_v52 = vor.u32 %v765_v47, %v764_v46 }
  0x42   :  { %5871 = vmatmul.msk.bf16.gmra.mxu1 %vm109_vm1, %v346_v41  ;;  %v829_v60 = vor.u32 %v828_v54, %v824_v53 }
  0x43   :  { %v703_v42 = vsel %vm342_vm5, %v699_v39, %v702_v40 }
  0x44   :  { %5874 = vmatmul.msk.bf16.gmra.mxu2 %vm109_vm1, %v384_v48  ;;  %v5887_v48 = vld [vmem:[%s9347_s1 + $0x38] sm:$0x3] }
  0x45   :  { %v796_v49 = vpack.c.bf16 %v5887_v48, %v5887_v48 }
  0x47   :  { %v830_v55 = vshll.u32 %v796_v49, 16 }
  0x48   :  { %5868 = vmatmul.msk.bf16.gmra.mxu0 %vm109_vm1, %v308_v56 }
  0x49   :  { %5877 = vmatmul.msk.bf16.gmra.mxu3 %vm109_vm1, %v422_v51 }
  0x52   :  { %5882 = vmatmul.msk.bf16.vlgmr.msra.gmra.mxu1 %vm109_vm1, %v501_v19 }
  0x53   :  { %781 = vmatpush.bf16.msra.mxu1 %v6810_v38  ;;  %v604_v38 = vrot.slane %v6869_v9, 1 }
  0x54   :  { %5888 = vmatmul.msk.bf16.vlgmr.msra.gmra.mxu2 %vm109_vm1, %v552_v20 }
  0x55   :  { %810 = vmatpush.bf16.msra.mxu2 %v467_v61  ;;  %v605_v41 = vsel %vm230_vm2, %v603_v37, %v604_v38  ;;  %v832_v61 = vrot.slane %v830_v55, 1 }
  0x58   :  { %5879 = vmatmul.msk.bf16.vlgmr.msra.gmra.mxu0 %vm109_vm1, %v456_v1  ;;  %v833_v1 = vsel %vm158_vm3, %v829_v60, %v832_v61 }
  0x59   :  { %5890 = vmatmul.msk.bf16.vlgmr.msra.gmra.mxu3 %vm109_vm1, %v6862_v3  ;;  %747 = vmatpush.bf16.msra.mxu0 %v6792_v22  ;;  %v635_v22 = vor.u32 %v634_v25, %v633_v24 }
  0x5a   :  { %849 = vmatpush.bf16.msra.mxu3 %v6825_v44  ;;  %v761_v44 = vrot.slane %v542_v12, 3  ;;  %v834_v12 = vshrl.u32 %v796_v49, 16 }
  0x5b   :  { %v639_v35 = vsel %vm266_vm4, %v635_v22, %v638_v28 }
  0x5c   :  { %v763_v51 = vor.u32 %v762_v45, %v761_v44 }
  0x5e   :  { %v767_v57 = vsel %vm418_vm8, %v763_v51, %v766_v52  ;;  %vm1327_vm8 = vcmask 253952  }
  0x62   :  { %5883 = vmatmul.msk.bf16.gmra.mxu1 %vm109_vm1, %v502_v21 }
  0x64   :  { %5889 = vmatmul.msk.bf16.gmra.mxu2 %vm109_vm1, %v6890_v23 }
  0x68   :  { %5880 = vmatmul.msk.bf16.gmra.mxu0 %vm109_vm1, %v457_v7 }
  0x69   :  { %5891 = vmatmul.msk.bf16.gmra.mxu3 %vm109_vm1, %v6869_v9 }
  0x72   :  { %5894 = vmatmul.msk.bf16.vlgmr.msrb.gmra.mxu1 %vm109_vm1, %v639_v35 }
  0x74   :  { %5896 = vmatmul.msk.bf16.vlgmr.msrb.gmra.mxu2 %vm109_vm1, %v669_v36 }
  0x78   :  { %5892 = vmatmul.msk.bf16.vlgmr.msrb.gmra.mxu0 %vm109_vm1, %v605_v41 }
  0x79   :  { %5898 = vmatmul.msk.bf16.vlgmr.msrb.gmra.mxu3 %vm109_vm1, %v703_v42 }
  0x82   :  { %5895 = vmatmul.msk.bf16.gmra.mxu1 %vm109_vm1, %v636_v26 }
  0x84   :  { %5897 = vmatmul.msk.bf16.gmra.mxu2 %vm109_vm1, %v668_v30 }
  0x88   :  { %5893 = vmatmul.msk.bf16.gmra.mxu0 %vm109_vm1, %v604_v38 }
  0x89   :  { %5899 = vmatmul.msk.bf16.gmra.mxu3 %vm109_vm1, %v700_v33 }
  0x8f   :  { %v217_v56 = vpop.f32.mrf.mxu1 }
  0x92   :  { %5902 = vmatmul.msk.bf16.vlgmr.msra.gmra.mxu1 %vm109_vm1, %v767_v57 }
  0x94   :  { %5904 = vmatmul.msk.bf16.vlgmr.msra.gmra.mxu2 %vm109_vm1, %v795_v43 }
  0x95   :  { %v192_v62 = vpop.f32.mrf.mxu0 }
  0x96   :  { %v218_v0 = vadd.f32 %v217_v56, %v192_v62 }
  0x97   :  { %v252_v2 = vpop.f32.mrf.mxu2  ;;  %v219_v4 = vpop.f32.mrf.mxu1 }
  0x98   :  { %v261_v7 = vadd.f32 %v252_v2, %v218_v0  ;;  %5900 = vmatmul.msk.bf16.vlgmr.msra.gmra.mxu0 %vm109_vm1, %v733_v63 }
  0x99   :  { %5906 = vmatmul.msk.bf16.vlgmr.msra.gmra.mxu3 %vm109_vm1, %v833_v1 }
  0x9c   :  { %v292_v3 = vpop.f32.mrf.mxu3 }
  0x9d   :  { %v301_v8 = vadd.f32 %v292_v3, %v261_v7  ;;  %v194_v9 = vpop.f32.mrf.mxu0 }
  0x9e   :  { %v220_v39 = vadd.f32 %v219_v4, %v194_v9 }
  0x9f   :  { %v254_v5 = vpop.f32.mrf.mxu2  ;;  %v222_v6 = vpop.f32.mrf.mxu1 }
  0xa0   :  { %v262_v42 = vadd.f32 %v254_v5, %v220_v39 }
  0xa2   :  { %5903 = vmatmul.msk.bf16.gmra.mxu1 %vm109_vm1, %v764_v46 }
  0xa4   :  { %v294_v10 = vpop.f32.mrf.mxu3  ;;  %5905 = vmatmul.msk.bf16.gmra.mxu2 %vm109_vm1, %v796_v49 }
  0xa5   :  { %v197_v11 = vpop.f32.mrf.mxu0  ;;  %v302_v46 = vadd.f32 %v294_v10, %v262_v42 }
  0xa6   :  { %v223_v13 = vadd.f32 %v222_v6, %v197_v11 }
  0xa7   :  { %v257_v14 = vpop.f32.mrf.mxu2  ;;  %v224_v15 = vpop.f32.mrf.mxu1 }
  0xa8   :  { %v263_v16 = vadd.f32 %v257_v14, %v223_v13  ;;  %5901 = vmatmul.msk.bf16.gmra.mxu0 %vm109_vm1, %v732_v59 }
  0xa9   :  { %5907 = vmatmul.msk.bf16.gmra.mxu3 %vm109_vm1, %v834_v12 }
  0xac   :  { %v297_v17 = vpop.f32.mrf.mxu3 }
  0xad   :  { %v303_v18 = vadd.f32 %v297_v17, %v263_v16  ;;  %v199_v19 = vpop.f32.mrf.mxu0 }
  0xaf   :  { %v259_v20 = vpop.f32.mrf.mxu2  ;;  %v368_v21 = vpop.f32.mrf.mxu1 }
  0xb4   :  { %v299_v23 = vpop.f32.mrf.mxu3 }
  0xb5   :  { %v328_v24 = vpop.f32.mrf.mxu0 }
  0xb6   :  { %v337_v25 = vadd.f32 %v328_v24, %v301_v8 }
  0xb7   :  { %v404_v26 = vpop.f32.mrf.mxu2  ;;  %v370_v27 = vpop.f32.mrf.mxu1 }
  0xb8   :  { %v377_v22 = vadd.f32 %v368_v21, %v337_v25 }
  0xba   :  { %v413_v28 = vadd.f32 %v404_v26, %v377_v22 }
  0xbc   :  { %v444_v29 = vpop.f32.mrf.mxu3 }
  0xbd   :  { %v453_v30 = vadd.f32 %v444_v29, %v413_v28  ;;  %v330_v31 = vpop.f32.mrf.mxu0 }
  0xbe   :  { %v338_v49 = vadd.f32 %v330_v31, %v302_v46 }
  0xbf   :  { %v406_v32 = vpop.f32.mrf.mxu2  ;;  %v373_v33 = vpop.f32.mrf.mxu1 }
  0xc0   :  { %v378_v50 = vadd.f32 %v370_v27, %v338_v49 }
  0xc2   :  { %v414_v56 = vadd.f32 %v406_v32, %v378_v50 }
  0xc4   :  { %v446_v34 = vpop.f32.mrf.mxu3 }
  0xc5   :  { %v333_v35 = vpop.f32.mrf.mxu0  ;;  %v454_v58 = vadd.f32 %v446_v34, %v414_v56 }
  0xc6   :  { %v339_v36 = vadd.f32 %v333_v35, %v303_v18 }
  0xc7   :  { %v409_v37 = vpop.f32.mrf.mxu2  ;;  %v375_v38 = vpop.f32.mrf.mxu1 }
  0xc8   :  { %v379_v40 = vadd.f32 %v373_v33, %v339_v36 }
  0xca   :  { %v415_v41 = vadd.f32 %v409_v37, %v379_v40  ;;  %v6618_v37 = vmov 0.0  }
  0xcb   :  { %70 = vst.msk [vmem:[#allocation2] sm:$0xff] %vm69_vm9, %v6618_v37 }
  0xcc   :  { %v449_v43 = vpop.f32.mrf.mxu3  ;;  %71 = vst.msk [vmem:[#allocation2 + $0x8] sm:$0xff] %vm69_vm9, %v6618_v37 }
  0xcd   :  { %v455_v44 = vadd.f32 %v449_v43, %v415_v41  ;;  %v335_v45 = vpop.f32.mrf.mxu0  ;;  %73 = vst.msk [vmem:[#allocation2 + $0x10] sm:$0x7] %vm72_vm11, %v6618_v37 }
  0xce   :  { %74 = vst.msk [vmem:[#allocation2 + $0x18] sm:$0xff] %vm69_vm9, %v6618_v37 }
  0xcf   :  { %v411_v47 = vpop.f32.mrf.mxu2  ;;  %v522_v48 = vpop.f32.mrf.mxu1  ;;  %75 = vst.msk [vmem:[#allocation2 + $0x20] sm:$0xff] %vm69_vm9, %v6618_v37 }
  0xd0   :  { %76 = vst.msk [vmem:[#allocation2 + $0x28] sm:$0x7] %vm72_vm11, %v6618_v37 }
  0xd1   :  { %110 = vst.msk [vmem:[#allocation5] sm:$0xff] %vm109_vm1, %v6618_v37 }
  0xd2   :  { %111 = vst.msk [vmem:[#allocation5 + $0x8] sm:$0xff] %vm109_vm1, %v6618_v37 }
  0xd3   :  { %112 = vst.msk [vmem:[#allocation5 + $0x10] sm:$0xff] %vm109_vm1, %v6618_v37 }
  0xd4   :  { %v451_v51 = vpop.f32.mrf.mxu3  ;;  %113 = vst.msk [vmem:[#allocation5 + $0x18] sm:$0xff] %vm109_vm1, %v6618_v37 }
  0xd5   :  { %v478_v52 = vpop.f32.mrf.mxu0  ;;  %114 = vst.msk [vmem:[#allocation5 + $0x20] sm:$0xff] %vm109_vm1, %v6618_v37 }
  0xd6   :  { %v487_v53 = vadd.f32 %v478_v52, %v453_v30  ;;  %115 = vst.msk [vmem:[#allocation5 + $0x28] sm:$0xff] %vm109_vm1, %v6618_v37 }
  0xd7   :  { %v570_v54 = vpop.f32.mrf.mxu2  ;;  %v524_v55 = vpop.f32.mrf.mxu1  ;;  %116 = vst.msk [vmem:[#allocation5 + $0x30] sm:$0xff] %vm109_vm1, %v6618_v37 }
  0xd8   :  { %v6937_v57 = vadd.f32 %v522_v48, %v487_v53  ;;  %117 = vst.msk [vmem:[#allocation5 + $0x38] sm:$0xff] %vm109_vm1, %v6618_v37 }
  0xd9   :  { %118 = vst.msk [vmem:[#allocation5 + $0x40] sm:$0xff] %vm109_vm1, %v6618_v37 }
  0xda   :  { %v877_v7 = vmul.f32 %v6937_v57, %v6937_v57  ;;  %v865_v6 = vsel %vm69_vm9, %v6937_v57, 0.0  ;;  %119 = vst.msk [vmem:[#allocation5 + $0x48] sm:$0xff] %vm109_vm1, %v6618_v37 }
  0xdb   :  { %120 = vst.msk [vmem:[#allocation5 + $0x50] sm:$0xff] %vm109_vm1, %v6618_v37 }
  0xdc   :  { %v592_v59 = vpop.f32.mrf.mxu3  ;;  %v880_v13 = vsel %vm69_vm9, %v877_v7, 0.0  ;;  %121 = vst.msk [vmem:[#allocation5 + $0x58] sm:$0xff] %vm109_vm1, %v6618_v37 }
  0xdd   :  { %v480_v60 = vpop.f32.mrf.mxu0  ;;  %v593_v36 = vadd.f32 %v592_v59, %v570_v54  ;;  %122 = vst.msk [vmem:[#allocation5 + $0x60] sm:$0xff] %vm109_vm1, %v6618_v37 }
  0xde   :  { %v488_v61 = vadd.f32 %v480_v60, %v454_v58  ;;  %123 = vst.msk [vmem:[#allocation5 + $0x68] sm:$0xff] %vm109_vm1, %v6618_v37 }
  0xdf   :  { %v572_v62 = vpop.f32.mrf.mxu2  ;;  %v527_v63 = vpop.f32.mrf.mxu1  ;;  %124 = vst.msk [vmem:[#allocation5 + $0x70] sm:$0xff] %vm109_vm1, %v6618_v37 }
  0xe0   :  { %v6939_v0 = vadd.f32 %v524_v55, %v488_v61  ;;  %125 = vst.msk [vmem:[#allocation5 + $0x78] sm:$0xff] %vm109_vm1, %v6618_v37 }
  0xe1   :  { %126 = vst.msk [vmem:[#allocation5 + $0x80] sm:$0xff] %vm109_vm1, %v6618_v37 }
  0xe2   :  { %v878_v1 = vmul.f32 %v6939_v0, %v6939_v0  ;;  %v866_v3 = vsel %vm69_vm9, %v6939_v0, 0.0  ;;  %127 = vst.msk [vmem:[#allocation5 + $0x88] sm:$0xff] %vm109_vm1, %v6618_v37 }
  0xe3   :  { %v867_v12 = vadd.f32 %v866_v3, %v865_v6  ;;  %130 = vst.msk [vmem:[#allocation5 + $0x98] sm:$0xff] %vm109_vm1, %v6618_v37 }
  0xe4   :  { %v594_v2 = vpop.f32.mrf.mxu3  ;;  %v881_v10 = vsel %vm69_vm9, %v878_v1, 0.0  ;;  %131 = vst.msk [vmem:[#allocation5 + $0xa0] sm:$0xff] %vm109_vm1, %v6618_v37 }
  0xe5   :  { %v483_v4 = vpop.f32.mrf.mxu0  ;;  %v882_v16 = vadd.f32 %v881_v10, %v880_v13  ;;  %v595_v41 = vadd.f32 %v594_v2, %v572_v62  ;;  %132 = vst.msk [vmem:[#allocation5 + $0xa8] sm:$0xff] %vm109_vm1, %v6618_v37 }
  0xe6   :  { %v489_v8 = vadd.f32 %v483_v4, %v455_v44  ;;  %133 = vst.msk [vmem:[#allocation5 + $0xb0] sm:$0xff] %vm109_vm1, %v6618_v37 }
  0xe7   :  { %v575_v9 = vpop.f32.mrf.mxu2  ;;  %v529_v5 = vpop.f32.mrf.mxu1  ;;  %134 = vst.msk [vmem:[#allocation5 + $0xb8] sm:$0xff] %vm109_vm1, %v6618_v37 }
  0xe8   :  { %v6950_v11 = vadd.f32 %v527_v63, %v489_v8  ;;  %135 = vst.msk [vmem:[#allocation5 + $0xc0] sm:$0xff] %vm109_vm1, %v6618_v37 }
  0xe9   :  { %136 = vst.msk [vmem:[#allocation5 + $0xc8] sm:$0xff] %vm109_vm1, %v6618_v37 }
  0xea   :  { %v869_v14 = vsel %vm868_vm10, %v6950_v11, 0.0  ;;  %v879_v15 = vmul.f32 %v6950_v11, %v6950_v11  ;;  %137 = vst.msk [vmem:[#allocation5 + $0xd0] sm:$0xff] %vm109_vm1, %v6618_v37 }
  0xeb   :  { %v6957_v17 = vadd.f32 %v869_v14, %v867_v12  ;;  %138 = vst.msk [vmem:[#allocation5 + $0xd8] sm:$0xff] %vm109_vm1, %v6618_v37 }
  0xec   :  { %v883_v18 = vsel %vm868_vm10, %v879_v15, 0.0  ;;  %v597_v19 = vpop.f32.mrf.mxu3  ;;  %139 = vst.msk [vmem:[#allocation5 + $0xe0] sm:$0xff] %vm109_vm1, %v6618_v37 }
  0xed   :  { %v6960_v20 = vadd.f32 %v883_v18, %v882_v16  ;;  %v485_v21 = vpop.f32.mrf.mxu0  ;;  %v598_v50 = vadd.f32 %v597_v19, %v575_v9  ;;  %v871_v16 = vrot.slane %v6957_v17, 4  ;;  %140 = vst.msk [vmem:[#allocation5 + $0xe8] sm:$0xff] %vm109_vm1, %v6618_v37 }
  0xee   :  { %141 = vst.msk [vmem:[#allocation5 + $0xf0] sm:$0xff] %vm109_vm1, %v6618_v37 }
  0xef   :  { %v577_v23 = vpop.f32.mrf.mxu2  ;;  %v655_v24 = vpop.f32.mrf.mxu1  ;;  %v885_v21 = vrot.slane %v6960_v20, 4  ;;  %142 = vst.msk [vmem:[#allocation5 + $0xf8] sm:$0xff] %vm109_vm1, %v6618_v37 }
  0xf0   :  { %143 = vst.msk [vmem:[#allocation5 + $0x100] sm:$0xff] %vm109_vm1, %v6618_v37 }
  0xf1   :  { %144 = vst.msk [vmem:[#allocation5 + $0x108] sm:$0xff] %vm109_vm1, %v6618_v37 }
  0xf2   :  { %145 = vst.msk [vmem:[#allocation5 + $0x110] sm:$0xff] %vm109_vm1, %v6618_v37 }
  0xf3   :  { %146 = vst.msk [vmem:[#allocation5 + $0x118] sm:$0xff] %vm109_vm1, %v6618_v37 }
  0xf4   :  { %v599_v25 = vpop.f32.mrf.mxu3  ;;  %147 = vst.msk [vmem:[#allocation5 + $0x120] sm:$0xff] %vm109_vm1, %v6618_v37 }
  0xf5   :  { %v621_v26 = vpop.f32.mrf.mxu0  ;;  %78 = vst.msk [vmem:[#allocation3] sm:$0xff] %vm77_vm15, %v6618_v37 }
  0xf6   :  { %v630_v39 = vadd.f32 %v621_v26, %v593_v36  ;;  %v872_v26 = vadd.f32 %v871_v16, %v6957_v17  ;;  %v6484_v16 = vld [vmem:[%s9348_s23 + $0x30] sm:$0xff]  ;;  %79 = vst.msk [vmem:[#allocation3 + $0x8] sm:$0xff] %vm77_vm15, %v6618_v37 }
  0xf7   :  { %v685_v27 = vpop.f32.mrf.mxu2  ;;  %v657_v22 = vpop.f32.mrf.mxu1  ;;  %80 = vst.msk [vmem:[#allocation3 + $0x10] sm:$0xff] %vm77_vm15, %v6618_v37 }
  0xf8   :  { %v664_v45 = vadd.f32 %v655_v24, %v630_v39  ;;  %v873_v36 = vrot.slane %v872_v26, 2  ;;  %81 = vst.msk [vmem:[#allocation3 + $0x18] sm:$0xff] %vm77_vm15, %v6618_v37 }
  0xf9   :  { %84 = vst.msk [vmem:[#allocation3 + $0x28] sm:$0xff] %vm77_vm15, %v6618_v37 }
  0xfa   :  { %v694_v48 = vadd.f32 %v685_v27, %v664_v45  ;;  %85 = vst.msk [vmem:[#allocation3 + $0x30] sm:$0xff] %vm77_vm15, %v6618_v37 }
  0xfb   :  { %86 = vst.msk [vmem:[#allocation3 + $0x38] sm:$0xff] %vm77_vm15, %v6618_v37 }
  0xfc   :  { %v719_v28 = vpop.f32.mrf.mxu3  ;;  %87 = vst.msk [vmem:[#allocation3 + $0x40] sm:$0xff] %vm77_vm15, %v6618_v37 }
  0xfd   :  { %v623_v29 = vpop.f32.mrf.mxu0  ;;  %v728_v55 = vadd.f32 %v719_v28, %v694_v48 }
  0xfe   :  { %v631_v44 = vadd.f32 %v623_v29, %v595_v41 }
  0xff   :  { %v687_v30 = vpop.f32.mrf.mxu2  ;;  %v660_v31 = vpop.f32.mrf.mxu1 }
 0x100   :  { %v665_v46 = vadd.f32 %v657_v22, %v631_v44 }
 0x102   :  { %v695_v53 = vadd.f32 %v687_v30, %v665_v46 }
 0x104   :  { %v721_v32 = vpop.f32.mrf.mxu3 }
 0x105   :  { %v626_v33 = vpop.f32.mrf.mxu0  ;;  %v729_v58 = vadd.f32 %v721_v32, %v695_v53 }
 0x106   :  { %v632_v54 = vadd.f32 %v626_v33, %v598_v50 }
 0x107   :  { %v690_v34 = vpop.f32.mrf.mxu2  ;;  %v662_v35 = vpop.f32.mrf.mxu1 }
 0x108   :  { %v666_v59 = vadd.f32 %v660_v31, %v632_v54  ;;  %v886_v31 = vadd.f32 %v885_v21, %v6960_v20  ;;  %v6479_v21 = vld [vmem:[%s9348_s23 + $0x8] sm:$0xff] }
 0x10a   :  { %v696_v4 = vadd.f32 %v690_v34, %v666_v59 }
 0x10c   :  { %v724_v38 = vpop.f32.mrf.mxu3 }
 0x10d   :  { %v628_v40 = vpop.f32.mrf.mxu0  ;;  %v730_v9 = vadd.f32 %v724_v38, %v696_v4 }
 0x10e   :  { %v887_v40 = vrot.slane %v886_v31, 2 }
 0x10f   :  { %v692_v42 = vpop.f32.mrf.mxu2  ;;  %v783_v43 = vpop.f32.mrf.mxu1 }
 0x114   :  { %v726_v47 = vpop.f32.mrf.mxu3 }
 0x115   :  { %v749_v49 = vpop.f32.mrf.mxu0  ;;  %v888_v47 = vadd.f32 %v887_v40, %v886_v31  ;;  %v6482_v31 = vld [vmem:[%s9348_s23 + $0x20] sm:$0xff] }
 0x116   :  { %v758_v56 = vadd.f32 %v749_v49, %v728_v55 }
 0x117   :  { %v812_v51 = vpop.f32.mrf.mxu2  ;;  %v785_v52 = vpop.f32.mrf.mxu1  ;;  %v889_v53 = vrot.slane %v888_v47, 1 }
 0x118   :  { %v792_v63 = vadd.f32 %v783_v43, %v758_v56  ;;  %v874_v43 = vadd.f32 %v873_v36, %v872_v26  ;;  %v6483_v26 = vld [vmem:[%s9348_s23 + $0x28] sm:$0xff]  ;;  %v864_v36 = vld [vmem:[%s9350_s28] sm:$0x1] }
 0x11a   :  { %v821_v8 = vadd.f32 %v812_v51, %v792_v63  ;;  %v875_v50 = vrot.slane %v874_v43, 1 }
 0x11c   :  { %v851_v60 = vpop.f32.mrf.mxu3  ;;  %v876_v56 = vadd.f32 %v875_v50, %v874_v43 }
 0x11d   :  { %v751_v61 = vpop.f32.mrf.mxu0  ;;  %v7018_v13 = vadd.f32 %v851_v60, %v821_v8  ;;  %v890_v60 = vadd.f32 %v889_v53, %v888_v47 }
 0x11e   :  { %v759_v62 = vadd.f32 %v751_v61, %v729_v58 }
 0x11f   :  { %v814_v1 = vpop.f32.mrf.mxu2  ;;  %v788_v2 = vpop.f32.mrf.mxu1  ;;  %v902_v24 = vmul.f32 %v7018_v13, %v7018_v13  ;;  %v891_v22 = vsel %vm69_vm9, %v7018_v13, 0.0 }
 0x120   :  { %v793_v7 = vadd.f32 %v785_v52, %v759_v62 }
 0x121   :  { %v905_v17 = vsel %vm69_vm9, %v902_v24, 0.0 }
 0x122   :  { %v822_v3 = vadd.f32 %v814_v1, %v793_v7 }
 0x124   :  { %v853_v5 = vpop.f32.mrf.mxu3 }
 0x125   :  { %v7012_v6 = vadd.f32 %v853_v5, %v822_v3  ;;  %v754_v10 = vpop.f32.mrf.mxu0  ;;  %v6493_v3 = vld [vmem:[%s9348_s23 + $0x78] sm:$0xff]  ;;  %v6492_v5 = vld [vmem:[%s9348_s23 + $0x70] sm:$0xff] }
 0x126   :  { %v760_v12 = vadd.f32 %v754_v10, %v730_v9  ;;  %1041 = vmatpush.bf16.msrb.mxu0 %v6493_v3  ;;  %v6481_v9 = vld [vmem:[%s9348_s23 + $0x18] sm:$0xff] }
 0x127   :  { %v817_v14 = vpop.f32.mrf.mxu2  ;;  %v790_v15 = vpop.f32.mrf.mxu1  ;;  %v903_v19 = vmul.f32 %v7012_v6, %v7012_v6  ;;  %v892_v25 = vsel %vm69_vm9, %v7012_v6, 0.0  ;;  %1196 = vmatpush.bf16.msrb.mxu3 %v6481_v9  ;;  %v6485_v10 = vld [vmem:[%s9348_s23 + $0x38] sm:$0xff] }
 0x128   :  { %v794_v18 = vadd.f32 %v788_v2, %v760_v12  ;;  %v893_v32 = vadd.f32 %v892_v25, %v891_v22  ;;  %v6489_v12 = vld [vmem:[%s9348_s23 + $0x58] sm:$0xff]  ;;  %v6491_v15 = vld [vmem:[%s9348_s23 + $0x68] sm:$0xff]  ;;  %1101 = vmatpush.bf16.msrb.mxu1 %v6485_v10  ;;  %v6478_v22 = vld [vmem:[%s9348_s23] sm:$0xff] }
 0x129   :  { %v906_v28 = vsel %vm69_vm9, %v903_v19, 0.0  ;;  %1143 = vmatpush.bf16.msrb.mxu2 %v6489_v12 }
 0x12a   :  { %v823_v23 = vadd.f32 %v817_v14, %v794_v18  ;;  %v907_v38 = vadd.f32 %v906_v28, %v905_v17  ;;  %1042 = vmatpush.bf16.msrb.mxu0 %v6492_v5  ;;  %v6480_v14 = vld [vmem:[%s9348_s23 + $0x10] sm:$0xff]  ;;  %v863_v17 = vld [vmem:[%s9349_s26] sm:$0x1] }
 0x12b   :  { %v6488_v18 = vld [vmem:[%s9348_s23 + $0x50] sm:$0xff]  ;;  %1197 = vmatpush.bf16.msrb.mxu3 %v6480_v14 }
 0x12c   :  { %v856_v27 = vpop.f32.mrf.mxu3  ;;  %1102 = vmatpush.bf16.msrb.mxu1 %v6484_v16 }
 0x12d   :  { %v7044_v29 = vadd.f32 %v856_v27, %v823_v23  ;;  %v756_v30 = vpop.f32.mrf.mxu0  ;;  %v6490_v23 = vld [vmem:[%s9348_s23 + $0x60] sm:$0xff]  ;;  %1144 = vmatpush.bf16.msrb.mxu2 %v6488_v18  ;;  %v6487_v27 = vld [vmem:[%s9348_s23 + $0x48] sm:$0xff] }
 0x12e   :  { %1043 = vmatpush.bf16.msrb.mxu0 %v6491_v15 }
 0x12f   :  { %v894_v33 = vsel %vm868_vm10, %v7044_v29, 0.0  ;;  %v904_v34 = vmul.f32 %v7044_v29, %v7044_v29  ;;  %v819_v35 = vpop.f32.mrf.mxu2  ;;  %1198 = vmatpush.bf16.msrb.mxu3 %v6479_v21 }
 0x130   :  { %v895_v39 = vadd.f32 %v894_v33, %v893_v32  ;;  %1103 = vmatpush.bf16.msrb.mxu1 %v6483_v26  ;;  %v6486_v32 = vld [vmem:[%s9348_s23 + $0x40] sm:$0xff] }
 0x131   :  { %v908_v20 = vsel %vm868_vm10, %v904_v34, 0.0  ;;  %1145 = vmatpush.bf16.msrb.mxu2 %v6487_v27 }
 0x132   :  { %v896_v41 = vrot.slane %v895_v39, 4  ;;  %v909_v42 = vadd.f32 %v908_v20, %v907_v38  ;;  %1044 = vmatpush.bf16.msrb.mxu0 %v6490_v23 }
 0x133   :  { %1199 = vmatpush.bf16.msrb.mxu3 %v6478_v22 }
 0x134   :  { %v897_v44 = vadd.f32 %v896_v41, %v895_v39  ;;  %v910_v45 = vrot.slane %v909_v42, 4  ;;  %v858_v46 = vpop.f32.mrf.mxu3  ;;  %1104 = vmatpush.bf16.msrb.mxu1 %v6482_v31 }
 0x135   :  { %1146 = vmatpush.bf16.msrb.mxu2 %v6486_v32 }
 0x136   :  { %v898_v48 = vrot.slane %v897_v44, 2  ;;  %v911_v49 = vadd.f32 %v910_v45, %v909_v42  ;;  %1225 = vmatpush.bf16.msra.mxu0 %v6493_v3 }
 0x137   :  { %1308 = vmatpush.bf16.msra.mxu3 %v6481_v9 }
 0x138   :  { %v899_v51 = vadd.f32 %v898_v48, %v897_v44  ;;  %v912_v52 = vrot.slane %v911_v49, 2  ;;  %1261 = vmatpush.bf16.msra.mxu1 %v6485_v10 }
 0x139   :  { %1279 = vmatpush.bf16.msra.mxu2 %v6489_v12 }
 0x13a   :  { %v900_v54 = vrot.slane %v899_v51, 1  ;;  %v913_v55 = vadd.f32 %v912_v52, %v911_v49  ;;  %1226 = vmatpush.bf16.msra.mxu0 %v6492_v5 }
 0x13b   :  { %1309 = vmatpush.bf16.msra.mxu3 %v6480_v14 }
 0x13c   :  { %v901_v58 = vadd.f32 %v900_v54, %v899_v51  ;;  %v914_v59 = vrot.slane %v913_v55, 1  ;;  %1262 = vmatpush.bf16.msra.mxu1 %v6484_v16 }
 0x13d   :  { %1280 = vmatpush.bf16.msra.mxu2 %v6488_v18 }
 0x13e   :  { %v915_v61 = vadd.f32 %v914_v59, %v913_v55  ;;  %v916_v62 = vadd.f32 %v901_v58, %v876_v56  ;;  %1227 = vmatpush.bf16.msra.mxu0 %v6491_v15 }
 0x13f   :  { %1310 = vmatpush.bf16.msra.mxu3 %v6479_v21 }
 0x140   :  { %v917_v63 = vadd.f32 %v915_v61, %v890_v60  ;;  %v918_v1 = vmul.f32 0.029411765, %v916_v62  ;;  %1263 = vmatpush.bf16.msra.mxu1 %v6483_v26 }
 0x141   :  { %1281 = vmatpush.bf16.msra.mxu2 %v6487_v27 }
 0x142   :  { %v919_v2 = vmul.f32 0.029411765, %v917_v63  ;;  %v920_v4 = vmul.f32 %v918_v1, %v918_v1  ;;  %1228 = vmatpush.bf16.msra.mxu0 %v6490_v23 }
 0x143   :  { %1311 = vmatpush.bf16.msra.mxu3 %v6478_v22 }
 0x144   :  { %v921_v7 = vsub.f32 %v919_v2, %v920_v4  ;;  %1264 = vmatpush.bf16.msra.mxu1 %v6482_v31 }
 0x145   :  { %1282 = vmatpush.bf16.msra.mxu2 %v6486_v32 }
 0x146   :  { %v922_v8 = vadd.f32 1e-05, %v921_v7 }
 0x148   :  { %6538 = vrsqrt.f32 %v922_v8  ;;  %vm929_vm13 = vweird.f32 %v922_v8 }
 0x14e   :  { %v6539_v19 = vpop.eup %6538 }
 0x14f   :  { %v924_v24 = vmul.f32 %v6539_v19, %v922_v8  ;;  %vm930_vm12 = vweird.f32 %v6539_v19 }
 0x150   :  { %vm931_vm14 = vmor %vm929_vm13, %vm930_vm12  ;;  %vm1528_vm12 = vcmask 1040384   ;;  %vm1518_vm13 = vcmask 138240  }
 0x151   :  { %v925_v25 = vmul.f32 %v6539_v19, %v924_v24 }
 0x153   :  { %v926_v28 = vmul.f32 0.5, %v925_v25 }
 0x155   :  { %v927_v30 = vsub.f32 1.5, %v926_v28 }
 0x157   :  { %v928_v33 = vmul.f32 %v6539_v19, %v927_v30 }
 0x159   :  { %v932_v34 = vsel %vm931_vm14, %v6539_v19, %v928_v33  ;;  %vm82_vm14 = vcmask 257024  }
 0x15a   :  { %v933_v35 = vmul.f32 %v932_v34, %v863_v17  ;;  %83 = vst.msk [vmem:[#allocation3 + $0x20] sm:$0xf] %vm82_vm14, %v6618_v37 }
 0x15b   :  { %88 = vst.msk [vmem:[#allocation3 + $0x48] sm:$0xf] %vm82_vm14, %v6618_v37  ;;  %vm2330_vm14 = vcmask 277504  }
 0x15c   :  { %v934_v38 = vmul.f32 %v933_v35, %v918_v1  ;;  %v937_v39 = vperm.slane %v933_v35, 0 }
 0x15e   :  { %v935_v20 = vsub.f32 %v864_v36, %v934_v38  ;;  %v939_v40 = vmul.f32 %v937_v39, %v6937_v57  ;;  %v941_v41 = vmul.f32 %v937_v39, %v6950_v11  ;;  %v951_v42 = vmul.f32 %v937_v39, %v7018_v13 }
 0x15f   :  { %v940_v43 = vmul.f32 %v937_v39, %v6939_v0  ;;  %v952_v45 = vmul.f32 %v937_v39, %v7012_v6  ;;  %v953_v46 = vmul.f32 %v937_v39, %v7044_v29 }
 0x160   :  { %v943_v44 = vperm.slane %v935_v20, 0 }
 0x162   :  { %v945_v47 = vadd.f32 %v943_v44, %v939_v40  ;;  %v946_v48 = vadd.f32 %v943_v44, %v940_v43  ;;  %v947_v49 = vadd.f32 %v943_v44, %v941_v41  ;;  %v954_v50 = vadd.f32 %v951_v42, %v943_v44 }
 0x163   :  { %v955_v57 = vadd.f32 %v952_v45, %v943_v44  ;;  %v956_v11 = vadd.f32 %v953_v46, %v943_v44 }
 0x164   :  { %v948_v13 = vmax.f32 %v945_v47, 0.0  ;;  %v949_v51 = vmax.f32 %v946_v48, 0.0  ;;  %v950_v52 = vmax.f32 %v947_v49, 0.0  ;;  %v957_v53 = vmax.f32 %v954_v50, 0.0 }
 0x165   :  { %v958_v0 = vmax.f32 %v955_v57, 0.0  ;;  %v959_v6 = vmax.f32 %v956_v11, 0.0 }
 0x166   :  { %960 = vst.msk [vmem:[#allocation2 + $0x1] sm:$0xff] %vm69_vm9, %v948_v13 }
 0x167   :  { %961 = vst.msk [vmem:[#allocation2 + $0x9] sm:$0xff] %vm69_vm9, %v949_v51 }
 0x168   :  { %962 = vst.msk [vmem:[#allocation2 + $0x11] sm:$0x1] %vm868_vm10, %v950_v52 }
 0x169   :  { %964 = vst.msk [vmem:[#allocation2 + $0x19] sm:$0xff] %vm69_vm9, %v957_v53 }
 0x16a   :  { %965 = vst.msk [vmem:[#allocation2 + $0x21] sm:$0xff] %vm69_vm9, %v958_v0 }
 0x16b   :  { %966 = vst.msk [vmem:[#allocation2 + $0x29] sm:$0x1] %vm868_vm10, %v959_v6 }
 0x16d   :  { %v1002_v29 = vld [vmem:[#allocation2] sm:$0xff] }
 0x16e   :  { %v1003_v54 = vld [vmem:[#allocation2 + $0x8] sm:$0xff] }
 0x16f   :  { %v1005_v55 = vpack.c.bf16 %v1003_v54, %v1002_v29  ;;  %v1004_v56 = vld [vmem:[#allocation2 + $0x10] sm:$0x7] }
 0x170   :  { %v1006_v58 = vpack.c.bf16 %v1004_v56, %v1004_v56  ;;  %v1210_v8 = vld [vmem:[#allocation2 + $0x18] sm:$0xff] }
 0x171   :  { %5948 = vmatmul.msk.bf16.vlgmr.msrb.gmra.mxu0 %vm69_vm9, %v1005_v55  ;;  %v1159_v59 = vrot.slane %v1005_v55, 1  ;;  %v1057_v60 = vshll.u32 %v1005_v55, 16  ;;  %v1055_v63 = vshrl.u32 %v1005_v55, 16  ;;  %v1211_v9 = vld [vmem:[#allocation2 + $0x20] sm:$0xff] }
 0x172   :  { %v1160_v61 = vrot.slane %v1006_v58, 1  ;;  %v1061_v62 = vshll.u32 %v1006_v58, 16  ;;  %v1065_v5 = vshrl.u32 %v1006_v58, 16  ;;  %v1213_v10 = vpack.c.bf16 %v1211_v9, %v1210_v8  ;;  %v1212_v12 = vld [vmem:[#allocation2 + $0x28] sm:$0x7] }
 0x173   :  { %v1059_v1 = vrot.slane %v1057_v60, 1  ;;  %v1214_v15 = vpack.c.bf16 %v1212_v12, %v1212_v12 }
 0x174   :  { %v1161_v2 = vsel %vm230_vm2, %v1159_v59, %v1160_v61  ;;  %v1063_v7 = vrot.slane %v1061_v62, 1  ;;  %v1241_v14 = vshll.u32 %v1213_v10, 16  ;;  %v1295_v18 = vrot.slane %v1213_v10, 1 }
 0x175   :  { %6002 = vmatmul.msk.bf16.vlgmr.msrb.gmra.mxu3 %vm69_vm9, %v1161_v2  ;;  %v1060_v4 = vor.u32 %v1059_v1, %v1055_v63  ;;  %v1296_v19 = vrot.slane %v1214_v15, 1  ;;  %v1239_v21 = vshrl.u32 %v1213_v10, 16  ;;  %v1245_v23 = vshll.u32 %v1214_v15, 16 }
 0x176   :  { %v1243_v16 = vrot.slane %v1241_v14, 1  ;;  %v1249_v22 = vshrl.u32 %v1214_v15, 16 }
 0x177   :  { %v1064_v3 = vsel %vm158_vm3, %v1060_v4, %v1063_v7  ;;  %v1297_v25 = vsel %vm230_vm2, %v1295_v18, %v1296_v19  ;;  %v1247_v26 = vrot.slane %v1245_v23, 1 }
 0x178   :  { %5966 = vmatmul.msk.bf16.vlgmr.msrb.gmra.mxu1 %vm69_vm9, %v1064_v3  ;;  %5984 = vmatmul.msk.bf16.vlgmr.msrb.gmra.mxu2 %vm69_vm9, %v1064_v3  ;;  %v1244_v24 = vor.u32 %v1243_v16, %v1239_v21 }
 0x17a   :  { %v1248_v27 = vsel %vm158_vm3, %v1244_v24, %v1247_v26 }
 0x181   :  { %5949 = vmatmul.msk.bf16.gmra.mxu0 %vm69_vm9, %v1006_v58 }
 0x185   :  { %6003 = vmatmul.msk.bf16.gmra.mxu3 %vm69_vm9, %v1160_v61 }
 0x188   :  { %5967 = vmatmul.msk.bf16.gmra.mxu1 %vm69_vm9, %v1065_v5  ;;  %5985 = vmatmul.msk.bf16.gmra.mxu2 %vm69_vm9, %v1065_v5 }
 0x191   :  { %6004 = vmatmul.msk.bf16.vlgmr.msra.gmra.mxu0 %vm69_vm9, %v1213_v10 }
 0x195   :  { %6010 = vmatmul.msk.bf16.vlgmr.msra.gmra.mxu3 %vm69_vm9, %v1297_v25 }
 0x198   :  { %6006 = vmatmul.msk.bf16.vlgmr.msra.gmra.mxu1 %vm69_vm9, %v1248_v27  ;;  %6008 = vmatmul.msk.bf16.vlgmr.msra.gmra.mxu2 %vm69_vm9, %v1248_v27 }
 0x1a1   :  { %6005 = vmatmul.msk.bf16.gmra.mxu0 %vm69_vm9, %v1214_v15 }
 0x1a5   :  { %6011 = vmatmul.msk.bf16.gmra.mxu3 %vm69_vm9, %v1296_v19 }
 0x1a8   :  { %6007 = vmatmul.msk.bf16.gmra.mxu1 %vm69_vm9, %v1249_v22  ;;  %6009 = vmatmul.msk.bf16.gmra.mxu2 %vm69_vm9, %v1249_v22 }
 0x1ee   :  { %v1046_v28 = vpop.f32.mrf.mxu0 }
 0x1f5   :  { %v1106_v30 = vpop.f32.mrf.mxu1 }
 0x1f6   :  { %v1048_v31 = vpop.f32.mrf.mxu0  ;;  %v7179_v48 = vadd.f32 %v1106_v30, %v1046_v28 }
 0x1f8   :  { %v1201_v32 = vpop.f32.mrf.mxu3  ;;  %v1336_v6 = vmul.f32 %v7179_v48, %v7179_v48  ;;  %v1324_v60 = vsel %vm77_vm15, %v7179_v48, 0.0 }
 0x1fa   :  { %v1339_v9 = vsel %vm77_vm15, %v1336_v6, 0.0 }
 0x1fb   :  { %v1148_v17 = vpop.f32.mrf.mxu2 }
 0x1fc   :  { %v7173_v45 = vadd.f32 %v1201_v32, %v1148_v17 }
 0x1fd   :  { %v1108_v33 = vpop.f32.mrf.mxu1 }
 0x1fe   :  { %v1051_v34 = vpop.f32.mrf.mxu0  ;;  %v7175_v46 = vadd.f32 %v1108_v33, %v1048_v31  ;;  %v1361_v13 = vmul.f32 %v7173_v45, %v7173_v45  ;;  %v1350_v29 = vsel %vm77_vm15, %v7173_v45, 0.0 }
 0x200   :  { %v1203_v35 = vpop.f32.mrf.mxu3  ;;  %v1337_v51 = vmul.f32 %v7175_v46, %v7175_v46  ;;  %v1325_v54 = vsel %vm77_vm15, %v7175_v46, 0.0  ;;  %v1364_v62 = vsel %vm77_vm15, %v1361_v13, 0.0 }
 0x201   :  { %v1326_v4 = vadd.f32 %v1325_v54, %v1324_v60 }
 0x202   :  { %v1340_v63 = vsel %vm77_vm15, %v1337_v51, 0.0 }
 0x203   :  { %v1150_v36 = vpop.f32.mrf.mxu2  ;;  %v1341_v10 = vadd.f32 %v1340_v63, %v1339_v9 }
 0x204   :  { %v7171_v43 = vadd.f32 %v1203_v35, %v1150_v36 }
 0x205   :  { %v1111_v38 = vpop.f32.mrf.mxu1 }
 0x206   :  { %v1053_v39 = vpop.f32.mrf.mxu0  ;;  %v1362_v50 = vmul.f32 %v7171_v43, %v7171_v43  ;;  %v7183_v57 = vadd.f32 %v1111_v38, %v1051_v34  ;;  %v1351_v52 = vsel %vm77_vm15, %v7171_v43, 0.0 }
 0x207   :  { %v1352_v61 = vadd.f32 %v1351_v52, %v1350_v29 }
 0x208   :  { %v1206_v20 = vpop.f32.mrf.mxu3  ;;  %v1365_v55 = vsel %vm77_vm15, %v1362_v50, 0.0  ;;  %v1338_v56 = vmul.f32 %v7183_v57, %v7183_v57  ;;  %v1328_v1 = vsel %vm1327_vm8, %v7183_v57, 0.0 }
 0x209   :  { %v1366_v7 = vadd.f32 %v1365_v55, %v1364_v62  ;;  %v1329_v12 = vadd.f32 %v1328_v1, %v1326_v4 }
 0x20a   :  { %v1342_v5 = vsel %vm1327_vm8, %v1338_v56, 0.0 }
 0x20b   :  { %v1153_v40 = vpop.f32.mrf.mxu2  ;;  %v1343_v19 = vadd.f32 %v1342_v5, %v1341_v10  ;;  %v1330_v25 = vrot.slane %v1329_v12, 4 }
 0x20c   :  { %v7177_v47 = vadd.f32 %v1206_v20, %v1153_v40 }
 0x20d   :  { %v1113_v41 = vpop.f32.mrf.mxu1  ;;  %v1344_v22 = vrot.slane %v1343_v19, 4  ;;  %v1331_v33 = vadd.f32 %v1330_v25, %v1329_v12 }
 0x20e   :  { %v1230_v42 = vpop.f32.mrf.mxu0  ;;  %v1363_v53 = vmul.f32 %v7177_v47, %v7177_v47  ;;  %v1353_v58 = vsel %vm1327_vm8, %v7177_v47, 0.0 }
 0x20f   :  { %v1354_v3 = vadd.f32 %v1353_v58, %v1352_v61  ;;  %v1345_v41 = vadd.f32 %v1344_v22, %v1343_v19  ;;  %v1332_v52 = vrot.slane %v1331_v33, 2 }
 0x210   :  { %v1208_v44 = vpop.f32.mrf.mxu3  ;;  %v1367_v2 = vsel %vm1327_vm8, %v1363_v53, 0.0 }
 0x211   :  { %v1368_v14 = vadd.f32 %v1367_v2, %v1366_v7  ;;  %v1355_v21 = vrot.slane %v1354_v3, 4  ;;  %v1346_v56 = vrot.slane %v1345_v41, 2  ;;  %v1333_v2 = vadd.f32 %v1332_v52, %v1331_v33 }
 0x213   :  { %v1155_v49 = vpop.f32.mrf.mxu2  ;;  %v1369_v26 = vrot.slane %v1368_v14, 4  ;;  %v1356_v28 = vadd.f32 %v1355_v21, %v1354_v3  ;;  %v1347_v21 = vadd.f32 %v1346_v56, %v1345_v41 }
 0x215   :  { %v1266_v11 = vpop.f32.mrf.mxu1  ;;  %v1370_v34 = vadd.f32 %v1369_v26, %v1368_v14 }
 0x216   :  { %v1232_v0 = vpop.f32.mrf.mxu0  ;;  %v7215_v23 = vadd.f32 %v1266_v11, %v1230_v42  ;;  %v1357_v42 = vrot.slane %v1356_v28, 2 }
 0x217   :  { %v1371_v6 = vrot.slane %v1370_v34, 2 }
 0x218   :  { %v1313_v59 = vpop.f32.mrf.mxu3  ;;  %v1388_v31 = vmul.f32 %v7215_v23, %v7215_v23  ;;  %v1377_v36 = vsel %vm77_vm15, %v7215_v23, 0.0  ;;  %v1358_v61 = vadd.f32 %v1357_v42, %v1356_v28 }
 0x219   :  { %v1372_v9 = vadd.f32 %v1371_v6, %v1370_v34 }
 0x21a   :  { %v1391_v49 = vsel %vm77_vm15, %v1388_v31, 0.0  ;;  %v1334_v31 = vrot.slane %v1333_v2, 1 }
 0x21b   :  { %v1284_v8 = vpop.f32.mrf.mxu2 }
 0x21c   :  { %v7227_v38 = vadd.f32 %v1313_v59, %v1284_v8 }
 0x21d   :  { %v1268_v15 = vpop.f32.mrf.mxu1 }
 0x21e   :  { %v7213_v16 = vadd.f32 %v1268_v15, %v1232_v0  ;;  %v1235_v18 = vpop.f32.mrf.mxu0  ;;  %v1415_v29 = vmul.f32 %v7227_v38, %v7227_v38  ;;  %v1404_v62 = vsel %vm77_vm15, %v7227_v38, 0.0 }
 0x220   :  { %v1315_v24 = vpop.f32.mrf.mxu3  ;;  %v1389_v27 = vmul.f32 %v7213_v16, %v7213_v16  ;;  %v1378_v32 = vsel %vm77_vm15, %v7213_v16, 0.0  ;;  %v1418_v5 = vsel %vm77_vm15, %v1415_v29, 0.0 }
 0x221   :  { %v1379_v44 = vadd.f32 %v1378_v32, %v1377_v36  ;;  %v1373_v32 = vrot.slane %v1372_v9, 1 }
 0x222   :  { %v1392_v39 = vsel %vm77_vm15, %v1389_v27, 0.0 }
 0x223   :  { %v1286_v30 = vpop.f32.mrf.mxu2  ;;  %v1393_v53 = vadd.f32 %v1392_v39, %v1391_v49 }
 0x224   :  { %v7223_v17 = vadd.f32 %v1315_v24, %v1286_v30  ;;  %v1359_v24 = vrot.slane %v1358_v61, 1 }
 0x225   :  { %v1271_v35 = vpop.f32.mrf.mxu1 }
 0x226   :  { %v7230_v20 = vadd.f32 %v1271_v35, %v1235_v18  ;;  %v1237_v40 = vpop.f32.mrf.mxu0  ;;  %v1416_v50 = vmul.f32 %v7223_v17, %v7223_v17  ;;  %v1405_v54 = vsel %vm77_vm15, %v7223_v17, 0.0  ;;  %v1360_v42 = vadd.f32 %v1359_v24, %v1358_v61  ;;  %v1323_v24 = vld [vmem:[%s9319_s8] sm:$0x1] }
 0x227   :  { %v1406_v4 = vadd.f32 %v1405_v54, %v1404_v62  ;;  %v1348_v40 = vrot.slane %v1347_v21, 1 }
 0x228   :  { %v1380_v11 = vsel %vm1327_vm8, %v7230_v20, 0.0  ;;  %v1390_v13 = vmul.f32 %v7230_v20, %v7230_v20  ;;  %v1318_v51 = vpop.f32.mrf.mxu3  ;;  %v1419_v63 = vsel %vm77_vm15, %v1416_v50, 0.0  ;;  %v1335_v50 = vadd.f32 %v1334_v31, %v1333_v2 }
 0x229   :  { %v1381_v0 = vadd.f32 %v1380_v11, %v1379_v44  ;;  %v1420_v14 = vadd.f32 %v1419_v63, %v1418_v5  ;;  %v1374_v11 = vadd.f32 %v1373_v32, %v1372_v9 }
 0x22a   :  { %v1394_v55 = vsel %vm1327_vm8, %v1390_v13, 0.0 }
 0x22b   :  { %v1382_v58 = vrot.slane %v1381_v0, 4  ;;  %v1395_v59 = vadd.f32 %v1394_v55, %v1393_v53  ;;  %v1289_v60 = vpop.f32.mrf.mxu2  ;;  %v1349_v53 = vadd.f32 %v1348_v40, %v1347_v21 }
 0x22c   :  { %v7247_v1 = vadd.f32 %v1318_v51, %v1289_v60 }
 0x22d   :  { %v1383_v7 = vadd.f32 %v1382_v58, %v1381_v0  ;;  %v1396_v3 = vrot.slane %v1395_v59, 4  ;;  %v1273_v8 = vpop.f32.mrf.mxu1  ;;  %v1375_v0 = vadd.f32 %v1360_v42, %v1335_v50  ;;  %v1376_v55 = vadd.f32 %v1374_v11, %v1349_v53 }
 0x22e   :  { %v1407_v10 = vsel %vm1327_vm8, %v7247_v1, 0.0  ;;  %v1417_v12 = vmul.f32 %v7247_v1, %v7247_v1 }
 0x22f   :  { %v1384_v15 = vrot.slane %v1383_v7, 2  ;;  %v1397_v18 = vadd.f32 %v1396_v3, %v1395_v59  ;;  %v1408_v19 = vadd.f32 %v1407_v10, %v1406_v4 }
 0x230   :  { %v1421_v25 = vsel %vm1327_vm8, %v1417_v12, 0.0  ;;  %v1320_v26 = vpop.f32.mrf.mxu3  ;;  %vm1609_vm8 = vcmask 254976  }
 0x231   :  { %v1385_v27 = vadd.f32 %v1384_v15, %v1383_v7  ;;  %v1398_v22 = vrot.slane %v1397_v18, 2  ;;  %v1409_v28 = vrot.slane %v1408_v19, 4  ;;  %v1422_v30 = vadd.f32 %v1421_v25, %v1420_v14  ;;  %v1322_v15 = vld [vmem:[%s9351_s3] sm:$0x1] }
 0x233   :  { %v1386_v33 = vrot.slane %v1385_v27, 1  ;;  %v1399_v34 = vadd.f32 %v1398_v22, %v1397_v18  ;;  %v1410_v35 = vadd.f32 %v1409_v28, %v1408_v19  ;;  %v1423_v36 = vrot.slane %v1422_v30, 4  ;;  %v1291_v39 = vpop.f32.mrf.mxu2 }
 0x235   :  { %v1400_v44 = vrot.slane %v1399_v34, 1  ;;  %v1411_v49 = vrot.slane %v1410_v35, 2  ;;  %v1424_v41 = vadd.f32 %v1423_v36, %v1422_v30  ;;  %v1387_v13 = vadd.f32 %v1386_v33, %v1385_v27 }
 0x236   :  { %v6619_v30 = vmov 0  }
 0x237   :  { %v1412_v51 = vadd.f32 %v1411_v49, %v1410_v35  ;;  %v1425_v52 = vrot.slane %v1424_v41, 2  ;;  %v1401_v6 = vadd.f32 %v1400_v44, %v1399_v34  ;;  %v1402_v56 = vadd.f32 %v1387_v13, %v1375_v0 }
 0x238   :  { %v1530_v31 = vsel %vm1528_vm12, 65535, %v6619_v30 }
 0x239   :  { %v1413_v29 = vrot.slane %v1412_v51, 1  ;;  %v1426_v54 = vadd.f32 %v1425_v52, %v1424_v41  ;;  %v1403_v60 = vadd.f32 %v1401_v6, %v1376_v55 }
 0x23b   :  { %v1414_v58 = vadd.f32 %v1413_v29, %v1412_v51  ;;  %v1427_v59 = vrot.slane %v1426_v54, 1 }
 0x23d   :  { %v1428_v62 = vadd.f32 %v1427_v59, %v1426_v54  ;;  %v1429_v61 = vadd.f32 %v1414_v58, %v1402_v56 }
 0x23f   :  { %v1430_v63 = vadd.f32 %v1428_v62, %v1403_v60  ;;  %v1431_v4 = vmul.f32 0.014705882, %v1429_v61 }
 0x241   :  { %v1432_v7 = vmul.f32 0.014705882, %v1430_v63  ;;  %v1433_v2 = vmul.f32 %v1431_v4, %v1431_v4 }
 0x243   :  { %v1434_v3 = vsub.f32 %v1432_v7, %v1433_v2 }
 0x245   :  { %v1435_v8 = vadd.f32 1e-05, %v1434_v3 }
 0x247   :  { %6540 = vrsqrt.f32 %v1435_v8  ;;  %vm1442_vm10 = vweird.f32 %v1435_v8 }
 0x24d   :  { %v6541_v9 = vpop.eup %6540 }
 0x24e   :  { %v1437_v5 = vmul.f32 %v6541_v9, %v1435_v8  ;;  %vm1443_vm9 = vweird.f32 %v6541_v9 }
 0x24f   :  { %vm1444_vm11 = vmor %vm1442_vm10, %vm1443_vm9  ;;  %vm89_vm9 = vcmask 130048  }
 0x250   :  { %v1438_v10 = vmul.f32 %v6541_v9, %v1437_v5  ;;  %v6496_v5 = vld [vmem:[%s9320_s6] sm:$0xff]  ;;  %90 = vst.msk [vmem:[#allocation4] sm:$0xff] %vm89_vm9, %v6618_v37 }
 0x251   :  { %91 = vst.msk [vmem:[#allocation4 + $0x8] sm:$0xff] %vm89_vm9, %v6618_v37 }
 0x252   :  { %v1439_v12 = vmul.f32 0.5, %v1438_v10  ;;  %v6494_v10 = vld [vmem:[%s9321_s5] sm:$0xff]  ;;  %92 = vst.msk [vmem:[#allocation4 + $0x10] sm:$0xff] %vm89_vm9, %v6618_v37 }
 0x253   :  { %93 = vst.msk [vmem:[#allocation4 + $0x18] sm:$0xff] %vm89_vm9, %v6618_v37 }
 0x254   :  { %v1440_v14 = vsub.f32 1.5, %v1439_v12  ;;  %v6497_v12 = vld [vmem:[%s9320_s6 + $0x8] sm:$0xff]  ;;  %94 = vst.msk [vmem:[#allocation4 + $0x20] sm:$0xff] %vm89_vm9, %v6618_v37 }
 0x255   :  { %95 = vst.msk [vmem:[#allocation4 + $0x28] sm:$0xff] %vm89_vm9, %v6618_v37 }
 0x256   :  { %v1441_v18 = vmul.f32 %v6541_v9, %v1440_v14  ;;  %v6495_v14 = vld [vmem:[%s9321_s5 + $0x8] sm:$0xff]  ;;  %96 = vst.msk [vmem:[#allocation4 + $0x30] sm:$0xff] %vm89_vm9, %v6618_v37 }
 0x257   :  { %97 = vst.msk [vmem:[#allocation4 + $0x38] sm:$0xff] %vm89_vm9, %v6618_v37 }
 0x258   :  { %v1445_v19 = vsel %vm1444_vm11, %v6541_v9, %v1441_v18  ;;  %v1495_v18 = vld [vmem:[%s9321_s5 + $0x10] sm:$0x1]  ;;  %100 = vst.msk [vmem:[#allocation4 + $0x48] sm:$0xff] %vm89_vm9, %v6618_v37 }
 0x259   :  { %v1446_v21 = vmul.f32 %v1445_v19, %v1322_v15  ;;  %v1500_v15 = vld [vmem:[%s9320_s6 + $0x10] sm:$0x1]  ;;  %101 = vst.msk [vmem:[#allocation4 + $0x50] sm:$0xff] %vm89_vm9, %v6618_v37 }
 0x25a   :  { %v1514_v19 = vunpack.c.l.b16 %v1500_v15  ;;  %102 = vst.msk [vmem:[#allocation4 + $0x58] sm:$0xff] %vm89_vm9, %v6618_v37 }
 0x25b   :  { %v1447_v25 = vmul.f32 %v1446_v21, %v1431_v4  ;;  %v1450_v26 = vperm.slane %v1446_v21, 0  ;;  %v1566_v21 = vunpack.c.l.b16 %v1495_v18  ;;  %103 = vst.msk [vmem:[#allocation4 + $0x60] sm:$0xff] %vm89_vm9, %v6618_v37 }
 0x25c   :  { %104 = vst.msk [vmem:[#allocation4 + $0x68] sm:$0xff] %vm89_vm9, %v6618_v37 }
 0x25d   :  { %v1448_v27 = vsub.f32 %v1323_v24, %v1447_v25  ;;  %v1484_v22 = vmul.f32 %v1450_v26, %v7247_v1  ;;  %v1466_v28 = vmul.f32 %v1450_v26, %v7177_v47  ;;  %v1454_v32 = vmul.f32 %v1450_v26, %v7183_v57  ;;  %105 = vst.msk [vmem:[#allocation4 + $0x70] sm:$0xff] %vm89_vm9, %v6618_v37 }
 0x25e   :  { %v1475_v34 = vmul.f32 %v1450_v26, %v7230_v20  ;;  %v1464_v35 = vmul.f32 %v1450_v26, %v7173_v45  ;;  %v1465_v36 = vmul.f32 %v1450_v26, %v7171_v43  ;;  %v1452_v39 = vmul.f32 %v1450_v26, %v7179_v48  ;;  %106 = vst.msk [vmem:[#allocation4 + $0x78] sm:$0xff] %vm89_vm9, %v6618_v37 }
 0x25f   :  { %v1456_v33 = vperm.slane %v1448_v27, 0  ;;  %v1453_v40 = vmul.f32 %v1450_v26, %v7175_v46  ;;  %v1482_v1 = vmul.f32 %v1450_v26, %v7227_v38  ;;  %v1483_v47 = vmul.f32 %v1450_v26, %v7223_v17  ;;  %v6504_v27 = vld [vmem:[%s9322_s9 + $0x30] sm:$0xff]  ;;  %107 = vst.msk [vmem:[#allocation4 + $0x80] sm:$0xff] %vm89_vm9, %v6618_v37 }
 0x260   :  { %v1473_v46 = vmul.f32 %v1450_v26, %v7215_v23  ;;  %v1474_v38 = vmul.f32 %v1450_v26, %v7213_v16  ;;  %v1517_v24 = vpack.c.b16 %v1514_v19, %v1514_v19  ;;  %v1569_v25 = vpack.c.b16 %v1566_v21, %v1566_v21  ;;  %v6505_v26 = vld [vmem:[%s9322_s9 + $0x38] sm:$0xff] }
 0x261   :  { %v1487_v42 = vadd.f32 %v1484_v22, %v1456_v33  ;;  %v1469_v44 = vadd.f32 %v1466_v28, %v1456_v33  ;;  %v1460_v49 = vadd.f32 %v1456_v33, %v1454_v32  ;;  %v1478_v41 = vadd.f32 %v1475_v34, %v1456_v33  ;;  %v6501_v32 = vld [vmem:[%s9322_s9 + $0x18] sm:$0xff]  ;;  %v6498_v34 = vld [vmem:[%s9322_s9] sm:$0xff] }
 0x262   :  { %v1467_v57 = vadd.f32 %v1464_v35, %v1456_v33  ;;  %v1468_v50 = vadd.f32 %v1465_v36, %v1456_v33  ;;  %v1458_v11 = vadd.f32 %v1456_v33, %v1452_v39  ;;  %v1459_v20 = vadd.f32 %v1456_v33, %v1453_v40  ;;  %v6500_v35 = vld [vmem:[%s9322_s9 + $0x10] sm:$0xff]  ;;  %v6502_v36 = vld [vmem:[%s9322_s9 + $0x20] sm:$0xff] }
 0x263   :  { %v1490_v13 = vmax.f32 %v1487_v42, 0.0  ;;  %v1472_v45 = vmax.f32 %v1469_v44, 0.0  ;;  %v1463_v51 = vmax.f32 %v1460_v49, 0.0  ;;  %v1481_v43 = vmax.f32 %v1478_v41, 0.0 }
 0x264   :  { %v1470_v52 = vmax.f32 %v1467_v57, 0.0  ;;  %v1471_v48 = vmax.f32 %v1468_v50, 0.0  ;;  %v1461_v29 = vmax.f32 %v1458_v11, 0.0  ;;  %v1462_v54 = vmax.f32 %v1459_v20, 0.0 }
 0x265   :  { %v1614_v53 = vpack.c.bf16 %v1490_v13, %v1490_v13  ;;  %v1504_v17 = vpack.c.bf16 %v1472_v45, %v1472_v45  ;;  %v1502_v0 = vpack.c.bf16 %v1463_v51, %v1463_v51  ;;  %v1612_v6 = vpack.c.bf16 %v1481_v43, %v1481_v43 }
 0x266   :  { %v1485_v55 = vadd.f32 %v1482_v1, %v1456_v33  ;;  %v1486_v56 = vadd.f32 %v1483_v47, %v1456_v33  ;;  %v1476_v4 = vadd.f32 %v1473_v46, %v1456_v33  ;;  %v1477_v7 = vadd.f32 %v1474_v38, %v1456_v33  ;;  %v6503_v33 = vld [vmem:[%s9322_s9 + $0x28] sm:$0xff] }
 0x267   :  { %v1532_v58 = vand.u32 %v1530_v31, %v1504_v17  ;;  %v1580_v59 = vand.u32 %v1530_v31, %v1502_v0  ;;  %v1616_v60 = vand.u32 %v1614_v53, %v1530_v31  ;;  %v1642_v62 = vand.u32 %v1612_v6, %v1530_v31  ;;  %v6499_v31 = vld [vmem:[%s9322_s9 + $0x8] sm:$0xff] }
 0x268   :  { %v1488_v61 = vmax.f32 %v1485_v55, 0.0  ;;  %v1489_v63 = vmax.f32 %v1486_v56, 0.0  ;;  %v1479_v16 = vmax.f32 %v1476_v4, 0.0  ;;  %v1480_v23 = vmax.f32 %v1477_v7, 0.0 }
 0x269   :  { %1540 = vmatpush.bf16.msrb.mxu0 %v1532_v58  ;;  %1588 = vmatpush.bf16.msrb.mxu1 %v1580_v59  ;;  %v1503_v2 = vpack.c.bf16 %v1471_v48, %v1470_v52  ;;  %v1501_v3 = vpack.c.bf16 %v1462_v54, %v1461_v29 }
 0x26a   :  { %1624 = vmatpush.bf16.msrb.mxu2 %v1616_v60  ;;  %1650 = vmatpush.bf16.msrb.mxu3 %v1642_v62  ;;  %v1613_v8 = vpack.c.bf16 %v1489_v63, %v1488_v61  ;;  %v1611_v9 = vpack.c.bf16 %v1480_v23, %v1479_v16 }
 0x26d   :  { %1541 = vmatpush.bf16.msrb.mxu0 %v1503_v2  ;;  %1589 = vmatpush.bf16.msrb.mxu1 %v1501_v3 }
 0x26e   :  { %1625 = vmatpush.bf16.msrb.mxu2 %v1613_v8  ;;  %1651 = vmatpush.bf16.msrb.mxu3 %v1611_v9 }
 0x270   :  { %6020 = vmatmul.msk.bf16.vlgmr.msrb.gmra.mxu0 %vm1518_vm13, %v6496_v5  ;;  %6031 = vmatmul.msk.bf16.vlgmr.msrb.gmra.mxu1 %vm1518_vm13, %v6494_v10 }
 0x271   :  { %6034 = vmatmul.msk.bf16.vlgmr.msrb.gmra.mxu2 %vm1518_vm13, %v6496_v5  ;;  %6037 = vmatmul.msk.bf16.vlgmr.msrb.gmra.mxu3 %vm1518_vm13, %v6494_v10 }
 0x272   :  { %1727 = vmatpush.bf16.msra.mxu0 %v6505_v26  ;;  %1878 = vmatpush.bf16.msra.mxu3 %v6499_v31 }
 0x273   :  { %1791 = vmatpush.bf16.msra.mxu1 %v6501_v32  ;;  %1826 = vmatpush.bf16.msra.mxu2 %v6503_v33 }
 0x276   :  { %1728 = vmatpush.bf16.msra.mxu0 %v6504_v27  ;;  %1879 = vmatpush.bf16.msra.mxu3 %v6498_v34 }
 0x277   :  { %1792 = vmatpush.bf16.msra.mxu1 %v6500_v35  ;;  %1827 = vmatpush.bf16.msra.mxu2 %v6502_v36 }
 0x27a   :  { %1918 = vmatpush.bf16.msrb.mxu0 %v6505_v26  ;;  %2033 = vmatpush.bf16.msrb.mxu3 %v6499_v31 }
 0x27b   :  { %1970 = vmatpush.bf16.msrb.mxu1 %v6501_v32  ;;  %1993 = vmatpush.bf16.msrb.mxu2 %v6503_v33 }
 0x27e   :  { %1919 = vmatpush.bf16.msrb.mxu0 %v6504_v27  ;;  %2034 = vmatpush.bf16.msrb.mxu3 %v6498_v34 }
 0x27f   :  { %1971 = vmatpush.bf16.msrb.mxu1 %v6500_v35  ;;  %1994 = vmatpush.bf16.msrb.mxu2 %v6502_v36 }
 0x280   :  { %6021 = vmatmul.msk.bf16.gmra.mxu0 %vm1518_vm13, %v6497_v12  ;;  %6032 = vmatmul.msk.bf16.gmra.mxu1 %vm1518_vm13, %v6495_v14 }
 0x281   :  { %6035 = vmatmul.msk.bf16.gmra.mxu2 %vm1518_vm13, %v6497_v12  ;;  %6038 = vmatmul.msk.bf16.gmra.mxu3 %vm1518_vm13, %v6495_v14 }
 0x290   :  { %6022 = vmatmul.msk.bf16.gmra.mxu0 %vm1518_vm13, %v1517_v24  ;;  %6033 = vmatmul.msk.bf16.gmra.mxu1 %vm1518_vm13, %v1569_v25 }
 0x291   :  { %6036 = vmatmul.msk.bf16.gmra.mxu2 %vm1518_vm13, %v1517_v24  ;;  %6039 = vmatmul.msk.bf16.gmra.mxu3 %vm1518_vm13, %v1569_v25 }
 0x2ed   :  { %v1543_v22 = vpop.f32.mrf.mxu0  ;;  %v1591_v28 = vpop.f32.mrf.mxu1 }
 0x2ee   :  { %v1592_v30 = vadd.f32 %v1591_v28, %v1543_v22 }
 0x2f0   :  { %1605 = vst.msk [vmem:[#allocation3 + $0x1] sm:$0xff] %vm77_vm15, %v1592_v30 }
 0x2f4   :  { %v1627_v39 = vpop.f32.mrf.mxu2  ;;  %v1653_v40 = vpop.f32.mrf.mxu3 }
 0x2f5   :  { %v1545_v1 = vpop.f32.mrf.mxu0  ;;  %v1593_v47 = vpop.f32.mrf.mxu1  ;;  %v1654_v42 = vadd.f32 %v1653_v40, %v1627_v39 }
 0x2f6   :  { %v1594_v44 = vadd.f32 %v1593_v47, %v1545_v1 }
 0x2f7   :  { %1668 = vst.msk [vmem:[#allocation3 + $0x29] sm:$0xff] %vm77_vm15, %v1654_v42  ;;  %v1692_v13 = vld [vmem:[#allocation3] sm:$0xff] }
 0x2f8   :  { %1606 = vst.msk [vmem:[#allocation3 + $0x9] sm:$0xff] %vm77_vm15, %v1594_v44 }
 0x2fc   :  { %v1629_v49 = vpop.f32.mrf.mxu2  ;;  %v1655_v41 = vpop.f32.mrf.mxu3 }
 0x2fd   :  { %v1548_v57 = vpop.f32.mrf.mxu0  ;;  %v1596_v50 = vpop.f32.mrf.mxu1  ;;  %v1656_v11 = vadd.f32 %v1655_v41, %v1629_v49 }
 0x2fe   :  { %v1597_v20 = vadd.f32 %v1596_v50, %v1548_v57  ;;  %v1895_v30 = vld [vmem:[#allocation3 + $0x28] sm:$0xff] }
 0x2ff   :  { %v1693_v45 = vld [vmem:[#allocation3 + $0x8] sm:$0xff]  ;;  %1669 = vst.msk [vmem:[#allocation3 + $0x31] sm:$0xff] %vm77_vm15, %v1656_v11 }
 0x300   :  { %1607 = vst.msk [vmem:[#allocation3 + $0x11] sm:$0xff] %vm77_vm15, %v1597_v20  ;;  %v1697_v51 = vpack.c.bf16 %v1693_v45, %v1692_v13 }
 0x302   :  { %6060 = vmatmul.msk.bf16.vlgmr.msra.gmra.mxu0 %vm77_vm15, %v1697_v51  ;;  %v1746_v6 = vshll.u32 %v1697_v51, 16  ;;  %v1846_v61 = vrot.slane %v1697_v51, 1  ;;  %v1744_v4 = vshrl.u32 %v1697_v51, 16 }
 0x304   :  { %v1632_v43 = vpop.f32.mrf.mxu2  ;;  %v1658_v52 = vpop.f32.mrf.mxu3  ;;  %v1748_v62 = vrot.slane %v1746_v6, 1 }
 0x305   :  { %v1550_v48 = vpop.f32.mrf.mxu0  ;;  %v1598_v46 = vpop.f32.mrf.mxu1  ;;  %v1659_v38 = vadd.f32 %v1658_v52, %v1632_v43 }
 0x306   :  { %v1599_v53 = vadd.f32 %v1598_v46, %v1550_v48  ;;  %v1749_v23 = vor.u32 %v1748_v62, %v1744_v4  ;;  %v1896_v31 = vld [vmem:[#allocation3 + $0x30] sm:$0xff] }
 0x307   :  { %1670 = vst.msk [vmem:[#allocation3 + $0x39] sm:$0xff] %vm77_vm15, %v1659_v38  ;;  %v1694_v58 = vld [vmem:[#allocation3 + $0x10] sm:$0xff]  ;;  %v1900_v32 = vpack.c.bf16 %v1896_v31, %v1895_v30 }
 0x308   :  { %1608 = vst.msk [vmem:[#allocation3 + $0x19] sm:$0xff] %vm77_vm15, %v1599_v53 }
 0x309   :  { %v1937_v39 = vshll.u32 %v1900_v32, 16  ;;  %v1935_v1 = vshrl.u32 %v1900_v32, 16  ;;  %v2013_v42 = vrot.slane %v1900_v32, 1 }
 0x30b   :  { %v1939_v47 = vrot.slane %v1937_v39, 1 }
 0x30c   :  { %v1634_v17 = vpop.f32.mrf.mxu2  ;;  %v1660_v0 = vpop.f32.mrf.mxu3 }
 0x30d   :  { %v1553_v29 = vpop.f32.mrf.mxu0  ;;  %v1601_v54 = vpop.f32.mrf.mxu1  ;;  %v1661_v55 = vadd.f32 %v1660_v0, %v1634_v17  ;;  %v1940_v41 = vor.u32 %v1939_v47, %v1935_v1 }
 0x30e   :  { %v1602_v56 = vadd.f32 %v1601_v54, %v1553_v29  ;;  %v1897_v35 = vld [vmem:[#allocation3 + $0x38] sm:$0xff] }
 0x30f   :  { %v1695_v59 = vld [vmem:[#allocation3 + $0x18] sm:$0xff]  ;;  %1671 = vst.msk [vmem:[#allocation3 + $0x41] sm:$0xff] %vm77_vm15, %v1661_v55 }
 0x310   :  { %1610 = vst.msk [vmem:[#allocation3 + $0x21] sm:$0x3] %vm1609_vm8, %v1602_v56  ;;  %v1698_v60 = vpack.c.bf16 %v1695_v59, %v1694_v58 }
 0x312   :  { %6061 = vmatmul.msk.bf16.gmra.mxu0 %vm77_vm15, %v1698_v60  ;;  %v1847_v63 = vrot.slane %v1698_v60, 1  ;;  %v1750_v7 = vshll.u32 %v1698_v60, 16  ;;  %v1754_v25 = vshrl.u32 %v1698_v60, 16 }
 0x314   :  { %v1848_v16 = vsel %vm230_vm2, %v1846_v61, %v1847_v63  ;;  %v1752_v2 = vrot.slane %v1750_v7, 1  ;;  %v1637_v3 = vpop.f32.mrf.mxu2  ;;  %v1663_v8 = vpop.f32.mrf.mxu3 }
 0x315   :  { %v1555_v9 = vpop.f32.mrf.mxu0  ;;  %v1603_v5 = vpop.f32.mrf.mxu1  ;;  %6093 = vmatmul.msk.bf16.vlgmr.msra.gmra.mxu3 %vm77_vm15, %v1848_v16  ;;  %v1664_v10 = vadd.f32 %v1663_v8, %v1637_v3 }
 0x316   :  { %v1753_v12 = vsel %vm158_vm3, %v1749_v23, %v1752_v2  ;;  %v1756_v22 = vor.u32 %v1754_v25, %v1752_v2  ;;  %v1898_v36 = vld [vmem:[#allocation3 + $0x40] sm:$0xff] }
 0x317   :  { %6071 = vmatmul.msk.bf16.vlgmr.msra.gmra.mxu1 %vm77_vm15, %v1753_v12  ;;  %6082 = vmatmul.msk.bf16.vlgmr.msra.gmra.mxu2 %vm77_vm15, %v1753_v12  ;;  %1672 = vst.msk [vmem:[#allocation3 + $0x49] sm:$0x3] %vm1609_vm8, %v1664_v10  ;;  %v1696_v14 = vld [vmem:[#allocation3 + $0x20] sm:$0xf]  ;;  %v1901_v40 = vpack.c.bf16 %v1898_v36, %v1897_v35  ;;  %vm2464_vm8 = vcmask 125952  }
 0x318   :  { %v1699_v15 = vpack.c.bf16 %v1696_v14, %v1696_v14 }
 0x319   :  { %v2014_v44 = vrot.slane %v1901_v40, 1  ;;  %v1941_v49 = vshll.u32 %v1901_v40, 16  ;;  %v1945_v45 = vshrl.u32 %v1901_v40, 16 }
 0x31a   :  { %v1757_v21 = vshll.u32 %v1699_v15, 16  ;;  %v1849_v24 = vrot.slane %v1699_v15, 1  ;;  %v1761_v33 = vshrl.u32 %v1699_v15, 16 }
 0x31b   :  { %v2015_v57 = vsel %vm230_vm2, %v2013_v42, %v2014_v44  ;;  %v1943_v50 = vrot.slane %v1941_v49, 1 }
 0x31c   :  { %v1639_v18 = vpop.f32.mrf.mxu2  ;;  %v1665_v19 = vpop.f32.mrf.mxu3  ;;  %v1759_v26 = vrot.slane %v1757_v21, 1  ;;  %v1850_v27 = vsel %vm230_vm2, %v1847_v63, %v1849_v24 }
 0x31d   :  { %v1944_v11 = vsel %vm158_vm3, %v1940_v41, %v1943_v50  ;;  %v1947_v52 = vor.u32 %v1945_v45, %v1943_v50 }
 0x31e   :  { %v1760_v28 = vsel %vm158_vm3, %v1756_v22, %v1759_v26  ;;  %v1763_v34 = vor.u32 %v1761_v33, %v1759_v26  ;;  %v1899_v20 = vld [vmem:[#allocation3 + $0x48] sm:$0xf] }
 0x31f   :  { %v1902_v13 = vpack.c.bf16 %v1899_v20, %v1899_v20 }
 0x321   :  { %v1948_v51 = vshll.u32 %v1902_v13, 16  ;;  %v2016_v43 = vrot.slane %v1902_v13, 1  ;;  %v1952_v53 = vshrl.u32 %v1902_v13, 16 }
 0x322   :  { %6062 = vmatmul.msk.bf16.gmra.mxu0 %vm77_vm15, %v1699_v15 }
 0x323   :  { %v1950_v48 = vrot.slane %v1948_v51, 1  ;;  %v2017_v46 = vsel %vm230_vm2, %v2014_v44, %v2016_v43 }
 0x325   :  { %6094 = vmatmul.msk.bf16.gmra.mxu3 %vm77_vm15, %v1850_v27  ;;  %v1951_v38 = vsel %vm158_vm3, %v1947_v52, %v1950_v48  ;;  %v1954_v17 = vor.u32 %v1952_v53, %v1950_v48 }
 0x327   :  { %6072 = vmatmul.msk.bf16.gmra.mxu1 %vm77_vm15, %v1760_v28  ;;  %6083 = vmatmul.msk.bf16.gmra.mxu2 %vm77_vm15, %v1760_v28 }
 0x332   :  { %6096 = vmatmul.msk.bf16.vlgmr.msrb.gmra.mxu0 %vm77_vm15, %v1900_v32 }
 0x335   :  { %6095 = vmatmul.msk.bf16.gmra.mxu3 %vm77_vm15, %v1849_v24 }
 0x337   :  { %6073 = vmatmul.msk.bf16.gmra.mxu1 %vm77_vm15, %v1763_v34  ;;  %6084 = vmatmul.msk.bf16.gmra.mxu2 %vm77_vm15, %v1763_v34 }
 0x342   :  { %6097 = vmatmul.msk.bf16.gmra.mxu0 %vm77_vm15, %v1901_v40 }
 0x345   :  { %6105 = vmatmul.msk.bf16.vlgmr.msrb.gmra.mxu3 %vm77_vm15, %v2015_v57 }
 0x347   :  { %6099 = vmatmul.msk.bf16.vlgmr.msrb.gmra.mxu1 %vm77_vm15, %v1944_v11  ;;  %6102 = vmatmul.msk.bf16.vlgmr.msrb.gmra.mxu2 %vm77_vm15, %v1944_v11 }
 0x352   :  { %6098 = vmatmul.msk.bf16.gmra.mxu0 %vm77_vm15, %v1902_v13 }
 0x355   :  { %6106 = vmatmul.msk.bf16.gmra.mxu3 %vm77_vm15, %v2017_v46 }
 0x357   :  { %6100 = vmatmul.msk.bf16.gmra.mxu1 %vm77_vm15, %v1951_v38  ;;  %6103 = vmatmul.msk.bf16.gmra.mxu2 %vm77_vm15, %v1951_v38 }
 0x365   :  { %6107 = vmatmul.msk.bf16.gmra.mxu3 %vm77_vm15, %v2016_v43 }
 0x367   :  { %6101 = vmatmul.msk.bf16.gmra.mxu1 %vm77_vm15, %v1954_v17  ;;  %6104 = vmatmul.msk.bf16.gmra.mxu2 %vm77_vm15, %v1954_v17  ;;  %vm2059_vm15 = vcmask 123904  }
 0x37f   :  { %v1730_v0 = vpop.f32.mrf.mxu0 }
 0x387   :  { %v1732_v6 = vpop.f32.mrf.mxu0 }
 0x38f   :  { %v1735_v29 = vpop.f32.mrf.mxu0 }
 0x394   :  { %v1794_v54 = vpop.f32.mrf.mxu1 }
 0x395   :  { %v7404_v55 = vadd.f32 %v1794_v54, %v1730_v0 }
 0x397   :  { %v1737_v56 = vpop.f32.mrf.mxu0  ;;  %v2068_v12 = vmul.f32 %v7404_v55, %v7404_v55  ;;  %v2052_v21 = vsel %vm89_vm9, %v7404_v55, 0.0 }
 0x398   :  { %v1881_v58 = vpop.f32.mrf.mxu3 }
 0x399   :  { %v2073_v28 = vsel %vm89_vm9, %v2068_v12, 0.0 }
 0x39a   :  { %v1829_v59 = vpop.f32.mrf.mxu2 }
 0x39b   :  { %v7406_v60 = vadd.f32 %v1881_v58, %v1829_v59 }
 0x39c   :  { %v1796_v62 = vpop.f32.mrf.mxu1 }
 0x39d   :  { %v7408_v2 = vadd.f32 %v1796_v62, %v1732_v6 }
 0x39f   :  { %v1740_v61 = vpop.f32.mrf.mxu0  ;;  %v2069_v5 = vmul.f32 %v7408_v2, %v7408_v2  ;;  %v2053_v14 = vsel %vm89_vm9, %v7408_v2, 0.0 }
 0x3a0   :  { %v1883_v63 = vpop.f32.mrf.mxu3  ;;  %v2054_v27 = vadd.f32 %v2053_v14, %v2052_v21 }
 0x3a1   :  { %v2074_v24 = vsel %vm89_vm9, %v2069_v5, 0.0 }
 0x3a2   :  { %v1831_v4 = vpop.f32.mrf.mxu2  ;;  %v2075_v32 = vadd.f32 %v2074_v24, %v2073_v28 }
 0x3a3   :  { %v7445_v46 = vadd.f32 %v1883_v63, %v1831_v4  ;;  %v2103_v63 = vmul.f32 %v7406_v60, %v7406_v60 }
 0x3a4   :  { %v1799_v7 = vpop.f32.mrf.mxu1 }
 0x3a5   :  { %v7410_v8 = vadd.f32 %v1799_v7, %v1735_v29  ;;  %v2089_v0 = vsel %vm89_vm9, %v7445_v46, 0.0  ;;  %v2088_v29 = vsel %vm89_vm9, %v7406_v60, 0.0  ;;  %v2104_v54 = vmul.f32 %v7445_v46, %v7445_v46 }
 0x3a6   :  { %v2090_v62 = vadd.f32 %v2089_v0, %v2088_v29 }
 0x3a7   :  { %v1742_v16 = vpop.f32.mrf.mxu0  ;;  %v2070_v15 = vmul.f32 %v7410_v8, %v7410_v8  ;;  %v2055_v25 = vsel %vm89_vm9, %v7410_v8, 0.0 }
 0x3a8   :  { %v1886_v23 = vpop.f32.mrf.mxu3  ;;  %v2056_v33 = vadd.f32 %v2055_v25, %v2054_v27 }
 0x3a9   :  { %v2076_v30 = vsel %vm89_vm9, %v2070_v15, 0.0  ;;  %v2108_v15 = vsel %vm89_vm9, %v2103_v63, 0.0 }
 0x3aa   :  { %v1834_v3 = vpop.f32.mrf.mxu2  ;;  %v2077_v39 = vadd.f32 %v2076_v30, %v2075_v32 }
 0x3ab   :  { %v7447_v53 = vadd.f32 %v1886_v23, %v1834_v3  ;;  %v2109_v3 = vsel %vm89_vm9, %v2104_v54, 0.0 }
 0x3ac   :  { %v1801_v9 = vpop.f32.mrf.mxu1  ;;  %v2110_v24 = vadd.f32 %v2109_v3, %v2108_v15 }
 0x3ad   :  { %v7414_v10 = vadd.f32 %v1801_v9, %v1737_v56  ;;  %v2091_v56 = vsel %vm89_vm9, %v7447_v53, 0.0  ;;  %v2105_v4 = vmul.f32 %v7447_v53, %v7447_v53 }
 0x3ae   :  { %v2092_v16 = vadd.f32 %v2091_v56, %v2090_v62 }
 0x3af   :  { %v7422_v18 = vpop.f32.mrf.mxu0  ;;  %v2071_v26 = vmul.f32 %v7414_v10, %v7414_v10  ;;  %v2057_v31 = vsel %vm89_vm9, %v7414_v10, 0.0 }
 0x3b0   :  { %v1888_v19 = vpop.f32.mrf.mxu3  ;;  %v2058_v40 = vadd.f32 %v2057_v31, %v2056_v33 }
 0x3b1   :  { %v2078_v35 = vsel %vm89_vm9, %v2071_v26, 0.0 }
 0x3b2   :  { %v1836_v22 = vpop.f32.mrf.mxu2  ;;  %v2079_v44 = vadd.f32 %v2078_v35, %v2077_v39 }
 0x3b3   :  { %v7451_v6 = vadd.f32 %v1888_v19, %v1836_v22  ;;  %v2111_v19 = vsel %vm89_vm9, %v2105_v4, 0.0 }
 0x3b4   :  { %v1804_v34 = vpop.f32.mrf.mxu1  ;;  %v2112_v22 = vadd.f32 %v2111_v19, %v2110_v24 }
 0x3b5   :  { %v7436_v36 = vadd.f32 %v1804_v34, %v1740_v61  ;;  %v2093_v7 = vsel %vm89_vm9, %v7451_v6, 0.0  ;;  %v2106_v9 = vmul.f32 %v7451_v6, %v7451_v6 }
 0x3b6   :  { %v2094_v12 = vadd.f32 %v2093_v7, %v2092_v16 }
 0x3b7   :  { %v2060_v1 = vsel %vm2059_vm15, %v7436_v36, 0.0  ;;  %v2072_v47 = vmul.f32 %v7436_v36, %v7436_v36  ;;  %v1923_v42 = vpop.f32.mrf.mxu0  ;;  %v2113_v26 = vsel %vm89_vm9, %v2106_v9, 0.0 }
 0x3b8   :  { %v2061_v49 = vadd.f32 %v2060_v1, %v2058_v40  ;;  %v1891_v41 = vpop.f32.mrf.mxu3  ;;  %v2114_v33 = vadd.f32 %v2113_v26, %v2112_v22 }
 0x3b9   :  { %v2080_v57 = vsel %vm2059_vm15, %v2072_v47, 0.0 }
 0x3ba   :  { %v7443_v50 = vadd.f32 %v2080_v57, %v2079_v44  ;;  %v1839_v11 = vpop.f32.mrf.mxu2  ;;  %v2062_v28 = vrot.slane %v2061_v49, 4 }
 0x3bb   :  { %v7459_v58 = vadd.f32 %v1891_v41, %v1839_v11 }
 0x3bc   :  { %v1806_v20 = vpop.f32.mrf.mxu1  ;;  %v7487_v1 = vadd.f32 %v2062_v28, %v2061_v49 }
 0x3bd   :  { %v2095_v5 = vsel %vm2059_vm15, %v7459_v58, 0.0  ;;  %v2107_v21 = vmul.f32 %v7459_v58, %v7459_v58 }
 0x3be   :  { %v2096_v25 = vadd.f32 %v2095_v5, %v2094_v12 }
 0x3bf   :  { %v1926_v13 = vpop.f32.mrf.mxu0  ;;  %v2115_v31 = vsel %vm2059_vm15, %v2107_v21, 0.0 }
 0x3c0   :  { %v1893_v45 = vpop.f32.mrf.mxu3  ;;  %v2097_v34 = vrot.slane %v2096_v25, 4  ;;  %v2116_v47 = vadd.f32 %v2115_v31, %v2114_v33 }
 0x3c1   :  { %v2064_v45 = vrot.slane %v7487_v1, 2 }
 0x3c2   :  { %v1841_v51 = vpop.f32.mrf.mxu2  ;;  %v2098_v11 = vadd.f32 %v2097_v34, %v2096_v25 }
 0x3c3   :  { %v2117_v51 = vrot.slane %v2116_v47, 4 }
 0x3c4   :  { %v1973_v43 = vpop.f32.mrf.mxu1 }
 0x3c5   :  { %v7483_v39 = vadd.f32 %v1973_v43, %v7422_v18  ;;  %v2118_v3 = vadd.f32 %v2117_v51, %v2116_v47 }
 0x3c7   :  { %v1928_v52 = vpop.f32.mrf.mxu0  ;;  %v2140_v18 = vmul.f32 %v7483_v39, %v7483_v39  ;;  %v2125_v43 = vsel %vm89_vm9, %v7483_v39, 0.0  ;;  %v2119_v31 = vrot.slane %v2118_v3, 2 }
 0x3c8   :  { %v2036_v48 = vpop.f32.mrf.mxu3 }
 0x3ca   :  { %v1996_v38 = vpop.f32.mrf.mxu2 }
 0x3cc   :  { %v1975_v17 = vpop.f32.mrf.mxu1 }
 0x3cd   :  { %v7480_v32 = vadd.f32 %v1975_v17, %v1923_v42  ;;  %v2082_v42 = vrot.slane %v7443_v50, 4 }
 0x3cf   :  { %v7461_v59 = vpop.f32.mrf.mxu0  ;;  %v2141_v41 = vmul.f32 %v7480_v32, %v7480_v32  ;;  %v2083_v62 = vadd.f32 %v2082_v42, %v7443_v50 }
 0x3d0   :  { %v2038_v61 = vpop.f32.mrf.mxu3 }
 0x3d1   :  { %v2146_v0 = vsel %vm89_vm9, %v2141_v41, 0.0 }
 0x3d2   :  { %v1998_v23 = vpop.f32.mrf.mxu2 }
 0x3d3   :  { %v7494_v20 = vadd.f32 %v2038_v61, %v1998_v23  ;;  %v2099_v61 = vrot.slane %v2098_v11, 2 }
 0x3d4   :  { %v1978_v14 = vpop.f32.mrf.mxu1 }
 0x3d5   :  { %v7485_v40 = vadd.f32 %v1978_v14, %v1926_v13  ;;  %v2126_v13 = vsel %vm89_vm9, %v7480_v32, 0.0  ;;  %v2178_v4 = vmul.f32 %v7494_v20, %v7494_v20  ;;  %v2163_v14 = vsel %vm89_vm9, %v7494_v20, 0.0 }
 0x3d6   :  { %v2127_v63 = vadd.f32 %v2126_v13, %v2125_v43 }
 0x3d7   :  { %v1933_v27 = vpop.f32.mrf.mxu0  ;;  %v2142_v49 = vmul.f32 %v7485_v40, %v7485_v40  ;;  %v2128_v29 = vsel %vm89_vm9, %v7485_v40, 0.0  ;;  %v2183_v25 = vsel %vm89_vm9, %v2178_v4, 0.0 }
 0x3d8   :  { %v2041_v30 = vpop.f32.mrf.mxu3  ;;  %v2129_v5 = vadd.f32 %v2128_v29, %v2127_v63  ;;  %v2100_v29 = vadd.f32 %v2099_v61, %v2098_v11 }
 0x3d9   :  { %v2148_v7 = vsel %vm89_vm9, %v2142_v49, 0.0 }
 0x3da   :  { %v2001_v35 = vpop.f32.mrf.mxu2 }
 0x3db   :  { %v7510_v54 = vadd.f32 %v2041_v30, %v2001_v35 }
 0x3dc   :  { %v1980_v44 = vpop.f32.mrf.mxu1 }
 0x3dd   :  { %v7491_v57 = vadd.f32 %v1980_v44, %v1928_v52  ;;  %v7505_v52 = vadd.f32 %v2036_v48, %v1996_v38  ;;  %v2145_v38 = vsel %vm89_vm9, %v2140_v18, 0.0  ;;  %v2179_v15 = vmul.f32 %v7510_v54, %v7510_v54 }
 0x3de   :  { %v2147_v50 = vadd.f32 %v2146_v0, %v2145_v38  ;;  %v2165_v22 = vsel %vm89_vm9, %v7510_v54, 0.0  ;;  %v2084_v0 = vrot.slane %v2083_v62, 2 }
 0x3df   :  { %v2143_v56 = vmul.f32 %v7491_v57, %v7491_v57  ;;  %v2130_v16 = vsel %vm89_vm9, %v7491_v57, 0.0  ;;  %v2177_v9 = vmul.f32 %v7505_v52, %v7505_v52  ;;  %v2162_v24 = vsel %vm89_vm9, %v7505_v52, 0.0 }
 0x3e0   :  { %v2043_v17 = vpop.f32.mrf.mxu3  ;;  %v2149_v26 = vadd.f32 %v2148_v7, %v2147_v50  ;;  %v2131_v27 = vadd.f32 %v2130_v16, %v2129_v5  ;;  %v2164_v33 = vadd.f32 %v2163_v14, %v2162_v24  ;;  %v2185_v41 = vsel %vm89_vm9, %v2179_v15, 0.0 }
 0x3e1   :  { %v2150_v19 = vsel %vm89_vm9, %v2143_v56, 0.0  ;;  %v2182_v44 = vsel %vm89_vm9, %v2177_v9, 0.0  ;;  %v2065_v9 = vadd.f32 %v2064_v45, %v7487_v1  ;;  %v2120_v50 = vadd.f32 %v2119_v31, %v2118_v3 }
 0x3e2   :  { %v2003_v48 = vpop.f32.mrf.mxu2  ;;  %v2151_v34 = vadd.f32 %v2150_v19, %v2149_v26  ;;  %v2184_v13 = vadd.f32 %v2183_v25, %v2182_v44  ;;  %v2166_v49 = vadd.f32 %v2165_v22, %v2164_v33  ;;  %v2085_v19 = vadd.f32 %v2084_v0, %v2083_v62 }
 0x3e3   :  { %v7521_v23 = vadd.f32 %v2043_v17, %v2003_v48  ;;  %v2101_v24 = vrot.slane %v2100_v29, 1  ;;  %v2066_v45 = vrot.slane %v2065_v9, 1  ;;  %v2121_v3 = vrot.slane %v2120_v50, 1 }
 0x3e4   :  { %v1983_v12 = vpop.f32.mrf.mxu1  ;;  %v2186_v4 = vadd.f32 %v2185_v41, %v2184_v13 }
 0x3e5   :  { %v7531_v21 = vadd.f32 %v1983_v12, %v7461_v59  ;;  %v2180_v28 = vmul.f32 %v7521_v23, %v7521_v23  ;;  %v2167_v42 = vsel %vm89_vm9, %v7521_v23, 0.0 }
 0x3e6   :  { %v2168_v48 = vadd.f32 %v2167_v42, %v2166_v49  ;;  %v2067_v42 = vadd.f32 %v2066_v45, %v2065_v9 }
 0x3e7   :  { %v2132_v30 = vsel %vm2059_vm15, %v7531_v21, 0.0  ;;  %v2144_v59 = vmul.f32 %v7531_v21, %v7531_v21  ;;  %v2187_v56 = vsel %vm89_vm9, %v2180_v28, 0.0 }
 0x3e8   :  { %v2133_v35 = vadd.f32 %v2132_v30, %v2131_v27  ;;  %v2046_v47 = vpop.f32.mrf.mxu3  ;;  %v2188_v14 = vadd.f32 %v2187_v56, %v2186_v4 }
 0x3e9   :  { %v2152_v18 = vsel %vm2059_vm15, %v2144_v59, 0.0 }
 0x3ea   :  { %v2134_v51 = vrot.slane %v2133_v35, 4  ;;  %v2153_v43 = vadd.f32 %v2152_v18, %v2151_v34  ;;  %v2006_v17 = vpop.f32.mrf.mxu2  ;;  %v2122_v18 = vadd.f32 %v2121_v3, %v2120_v50  ;;  %v2051_v3 = vld [vmem:[%s9324_s13] sm:$0x1] }
 0x3eb   :  { %v7550_v63 = vadd.f32 %v2046_v47, %v2006_v17  ;;  %v2102_v47 = vadd.f32 %v2101_v24, %v2100_v29 }
 0x3ec   :  { %v2135_v38 = vadd.f32 %v2134_v51, %v2133_v35  ;;  %v2154_v7 = vrot.slane %v2153_v43, 4  ;;  %v1985_v16 = vpop.f32.mrf.mxu1  ;;  %v2086_v35 = vrot.slane %v2085_v19, 1 }
 0x3ed   :  { %v2169_v5 = vsel %vm2059_vm15, %v7550_v63, 0.0  ;;  %v2181_v12 = vmul.f32 %v7550_v63, %v7550_v63  ;;  %v2123_v17 = vadd.f32 %v2102_v47, %v2067_v42 }
 0x3ee   :  { %v2136_v11 = vrot.slane %v2135_v38, 2  ;;  %v2155_v61 = vadd.f32 %v2154_v7, %v2153_v43  ;;  %v2170_v15 = vadd.f32 %v2169_v5, %v2168_v48  ;;  %v2087_v43 = vadd.f32 %v2086_v35, %v2085_v19 }
 0x3ef   :  { %v2189_v25 = vsel %vm2059_vm15, %v2181_v12, 0.0  ;;  %vm128_vm15 = vcmask 60416  }
 0x3f0   :  { %v2137_v26 = vadd.f32 %v2136_v11, %v2135_v38  ;;  %v2156_v27 = vrot.slane %v2155_v61, 2  ;;  %v2171_v22 = vrot.slane %v2170_v15, 4  ;;  %v2190_v28 = vadd.f32 %v2189_v25, %v2188_v14  ;;  %v2048_v1 = vpop.f32.mrf.mxu3  ;;  %129 = vst.msk [vmem:[#allocation5 + $0x90] sm:$0xf] %vm128_vm15, %v6618_v37 }
 0x3f1   :  { %v2124_v48 = vadd.f32 %v2122_v18, %v2087_v43  ;;  %148 = vst.msk [vmem:[#allocation5 + $0x128] sm:$0xf] %vm128_vm15, %v6618_v37 }
 0x3f2   :  { %v2138_v30 = vrot.slane %v2137_v26, 1  ;;  %v2157_v59 = vadd.f32 %v2156_v27, %v2155_v61  ;;  %v2172_v31 = vadd.f32 %v2171_v22, %v2170_v15  ;;  %v2191_v33 = vrot.slane %v2190_v28, 4  ;;  %v2008_v34 = vpop.f32.mrf.mxu2  ;;  %v2050_v22 = vld [vmem:[%s9323_s12] sm:$0x1] }
 0x3f4   :  { %v2158_v44 = vrot.slane %v2157_v59, 1  ;;  %v2173_v41 = vrot.slane %v2172_v31, 2  ;;  %v2192_v62 = vadd.f32 %v2191_v33, %v2190_v28  ;;  %v2139_v13 = vadd.f32 %v2138_v30, %v2137_v26 }
 0x3f6   :  { %v2174_v49 = vadd.f32 %v2173_v41, %v2172_v31  ;;  %v2193_v51 = vrot.slane %v2192_v62, 2  ;;  %v2159_v0 = vadd.f32 %v2158_v44, %v2157_v59  ;;  %v2160_v38 = vadd.f32 %v2139_v13, %v2123_v17 }
 0x3f8   :  { %v2175_v56 = vrot.slane %v2174_v49, 1  ;;  %v2194_v4 = vadd.f32 %v2193_v51, %v2192_v62  ;;  %v2161_v5 = vadd.f32 %v2159_v0, %v2124_v48 }
 0x3fa   :  { %v2176_v7 = vadd.f32 %v2175_v56, %v2174_v49  ;;  %v2195_v16 = vrot.slane %v2194_v4, 1 }
 0x3fc   :  { %v2196_v12 = vadd.f32 %v2195_v16, %v2194_v4  ;;  %v2197_v29 = vadd.f32 %v2176_v7, %v2160_v38 }
 0x3fe   :  { %v2198_v14 = vadd.f32 %v2196_v12, %v2161_v5  ;;  %v2199_v11 = vmul.f32 0.007352941, %v2197_v29 }
 0x400   :  { %v2200_v61 = vmul.f32 0.007352941, %v2198_v14  ;;  %v2201_v9 = vmul.f32 %v2199_v11, %v2199_v11 }
 0x402   :  { %v2202_v50 = vsub.f32 %v2200_v61, %v2201_v9 }
 0x404   :  { %v2203_v15 = vadd.f32 1e-05, %v2202_v50 }
 0x406   :  { %6542 = vrsqrt.f32 %v2203_v15  ;;  %vm2210_vm11 = vweird.f32 %v2203_v15 }
 0x40c   :  { %v6543_v24 = vpop.eup %6542 }
 0x40d   :  { %v2205_v19 = vmul.f32 %v6543_v24, %v2203_v15  ;;  %vm2211_vm10 = vweird.f32 %v6543_v24 }
 0x40e   :  { %vm2212_vm13 = vmor %vm2210_vm11, %vm2211_vm10 }
 0x40f   :  { %v2206_v25 = vmul.f32 %v6543_v24, %v2205_v19 }
 0x411   :  { %v2207_v26 = vmul.f32 0.5, %v2206_v25 }
 0x413   :  { %v2208_v27 = vsub.f32 1.5, %v2207_v26 }
 0x415   :  { %v2209_v28 = vmul.f32 %v6543_v24, %v2208_v27 }
 0x417   :  { %v2213_v1 = vsel %vm2212_vm13, %v6543_v24, %v2209_v28  ;;  %vm3542_vm13 = vcmask 1041408  }
 0x418   :  { %v2214_v45 = vmul.f32 %v2213_v1, %v2050_v22 }
 0x41a   :  { %v2215_v30 = vmul.f32 %v2214_v45, %v2199_v11  ;;  %v7564_v59 = vperm.slane %v2214_v45, 0 }
 0x41c   :  { %v2216_v31 = vsub.f32 %v2051_v3, %v2215_v30  ;;  %v2272_v33 = vmul.f32 %v7564_v59, %v7550_v63  ;;  %v2242_v34 = vmul.f32 %v7564_v59, %v7459_v58  ;;  %v2224_v35 = vmul.f32 %v7564_v59, %v7436_v36 }
 0x41d   :  { %v2240_v47 = vmul.f32 %v7564_v59, %v7447_v53  ;;  %v2241_v44 = vmul.f32 %v7564_v59, %v7451_v6  ;;  %v2222_v41 = vmul.f32 %v7564_v59, %v7410_v8  ;;  %v2223_v62 = vmul.f32 %v7564_v59, %v7414_v10 }
 0x41e   :  { %v7580_v42 = vperm.slane %v2216_v31, 0  ;;  %v2238_v58 = vmul.f32 %v7564_v59, %v7406_v60  ;;  %v2239_v36 = vmul.f32 %v7564_v59, %v7445_v46  ;;  %v2220_v53 = vmul.f32 %v7564_v59, %v7404_v55 }
 0x41f   :  { %v2221_v6 = vmul.f32 %v7564_v59, %v7408_v2  ;;  %v2257_v8 = vmul.f32 %v7564_v59, %v7531_v21  ;;  %v2270_v10 = vmul.f32 %v7564_v59, %v7510_v54  ;;  %v2271_v63 = vmul.f32 %v7564_v59, %v7521_v23 }
 0x420   :  { %v2247_v60 = vadd.f32 %v2242_v34, %v7580_v42  ;;  %v2232_v18 = vadd.f32 %v7580_v42, %v2224_v35  ;;  %v2245_v46 = vadd.f32 %v2240_v47, %v7580_v42  ;;  %v2246_v55 = vadd.f32 %v2241_v44, %v7580_v42 }
 0x421   :  { %v2230_v13 = vadd.f32 %v7580_v42, %v2222_v41  ;;  %v2231_v2 = vadd.f32 %v7580_v42, %v2223_v62  ;;  %v2243_v21 = vadd.f32 %v2238_v58, %v7580_v42  ;;  %v2244_v49 = vadd.f32 %v2239_v36, %v7580_v42 }
 0x422   :  { %v2252_v54 = vmax.f32 %v2247_v60, 0.0  ;;  %v2237_v51 = vmax.f32 %v2232_v18, 0.0  ;;  %v2250_v43 = vmax.f32 %v2245_v46, 0.0  ;;  %v2251_v23 = vmax.f32 %v2246_v55, 0.0  ;;  %v6511_v46 = vld [vmem:[%s9325_s11 + $0x8] sm:$0xff]  ;;  %v6512_v55 = vld [vmem:[%s9325_s11 + $0x10] sm:$0xff] }
 0x423   :  { %v2235_v17 = vmax.f32 %v2230_v13, 0.0  ;;  %v2236_v0 = vmax.f32 %v2231_v2, 0.0  ;;  %v2248_v56 = vmax.f32 %v2243_v21, 0.0  ;;  %v2249_v4 = vmax.f32 %v2244_v49, 0.0  ;;  %v6508_v13 = vld [vmem:[%s9326_s10 + $0x10] sm:$0xff]  ;;  %v6513_v2 = vld [vmem:[%s9325_s11 + $0x18] sm:$0xff] }
 0x424   :  { %v2306_v48 = vpack.c.bf16 %v2252_v54, %v2252_v54  ;;  %v2303_v38 = vpack.c.bf16 %v2237_v51, %v2237_v51  ;;  %v2305_v7 = vpack.c.bf16 %v2251_v23, %v2250_v43  ;;  %v2228_v16 = vadd.f32 %v7580_v42, %v2220_v53  ;;  %v6506_v53 = vld [vmem:[%s9326_s10] sm:$0xff]  ;;  %v6509_v21 = vld [vmem:[%s9326_s10 + $0x18] sm:$0xff] }
 0x425   :  { %v2302_v5 = vpack.c.bf16 %v2236_v0, %v2235_v17  ;;  %v2304_v12 = vpack.c.bf16 %v2249_v4, %v2248_v56  ;;  %v2229_v29 = vadd.f32 %v7580_v42, %v2221_v6  ;;  %v2277_v14 = vadd.f32 %v2272_v33, %v7580_v42  ;;  %v2300_v49 = vld [vmem:[%s9325_s11 + $0x20] sm:$0x3]  ;;  %v6517_v0 = vld [vmem:[%s9327_s14 + $0x18] sm:$0xff]  ;;  %v6516_v56 = vld [vmem:[%s9327_s14 + $0x10] sm:$0xff] }
 0x426   :  { %v2347_v11 = vsel %vm1528_vm12, %v2306_v48, 0  ;;  %v2421_v61 = vsel %vm1528_vm12, %v2303_v38, 0  ;;  %v2233_v9 = vmax.f32 %v2228_v16, 0.0  ;;  %v2262_v50 = vadd.f32 %v2257_v8, %v7580_v42  ;;  %v2291_v54 = vld [vmem:[%s9326_s10 + $0x20] sm:$0x3]  ;;  %2607 = vmatpush.bf16.msra.mxu0 %v6517_v0  ;;  %v6515_v16 = vld [vmem:[%s9327_s14 + $0x8] sm:$0xff] }
 0x427   :  { %2354 = vmatpush.bf16.msra.mxu2 %v2347_v11  ;;  %2428 = vmatpush.bf16.msra.mxu3 %v2421_v61  ;;  %v2234_v15 = vmax.f32 %v2229_v29, 0.0  ;;  %v2282_v24 = vmax.f32 %v2277_v14, 0.0  ;;  %v2275_v19 = vadd.f32 %v2270_v10, %v7580_v42  ;;  %v2276_v25 = vadd.f32 %v2271_v63, %v7580_v42  ;;  %v6514_v4 = vld [vmem:[%s9327_s14] sm:$0xff] }
 0x428   :  { %v2267_v26 = vmax.f32 %v2262_v50, 0.0  ;;  %v2255_v27 = vmul.f32 %v7564_v59, %v7485_v40  ;;  %v2256_v22 = vmul.f32 %v7564_v59, %v7491_v57  ;;  %v2268_v28 = vmul.f32 %v7564_v59, %v7505_v52  ;;  %2695 = vmatpush.bf16.msra.mxu1 %v6515_v16 }
 0x429   :  { %v2301_v1 = vpack.c.bf16 %v2234_v15, %v2233_v9  ;;  %v2471_v45 = vpack.c.bf16 %v2282_v24, %v2282_v24  ;;  %v2280_v3 = vmax.f32 %v2275_v19, 0.0  ;;  %v2281_v30 = vmax.f32 %v2276_v25, 0.0 }
 0x42a   :  { %v2468_v31 = vpack.c.bf16 %v2267_v26, %v2267_v26  ;;  %v2260_v33 = vadd.f32 %v2255_v27, %v7580_v42  ;;  %v2261_v34 = vadd.f32 %v2256_v22, %v7580_v42  ;;  %v2269_v35 = vmul.f32 %v7564_v59, %v7494_v20  ;;  %v6510_v20 = vld [vmem:[%s9325_s11] sm:$0xff]  ;;  %2864 = vmatpush.bf16.msrb.mxu0 %v6517_v0 }
 0x42b   :  { %2355 = vmatpush.bf16.msra.mxu2 %v2305_v7  ;;  %2429 = vmatpush.bf16.msra.mxu3 %v2302_v5  ;;  %v2470_v40 = vpack.c.bf16 %v2281_v30, %v2280_v3  ;;  %v2273_v57 = vadd.f32 %v2268_v28, %v7580_v42  ;;  %v2253_v52 = vmul.f32 %v7564_v59, %v7483_v39  ;;  %v2473_v8 = vsel %vm1528_vm12, %v2471_v45, 0 }
 0x42c   :  { %v2265_v47 = vmax.f32 %v2260_v33, 0.0  ;;  %v2266_v44 = vmax.f32 %v2261_v34, 0.0  ;;  %v2274_v41 = vadd.f32 %v2269_v35, %v7580_v42  ;;  %v2254_v58 = vmul.f32 %v7564_v59, %v7480_v32  ;;  %2946 = vmatpush.bf16.msrb.mxu1 %v6515_v16 }
 0x42d   :  { %v2278_v62 = vmax.f32 %v2273_v57, 0.0  ;;  %v2258_v36 = vadd.f32 %v2253_v52, %v7580_v42  ;;  %v2509_v10 = vsel %vm1528_vm12, %v2468_v31, 0  ;;  %v2324_v51 = vunpack.c.l.b16 %v2300_v49 }
 0x42e   :  { %v2467_v39 = vpack.c.bf16 %v2266_v44, %v2265_v47  ;;  %v2279_v6 = vmax.f32 %v2274_v41, 0.0  ;;  %v2259_v32 = vadd.f32 %v2254_v58, %v7580_v42  ;;  %v6507_v42 = vld [vmem:[%s9326_s10 + $0x8] sm:$0xff]  ;;  %v2399_v43 = vunpack.c.l.b16 %v2291_v54 }
 0x42f   :  { %2356 = vmatpush.bf16.msra.mxu2 %v2304_v12  ;;  %2430 = vmatpush.bf16.msra.mxu3 %v2301_v1  ;;  %v2263_v59 = vmax.f32 %v2258_v36, 0.0  ;;  %v2329_v23 = vpack.c.b16 %v2324_v51, %v2324_v51  ;;  %vm98_vm12 = vcmask 128000  }
 0x430   :  { %v2469_v63 = vpack.c.bf16 %v2279_v6, %v2278_v62  ;;  %v2264_v60 = vmax.f32 %v2259_v32, 0.0  ;;  %v2404_v17 = vpack.c.b16 %v2399_v43, %v2399_v43  ;;  %99 = vst.msk [vmem:[#allocation4 + $0x40] sm:$0x3f] %vm98_vm12, %v6618_v37 }
 0x431   :  { %108 = vst.msk [vmem:[#allocation4 + $0x88] sm:$0x3f] %vm98_vm12, %v6618_v37 }
 0x432   :  { %6124 = vmatmul.msk.bf16.vlgmr.msra.gmra.mxu2 %vm2330_vm14, %v6510_v20  ;;  %6145 = vmatmul.msk.bf16.vlgmr.msra.gmra.mxu3 %vm2330_vm14, %v6506_v53  ;;  %v2466_v18 = vpack.c.bf16 %v2264_v60, %v2263_v59 }
 0x433   :  { %2480 = vmatpush.bf16.msrb.mxu2 %v2473_v8  ;;  %2516 = vmatpush.bf16.msrb.mxu3 %v2509_v10 }
 0x437   :  { %2481 = vmatpush.bf16.msrb.mxu2 %v2470_v40  ;;  %2517 = vmatpush.bf16.msrb.mxu3 %v2467_v39 }
 0x43b   :  { %2482 = vmatpush.bf16.msrb.mxu2 %v2469_v63  ;;  %2518 = vmatpush.bf16.msrb.mxu3 %v2466_v18 }
 0x43f   :  { %2734 = vmatpush.bf16.msra.mxu2 %v6516_v56  ;;  %2802 = vmatpush.bf16.msra.mxu3 %v6514_v4 }
 0x442   :  { %6125 = vmatmul.msk.bf16.gmra.mxu2 %vm2330_vm14, %v6511_v46  ;;  %6146 = vmatmul.msk.bf16.gmra.mxu3 %vm2330_vm14, %v6507_v42 }
 0x452   :  { %6126 = vmatmul.msk.bf16.gmra.mxu2 %vm2330_vm14, %v6512_v55  ;;  %6147 = vmatmul.msk.bf16.gmra.mxu3 %vm2330_vm14, %v6508_v13 }
 0x462   :  { %6127 = vmatmul.msk.bf16.gmra.mxu2 %vm2330_vm14, %v6513_v2  ;;  %6148 = vmatmul.msk.bf16.gmra.mxu3 %vm2330_vm14, %v6509_v21 }
 0x472   :  { %6128 = vmatmul.msk.bf16.gmra.mxu2 %vm2330_vm14, %v2329_v23  ;;  %6149 = vmatmul.msk.bf16.gmra.mxu3 %vm2330_vm14, %v2404_v17 }
 0x482   :  { %6150 = vmatmul.msk.bf16.vlgmr.msrb.gmra.mxu2 %vm2330_vm14, %v6510_v20  ;;  %6155 = vmatmul.msk.bf16.vlgmr.msrb.gmra.mxu3 %vm2330_vm14, %v6506_v53 }
 0x483   :  { %2979 = vmatpush.bf16.msrb.mxu2 %v6516_v56  ;;  %3041 = vmatpush.bf16.msrb.mxu3 %v6514_v4 }
 0x492   :  { %6151 = vmatmul.msk.bf16.gmra.mxu2 %vm2330_vm14, %v6511_v46  ;;  %6156 = vmatmul.msk.bf16.gmra.mxu3 %vm2330_vm14, %v6507_v42 }
 0x4a2   :  { %6152 = vmatmul.msk.bf16.gmra.mxu2 %vm2330_vm14, %v6512_v55  ;;  %6157 = vmatmul.msk.bf16.gmra.mxu3 %vm2330_vm14, %v6508_v13 }
 0x4b2   :  { %6153 = vmatmul.msk.bf16.gmra.mxu2 %vm2330_vm14, %v6513_v2  ;;  %6158 = vmatmul.msk.bf16.gmra.mxu3 %vm2330_vm14, %v6509_v21 }
 0x4b5   :  { %v2358_v48 = vpop.f32.mrf.mxu2  ;;  %v2432_v38 = vpop.f32.mrf.mxu3 }
 0x4b6   :  { %v2433_v7 = vadd.f32 %v2432_v38, %v2358_v48 }
 0x4b8   :  { %2456 = vst.msk [vmem:[#allocation4 + $0x1] sm:$0xff] %vm89_vm9, %v2433_v7 }
 0x4bd   :  { %v2360_v5 = vpop.f32.mrf.mxu2  ;;  %v2434_v12 = vpop.f32.mrf.mxu3 }
 0x4be   :  { %v2435_v29 = vadd.f32 %v2434_v12, %v2360_v5 }
 0x4bf   :  { %v2565_v9 = vld [vmem:[#allocation4] sm:$0xff] }
 0x4c0   :  { %2457 = vst.msk [vmem:[#allocation4 + $0x9] sm:$0xff] %vm89_vm9, %v2435_v29 }
 0x4c2   :  { %6154 = vmatmul.msk.bf16.gmra.mxu2 %vm2330_vm14, %v2329_v23  ;;  %6159 = vmatmul.msk.bf16.gmra.mxu3 %vm2330_vm14, %v2404_v17  ;;  %vm3514_vm14 = vcmask 556032  }
 0x4c5   :  { %v2363_v14 = vpop.f32.mrf.mxu2  ;;  %v2437_v11 = vpop.f32.mrf.mxu3 }
 0x4c6   :  { %v2438_v61 = vadd.f32 %v2437_v11, %v2363_v14 }
 0x4c7   :  { %v2566_v50 = vld [vmem:[#allocation4 + $0x8] sm:$0xff] }
 0x4c8   :  { %2458 = vst.msk [vmem:[#allocation4 + $0x11] sm:$0xff] %vm89_vm9, %v2438_v61  ;;  %v2574_v15 = vpack.c.bf16 %v2566_v50, %v2565_v9 }
 0x4ca   :  { %6170 = vmatmul.msk.bf16.vlgmr.msra.gmra.mxu0 %vm89_vm9, %v2574_v15  ;;  %v2635_v26 = vshll.u32 %v2574_v15, 16  ;;  %v2765_v31 = vrot.slane %v2574_v15, 1  ;;  %v2633_v34 = vshrl.u32 %v2574_v15, 16 }
 0x4cc   :  { %v2637_v30 = vrot.slane %v2635_v26, 1 }
 0x4cd   :  { %v2365_v24 = vpop.f32.mrf.mxu2  ;;  %v2439_v19 = vpop.f32.mrf.mxu3 }
 0x4ce   :  { %v2440_v25 = vadd.f32 %v2439_v19, %v2365_v24  ;;  %v2638_v57 = vor.u32 %v2637_v30, %v2633_v34 }
 0x4cf   :  { %v2567_v1 = vld [vmem:[#allocation4 + $0x10] sm:$0xff] }
 0x4d0   :  { %2459 = vst.msk [vmem:[#allocation4 + $0x19] sm:$0xff] %vm89_vm9, %v2440_v25 }
 0x4d5   :  { %v2368_v27 = vpop.f32.mrf.mxu2  ;;  %v2442_v22 = vpop.f32.mrf.mxu3 }
 0x4d6   :  { %v2443_v28 = vadd.f32 %v2442_v22, %v2368_v27 }
 0x4d7   :  { %v2568_v45 = vld [vmem:[#allocation4 + $0x18] sm:$0xff] }
 0x4d8   :  { %2460 = vst.msk [vmem:[#allocation4 + $0x21] sm:$0xff] %vm89_vm9, %v2443_v28  ;;  %v2575_v3 = vpack.c.bf16 %v2568_v45, %v2567_v1 }
 0x4da   :  { %6171 = vmatmul.msk.bf16.gmra.mxu0 %vm89_vm9, %v2575_v3  ;;  %v2766_v33 = vrot.slane %v2575_v3, 1  ;;  %v2639_v35 = vshll.u32 %v2575_v3, 16  ;;  %v2643_v10 = vshrl.u32 %v2575_v3, 16 }
 0x4dc   :  { %v2767_v40 = vsel %vm230_vm2, %v2765_v31, %v2766_v33  ;;  %v2641_v52 = vrot.slane %v2639_v35, 1 }
 0x4dd   :  { %v2370_v47 = vpop.f32.mrf.mxu2  ;;  %v2444_v44 = vpop.f32.mrf.mxu3  ;;  %6197 = vmatmul.msk.bf16.vlgmr.msra.gmra.mxu3 %vm89_vm9, %v2767_v40 }
 0x4de   :  { %v2445_v41 = vadd.f32 %v2444_v44, %v2370_v47  ;;  %v2642_v62 = vsel %vm158_vm3, %v2638_v57, %v2641_v52  ;;  %v2645_v63 = vor.u32 %v2643_v10, %v2641_v52 }
 0x4df   :  { %6179 = vmatmul.msk.bf16.vlgmr.msra.gmra.mxu1 %vm89_vm9, %v2642_v62  ;;  %6188 = vmatmul.msk.bf16.vlgmr.msra.gmra.mxu2 %vm89_vm9, %v2642_v62  ;;  %v2569_v53 = vld [vmem:[#allocation4 + $0x20] sm:$0xff] }
 0x4e0   :  { %2461 = vst.msk [vmem:[#allocation4 + $0x29] sm:$0xff] %vm89_vm9, %v2445_v41 }
 0x4e5   :  { %v2373_v58 = vpop.f32.mrf.mxu2  ;;  %v2447_v36 = vpop.f32.mrf.mxu3 }
 0x4e6   :  { %v2448_v20 = vadd.f32 %v2447_v36, %v2373_v58 }
 0x4e7   :  { %v2570_v39 = vld [vmem:[#allocation4 + $0x28] sm:$0xff] }
 0x4e8   :  { %2462 = vst.msk [vmem:[#allocation4 + $0x31] sm:$0xff] %vm89_vm9, %v2448_v20  ;;  %v2576_v6 = vpack.c.bf16 %v2570_v39, %v2569_v53 }
 0x4ea   :  { %6172 = vmatmul.msk.bf16.gmra.mxu0 %vm89_vm9, %v2576_v6  ;;  %v2768_v8 = vrot.slane %v2576_v6, 1  ;;  %v2646_v32 = vshll.u32 %v2576_v6, 16  ;;  %v2650_v23 = vshrl.u32 %v2576_v6, 16 }
 0x4ec   :  { %v2769_v59 = vsel %vm230_vm2, %v2766_v33, %v2768_v8  ;;  %v2648_v60 = vrot.slane %v2646_v32, 1 }
 0x4ed   :  { %v2375_v18 = vpop.f32.mrf.mxu2  ;;  %v2449_v46 = vpop.f32.mrf.mxu3  ;;  %6198 = vmatmul.msk.bf16.gmra.mxu3 %vm89_vm9, %v2769_v59 }
 0x4ee   :  { %v2450_v42 = vadd.f32 %v2449_v46, %v2375_v18  ;;  %v2649_v55 = vsel %vm158_vm3, %v2645_v63, %v2648_v60  ;;  %v2652_v56 = vor.u32 %v2650_v23, %v2648_v60 }
 0x4ef   :  { %6180 = vmatmul.msk.bf16.gmra.mxu1 %vm89_vm9, %v2649_v55  ;;  %6189 = vmatmul.msk.bf16.gmra.mxu2 %vm89_vm9, %v2649_v55  ;;  %v2571_v49 = vld [vmem:[#allocation4 + $0x30] sm:$0xff] }
 0x4f0   :  { %2463 = vst.msk [vmem:[#allocation4 + $0x39] sm:$0xff] %vm89_vm9, %v2450_v42 }
 0x4f5   :  { %v2378_v13 = vpop.f32.mrf.mxu2  ;;  %v2452_v2 = vpop.f32.mrf.mxu3 }
 0x4f6   :  { %v2453_v21 = vadd.f32 %v2452_v2, %v2378_v13 }
 0x4f7   :  { %v2572_v54 = vld [vmem:[#allocation4 + $0x38] sm:$0xff] }
 0x4f8   :  { %2465 = vst.msk [vmem:[#allocation4 + $0x41] sm:$0xf] %vm2464_vm8, %v2453_v21  ;;  %v2577_v51 = vpack.c.bf16 %v2572_v54, %v2571_v49 }
 0x4fa   :  { %6173 = vmatmul.msk.bf16.gmra.mxu0 %vm89_vm9, %v2577_v51  ;;  %v2770_v43 = vrot.slane %v2577_v51, 1  ;;  %v2653_v17 = vshll.u32 %v2577_v51, 16  ;;  %v2657_v9 = vshrl.u32 %v2577_v51, 16 }
 0x4fc   :  { %v2771_v0 = vsel %vm230_vm2, %v2768_v8, %v2770_v43  ;;  %v2655_v4 = vrot.slane %v2653_v17, 1 }
 0x4fd   :  { %v2380_v48 = vpop.f32.mrf.mxu2  ;;  %v2454_v38 = vpop.f32.mrf.mxu3  ;;  %6199 = vmatmul.msk.bf16.gmra.mxu3 %vm89_vm9, %v2771_v0 }
 0x4fe   :  { %v2656_v7 = vsel %vm158_vm3, %v2652_v56, %v2655_v4  ;;  %v2659_v24 = vor.u32 %v2657_v9, %v2655_v4 }
 0x4ff   :  { %6181 = vmatmul.msk.bf16.gmra.mxu1 %vm89_vm9, %v2656_v7  ;;  %6190 = vmatmul.msk.bf16.gmra.mxu2 %vm89_vm9, %v2656_v7  ;;  %v2573_v16 = vld [vmem:[#allocation4 + $0x40] sm:$0x3f] }
 0x500   :  { %v2578_v5 = vpack.c.bf16 %v2573_v16, %v2573_v16 }
 0x502   :  { %v2660_v11 = vshll.u32 %v2578_v5, 16  ;;  %v2772_v61 = vrot.slane %v2578_v5, 1  ;;  %v2664_v31 = vshrl.u32 %v2578_v5, 16 }
 0x504   :  { %v2662_v50 = vrot.slane %v2660_v11, 1  ;;  %v2773_v15 = vsel %vm230_vm2, %v2770_v43, %v2772_v61 }
 0x505   :  { %v2484_v12 = vpop.f32.mrf.mxu2  ;;  %v2520_v29 = vpop.f32.mrf.mxu3 }
 0x506   :  { %v2521_v14 = vadd.f32 %v2520_v29, %v2484_v12  ;;  %v2663_v27 = vsel %vm158_vm3, %v2659_v24, %v2662_v50  ;;  %v2666_v35 = vor.u32 %v2664_v31, %v2662_v50 }
 0x508   :  { %2545 = vst.msk [vmem:[#allocation4 + $0x49] sm:$0xff] %vm89_vm9, %v2521_v14 }
 0x50a   :  { %6174 = vmatmul.msk.bf16.gmra.mxu0 %vm89_vm9, %v2578_v5 }
 0x50d   :  { %v2486_v19 = vpop.f32.mrf.mxu2  ;;  %v2522_v25 = vpop.f32.mrf.mxu3  ;;  %6200 = vmatmul.msk.bf16.gmra.mxu3 %vm89_vm9, %v2773_v15 }
 0x50e   :  { %v2523_v26 = vadd.f32 %v2522_v25, %v2486_v19 }
 0x50f   :  { %6182 = vmatmul.msk.bf16.gmra.mxu1 %vm89_vm9, %v2663_v27  ;;  %6191 = vmatmul.msk.bf16.gmra.mxu2 %vm89_vm9, %v2663_v27  ;;  %v2828_v45 = vld [vmem:[#allocation4 + $0x48] sm:$0xff] }
 0x510   :  { %2546 = vst.msk [vmem:[#allocation4 + $0x51] sm:$0xff] %vm89_vm9, %v2523_v26 }
 0x515   :  { %v2489_v22 = vpop.f32.mrf.mxu2  ;;  %v2525_v28 = vpop.f32.mrf.mxu3 }
 0x516   :  { %v2526_v1 = vadd.f32 %v2525_v28, %v2489_v22 }
 0x517   :  { %v2829_v3 = vld [vmem:[#allocation4 + $0x50] sm:$0xff] }
 0x518   :  { %2547 = vst.msk [vmem:[#allocation4 + $0x59] sm:$0xff] %vm89_vm9, %v2526_v1  ;;  %v2837_v30 = vpack.c.bf16 %v2829_v3, %v2828_v45 }
 0x51a   :  { %6202 = vmatmul.msk.bf16.vlgmr.msrb.gmra.mxu0 %vm89_vm9, %v2837_v30  ;;  %v2892_v57 = vshll.u32 %v2837_v30, 16  ;;  %v3010_v20 = vrot.slane %v2837_v30, 1  ;;  %v2890_v39 = vshrl.u32 %v2837_v30, 16 }
 0x51c   :  { %v2894_v36 = vrot.slane %v2892_v57, 1 }
 0x51d   :  { %v2491_v33 = vpop.f32.mrf.mxu2  ;;  %v2527_v34 = vpop.f32.mrf.mxu3  ;;  %6201 = vmatmul.msk.bf16.gmra.mxu3 %vm89_vm9, %v2772_v61 }
 0x51e   :  { %v2528_v40 = vadd.f32 %v2527_v34, %v2491_v33  ;;  %v2895_v10 = vor.u32 %v2894_v36, %v2890_v39 }
 0x51f   :  { %6183 = vmatmul.msk.bf16.gmra.mxu1 %vm89_vm9, %v2666_v35  ;;  %6192 = vmatmul.msk.bf16.gmra.mxu2 %vm89_vm9, %v2666_v35  ;;  %v2830_v41 = vld [vmem:[#allocation4 + $0x58] sm:$0xff] }
 0x520   :  { %2548 = vst.msk [vmem:[#allocation4 + $0x61] sm:$0xff] %vm89_vm9, %v2528_v40 }
 0x525   :  { %v2494_v52 = vpop.f32.mrf.mxu2  ;;  %v2530_v47 = vpop.f32.mrf.mxu3 }
 0x526   :  { %v2531_v44 = vadd.f32 %v2530_v47, %v2494_v52 }
 0x527   :  { %v2831_v62 = vld [vmem:[#allocation4 + $0x60] sm:$0xff] }
 0x528   :  { %2549 = vst.msk [vmem:[#allocation4 + $0x69] sm:$0xff] %vm89_vm9, %v2531_v44  ;;  %v2838_v58 = vpack.c.bf16 %v2831_v62, %v2830_v41 }
 0x52a   :  { %6203 = vmatmul.msk.bf16.gmra.mxu0 %vm89_vm9, %v2838_v58  ;;  %v3011_v53 = vrot.slane %v2838_v58, 1  ;;  %v2896_v6 = vshll.u32 %v2838_v58, 16  ;;  %v2900_v54 = vshrl.u32 %v2838_v58, 16 }
 0x52c   :  { %v3012_v8 = vsel %vm230_vm2, %v3010_v20, %v3011_v53  ;;  %v2898_v32 = vrot.slane %v2896_v6, 1 }
 0x52d   :  { %v2496_v59 = vpop.f32.mrf.mxu2  ;;  %v2532_v63 = vpop.f32.mrf.mxu3  ;;  %6217 = vmatmul.msk.bf16.vlgmr.msrb.gmra.mxu3 %vm89_vm9, %v3012_v8 }
 0x52e   :  { %v2533_v60 = vadd.f32 %v2532_v63, %v2496_v59  ;;  %v2899_v18 = vsel %vm158_vm3, %v2895_v10, %v2898_v32  ;;  %v2902_v23 = vor.u32 %v2900_v54, %v2898_v32 }
 0x52f   :  { %6207 = vmatmul.msk.bf16.vlgmr.msrb.gmra.mxu1 %vm89_vm9, %v2899_v18  ;;  %6212 = vmatmul.msk.bf16.vlgmr.msrb.gmra.mxu2 %vm89_vm9, %v2899_v18  ;;  %v2832_v13 = vld [vmem:[#allocation4 + $0x68] sm:$0xff] }
 0x530   :  { %2550 = vst.msk [vmem:[#allocation4 + $0x71] sm:$0xff] %vm89_vm9, %v2533_v60 }
 0x535   :  { %v2499_v46 = vpop.f32.mrf.mxu2  ;;  %v2535_v42 = vpop.f32.mrf.mxu3 }
 0x536   :  { %v2536_v55 = vadd.f32 %v2535_v42, %v2499_v46 }
 0x537   :  { %v2833_v2 = vld [vmem:[#allocation4 + $0x70] sm:$0xff] }
 0x538   :  { %2551 = vst.msk [vmem:[#allocation4 + $0x79] sm:$0xff] %vm89_vm9, %v2536_v55  ;;  %v2839_v21 = vpack.c.bf16 %v2833_v2, %v2832_v13 }
 0x53a   :  { %6204 = vmatmul.msk.bf16.gmra.mxu0 %vm89_vm9, %v2839_v21  ;;  %v3013_v49 = vrot.slane %v2839_v21, 1  ;;  %v2903_v51 = vshll.u32 %v2839_v21, 16  ;;  %v2907_v61 = vshrl.u32 %v2839_v21, 16 }
 0x53c   :  { %v3014_v43 = vsel %vm230_vm2, %v3011_v53, %v3013_v49  ;;  %v2905_v17 = vrot.slane %v2903_v51, 1 }
 0x53d   :  { %v2501_v0 = vpop.f32.mrf.mxu2  ;;  %v2537_v56 = vpop.f32.mrf.mxu3  ;;  %6218 = vmatmul.msk.bf16.gmra.mxu3 %vm89_vm9, %v3014_v43 }
 0x53e   :  { %v2538_v4 = vadd.f32 %v2537_v56, %v2501_v0  ;;  %v2906_v48 = vsel %vm158_vm3, %v2902_v23, %v2905_v17  ;;  %v2909_v15 = vor.u32 %v2907_v61, %v2905_v17 }
 0x53f   :  { %6208 = vmatmul.msk.bf16.gmra.mxu1 %vm89_vm9, %v2906_v48  ;;  %6213 = vmatmul.msk.bf16.gmra.mxu2 %vm89_vm9, %v2906_v48  ;;  %v2834_v12 = vld [vmem:[#allocation4 + $0x78] sm:$0xff] }
 0x540   :  { %2552 = vst.msk [vmem:[#allocation4 + $0x81] sm:$0xff] %vm89_vm9, %v2538_v4 }
 0x545   :  { %v2504_v38 = vpop.f32.mrf.mxu2  ;;  %v2540_v7 = vpop.f32.mrf.mxu3 }
 0x546   :  { %v2541_v16 = vadd.f32 %v2540_v7, %v2504_v38 }
 0x547   :  { %v2609_v5 = vpop.f32.mrf.mxu0  ;;  %v2835_v29 = vld [vmem:[#allocation4 + $0x80] sm:$0xff] }
 0x548   :  { %2553 = vst.msk [vmem:[#allocation4 + $0x89] sm:$0xf] %vm2464_vm8, %v2541_v16  ;;  %v2840_v14 = vpack.c.bf16 %v2835_v29, %v2834_v12 }
 0x54a   :  { %6205 = vmatmul.msk.bf16.gmra.mxu0 %vm89_vm9, %v2840_v14  ;;  %v3015_v11 = vrot.slane %v2840_v14, 1  ;;  %v2910_v9 = vshll.u32 %v2840_v14, 16  ;;  %v2914_v30 = vshrl.u32 %v2840_v14, 16 }
 0x54c   :  { %v3016_v50 = vsel %vm230_vm2, %v3013_v49, %v3015_v11  ;;  %v2912_v24 = vrot.slane %v2910_v9, 1 }
 0x54d   :  { %v2506_v19 = vpop.f32.mrf.mxu2  ;;  %v2542_v25 = vpop.f32.mrf.mxu3  ;;  %6219 = vmatmul.msk.bf16.gmra.mxu3 %vm89_vm9, %v3016_v50 }
 0x54e   :  { %v2913_v26 = vsel %vm158_vm3, %v2909_v15, %v2912_v24  ;;  %v2916_v35 = vor.u32 %v2914_v30, %v2912_v24 }
 0x54f   :  { %v2611_v27 = vpop.f32.mrf.mxu0  ;;  %6209 = vmatmul.msk.bf16.gmra.mxu1 %vm89_vm9, %v2913_v26  ;;  %6214 = vmatmul.msk.bf16.gmra.mxu2 %vm89_vm9, %v2913_v26  ;;  %v2836_v22 = vld [vmem:[#allocation4 + $0x88] sm:$0x3f] }
 0x550   :  { %v2841_v28 = vpack.c.bf16 %v2836_v22, %v2836_v22 }
 0x552   :  { %v2917_v1 = vshll.u32 %v2841_v28, 16  ;;  %v3017_v3 = vrot.slane %v2841_v28, 1  ;;  %v2921_v53 = vshrl.u32 %v2841_v28, 16 }
 0x554   :  { %v2919_v31 = vrot.slane %v2917_v1, 1  ;;  %v3018_v34 = vsel %vm230_vm2, %v3015_v11, %v3017_v3 }
 0x556   :  { %v2920_v57 = vsel %vm158_vm3, %v2916_v35, %v2919_v31  ;;  %v2923_v8 = vor.u32 %v2921_v53, %v2919_v31 }
 0x557   :  { %v2614_v45 = vpop.f32.mrf.mxu0 }
 0x55a   :  { %6206 = vmatmul.msk.bf16.gmra.mxu0 %vm89_vm9, %v2841_v28 }
 0x55c   :  { %v2697_v33 = vpop.f32.mrf.mxu1 }
 0x55d   :  { %v7763_v40 = vadd.f32 %v2697_v33, %v2609_v5  ;;  %6220 = vmatmul.msk.bf16.gmra.mxu3 %vm89_vm9, %v3018_v34 }
 0x55f   :  { %v2616_v52 = vpop.f32.mrf.mxu0  ;;  %6210 = vmatmul.msk.bf16.gmra.mxu1 %vm89_vm9, %v2920_v57  ;;  %6215 = vmatmul.msk.bf16.gmra.mxu2 %vm89_vm9, %v2920_v57  ;;  %v3092_v4 = vmul.f32 %v7763_v40, %v7763_v40  ;;  %v3069_v12 = vsel %vm109_vm1, %v7763_v40, 0.0 }
 0x560   :  { %v2804_v47 = vpop.f32.mrf.mxu3 }
 0x561   :  { %v3101_v14 = vsel %vm109_vm1, %v3092_v4, 0.0 }
 0x562   :  { %v2736_v44 = vpop.f32.mrf.mxu2 }
 0x563   :  { %v7769_v41 = vadd.f32 %v2804_v47, %v2736_v44 }
 0x564   :  { %v2699_v62 = vpop.f32.mrf.mxu1 }
 0x565   :  { %v7786_v43 = vadd.f32 %v2699_v62, %v2611_v27  ;;  %v3147_v37 = vmul.f32 %v7769_v41, %v7769_v41  ;;  %v3124_v15 = vsel %vm109_vm1, %v7769_v41, 0.0 }
 0x567   :  { %v2619_v58 = vpop.f32.mrf.mxu0  ;;  %v3093_v48 = vmul.f32 %v7786_v43, %v7786_v43  ;;  %v3070_v11 = vsel %vm109_vm1, %v7786_v43, 0.0  ;;  %v3156_v24 = vsel %vm109_vm1, %v3147_v37, 0.0 }
 0x568   :  { %v2806_v36 = vpop.f32.mrf.mxu3 }
 0x569   :  { %v3102_v61 = vsel %vm109_vm1, %v3093_v48, 0.0 }
 0x56a   :  { %v2738_v20 = vpop.f32.mrf.mxu2 }
 0x56b   :  { %v7790_v0 = vadd.f32 %v2806_v36, %v2738_v20 }
 0x56c   :  { %v2702_v39 = vpop.f32.mrf.mxu1 }
 0x56d   :  { %v7771_v6 = vadd.f32 %v2702_v39, %v2614_v45  ;;  %6221 = vmatmul.msk.bf16.gmra.mxu3 %vm89_vm9, %v3017_v3  ;;  %v3148_v16 = vmul.f32 %v7790_v0, %v7790_v0  ;;  %v3125_v9 = vsel %vm109_vm1, %v7790_v0, 0.0  ;;  %v3071_v45 = vadd.f32 %v3070_v11, %v3069_v12 }
 0x56e   :  { %v3103_v3 = vadd.f32 %v3102_v61, %v3101_v14  ;;  %v3126_v30 = vadd.f32 %v3125_v9, %v3124_v15 }
 0x56f   :  { %v2621_v10 = vpop.f32.mrf.mxu0  ;;  %6211 = vmatmul.msk.bf16.gmra.mxu1 %vm89_vm9, %v2923_v8  ;;  %6216 = vmatmul.msk.bf16.gmra.mxu2 %vm89_vm9, %v2923_v8  ;;  %v3094_v29 = vmul.f32 %v7771_v6, %v7771_v6  ;;  %v3157_v27 = vsel %vm109_vm1, %v3148_v16, 0.0  ;;  %v3072_v22 = vsel %vm109_vm1, %v7771_v6, 0.0 }
 0x570   :  { %v2809_v32 = vpop.f32.mrf.mxu3  ;;  %v3158_v47 = vadd.f32 %v3157_v27, %v3156_v24  ;;  %v3073_v44 = vadd.f32 %v3072_v22, %v3071_v45 }
 0x571   :  { %v3104_v31 = vsel %vm109_vm1, %v3094_v29, 0.0 }
 0x572   :  { %v2741_v59 = vpop.f32.mrf.mxu2 }
 0x573   :  { %v7776_v63 = vadd.f32 %v2809_v32, %v2741_v59 }
 0x574   :  { %v2704_v60 = vpop.f32.mrf.mxu1 }
 0x575   :  { %v7798_v38 = vadd.f32 %v2704_v60, %v2616_v52  ;;  %v3149_v19 = vmul.f32 %v7776_v63, %v7776_v63  ;;  %v3127_v34 = vsel %vm109_vm1, %v7776_v63, 0.0 }
 0x576   :  { %v3128_v32 = vadd.f32 %v3127_v34, %v3126_v30 }
 0x577   :  { %v2624_v18 = vpop.f32.mrf.mxu0  ;;  %v3095_v25 = vmul.f32 %v7798_v38, %v7798_v38  ;;  %v3074_v35 = vsel %vm109_vm1, %v7798_v38, 0.0  ;;  %v3159_v62 = vsel %vm109_vm1, %v3149_v19, 0.0 }
 0x578   :  { %v2811_v46 = vpop.f32.mrf.mxu3  ;;  %v3075_v59 = vadd.f32 %v3074_v35, %v3073_v44 }
 0x57a   :  { %v2743_v42 = vpop.f32.mrf.mxu2 }
 0x57b   :  { %v7824_v28 = vadd.f32 %v2811_v46, %v2743_v42 }
 0x57c   :  { %v2707_v55 = vpop.f32.mrf.mxu1 }
 0x57d   :  { %v7778_v13 = vadd.f32 %v2707_v55, %v2619_v58  ;;  %v3106_v58 = vsel %vm109_vm1, %v3095_v25, 0.0  ;;  %v3150_v20 = vmul.f32 %v7824_v28, %v7824_v28 }
 0x57f   :  { %v2626_v2 = vpop.f32.mrf.mxu0  ;;  %v3096_v57 = vmul.f32 %v7778_v13, %v7778_v13  ;;  %v3076_v53 = vsel %vm109_vm1, %v7778_v13, 0.0  ;;  %v3161_v4 = vsel %vm109_vm1, %v3150_v20, 0.0 }
 0x580   :  { %v2814_v21 = vpop.f32.mrf.mxu3 }
 0x581   :  { %v3108_v46 = vsel %vm109_vm1, %v3096_v57, 0.0 }
 0x582   :  { %v2746_v49 = vpop.f32.mrf.mxu2 }
 0x583   :  { %v7784_v54 = vadd.f32 %v2814_v21, %v2746_v49 }
 0x584   :  { %v2709_v51 = vpop.f32.mrf.mxu1 }
 0x585   :  { %v7826_v1 = vadd.f32 %v2709_v51, %v2621_v10  ;;  %v3105_v10 = vadd.f32 %v3104_v31, %v3103_v3  ;;  %v3077_v51 = vadd.f32 %v3076_v53, %v3075_v59  ;;  %v3131_v61 = vsel %vm109_vm1, %v7784_v54, 0.0 }
 0x587   :  { %v7788_v23 = vpop.f32.mrf.mxu0  ;;  %v3097_v39 = vmul.f32 %v7826_v1, %v7826_v1  ;;  %v3078_v42 = vsel %vm109_vm1, %v7826_v1, 0.0  ;;  %v3107_v49 = vadd.f32 %v3106_v58, %v3105_v10 }
 0x588   :  { %v2816_v17 = vpop.f32.mrf.mxu3  ;;  %v3079_v29 = vadd.f32 %v3078_v42, %v3077_v51 }
 0x589   :  { %v3110_v48 = vsel %vm109_vm1, %v3097_v39, 0.0  ;;  %v3109_v12 = vadd.f32 %v3108_v46, %v3107_v49 }
 0x58a   :  { %v2748_v56 = vpop.f32.mrf.mxu2 }
 0x58b   :  { %v7847_v60 = vadd.f32 %v2816_v17, %v2748_v56  ;;  %v3151_v17 = vmul.f32 %v7784_v54, %v7784_v54  ;;  %v3111_v25 = vadd.f32 %v3110_v48, %v3109_v12 }
 0x58c   :  { %v2712_v7 = vpop.f32.mrf.mxu1 }
 0x58d   :  { %v7802_v5 = vadd.f32 %v2712_v7, %v2624_v18  ;;  %v3129_v18 = vsel %vm109_vm1, %v7824_v28, 0.0  ;;  %v3152_v14 = vmul.f32 %v7847_v60, %v7847_v60  ;;  %v3163_v19 = vsel %vm109_vm1, %v3151_v17, 0.0 }
 0x58e   :  { %v3130_v16 = vadd.f32 %v3129_v18, %v3128_v32  ;;  %v3133_v22 = vsel %vm109_vm1, %v7847_v60, 0.0 }
 0x58f   :  { %v2631_v50 = vpop.f32.mrf.mxu0  ;;  %v3098_v55 = vmul.f32 %v7802_v5, %v7802_v5  ;;  %v3080_v37 = vsel %vm109_vm1, %v7802_v5, 0.0 }
 0x590   :  { %v2819_v26 = vpop.f32.mrf.mxu3  ;;  %v3132_v31 = vadd.f32 %v3131_v61, %v3130_v16 }
 0x591   :  { %v3112_v9 = vsel %vm109_vm1, %v3098_v55, 0.0 }
 0x592   :  { %v2751_v33 = vpop.f32.mrf.mxu2  ;;  %v3113_v34 = vadd.f32 %v3112_v9, %v3111_v25 }
 0x593   :  { %v7835_v52 = vadd.f32 %v2819_v26, %v2751_v33  ;;  %v3081_v26 = vadd.f32 %v3080_v37, %v3079_v29  ;;  %v3165_v33 = vsel %vm109_vm1, %v3152_v14, 0.0 }
 0x594   :  { %v2714_v36 = vpop.f32.mrf.mxu1 }
 0x595   :  { %v7845_v8 = vadd.f32 %v2714_v36, %v2626_v2  ;;  %v3160_v2 = vadd.f32 %v3159_v62, %v3158_v47  ;;  %v3153_v45 = vmul.f32 %v7835_v52, %v7835_v52  ;;  %v3135_v57 = vsel %vm109_vm1, %v7835_v52, 0.0 }
 0x596   :  { %v3134_v36 = vadd.f32 %v3133_v22, %v3132_v31 }
 0x597   :  { %v7856_v21 = vpop.f32.mrf.mxu0  ;;  %v3099_v7 = vmul.f32 %v7845_v8, %v7845_v8  ;;  %v3082_v50 = vsel %vm109_vm1, %v7845_v8, 0.0  ;;  %v3162_v24 = vadd.f32 %v3161_v4, %v3160_v2  ;;  %v3167_v10 = vsel %vm109_vm1, %v3153_v45, 0.0 }
 0x598   :  { %v2821_v56 = vpop.f32.mrf.mxu3  ;;  %v3083_v35 = vadd.f32 %v3082_v50, %v3081_v26  ;;  %v3136_v46 = vadd.f32 %v3135_v57, %v3134_v36 }
 0x599   :  { %v3114_v3 = vsel %vm109_vm1, %v3099_v7, 0.0 }
 0x59a   :  { %v2753_v11 = vpop.f32.mrf.mxu2  ;;  %v3115_v20 = vadd.f32 %v3114_v3, %v3113_v34 }
 0x59b   :  { %v7873_v15 = vadd.f32 %v2821_v56, %v2753_v11 }
 0x59c   :  { %v2717_v27 = vpop.f32.mrf.mxu1 }
 0x59d   :  { %v7882_v30 = vadd.f32 %v2717_v27, %v7788_v23  ;;  %v3154_v47 = vmul.f32 %v7873_v15, %v7873_v15  ;;  %v3164_v23 = vadd.f32 %v3163_v19, %v3162_v24  ;;  %v3137_v32 = vsel %vm109_vm1, %v7873_v15, 0.0 }
 0x59e   :  { %v3138_v56 = vadd.f32 %v3137_v32, %v3136_v46 }
 0x59f   :  { %v3084_v44 = vsel %vm128_vm15, %v7882_v30, 0.0  ;;  %v3100_v62 = vmul.f32 %v7882_v30, %v7882_v30  ;;  %v7893_v58 = vpop.f32.mrf.mxu0  ;;  %v3166_v18 = vadd.f32 %v3165_v33, %v3164_v23  ;;  %v3169_v49 = vsel %vm109_vm1, %v3154_v47, 0.0 }
 0x5a0   :  { %v3085_v53 = vadd.f32 %v3084_v44, %v3083_v35  ;;  %v2824_v39 = vpop.f32.mrf.mxu3 }
 0x5a1   :  { %v3116_v59 = vsel %vm128_vm15, %v3100_v62, 0.0  ;;  %v3168_v17 = vadd.f32 %v3167_v10, %v3166_v18 }
 0x5a2   :  { %v3086_v42 = vrot.slane %v3085_v53, 4  ;;  %v3117_v55 = vadd.f32 %v3116_v59, %v3115_v20  ;;  %v2756_v2 = vpop.f32.mrf.mxu2 }
 0x5a3   :  { %v7900_v51 = vadd.f32 %v2824_v39, %v2756_v2  ;;  %v3170_v12 = vadd.f32 %v3169_v49, %v3168_v17 }
 0x5a4   :  { %v3087_v4 = vadd.f32 %v3086_v42, %v3085_v53  ;;  %v3118_v48 = vrot.slane %v3117_v55, 4  ;;  %v2719_v37 = vpop.f32.mrf.mxu1 }
 0x5a5   :  { %v3139_v7 = vsel %vm128_vm15, %v7900_v51, 0.0  ;;  %v3155_v16 = vmul.f32 %v7900_v51, %v7900_v51 }
 0x5a6   :  { %v3088_v29 = vrot.slane %v3087_v4, 2  ;;  %v3119_v14 = vadd.f32 %v3118_v48, %v3117_v55  ;;  %v3140_v11 = vadd.f32 %v3139_v7, %v3138_v56 }
 0x5a7   :  { %v3171_v61 = vsel %vm128_vm15, %v3155_v16, 0.0  ;;  %v2871_v9 = vpop.f32.mrf.mxu0 }
 0x5a8   :  { %v3120_v50 = vrot.slane %v3119_v14, 2  ;;  %v3141_v24 = vrot.slane %v3140_v11, 4  ;;  %v3172_v19 = vadd.f32 %v3171_v61, %v3170_v12  ;;  %v2826_v25 = vpop.f32.mrf.mxu3  ;;  %v3089_v26 = vadd.f32 %v3088_v29, %v3087_v4 }
 0x5aa   :  { %v3142_v27 = vadd.f32 %v3141_v24, %v3140_v11  ;;  %v3173_v22 = vrot.slane %v3172_v19, 4  ;;  %v2758_v45 = vpop.f32.mrf.mxu2  ;;  %v3121_v3 = vadd.f32 %v3120_v50, %v3119_v14  ;;  %v3090_v35 = vrot.slane %v3089_v26, 1 }
 0x5ac   :  { %v3143_v31 = vrot.slane %v3142_v27, 2  ;;  %v3174_v33 = vadd.f32 %v3173_v22, %v3172_v19  ;;  %v2948_v34 = vpop.f32.mrf.mxu1  ;;  %v3122_v62 = vrot.slane %v3121_v3, 1  ;;  %v3091_v53 = vadd.f32 %v3090_v35, %v3089_v26 }
 0x5ad   :  { %v7912_v19 = vadd.f32 %v2948_v34, %v7856_v21 }
 0x5ae   :  { %v3144_v57 = vadd.f32 %v3143_v31, %v3142_v27  ;;  %v3175_v47 = vrot.slane %v3174_v33, 2  ;;  %v3123_v59 = vadd.f32 %v3122_v62, %v3121_v3 }
 0x5af   :  { %v2873_v44 = vpop.f32.mrf.mxu0  ;;  %v3204_v31 = vmul.f32 %v7912_v19, %v7912_v19 }
 0x5b0   :  { %v3145_v23 = vrot.slane %v3144_v57, 1  ;;  %v3176_v36 = vadd.f32 %v3175_v47, %v3174_v33  ;;  %v3043_v20 = vpop.f32.mrf.mxu3 }
 0x5b2   :  { %v3146_v39 = vadd.f32 %v3145_v23, %v3144_v57  ;;  %v3177_v10 = vrot.slane %v3176_v36, 1  ;;  %v2981_v32 = vpop.f32.mrf.mxu2  ;;  %v3181_v23 = vsel %vm109_vm1, %v7912_v19, 0.0 }
 0x5b3   :  { %v7921_v22 = vadd.f32 %v3043_v20, %v2981_v32 }
 0x5b4   :  { %v3178_v18 = vadd.f32 %v3177_v10, %v3176_v36  ;;  %v7907_v46 = vadd.f32 %v3146_v39, %v3091_v53  ;;  %v2950_v42 = vpop.f32.mrf.mxu1  ;;  %v3213_v36 = vsel %vm109_vm1, %v3204_v31, 0.0 }
 0x5b5   :  { %v7915_v25 = vadd.f32 %v2950_v42, %v7893_v58  ;;  %v3261_v35 = vmul.f32 %v7921_v22, %v7921_v22 }
 0x5b6   :  { %v7909_v55 = vadd.f32 %v3178_v18, %v3123_v59 }
 0x5b7   :  { %v2876_v2 = vpop.f32.mrf.mxu0  ;;  %v3205_v33 = vmul.f32 %v7915_v25, %v7915_v25  ;;  %v3270_v18 = vsel %vm109_vm1, %v3261_v35, 0.0 }
 0x5b8   :  { %v3045_v49 = vpop.f32.mrf.mxu3 }
 0x5b9   :  { %v3214_v20 = vsel %vm109_vm1, %v3205_v33, 0.0 }
 0x5ba   :  { %v2983_v17 = vpop.f32.mrf.mxu2 }
 0x5bb   :  { %v7917_v26 = vadd.f32 %v3045_v49, %v2983_v17 }
 0x5bc   :  { %v2953_v56 = vpop.f32.mrf.mxu1 }
 0x5bd   :  { %v7923_v3 = vadd.f32 %v2953_v56, %v2871_v9  ;;  %v3262_v58 = vmul.f32 %v7917_v26, %v7917_v26  ;;  %v3182_v9 = vsel %vm109_vm1, %v7915_v25, 0.0  ;;  %v3239_v53 = vsel %vm109_vm1, %v7917_v26, 0.0 }
 0x5be   :  { %v3183_v42 = vadd.f32 %v3182_v9, %v3181_v23 }
 0x5bf   :  { %v2878_v4 = vpop.f32.mrf.mxu0  ;;  %v3206_v47 = vmul.f32 %v7923_v3, %v7923_v3  ;;  %v3271_v39 = vsel %vm109_vm1, %v3262_v58, 0.0  ;;  %v3184_v56 = vsel %vm109_vm1, %v7923_v3, 0.0 }
 0x5c0   :  { %v3048_v48 = vpop.f32.mrf.mxu3  ;;  %v3272_v31 = vadd.f32 %v3271_v39, %v3270_v18 }
 0x5c2   :  { %v2986_v37 = vpop.f32.mrf.mxu2 }
 0x5c3   :  { %v7931_v34 = vadd.f32 %v3048_v48, %v2986_v37  ;;  %v3216_v48 = vsel %vm109_vm1, %v3206_v47, 0.0  ;;  %v3185_v47 = vadd.f32 %v3184_v56, %v3183_v42 }
 0x5c4   :  { %v2955_v7 = vpop.f32.mrf.mxu1 }
 0x5c5   :  { %v7939_v62 = vadd.f32 %v2955_v7, %v2873_v44  ;;  %v3263_v10 = vmul.f32 %v7931_v34, %v7931_v34  ;;  %v3238_v44 = vsel %vm109_vm1, %v7921_v22, 0.0  ;;  %v3215_v7 = vadd.f32 %v3214_v20, %v3213_v36 }
 0x5c6   :  { %v3241_v33 = vsel %vm109_vm1, %v7931_v34, 0.0 }
 0x5c7   :  { %v2881_v16 = vpop.f32.mrf.mxu0  ;;  %v3207_v37 = vmul.f32 %v7939_v62, %v7939_v62 }
 0x5c8   :  { %v3050_v12 = vpop.f32.mrf.mxu3 }
 0x5c9   :  { %v3218_v20 = vsel %vm109_vm1, %v3207_v37, 0.0 }
 0x5ca   :  { %v2988_v29 = vpop.f32.mrf.mxu2 }
 0x5cb   :  { %v7955_v49 = vadd.f32 %v3050_v12, %v2988_v29  ;;  %v3273_v12 = vsel %vm109_vm1, %v3263_v10, 0.0  ;;  %v3186_v29 = vsel %vm109_vm1, %v7939_v62, 0.0 }
 0x5cc   :  { %v2958_v14 = vpop.f32.mrf.mxu1 }
 0x5cd   :  { %v7950_v32 = vadd.f32 %v2958_v14, %v2876_v2  ;;  %v3240_v14 = vadd.f32 %v3239_v53, %v3238_v44 }
 0x5cf   :  { %v2883_v11 = vpop.f32.mrf.mxu0  ;;  %v3208_v35 = vmul.f32 %v7950_v32, %v7950_v32  ;;  %v3188_v53 = vsel %vm109_vm1, %v7950_v32, 0.0 }
 0x5d0   :  { %v3053_v61 = vpop.f32.mrf.mxu3 }
 0x5d2   :  { %v2991_v50 = vpop.f32.mrf.mxu2 }
 0x5d3   :  { %v7975_v23 = vadd.f32 %v3053_v61, %v2991_v50  ;;  %v3243_v61 = vsel %vm109_vm1, %v7955_v49, 0.0  ;;  %v3220_v50 = vsel %vm109_vm1, %v3208_v35, 0.0 }
 0x5d4   :  { %v2960_v24 = vpop.f32.mrf.mxu1 }
 0x5d5   :  { %v7962_v2 = vadd.f32 %v2960_v24, %v2878_v4  ;;  %v3217_v4 = vadd.f32 %v3216_v48, %v3215_v7  ;;  %v3264_v24 = vmul.f32 %v7955_v49, %v7955_v49  ;;  %v3265_v37 = vmul.f32 %v7975_v23, %v7975_v23 }
 0x5d7   :  { %v7919_v27 = vpop.f32.mrf.mxu0  ;;  %v3209_v39 = vmul.f32 %v7962_v2, %v7962_v2  ;;  %v3190_v18 = vsel %vm109_vm1, %v7962_v2, 0.0  ;;  %v3219_v56 = vadd.f32 %v3218_v20, %v3217_v4  ;;  %v3245_v4 = vsel %vm109_vm1, %v7975_v23, 0.0 }
 0x5d8   :  { %v3055_v45 = vpop.f32.mrf.mxu3  ;;  %v3277_v20 = vsel %vm109_vm1, %v3265_v37, 0.0 }
 0x5da   :  { %v2993_v21 = vpop.f32.mrf.mxu2 }
 0x5db   :  { %v7984_v44 = vadd.f32 %v3055_v45, %v2993_v21  ;;  %v3222_v21 = vsel %vm109_vm1, %v3209_v39, 0.0 }
 0x5dc   :  { %v2963_v57 = vpop.f32.mrf.mxu1 }
 0x5dd   :  { %v7971_v9 = vadd.f32 %v2963_v57, %v2881_v16  ;;  %v3242_v16 = vadd.f32 %v3241_v33, %v3240_v14  ;;  %v3274_v57 = vadd.f32 %v3273_v12, %v3272_v31  ;;  %v3221_v12 = vadd.f32 %v3220_v50, %v3219_v56 }
 0x5de   :  { %v3266_v35 = vmul.f32 %v7984_v44, %v7984_v44 }
 0x5df   :  { %v2888_v59 = vpop.f32.mrf.mxu0  ;;  %v3210_v42 = vmul.f32 %v7971_v9, %v7971_v9  ;;  %v3192_v7 = vsel %vm109_vm1, %v7971_v9, 0.0  ;;  %v3244_v33 = vadd.f32 %v3243_v61, %v3242_v16 }
 0x5e0   :  { %v3058_v17 = vpop.f32.mrf.mxu3  ;;  %v3187_v59 = vadd.f32 %v3186_v29, %v3185_v47  ;;  %v3279_v56 = vsel %vm109_vm1, %v3266_v35, 0.0 }
 0x5e2   :  { %v2996_v58 = vpop.f32.mrf.mxu2  ;;  %v3189_v48 = vadd.f32 %v3188_v53, %v3187_v59  ;;  %v3223_v53 = vadd.f32 %v3222_v21, %v3221_v12  ;;  %v3247_v59 = vsel %vm109_vm1, %v7984_v44, 0.0 }
 0x5e3   :  { %v7999_v14 = vadd.f32 %v3058_v17, %v2996_v58 }
 0x5e4   :  { %v2965_v36 = vpop.f32.mrf.mxu1  ;;  %v3191_v29 = vadd.f32 %v3190_v18, %v3189_v48 }
 0x5e5   :  { %v7982_v10 = vadd.f32 %v2965_v36, %v2883_v11  ;;  %v3275_v11 = vsel %vm109_vm1, %v3264_v24, 0.0  ;;  %9352 = vst [vmem:[#allocation6_spill] sm:$0xff] %v7999_v14  ;;  %v3224_v24 = vsel %vm109_vm1, %v3210_v42, 0.0  ;;  %v3267_v61 = vmul.f32 %v7999_v14, %v7999_v14 }
 0x5e6   :  { %v3276_v58 = vadd.f32 %v3275_v11, %v3274_v57  ;;  %v3193_v39 = vadd.f32 %v3192_v7, %v3191_v29  ;;  %v3246_v42 = vadd.f32 %v3245_v4, %v3244_v33  ;;  %v3225_v57 = vadd.f32 %v3224_v24, %v3223_v53 }
 0x5e7   :  { %v3211_v31 = vmul.f32 %v7982_v10, %v7982_v10  ;;  %v3194_v36 = vsel %vm109_vm1, %v7982_v10, 0.0  ;;  %v3249_v48 = vsel %vm109_vm1, %v7999_v14, 0.0  ;;  %v3281_v29 = vsel %vm109_vm1, %v3267_v61, 0.0 }
 0x5e8   :  { %v3060_v45 = vpop.f32.mrf.mxu3  ;;  %v3195_v11 = vadd.f32 %v3194_v36, %v3193_v39  ;;  %v3278_v7 = vadd.f32 %v3277_v20, %v3276_v58 }
 0x5e9   :  { %v3226_v50 = vsel %vm109_vm1, %v3211_v31, 0.0 }
 0x5ea   :  { %v2998_v47 = vpop.f32.mrf.mxu2  ;;  %v3227_v31 = vadd.f32 %v3226_v50, %v3225_v57  ;;  %v3280_v4 = vadd.f32 %v3279_v56, %v3278_v7 }
 0x5eb   :  { %v8010_v17 = vadd.f32 %v3060_v45, %v2998_v47 }
 0x5ec   :  { %v2968_v16 = vpop.f32.mrf.mxu1  ;;  %v3282_v58 = vadd.f32 %v3281_v29, %v3280_v4 }
 0x5ed   :  { %v8019_v18 = vadd.f32 %v2968_v16, %v7919_v27  ;;  %v3268_v37 = vmul.f32 %v8010_v17, %v8010_v17  ;;  %v3248_v27 = vadd.f32 %v3247_v59, %v3246_v42  ;;  %v3251_v35 = vsel %vm109_vm1, %v8010_v17, 0.0 }
 0x5ef   :  { %v3196_v45 = vsel %vm128_vm15, %v8019_v18, 0.0  ;;  %v3212_v21 = vmul.f32 %v8019_v18, %v8019_v18  ;;  %v3250_v24 = vadd.f32 %v3249_v48, %v3248_v27  ;;  %v3283_v16 = vsel %vm109_vm1, %v3268_v37, 0.0 }
 0x5f0   :  { %v3197_v33 = vadd.f32 %v3196_v45, %v3195_v11  ;;  %v3063_v12 = vpop.f32.mrf.mxu3  ;;  %v3284_v56 = vadd.f32 %v3283_v16, %v3282_v58 }
 0x5f1   :  { %v3228_v47 = vsel %vm128_vm15, %v3212_v21, 0.0  ;;  %v3252_v20 = vadd.f32 %v3251_v35, %v3250_v24 }
 0x5f2   :  { %v3198_v36 = vrot.slane %v3197_v33, 4  ;;  %v3229_v53 = vadd.f32 %v3228_v47, %v3227_v31  ;;  %v3001_v39 = vpop.f32.mrf.mxu2 }
 0x5f3   :  { %v8035_v14 = vadd.f32 %v3063_v12, %v3001_v39 }
 0x5f4   :  { %v3199_v59 = vadd.f32 %v3198_v36, %v3197_v33  ;;  %v3230_v50 = vrot.slane %v3229_v53, 4  ;;  %v2970_v42 = vpop.f32.mrf.mxu1 }
 0x5f5   :  { %v3253_v61 = vsel %vm128_vm15, %v8035_v14, 0.0  ;;  %v3269_v57 = vmul.f32 %v8035_v14, %v8035_v14 }
 0x5f6   :  { %v3200_v11 = vrot.slane %v3199_v59, 2  ;;  %v3231_v48 = vadd.f32 %v3230_v50, %v3229_v53  ;;  %v3254_v45 = vadd.f32 %v3253_v61, %v3252_v20 }
 0x5f7   :  { %v3285_v21 = vsel %vm128_vm15, %v3269_v57, 0.0 }
 0x5f8   :  { %v3201_v37 = vadd.f32 %v3200_v11, %v3199_v59  ;;  %v3232_v7 = vrot.slane %v3231_v48, 2  ;;  %v3255_v27 = vrot.slane %v3254_v45, 4  ;;  %v3286_v31 = vadd.f32 %v3285_v21, %v3284_v56  ;;  %v3065_v12 = vpop.f32.mrf.mxu3 }
 0x5fa   :  { %v3202_v33 = vrot.slane %v3201_v37, 1  ;;  %v3233_v29 = vadd.f32 %v3232_v7, %v3231_v48  ;;  %v3256_v35 = vadd.f32 %v3255_v27, %v3254_v45  ;;  %v3287_v47 = vrot.slane %v3286_v31, 4  ;;  %v3003_v4 = vpop.f32.mrf.mxu2 }
 0x5fc   :  { %v3234_v24 = vrot.slane %v3233_v29, 1  ;;  %v3257_v36 = vrot.slane %v3256_v35, 2  ;;  %v3288_v39 = vadd.f32 %v3287_v47, %v3286_v31  ;;  %v3203_v42 = vadd.f32 %v3202_v33, %v3201_v37 }
 0x5fe   :  { %v3258_v16 = vadd.f32 %v3257_v36, %v3256_v35  ;;  %v3289_v58 = vrot.slane %v3288_v39, 2  ;;  %v3235_v53 = vadd.f32 %v3234_v24, %v3233_v29  ;;  %v3236_v59 = vadd.f32 %v3203_v42, %v7907_v46  ;;  %v3067_v46 = vld [vmem:[%s9328_s17] sm:$0x1] }
 0x5ff   :  { %v3068_v36 = vld [vmem:[%s9329_s18] sm:$0x1] }
 0x600   :  { %v3259_v20 = vrot.slane %v3258_v16, 1  ;;  %v3290_v50 = vadd.f32 %v3289_v58, %v3288_v39  ;;  %v3237_v56 = vadd.f32 %v3235_v53, %v7909_v55 }
 0x602   :  { %v3260_v61 = vadd.f32 %v3259_v20, %v3258_v16  ;;  %v3291_v57 = vrot.slane %v3290_v50, 1 }
 0x604   :  { %v3292_v11 = vadd.f32 %v3291_v57, %v3290_v50  ;;  %v3293_v48 = vadd.f32 %v3260_v61, %v3236_v59 }
 0x606   :  { %v3294_v45 = vadd.f32 %v3292_v11, %v3237_v56  ;;  %v3295_v21 = vmul.f32 0.0036764706, %v3293_v48  ;;  %v9353_v48 = vld [vmem:[#allocation6_spill] sm:$0xff] }
 0x608   :  { %v3296_v7 = vmul.f32 0.0036764706, %v3294_v45  ;;  %v3297_v27 = vmul.f32 %v3295_v21, %v3295_v21 }
 0x60a   :  { %v3298_v12 = vsub.f32 %v3296_v7, %v3297_v27 }
 0x60c   :  { %v3299_v31 = vadd.f32 1e-05, %v3298_v12 }
 0x60e   :  { %6544 = vrsqrt.f32 %v3299_v31  ;;  %vm3306_vm10 = vweird.f32 %v3299_v31 }
 0x614   :  { %v6545_v37 = vpop.eup %6544 }
 0x615   :  { %v3301_v33 = vmul.f32 %v6545_v37, %v3299_v31  ;;  %vm3307_vm9 = vweird.f32 %v6545_v37 }
 0x616   :  { %vm3308_vm11 = vmor %vm3306_vm10, %vm3307_vm9 }
 0x617   :  { %v3302_v29 = vmul.f32 %v6545_v37, %v3301_v33 }
 0x619   :  { %v3303_v35 = vmul.f32 0.5, %v3302_v29 }
 0x61b   :  { %v3304_v47 = vsub.f32 1.5, %v3303_v35 }
 0x61d   :  { %v3305_v55 = vmul.f32 %v6545_v37, %v3304_v47 }
 0x61f   :  { %v3309_v4 = vsel %vm3308_vm11, %v6545_v37, %v3305_v55 }
 0x620   :  { %v3310_v24 = vmul.f32 %v3309_v4, %v3067_v46 }
 0x622   :  { %v3311_v39 = vmul.f32 %v3310_v24, %v3295_v21  ;;  %v3314_v42 = vperm.slane %v3310_v24, 0 }
 0x624   :  { %v3312_v16 = vsub.f32 %v3068_v36, %v3311_v39  ;;  %v3408_v58 = vmul.f32 %v3314_v42, %v8035_v14  ;;  %v8052_v53 = vmul.f32 %v3314_v42, %v7763_v40  ;;  %v8055_v20 = vmul.f32 %v3314_v42, %v7786_v43 }
 0x625   :  { %v8058_v50 = vmul.f32 %v3314_v42, %v7771_v6  ;;  %v8061_v59 = vmul.f32 %v3314_v42, %v7798_v38  ;;  %v8064_v61 = vmul.f32 %v3314_v42, %v7778_v13  ;;  %v8067_v57 = vmul.f32 %v3314_v42, %v7826_v1 }
 0x626   :  { %v8069_v56 = vperm.slane %v3312_v16, 0  ;;  %v3322_v40 = vmul.f32 %v3314_v42, %v7802_v5  ;;  %v3323_v14 = vmul.f32 %v3314_v42, %v7845_v8  ;;  %v3324_v43 = vmul.f32 %v3314_v42, %v7882_v30 }
 0x627   :  { %v8075_v6 = vmul.f32 %v3314_v42, %v7769_v41  ;;  %v8078_v38 = vmul.f32 %v3314_v42, %v7790_v0  ;;  %v8081_v13 = vmul.f32 %v3314_v42, %v7776_v63  ;;  %v8084_v1 = vmul.f32 %v3314_v42, %v7824_v28 }
 0x628   :  { %v3350_v11 = vmul.f32 %v3314_v42, %v7784_v54  ;;  %v3351_v5 = vmul.f32 %v3314_v42, %v7847_v60  ;;  %v3352_v8 = vmul.f32 %v3314_v42, %v7835_v52  ;;  %v3353_v30 = vmul.f32 %v3314_v42, %v7873_v15 }
 0x629   :  { %v3354_v41 = vmul.f32 %v3314_v42, %v7900_v51  ;;  %v8092_v0 = vmul.f32 %v3314_v42, %v7912_v19  ;;  %v8095_v63 = vmul.f32 %v3314_v42, %v7915_v25  ;;  %v8098_v28 = vmul.f32 %v3314_v42, %v7923_v3 }
 0x62a   :  { %v8101_v54 = vmul.f32 %v3314_v42, %v7939_v62  ;;  %v8104_v60 = vmul.f32 %v3314_v42, %v7950_v32  ;;  %v8107_v52 = vmul.f32 %v3314_v42, %v7962_v2  ;;  %v3379_v15 = vmul.f32 %v3314_v42, %v7971_v9 }
 0x62b   :  { %v3380_v51 = vmul.f32 %v3314_v42, %v7982_v10  ;;  %v3381_v19 = vmul.f32 %v3314_v42, %v8019_v18  ;;  %v8113_v25 = vmul.f32 %v3314_v42, %v7921_v22  ;;  %v8116_v3 = vmul.f32 %v3314_v42, %v7917_v26 }
 0x62c   :  { %v8119_v62 = vmul.f32 %v3314_v42, %v7931_v34  ;;  %v8122_v32 = vmul.f32 %v3314_v42, %v7955_v49  ;;  %v3404_v2 = vmul.f32 %v3314_v42, %v7975_v23  ;;  %v3405_v9 = vmul.f32 %v3314_v42, %v7984_v44 }
 0x62d   :  { %v3406_v10 = vmul.f32 %v3314_v42, %v9353_v48  ;;  %v3407_v18 = vmul.f32 %v3314_v42, %v8010_v17  ;;  %v3363_v22 = vadd.f32 %v3354_v41, %v8069_v56  ;;  %v3336_v45 = vadd.f32 %v8069_v56, %v3324_v43 }
 0x62e   :  { %v3417_v26 = vadd.f32 %v3408_v58, %v8069_v56  ;;  %v3390_v34 = vadd.f32 %v3381_v19, %v8069_v56  ;;  %v3361_v21 = vadd.f32 %v3352_v8, %v8069_v56  ;;  %v3362_v49 = vadd.f32 %v3353_v30, %v8069_v56 }
 0x62f   :  { %v3372_v7 = vmax.f32 %v3363_v22, 0.0  ;;  %v3345_v23 = vmax.f32 %v3336_v45, 0.0  ;;  %v3334_v44 = vadd.f32 %v8069_v56, %v3322_v40  ;;  %v3335_v27 = vadd.f32 %v8069_v56, %v3323_v14 }
 0x630   :  { %v3426_v12 = vmax.f32 %v3417_v26, 0.0  ;;  %v3399_v17 = vmax.f32 %v3390_v34, 0.0  ;;  %v3370_v31 = vmax.f32 %v3361_v21, 0.0  ;;  %v3371_v37 = vmax.f32 %v3362_v49, 0.0 }
 0x631   :  { %v3470_v33 = vpack.c.bf16 %v3372_v7, %v3372_v7  ;;  %v3465_v29 = vpack.c.bf16 %v3345_v23, %v3345_v23  ;;  %v3343_v35 = vmax.f32 %v3334_v44, 0.0  ;;  %v3344_v47 = vmax.f32 %v3335_v27, 0.0 }
 0x632   :  { %v3751_v46 = vpack.c.bf16 %v3426_v12, %v3426_v12  ;;  %v3746_v55 = vpack.c.bf16 %v3399_v17, %v3399_v17  ;;  %v3469_v4 = vpack.c.bf16 %v3371_v37, %v3370_v31  ;;  %v3415_v24 = vadd.f32 %v3406_v10, %v8069_v56 }
 0x633   :  { %v3544_v36 = vsel %vm3542_vm13, %v3470_v33, 0  ;;  %v3670_v39 = vsel %vm3542_vm13, %v3465_v29, 0  ;;  %v3464_v42 = vpack.c.bf16 %v3344_v47, %v3343_v35  ;;  %v3416_v16 = vadd.f32 %v3407_v18, %v8069_v56 }
 0x634   :  { %3549 = vmatpush.bf16.msra.mxu0 %v3544_v36  ;;  %3675 = vmatpush.bf16.msra.mxu1 %v3670_v39  ;;  %v3753_v58 = vsel %vm3542_vm13, %v3751_v46, 0  ;;  %v3809_v40 = vsel %vm3542_vm13, %v3746_v55, 0  ;;  %v3424_v14 = vmax.f32 %v3415_v24, 0.0  ;;  %v3388_v43 = vadd.f32 %v3379_v15, %v8069_v56 }
 0x635   :  { %3758 = vmatpush.bf16.msra.mxu2 %v3753_v58  ;;  %3814 = vmatpush.bf16.msra.mxu3 %v3809_v40  ;;  %v3425_v8 = vmax.f32 %v3416_v16, 0.0  ;;  %v3389_v30 = vadd.f32 %v3380_v51, %v8069_v56  ;;  %v3359_v41 = vadd.f32 %v3350_v11, %v8069_v56  ;;  %v3360_v19 = vadd.f32 %v3351_v5, %v8069_v56 }
 0x636   :  { %v3397_v48 = vmax.f32 %v3388_v43, 0.0  ;;  %v3332_v10 = vadd.f32 %v8069_v56, %v8064_v61  ;;  %v3333_v18 = vadd.f32 %v8069_v56, %v8067_v57  ;;  %v3413_v22 = vadd.f32 %v3404_v2, %v8069_v56 }
 0x637   :  { %v3750_v45 = vpack.c.bf16 %v3425_v8, %v3424_v14  ;;  %v3398_v15 = vmax.f32 %v3389_v30, 0.0  ;;  %v3368_v26 = vmax.f32 %v3359_v41, 0.0  ;;  %v3369_v34 = vmax.f32 %v3360_v19, 0.0 }
 0x638   :  { %3550 = vmatpush.bf16.msra.mxu0 %v3469_v4  ;;  %3676 = vmatpush.bf16.msra.mxu1 %v3464_v42  ;;  %v3341_v51 = vmax.f32 %v3332_v10, 0.0  ;;  %v3342_v21 = vmax.f32 %v3333_v18, 0.0  ;;  %v3414_v11 = vadd.f32 %v3405_v9, %v8069_v56  ;;  %v3422_v5 = vmax.f32 %v3413_v22, 0.0  ;;  %v6528_v18 = vld [vmem:[%s9330_s16 + $0x10] sm:$0xff] }
 0x639   :  { %3759 = vmatpush.bf16.msra.mxu2 %v3750_v45  ;;  %v3745_v49 = vpack.c.bf16 %v3398_v15, %v3397_v48  ;;  %v3468_v7 = vpack.c.bf16 %v3369_v34, %v3368_v26  ;;  %v3386_v61 = vadd.f32 %v8104_v60, %v8069_v56  ;;  %v3387_v57 = vadd.f32 %v8107_v52, %v8069_v56  ;;  %v6520_v22 = vld [vmem:[%s9331_s15 + $0x10] sm:$0xff]  ;;  %v6529_v45 = vld [vmem:[%s9330_s16 + $0x18] sm:$0xff]  ;;  %v6322_v26 = vld [vmem:[%s9332_s19 + $0x4] sm:$0xf] }
 0x63a   :  { %v3463_v2 = vpack.c.bf16 %v3342_v21, %v3341_v51  ;;  %v3423_v23 = vmax.f32 %v3414_v11, 0.0  ;;  %v3357_v44 = vadd.f32 %v8081_v13, %v8069_v56  ;;  %v3358_v27 = vadd.f32 %v8084_v1, %v8069_v56  ;;  %v6521_v15 = vld [vmem:[%s9331_s15 + $0x18] sm:$0xff]  ;;  %v3910_v34 = vld [vmem:[%s9332_s19] sm:$0xf] }
 0x63b   :  { %3815 = vmatpush.bf16.msra.mxu3 %v3745_v49  ;;  %v3395_v9 = vmax.f32 %v3386_v61, 0.0  ;;  %v3396_v12 = vmax.f32 %v3387_v57, 0.0  ;;  %v3330_v17 = vadd.f32 %v8069_v56, %v8058_v50  ;;  %v3331_v60 = vadd.f32 %v8069_v56, %v8061_v59  ;;  %v6530_v11 = vld [vmem:[%s9330_s16 + $0x20] sm:$0xff]  ;;  %v6531_v49 = vld [vmem:[%s9330_s16 + $0x28] sm:$0xff]  ;;  %v6532_v61 = vld [vmem:[%s9330_s16 + $0x30] sm:$0xff] }
 0x63c   :  { %3551 = vmatpush.bf16.msra.mxu0 %v3468_v7  ;;  %3677 = vmatpush.bf16.msra.mxu1 %v3463_v2  ;;  %v3749_v52 = vpack.c.bf16 %v3423_v23, %v3422_v5  ;;  %v3366_v31 = vmax.f32 %v3357_v44, 0.0  ;;  %v3367_v37 = vmax.f32 %v3358_v27, 0.0  ;;  %v3411_v13 = vadd.f32 %v8119_v62, %v8069_v56  ;;  %v6522_v5 = vld [vmem:[%s9331_s15 + $0x20] sm:$0xff]  ;;  %v6523_v7 = vld [vmem:[%s9331_s15 + $0x28] sm:$0xff]  ;;  %v6524_v57 = vld [vmem:[%s9331_s15 + $0x30] sm:$0xff] }
 0x63d   :  { %v3744_v33 = vpack.c.bf16 %v3396_v12, %v3395_v9  ;;  %v3339_v29 = vmax.f32 %v3330_v17, 0.0  ;;  %v3340_v1 = vmax.f32 %v3331_v60, 0.0  ;;  %v3412_v35 = vadd.f32 %v8122_v32, %v8069_v56  ;;  %v6533_v2 = vld [vmem:[%s9330_s16 + $0x38] sm:$0xff]  ;;  %v3460_v44 = vld [vmem:[%s9330_s16 + $0x40] sm:$0xf] }
 0x63e   :  { %3760 = vmatpush.bf16.msra.mxu2 %v3749_v52  ;;  %v3467_v47 = vpack.c.bf16 %v3367_v37, %v3366_v31  ;;  %v3420_v50 = vmax.f32 %v3411_v13, 0.0  ;;  %v3384_v59 = vadd.f32 %v8098_v28, %v8069_v56  ;;  %v3385_v46 = vadd.f32 %v8101_v54, %v8069_v56  ;;  %v6525_v23 = vld [vmem:[%s9331_s15 + $0x38] sm:$0xff]  ;;  %v3443_v27 = vld [vmem:[%s9331_s15 + $0x40] sm:$0xf]  ;;  %v6341_v13 = vld [vmem:[%s9332_s19 + $0x8] sm:$0xf] }
 0x63f   :  { %3816 = vmatpush.bf16.msra.mxu3 %v3744_v33  ;;  %v3462_v55 = vpack.c.bf16 %v3340_v1, %v3339_v29  ;;  %v3421_v4 = vmax.f32 %v3412_v35, 0.0  ;;  %v3355_v62 = vadd.f32 %v8075_v6, %v8069_v56  ;;  %v3356_v24 = vadd.f32 %v8078_v38, %v8069_v56 }
 0x640   :  { %3552 = vmatpush.bf16.msra.mxu0 %v3467_v47  ;;  %v3393_v32 = vmax.f32 %v3384_v59, 0.0  ;;  %v3394_v36 = vmax.f32 %v3385_v46, 0.0  ;;  %v3328_v39 = vadd.f32 %v8069_v56, %v8052_v53  ;;  %v3329_v28 = vadd.f32 %v8069_v56, %v8055_v20  ;;  %v6351_v46 = vld [vmem:[%s9332_s19 + $0xc] sm:$0xf] }
 0x641   :  { %3678 = vmatpush.bf16.msra.mxu1 %v3462_v55  ;;  %v3748_v54 = vpack.c.bf16 %v3421_v4, %v3420_v50  ;;  %v3364_v42 = vmax.f32 %v3355_v62, 0.0  ;;  %v3365_v16 = vmax.f32 %v3356_v24, 0.0  ;;  %v3409_v58 = vadd.f32 %v8113_v25, %v8069_v56  ;;  %v6526_v25 = vld [vmem:[%s9330_s16] sm:$0xff] }
 0x642   :  { %v3743_v6 = vpack.c.bf16 %v3394_v36, %v3393_v32  ;;  %v3337_v40 = vmax.f32 %v3328_v39, 0.0  ;;  %v3338_v14 = vmax.f32 %v3329_v28, 0.0  ;;  %v3410_v38 = vadd.f32 %v8116_v3, %v8069_v56  ;;  %v6518_v3 = vld [vmem:[%s9331_s15] sm:$0xff] }
 0x643   :  { %3761 = vmatpush.bf16.msra.mxu2 %v3748_v54  ;;  %v3466_v43 = vpack.c.bf16 %v3365_v16, %v3364_v42  ;;  %v3418_v8 = vmax.f32 %v3409_v58, 0.0  ;;  %v3382_v53 = vadd.f32 %v8092_v0, %v8069_v56  ;;  %v3383_v20 = vadd.f32 %v8095_v63, %v8069_v56  ;;  %v6527_v56 = vld [vmem:[%s9330_s16 + $0x8] sm:$0xff] }
 0x644   :  { %3817 = vmatpush.bf16.msra.mxu3 %v3743_v6  ;;  %v3461_v30 = vpack.c.bf16 %v3338_v14, %v3337_v40  ;;  %v3419_v41 = vmax.f32 %v3410_v38, 0.0  ;;  %v6519_v63 = vld [vmem:[%s9331_s15 + $0x8] sm:$0xff]  ;;  %v4012_v51 = vsel %vm179_vm0, %v6322_v26, 0  ;;  %v4087_v21 = vsel %vm179_vm0, %v3910_v34, 0 }
 0x645   :  { %3553 = vmatpush.bf16.msra.mxu0 %v3466_v43  ;;  %v3391_v19 = vmax.f32 %v3382_v53, 0.0  ;;  %v3392_v48 = vmax.f32 %v3383_v20, 0.0  ;;  %v3504_v9 = vunpack.c.l.b16 %v3460_v44  ;;  %v3632_v12 = vunpack.c.l.b16 %v3443_v27 }
 0x646   :  { %3679 = vmatpush.bf16.msra.mxu1 %v3461_v30  ;;  %v3747_v0 = vpack.c.bf16 %v3419_v41, %v3418_v8  ;;  %v4199_v33 = vsel %vm179_vm0, %v6341_v13, 0  ;;  %v4344_v55 = vsel %vm179_vm0, %v6351_v46, 0 }
 0x647   :  { %v3742_v10 = vpack.c.bf16 %v3392_v48, %v3391_v19  ;;  %v3513_v17 = vpack.c.b16 %v3504_v9, %v3504_v9  ;;  %v3641_v52 = vpack.c.b16 %v3632_v12, %v3632_v12 }
 0x648   :  { %3762 = vmatpush.bf16.msra.mxu2 %v3747_v0  ;;  %6254 = vmatmul.msk.bf16.vlgmr.msra.gmra.mxu0 %vm3514_vm14, %v6526_v25 }
 0x649   :  { %3818 = vmatpush.bf16.msra.mxu3 %v3742_v10  ;;  %6295 = vmatmul.msk.bf16.vlgmr.msra.gmra.mxu1 %vm3514_vm14, %v6518_v3 }
 0x64a   :  { %4021 = vmatpush.bf16.msrb.mxu0 %v4012_v51  ;;  %4096 = vmatpush.bf16.msrb.mxu1 %v4087_v21 }
 0x64b   :  { %6304 = vmatmul.msk.bf16.vlgmr.msra.gmra.mxu2 %vm3514_vm14, %v6526_v25 }
 0x64c   :  { %6313 = vmatmul.msk.bf16.vlgmr.msra.gmra.mxu3 %vm3514_vm14, %v6518_v3  ;;  %4208 = vmatpush.bf16.msrb.mxu2 %v4199_v33 }
 0x64d   :  { %4353 = vmatpush.bf16.msrb.mxu3 %v4344_v55 }
 0x658   :  { %6255 = vmatmul.msk.bf16.gmra.mxu0 %vm3514_vm14, %v6527_v56 }
 0x659   :  { %6296 = vmatmul.msk.bf16.gmra.mxu1 %vm3514_vm14, %v6519_v63 }
 0x65b   :  { %6305 = vmatmul.msk.bf16.gmra.mxu2 %vm3514_vm14, %v6527_v56 }
 0x65c   :  { %6314 = vmatmul.msk.bf16.gmra.mxu3 %vm3514_vm14, %v6519_v63 }
 0x668   :  { %6256 = vmatmul.msk.bf16.gmra.mxu0 %vm3514_vm14, %v6528_v18 }
 0x669   :  { %6297 = vmatmul.msk.bf16.gmra.mxu1 %vm3514_vm14, %v6520_v22 }
 0x66b   :  { %6306 = vmatmul.msk.bf16.gmra.mxu2 %vm3514_vm14, %v6528_v18 }
 0x66c   :  { %6315 = vmatmul.msk.bf16.gmra.mxu3 %vm3514_vm14, %v6520_v22 }
 0x678   :  { %6257 = vmatmul.msk.bf16.gmra.mxu0 %vm3514_vm14, %v6529_v45 }
 0x679   :  { %6298 = vmatmul.msk.bf16.gmra.mxu1 %vm3514_vm14, %v6521_v15 }
 0x67b   :  { %6307 = vmatmul.msk.bf16.gmra.mxu2 %vm3514_vm14, %v6529_v45 }
 0x67c   :  { %6316 = vmatmul.msk.bf16.gmra.mxu3 %vm3514_vm14, %v6521_v15 }
 0x688   :  { %6258 = vmatmul.msk.bf16.gmra.mxu0 %vm3514_vm14, %v6530_v11 }
 0x689   :  { %6299 = vmatmul.msk.bf16.gmra.mxu1 %vm3514_vm14, %v6522_v5 }
 0x68b   :  { %6308 = vmatmul.msk.bf16.gmra.mxu2 %vm3514_vm14, %v6530_v11 }
 0x68c   :  { %6317 = vmatmul.msk.bf16.gmra.mxu3 %vm3514_vm14, %v6522_v5 }
 0x698   :  { %6259 = vmatmul.msk.bf16.gmra.mxu0 %vm3514_vm14, %v6531_v49 }
 0x699   :  { %6300 = vmatmul.msk.bf16.gmra.mxu1 %vm3514_vm14, %v6523_v7 }
 0x69b   :  { %6309 = vmatmul.msk.bf16.gmra.mxu2 %vm3514_vm14, %v6531_v49 }
 0x69c   :  { %6318 = vmatmul.msk.bf16.gmra.mxu3 %vm3514_vm14, %v6523_v7 }
 0x6a8   :  { %6260 = vmatmul.msk.bf16.gmra.mxu0 %vm3514_vm14, %v6532_v61 }
 0x6a9   :  { %6301 = vmatmul.msk.bf16.gmra.mxu1 %vm3514_vm14, %v6524_v57 }
 0x6ab   :  { %6310 = vmatmul.msk.bf16.gmra.mxu2 %vm3514_vm14, %v6532_v61 }
 0x6ac   :  { %6319 = vmatmul.msk.bf16.gmra.mxu3 %vm3514_vm14, %v6524_v57 }
 0x6b8   :  { %6261 = vmatmul.msk.bf16.gmra.mxu0 %vm3514_vm14, %v6533_v2 }
 0x6b9   :  { %6302 = vmatmul.msk.bf16.gmra.mxu1 %vm3514_vm14, %v6525_v23 }
 0x6bb   :  { %6311 = vmatmul.msk.bf16.gmra.mxu2 %vm3514_vm14, %v6533_v2 }
 0x6bc   :  { %6320 = vmatmul.msk.bf16.gmra.mxu3 %vm3514_vm14, %v6525_v23 }
 0x6c5   :  { %v3555_v60 = vpop.f32.mrf.mxu0 }
 0x6c6   :  { %v3681_v31 = vpop.f32.mrf.mxu1 }
 0x6c7   :  { %v3682_v37 = vadd.f32 %v3681_v31, %v3555_v60 }
 0x6c8   :  { %6262 = vmatmul.msk.bf16.gmra.mxu0 %vm3514_vm14, %v3513_v17 }
 0x6c9   :  { %3725 = vst.msk [vmem:[#allocation5 + $0x6] sm:$0xff] %vm109_vm1, %v3682_v37  ;;  %6303 = vmatmul.msk.bf16.gmra.mxu1 %vm3514_vm14, %v3641_v52 }
 0x6cb   :  { %6312 = vmatmul.msk.bf16.gmra.mxu2 %vm3514_vm14, %v3513_v17 }
 0x6cc   :  { %6321 = vmatmul.msk.bf16.gmra.mxu3 %vm3514_vm14, %v3641_v52 }
 0x6cd   :  { %v3557_v29 = vpop.f32.mrf.mxu0 }
 0x6ce   :  { %v3683_v1 = vpop.f32.mrf.mxu1  ;;  %v3764_v35 = vpop.f32.mrf.mxu2 }
 0x6cf   :  { %v3684_v47 = vadd.f32 %v3683_v1, %v3557_v29  ;;  %v3820_v50 = vpop.f32.mrf.mxu3 }
 0x6d0   :  { %v3821_v59 = vadd.f32 %v3820_v50, %v3764_v35  ;;  %v3882_v39 = vld [vmem:[#allocation5] sm:$0xff] }
 0x6d1   :  { %3726 = vst.msk [vmem:[#allocation5 + $0xe] sm:$0xff] %vm109_vm1, %v3684_v47 }
 0x6d2   :  { %3865 = vst.msk [vmem:[#allocation5 + $0x9e] sm:$0xff] %vm109_vm1, %v3821_v59 }
 0x6d5   :  { %v3560_v4 = vpop.f32.mrf.mxu0 }
 0x6d6   :  { %v3686_v62 = vpop.f32.mrf.mxu1  ;;  %v3766_v24 = vpop.f32.mrf.mxu2 }
 0x6d7   :  { %v3687_v32 = vadd.f32 %v3686_v62, %v3560_v4  ;;  %v3822_v36 = vpop.f32.mrf.mxu3 }
 0x6d8   :  { %v3883_v28 = vld [vmem:[#allocation5 + $0x8] sm:$0xff]  ;;  %v3823_v54 = vadd.f32 %v3822_v36, %v3766_v24 }
 0x6d9   :  { %3727 = vst.msk [vmem:[#allocation5 + $0x16] sm:$0xff] %vm109_vm1, %v3687_v32  ;;  %v3901_v42 = vpack.c.bf16 %v3883_v28, %v3882_v39 }
 0x6da   :  { %3866 = vst.msk [vmem:[#allocation5 + $0xa6] sm:$0xff] %vm109_vm1, %v3823_v54 }
 0x6db   :  { %6332 = vmatmul.msk.bf16.vlgmr.msrb.gmra.mxu1 %vm109_vm1, %v3901_v42  ;;  %v3914_v16 = vshrl.u32 %v3901_v42, 16  ;;  %v3916_v58 = vshll.u32 %v3901_v42, 16  ;;  %v4154_v22 = vrot.slane %v3901_v42, 1  ;;  %v4689_v5 = vrot.slane %v3901_v42, 3 }
 0x6dc   :  { %v4421_v49 = vrot.slane %v3901_v42, 2 }
 0x6dd   :  { %v3562_v6 = vpop.f32.mrf.mxu0  ;;  %v4544_v40 = vrot.slane %v3914_v16, 2  ;;  %v4545_v43 = vrot.slane %v3916_v58, 3  ;;  %v3918_v56 = vrot.slane %v3916_v58, 1  ;;  %v4276_v45 = vrot.slane %v3914_v16, 1 }
 0x6de   :  { %v3688_v14 = vpop.f32.mrf.mxu1  ;;  %v3769_v38 = vpop.f32.mrf.mxu2  ;;  %v4277_v15 = vrot.slane %v3916_v58, 2 }
 0x6df   :  { %v3689_v8 = vadd.f32 %v3688_v14, %v3562_v6  ;;  %v3825_v53 = vpop.f32.mrf.mxu3  ;;  %v4546_v30 = vor.u32 %v4545_v43, %v4544_v40  ;;  %v3919_v11 = vor.u32 %v3918_v56, %v3914_v16 }
 0x6e0   :  { %v3826_v20 = vadd.f32 %v3825_v53, %v3769_v38  ;;  %v3884_v0 = vld [vmem:[#allocation5 + $0x10] sm:$0xff]  ;;  %v4278_v13 = vor.u32 %v4277_v15, %v4276_v45 }
 0x6e1   :  { %3728 = vst.msk [vmem:[#allocation5 + $0x1e] sm:$0xff] %vm109_vm1, %v3689_v8 }
 0x6e2   :  { %3867 = vst.msk [vmem:[#allocation5 + $0xae] sm:$0xff] %vm109_vm1, %v3826_v20 }
 0x6e5   :  { %v3565_v41 = vpop.f32.mrf.mxu0 }
 0x6e6   :  { %v3691_v25 = vpop.f32.mrf.mxu1  ;;  %v3771_v19 = vpop.f32.mrf.mxu2 }
 0x6e7   :  { %v3692_v48 = vadd.f32 %v3691_v25, %v3565_v41  ;;  %v3827_v3 = vpop.f32.mrf.mxu3 }
 0x6e8   :  { %v3885_v10 = vld [vmem:[#allocation5 + $0x18] sm:$0xff]  ;;  %v3828_v63 = vadd.f32 %v3827_v3, %v3771_v19 }
 0x6e9   :  { %3729 = vst.msk [vmem:[#allocation5 + $0x26] sm:$0xff] %vm109_vm1, %v3692_v48  ;;  %v8303_v18 = vpack.c.bf16 %v3885_v10, %v3884_v0 }
 0x6ea   :  { %3868 = vst.msk [vmem:[#allocation5 + $0xb6] sm:$0xff] %vm109_vm1, %v3828_v63 }
 0x6eb   :  { %6333 = vmatmul.msk.bf16.gmra.mxu1 %vm109_vm1, %v8303_v18  ;;  %v4155_v26 = vrot.slane %v8303_v18, 1  ;;  %v3921_v34 = vshll.u32 %v8303_v18, 16  ;;  %v3925_v51 = vshrl.u32 %v8303_v18, 16  ;;  %v4690_v21 = vrot.slane %v8303_v18, 3 }
 0x6ec   :  { %v4422_v7 = vrot.slane %v8303_v18, 2 }
 0x6ed   :  { %v3567_v61 = vpop.f32.mrf.mxu0  ;;  %v4156_v57 = vsel %vm230_vm2, %v4154_v22, %v4155_v26  ;;  %v3923_v2 = vrot.slane %v3921_v34, 1  ;;  %v4279_v23 = vrot.slane %v3925_v51, 1  ;;  %v4280_v44 = vrot.slane %v3921_v34, 2 }
 0x6ee   :  { %v3693_v27 = vpop.f32.mrf.mxu1  ;;  %6342 = vmatmul.msk.bf16.vlgmr.msrb.gmra.mxu2 %vm109_vm1, %v4156_v57  ;;  %v3774_v9 = vpop.f32.mrf.mxu2  ;;  %v4547_v12 = vrot.slane %v3925_v51, 2  ;;  %v4548_v17 = vrot.slane %v3921_v34, 3  ;;  %v8316_v60 = vsel %vm382_vm6, %v4689_v5, %v4690_v21  ;;  %v8319_v52 = vsel %vm306_vm7, %v4421_v49, %v4422_v7 }
 0x6ef   :  { %v3694_v31 = vadd.f32 %v3693_v27, %v3567_v61  ;;  %v3924_v37 = vsel %vm158_vm3, %v3919_v11, %v3923_v2  ;;  %v4281_v33 = vor.u32 %v4280_v44, %v4279_v23  ;;  %v3830_v29 = vpop.f32.mrf.mxu3  ;;  %v3927_v58 = vor.u32 %v3925_v51, %v3923_v2  ;;  %v6361_v2 = vld [vmem:[%s9332_s19 + $0x10] sm:$0xf] }
 0x6f0   :  { %6323 = vmatmul.msk.bf16.vlgmr.msrb.gmra.mxu0 %vm109_vm1, %v3924_v37  ;;  %v3831_v1 = vadd.f32 %v3830_v29, %v3774_v9  ;;  %v4549_v35 = vor.u32 %v4548_v17, %v4547_v12  ;;  %v3886_v24 = vld [vmem:[#allocation5 + $0x20] sm:$0xff]  ;;  %v4468_v27 = vsel %vm179_vm0, %v6361_v2, 0 }
 0x6f1   :  { %3730 = vst.msk [vmem:[#allocation5 + $0x2e] sm:$0xff] %vm109_vm1, %v3694_v31  ;;  %v4282_v47 = vsel %vm266_vm4, %v4278_v13, %v4281_v33  ;;  %4477 = vmatpush.bf16.msra.mxu0 %v4468_v27 }
 0x6f2   :  { %6352 = vmatmul.msk.bf16.vlgmr.msrb.gmra.mxu3 %vm109_vm1, %v4282_v47  ;;  %3869 = vst.msk [vmem:[#allocation5 + $0xbe] sm:$0xff] %vm109_vm1, %v3831_v1  ;;  %v8328_v50 = vsel %vm342_vm5, %v4546_v30, %v4549_v35 }
 0x6f5   :  { %v3570_v59 = vpop.f32.mrf.mxu0 }
 0x6f6   :  { %v3696_v46 = vpop.f32.mrf.mxu1  ;;  %v3776_v55 = vpop.f32.mrf.mxu2 }
 0x6f7   :  { %v3697_v4 = vadd.f32 %v3696_v46, %v3570_v59  ;;  %v3832_v62 = vpop.f32.mrf.mxu3 }
 0x6f8   :  { %v3887_v32 = vld [vmem:[#allocation5 + $0x28] sm:$0xff]  ;;  %v3833_v36 = vadd.f32 %v3832_v62, %v3776_v55 }
 0x6f9   :  { %3731 = vst.msk [vmem:[#allocation5 + $0x36] sm:$0xff] %vm109_vm1, %v3697_v4  ;;  %v8331_v39 = vpack.c.bf16 %v3887_v32, %v3886_v24 }
 0x6fa   :  { %3870 = vst.msk [vmem:[#allocation5 + $0xc6] sm:$0xff] %vm109_vm1, %v3833_v36 }
 0x6fb   :  { %6334 = vmatmul.msk.bf16.gmra.mxu1 %vm109_vm1, %v8331_v39  ;;  %v4157_v28 = vrot.slane %v8331_v39, 1  ;;  %v3929_v54 = vshll.u32 %v8331_v39, 16  ;;  %v3933_v42 = vshrl.u32 %v8331_v39, 16  ;;  %v4692_v16 = vrot.slane %v8331_v39, 3 }
 0x6fc   :  { %v4424_v6 = vrot.slane %v8331_v39, 2  ;;  %v6371_v39 = vld [vmem:[%s9332_s19 + $0x14] sm:$0xf] }
 0x6fd   :  { %v3572_v40 = vpop.f32.mrf.mxu0  ;;  %v4158_v14 = vsel %vm230_vm2, %v4155_v26, %v4157_v28  ;;  %v3931_v38 = vrot.slane %v3929_v54, 1  ;;  %v4283_v43 = vrot.slane %v3933_v42, 1  ;;  %v4284_v8 = vrot.slane %v3929_v54, 2 }
 0x6fe   :  { %v3698_v53 = vpop.f32.mrf.mxu1  ;;  %6343 = vmatmul.msk.bf16.gmra.mxu2 %vm109_vm1, %v4158_v14  ;;  %v3779_v20 = vpop.f32.mrf.mxu2  ;;  %v4551_v30 = vrot.slane %v3933_v42, 2  ;;  %v4552_v41 = vrot.slane %v3929_v54, 3  ;;  %v8344_v25 = vsel %vm382_vm6, %v4690_v21, %v4692_v16  ;;  %v8347_v19 = vsel %vm306_vm7, %v4422_v7, %v4424_v6 }
 0x6ff   :  { %v3699_v48 = vadd.f32 %v3698_v53, %v3572_v40  ;;  %v3932_v3 = vsel %vm158_vm3, %v3927_v58, %v3931_v38  ;;  %v4285_v0 = vor.u32 %v4284_v8, %v4283_v43  ;;  %v3835_v10 = vpop.f32.mrf.mxu3  ;;  %v3935_v44 = vor.u32 %v3933_v42, %v3931_v38 }
 0x700   :  { %6324 = vmatmul.msk.bf16.gmra.mxu0 %vm109_vm1, %v3932_v3  ;;  %v3836_v56 = vadd.f32 %v3835_v10, %v3779_v20  ;;  %v4553_v63 = vor.u32 %v4552_v41, %v4551_v30  ;;  %v3888_v21 = vld [vmem:[#allocation5 + $0x30] sm:$0xff] }
 0x701   :  { %3732 = vst.msk [vmem:[#allocation5 + $0x3e] sm:$0xff] %vm109_vm1, %v3699_v48  ;;  %v4286_v18 = vsel %vm266_vm4, %v4281_v33, %v4285_v0 }
 0x702   :  { %6353 = vmatmul.msk.bf16.gmra.mxu3 %vm109_vm1, %v4286_v18  ;;  %3871 = vst.msk [vmem:[#allocation5 + $0xce] sm:$0xff] %vm109_vm1, %v3836_v56  ;;  %v8356_v22 = vsel %vm342_vm5, %v4549_v35, %v4553_v63 }
 0x705   :  { %v3575_v45 = vpop.f32.mrf.mxu0 }
 0x706   :  { %v3701_v15 = vpop.f32.mrf.mxu1  ;;  %v3781_v26 = vpop.f32.mrf.mxu2 }
 0x707   :  { %v3702_v34 = vadd.f32 %v3701_v15, %v3575_v45  ;;  %v3837_v51 = vpop.f32.mrf.mxu3 }
 0x708   :  { %v3889_v11 = vld [vmem:[#allocation5 + $0x38] sm:$0xff]  ;;  %v3838_v5 = vadd.f32 %v3837_v51, %v3781_v26 }
 0x709   :  { %3733 = vst.msk [vmem:[#allocation5 + $0x46] sm:$0xff] %vm109_vm1, %v3702_v34  ;;  %v8359_v49 = vpack.c.bf16 %v3889_v11, %v3888_v21 }
 0x70a   :  { %3872 = vst.msk [vmem:[#allocation5 + $0xd6] sm:$0xff] %vm109_vm1, %v3838_v5 }
 0x70b   :  { %6335 = vmatmul.msk.bf16.gmra.mxu1 %vm109_vm1, %v8359_v49  ;;  %v4159_v7 = vrot.slane %v8359_v49, 1  ;;  %v3937_v61 = vshll.u32 %v8359_v49, 16  ;;  %v3941_v57 = vshrl.u32 %v8359_v49, 16  ;;  %v4694_v23 = vrot.slane %v8359_v49, 3 }
 0x70c   :  { %v4426_v9 = vrot.slane %v8359_v49, 2 }
 0x70d   :  { %v3577_v12 = vpop.f32.mrf.mxu0  ;;  %v4160_v17 = vsel %vm230_vm2, %v4157_v28, %v4159_v7  ;;  %v3939_v31 = vrot.slane %v3937_v61, 1  ;;  %v4287_v37 = vrot.slane %v3941_v57, 1  ;;  %v4288_v13 = vrot.slane %v3937_v61, 2 }
 0x70e   :  { %v3703_v33 = vpop.f32.mrf.mxu1  ;;  %6344 = vmatmul.msk.bf16.gmra.mxu2 %vm109_vm1, %v4160_v17  ;;  %v3784_v29 = vpop.f32.mrf.mxu2  ;;  %v4555_v1 = vrot.slane %v3941_v57, 2  ;;  %v4556_v35 = vrot.slane %v3937_v61, 3  ;;  %v8376_v47 = vsel %vm382_vm6, %v4692_v16, %v4694_v23  ;;  %v8379_v59 = vsel %vm306_vm7, %v4424_v6, %v4426_v9 }
 0x70f   :  { %v3704_v46 = vadd.f32 %v3703_v33, %v3577_v12  ;;  %v3940_v55 = vsel %vm158_vm3, %v3935_v44, %v3939_v31  ;;  %v4289_v4 = vor.u32 %v4288_v13, %v4287_v37  ;;  %v3840_v62 = vpop.f32.mrf.mxu3  ;;  %v4613_v28 = vsel %vm179_vm0, %v6371_v39, 0 }
 0x710   :  { %6325 = vmatmul.msk.bf16.gmra.mxu0 %vm109_vm1, %v3940_v55  ;;  %v3841_v24 = vadd.f32 %v3840_v62, %v3784_v29  ;;  %v4557_v32 = vor.u32 %v4556_v35, %v4555_v1  ;;  %4622 = vmatpush.bf16.msra.mxu1 %v4613_v28  ;;  %v3890_v14 = vld [vmem:[#allocation5 + $0x40] sm:$0xff]  ;;  %v3943_v48 = vor.u32 %v3941_v57, %v3939_v31 }
 0x711   :  { %3734 = vst.msk [vmem:[#allocation5 + $0x4e] sm:$0xff] %vm109_vm1, %v3704_v46  ;;  %v4290_v36 = vsel %vm266_vm4, %v4285_v0, %v4289_v4 }
 0x712   :  { %6354 = vmatmul.msk.bf16.gmra.mxu3 %vm109_vm1, %v4290_v36  ;;  %3873 = vst.msk [vmem:[#allocation5 + $0xde] sm:$0xff] %vm109_vm1, %v3841_v24  ;;  %v8392_v54 = vsel %vm342_vm5, %v4553_v63, %v4557_v32 }
 0x715   :  { %v3580_v42 = vpop.f32.mrf.mxu0 }
 0x716   :  { %v3706_v16 = vpop.f32.mrf.mxu1  ;;  %v3786_v58 = vpop.f32.mrf.mxu2 }
 0x717   :  { %v3707_v6 = vadd.f32 %v3706_v16, %v3580_v42  ;;  %v3842_v40 = vpop.f32.mrf.mxu3 }
 0x718   :  { %v3891_v38 = vld [vmem:[#allocation5 + $0x48] sm:$0xff]  ;;  %v3843_v43 = vadd.f32 %v3842_v40, %v3786_v58 }
 0x719   :  { %3735 = vst.msk [vmem:[#allocation5 + $0x56] sm:$0xff] %vm109_vm1, %v3707_v6  ;;  %v8395_v8 = vpack.c.bf16 %v3891_v38, %v3890_v14 }
 0x71a   :  { %3874 = vst.msk [vmem:[#allocation5 + $0xe6] sm:$0xff] %vm109_vm1, %v3843_v43 }
 0x71b   :  { %6336 = vmatmul.msk.bf16.gmra.mxu1 %vm109_vm1, %v8395_v8  ;;  %v4161_v53 = vrot.slane %v8395_v8, 1  ;;  %v3945_v20 = vshll.u32 %v8395_v8, 16  ;;  %v3949_v30 = vshrl.u32 %v8395_v8, 16  ;;  %v4696_v41 = vrot.slane %v8395_v8, 3 }
 0x71c   :  { %v4428_v3 = vrot.slane %v8395_v8, 2 }
 0x71d   :  { %v3582_v0 = vpop.f32.mrf.mxu0  ;;  %v4162_v10 = vsel %vm230_vm2, %v4159_v7, %v4161_v53  ;;  %v3947_v56 = vrot.slane %v3945_v20, 1  ;;  %v4291_v63 = vrot.slane %v3949_v30, 1  ;;  %v4292_v18 = vrot.slane %v3945_v20, 2 }
 0x71e   :  { %v3708_v45 = vpop.f32.mrf.mxu1  ;;  %6345 = vmatmul.msk.bf16.gmra.mxu2 %vm109_vm1, %v4162_v10  ;;  %v3789_v15 = vpop.f32.mrf.mxu2  ;;  %v4559_v26 = vrot.slane %v3949_v30, 2  ;;  %v4560_v34 = vrot.slane %v3945_v20, 3  ;;  %v8408_v51 = vsel %vm382_vm6, %v4694_v23, %v4696_v41  ;;  %v8411_v21 = vsel %vm306_vm7, %v4426_v9, %v4428_v3 }
 0x71f   :  { %v3709_v11 = vadd.f32 %v3708_v45, %v3582_v0  ;;  %v3948_v5 = vsel %vm158_vm3, %v3943_v48, %v3947_v56  ;;  %v4293_v49 = vor.u32 %v4292_v18, %v4291_v63  ;;  %v3845_v7 = vpop.f32.mrf.mxu3  ;;  %v3951_v55 = vor.u32 %v3949_v30, %v3947_v56 }
 0x720   :  { %6326 = vmatmul.msk.bf16.gmra.mxu0 %vm109_vm1, %v3948_v5  ;;  %v3846_v61 = vadd.f32 %v3845_v7, %v3789_v15  ;;  %v4561_v57 = vor.u32 %v4560_v34, %v4559_v26  ;;  %v3892_v31 = vld [vmem:[#allocation5 + $0x50] sm:$0xff] }
 0x721   :  { %3736 = vst.msk [vmem:[#allocation5 + $0x5e] sm:$0xff] %vm109_vm1, %v3709_v11  ;;  %v4294_v2 = vsel %vm266_vm4, %v4289_v4, %v4293_v49 }
 0x722   :  { %6355 = vmatmul.msk.bf16.gmra.mxu3 %vm109_vm1, %v4294_v2  ;;  %3875 = vst.msk [vmem:[#allocation5 + $0xee] sm:$0xff] %vm109_vm1, %v3846_v61  ;;  %v8420_v23 = vsel %vm342_vm5, %v4557_v32, %v4561_v57 }
 0x725   :  { %v3585_v44 = vpop.f32.mrf.mxu0 }
 0x726   :  { %v3711_v27 = vpop.f32.mrf.mxu1  ;;  %v3791_v9 = vpop.f32.mrf.mxu2 }
 0x727   :  { %v3712_v12 = vadd.f32 %v3711_v27, %v3585_v44  ;;  %v3847_v17 = vpop.f32.mrf.mxu3 }
 0x728   :  { %v3893_v37 = vld [vmem:[#allocation5 + $0x58] sm:$0xff]  ;;  %v3848_v13 = vadd.f32 %v3847_v17, %v3791_v9 }
 0x729   :  { %3737 = vst.msk [vmem:[#allocation5 + $0x66] sm:$0xff] %vm109_vm1, %v3712_v12  ;;  %v8423_v33 = vpack.c.bf16 %v3893_v37, %v3892_v31 }
 0x72a   :  { %3876 = vst.msk [vmem:[#allocation5 + $0xf6] sm:$0xff] %vm109_vm1, %v3848_v13 }
 0x72b   :  { %6337 = vmatmul.msk.bf16.gmra.mxu1 %vm109_vm1, %v8423_v33  ;;  %v4163_v29 = vrot.slane %v8423_v33, 1  ;;  %v3953_v1 = vshll.u32 %v8423_v33, 16  ;;  %v3957_v35 = vshrl.u32 %v8423_v33, 16  ;;  %v4698_v46 = vrot.slane %v8423_v33, 3 }
 0x72c   :  { %v4430_v4 = vrot.slane %v8423_v33, 2 }
 0x72d   :  { %v3587_v62 = vpop.f32.mrf.mxu0  ;;  %v4164_v24 = vsel %vm230_vm2, %v4161_v53, %v4163_v29  ;;  %v3955_v32 = vrot.slane %v3953_v1, 1  ;;  %v4295_v36 = vrot.slane %v3957_v35, 1  ;;  %v4296_v39 = vrot.slane %v3953_v1, 2 }
 0x72e   :  { %v3713_v28 = vpop.f32.mrf.mxu1  ;;  %6346 = vmatmul.msk.bf16.gmra.mxu2 %vm109_vm1, %v4164_v24  ;;  %v3794_v42 = vpop.f32.mrf.mxu2  ;;  %v4563_v16 = vrot.slane %v3957_v35, 2  ;;  %v4564_v58 = vrot.slane %v3953_v1, 3  ;;  %v8436_v6 = vsel %vm382_vm6, %v4696_v41, %v4698_v46  ;;  %v8439_v40 = vsel %vm306_vm7, %v4428_v3, %v4430_v4 }
 0x72f   :  { %v3714_v14 = vadd.f32 %v3713_v28, %v3587_v62  ;;  %v3956_v38 = vsel %vm158_vm3, %v3951_v55, %v3955_v32  ;;  %v4297_v43 = vor.u32 %v4296_v39, %v4295_v36  ;;  %v3850_v8 = vpop.f32.mrf.mxu3 }
 0x730   :  { %6327 = vmatmul.msk.bf16.gmra.mxu0 %vm109_vm1, %v3956_v38  ;;  %v3851_v53 = vadd.f32 %v3850_v8, %v3794_v42  ;;  %v4565_v20 = vor.u32 %v4564_v58, %v4563_v16  ;;  %v3894_v63 = vld [vmem:[#allocation5 + $0x60] sm:$0xff] }
 0x731   :  { %3738 = vst.msk [vmem:[#allocation5 + $0x6e] sm:$0xff] %vm109_vm1, %v3714_v14  ;;  %v4298_v30 = vsel %vm266_vm4, %v4293_v49, %v4297_v43  ;;  %v3959_v49 = vor.u32 %v3957_v35, %v3955_v32 }
 0x732   :  { %6356 = vmatmul.msk.bf16.gmra.mxu3 %vm109_vm1, %v4298_v30  ;;  %3877 = vst.msk [vmem:[#allocation5 + $0xfe] sm:$0xff] %vm109_vm1, %v3851_v53  ;;  %v8448_v41 = vsel %vm342_vm5, %v4561_v57, %v4565_v20 }
 0x735   :  { %v3590_v48 = vpop.f32.mrf.mxu0 }
 0x736   :  { %v3716_v3 = vpop.f32.mrf.mxu1  ;;  %v3796_v0 = vpop.f32.mrf.mxu2 }
 0x737   :  { %v3717_v10 = vadd.f32 %v3716_v3, %v3590_v48  ;;  %v3852_v56 = vpop.f32.mrf.mxu3 }
 0x738   :  { %v3895_v18 = vld [vmem:[#allocation5 + $0x68] sm:$0xff]  ;;  %v3853_v45 = vadd.f32 %v3852_v56, %v3796_v0 }
 0x739   :  { %3739 = vst.msk [vmem:[#allocation5 + $0x76] sm:$0xff] %vm109_vm1, %v3717_v10  ;;  %v8451_v15 = vpack.c.bf16 %v3895_v18, %v3894_v63 }
 0x73a   :  { %3878 = vst.msk [vmem:[#allocation5 + $0x106] sm:$0xff] %vm109_vm1, %v3853_v45 }
 0x73b   :  { %6338 = vmatmul.msk.bf16.gmra.mxu1 %vm109_vm1, %v8451_v15  ;;  %v4165_v26 = vrot.slane %v8451_v15, 1  ;;  %v3961_v34 = vshll.u32 %v8451_v15, 16  ;;  %v3965_v11 = vshrl.u32 %v8451_v15, 16  ;;  %v4700_v5 = vrot.slane %v8451_v15, 3 }
 0x73c   :  { %v4432_v7 = vrot.slane %v8451_v15, 2 }
 0x73d   :  { %v3592_v61 = vpop.f32.mrf.mxu0  ;;  %v4166_v57 = vsel %vm230_vm2, %v4163_v29, %v4165_v26  ;;  %v3963_v2 = vrot.slane %v3961_v34, 1  ;;  %v4299_v44 = vrot.slane %v3965_v11, 1  ;;  %v4300_v27 = vrot.slane %v3961_v34, 2 }
 0x73e   :  { %v3718_v9 = vpop.f32.mrf.mxu1  ;;  %6347 = vmatmul.msk.bf16.gmra.mxu2 %vm109_vm1, %v4166_v57  ;;  %v3799_v12 = vpop.f32.mrf.mxu2  ;;  %v4567_v17 = vrot.slane %v3965_v11, 2  ;;  %v4568_v31 = vrot.slane %v3961_v34, 3  ;;  %v8466_v37 = vsel %vm382_vm6, %v4698_v46, %v4700_v5  ;;  %v8469_v13 = vsel %vm306_vm7, %v4430_v4, %v4432_v7  ;;  %v3900_v4 = vld [vmem:[#allocation5 + $0x90] sm:$0xf] }
 0x73f   :  { %v3719_v33 = vadd.f32 %v3718_v9, %v3592_v61  ;;  %v3964_v29 = vsel %vm158_vm3, %v3959_v49, %v3963_v2  ;;  %v4301_v1 = vor.u32 %v4300_v27, %v4299_v44  ;;  %v3855_v35 = vpop.f32.mrf.mxu3  ;;  %v8480_v36 = vpack.c.bf16 %v3900_v4, %v3900_v4 }
 0x740   :  { %6328 = vmatmul.msk.bf16.gmra.mxu0 %vm109_vm1, %v3964_v29  ;;  %v3856_v55 = vadd.f32 %v3855_v35, %v3799_v12  ;;  %v4569_v62 = vor.u32 %v4568_v31, %v4567_v17  ;;  %v3896_v38 = vld [vmem:[#allocation5 + $0x70] sm:$0xff]  ;;  %v3967_v10 = vor.u32 %v3965_v11, %v3963_v2 }
 0x741   :  { %3740 = vst.msk [vmem:[#allocation5 + $0x7e] sm:$0xff] %vm109_vm1, %v3719_v33  ;;  %v4302_v24 = vsel %vm266_vm4, %v4297_v43, %v4301_v1  ;;  %v4312_v58 = vshll.u32 %v8480_v36, 16  ;;  %v4579_v14 = vshrl.u32 %v8480_v36, 16 }
 0x742   :  { %6357 = vmatmul.msk.bf16.gmra.mxu3 %vm109_vm1, %v4302_v24  ;;  %3879 = vst.msk [vmem:[#allocation5 + $0x10e] sm:$0xff] %vm109_vm1, %v3856_v55  ;;  %v8478_v46 = vsel %vm342_vm5, %v4565_v20, %v4569_v62 }
 0x743   :  { %v4581_v20 = vrot.slane %v4579_v14, 2  ;;  %v4582_v30 = vrot.slane %v4312_v58, 3 }
 0x745   :  { %v3595_v32 = vpop.f32.mrf.mxu0  ;;  %v4583_v18 = vor.u32 %v4582_v30, %v4581_v20 }
 0x746   :  { %v3721_v39 = vpop.f32.mrf.mxu1  ;;  %v3801_v28 = vpop.f32.mrf.mxu2 }
 0x747   :  { %v3722_v42 = vadd.f32 %v3721_v39, %v3595_v32  ;;  %v3857_v16 = vpop.f32.mrf.mxu3  ;;  %v4706_v39 = vrot.slane %v8480_v36, 3 }
 0x748   :  { %v3897_v43 = vld [vmem:[#allocation5 + $0x78] sm:$0xff]  ;;  %v3858_v8 = vadd.f32 %v3857_v16, %v3801_v28  ;;  %v4438_v28 = vrot.slane %v8480_v36, 2 }
 0x749   :  { %v8484_v53 = vpack.c.bf16 %v3897_v43, %v3896_v38  ;;  %3741 = vst.msk [vmem:[#allocation5 + $0x86] sm:$0xff] %vm109_vm1, %v3722_v42 }
 0x74a   :  { %3880 = vst.msk [vmem:[#allocation5 + $0x116] sm:$0xff] %vm109_vm1, %v3858_v8 }
 0x74b   :  { %6339 = vmatmul.msk.bf16.gmra.mxu1 %vm109_vm1, %v8484_v53  ;;  %v4167_v48 = vrot.slane %v8484_v53, 1  ;;  %v3969_v3 = vshll.u32 %v8484_v53, 16  ;;  %v3973_v0 = vshrl.u32 %v8484_v53, 16  ;;  %v4702_v56 = vrot.slane %v8484_v53, 3 }
 0x74c   :  { %v4434_v63 = vrot.slane %v8484_v53, 2 }
 0x74d   :  { %v4168_v45 = vsel %vm230_vm2, %v4165_v26, %v4167_v48  ;;  %v3971_v34 = vrot.slane %v3969_v3, 1  ;;  %v4303_v49 = vrot.slane %v3973_v0, 1  ;;  %v4304_v61 = vrot.slane %v3969_v3, 2  ;;  %v3597_v57 = vpop.f32.mrf.mxu0 }
 0x74e   :  { %6348 = vmatmul.msk.bf16.gmra.mxu2 %vm109_vm1, %v4168_v45  ;;  %v3723_v44 = vpop.f32.mrf.mxu1  ;;  %v3804_v27 = vpop.f32.mrf.mxu2  ;;  %v4571_v9 = vrot.slane %v3973_v0, 2  ;;  %v4572_v12 = vrot.slane %v3969_v3, 3  ;;  %v8502_v11 = vsel %vm382_vm6, %v4700_v5, %v4702_v56  ;;  %v8505_v2 = vsel %vm306_vm7, %v4432_v7, %v4434_v63 }
 0x74f   :  { %v3972_v26 = vsel %vm158_vm3, %v3967_v10, %v3971_v34  ;;  %v4305_v17 = vor.u32 %v4304_v61, %v4303_v49  ;;  %v3860_v31 = vpop.f32.mrf.mxu3  ;;  %v6381_v61 = vld [vmem:[%s9332_s19 + $0x18] sm:$0xf] }
 0x750   :  { %6329 = vmatmul.msk.bf16.gmra.mxu0 %vm109_vm1, %v3972_v26  ;;  %v3898_v33 = vld [vmem:[#allocation5 + $0x80] sm:$0xff]  ;;  %v3899_v29 = vld [vmem:[#allocation5 + $0x88] sm:$0xff]  ;;  %v3861_v35 = vadd.f32 %v3860_v31, %v3804_v27  ;;  %v4573_v55 = vor.u32 %v4572_v12, %v4571_v9  ;;  %v4736_v57 = vsel %vm179_vm0, %v6381_v61, 0  ;;  %v3975_v27 = vor.u32 %v3973_v0, %v3971_v34 }
 0x751   :  { %v4306_v24 = vsel %vm266_vm4, %v4301_v1, %v4305_v17  ;;  %v8510_v4 = vpack.c.bf16 %v3899_v29, %v3898_v33  ;;  %4745 = vmatpush.bf16.msra.mxu2 %v4736_v57  ;;  %v4871_v0 = vld [vmem:[#allocation5 + $0xa0] sm:$0xff]  ;;  %v4872_v34 = vld [vmem:[#allocation5 + $0xa8] sm:$0xff]  ;;  %v4873_v29 = vld [vmem:[#allocation5 + $0xb0] sm:$0xff] }
 0x752   :  { %6358 = vmatmul.msk.bf16.gmra.mxu3 %vm109_vm1, %v4306_v24  ;;  %3881 = vst.msk [vmem:[#allocation5 + $0x11e] sm:$0xff] %vm109_vm1, %v3861_v35  ;;  %v8515_v15 = vsel %vm342_vm5, %v4569_v62, %v4573_v55  ;;  %v4874_v24 = vld [vmem:[#allocation5 + $0xb8] sm:$0xff] }
 0x753   :  { %v8518_v5 = vshll.u32 %v8510_v4, 16  ;;  %v3981_v7 = vshrl.u32 %v8510_v4, 16  ;;  %v4704_v32 = vrot.slane %v8510_v4, 3  ;;  %v4436_v1 = vrot.slane %v8510_v4, 2 }
 0x754   :  { %v4169_v3 = vrot.slane %v8510_v4, 1 }
 0x755   :  { %v4575_v16 = vrot.slane %v3981_v7, 2  ;;  %v4576_v14 = vrot.slane %v8518_v5, 3  ;;  %v8527_v62 = vsel %vm382_vm6, %v4702_v56, %v4704_v32  ;;  %v8530_v38 = vsel %vm306_vm7, %v4434_v63, %v4436_v1 }
 0x756   :  { %v3806_v42 = vpop.f32.mrf.mxu2  ;;  %v8533_v8 = vsel %vm382_vm6, %v4704_v32, %v4706_v39  ;;  %v8536_v30 = vsel %vm306_vm7, %v4436_v1, %v4438_v28  ;;  %v4307_v10 = vrot.slane %v3981_v7, 1  ;;  %v4308_v45 = vrot.slane %v8518_v5, 2 }
 0x757   :  { %v3862_v43 = vpop.f32.mrf.mxu3  ;;  %v4577_v20 = vor.u32 %v4576_v14, %v4575_v16  ;;  %v3979_v49 = vrot.slane %v8518_v5, 1  ;;  %v4170_v44 = vsel %vm230_vm2, %v4167_v48, %v4169_v3  ;;  %v4870_v48 = vld [vmem:[#allocation5 + $0x98] sm:$0xff] }
 0x758   :  { %v4098_v53 = vpop.f32.mrf.mxu1  ;;  %v4309_v9 = vor.u32 %v4308_v45, %v4307_v10  ;;  %v8563_v35 = vpack.c.bf16 %v4871_v0, %v4870_v48  ;;  %v4314_v10 = vrot.slane %v4312_v58, 2 }
 0x759   :  { %v8541_v56 = vsel %vm342_vm5, %v4573_v55, %v4577_v20  ;;  %v8544_v63 = vsel %vm342_vm5, %v4577_v20, %v4583_v18  ;;  %v6391_v18 = vld [vmem:[%s9332_s19 + $0x4] sm:$0xf]  ;;  %v3980_v12 = vsel %vm158_vm3, %v3975_v27, %v3979_v49  ;;  %v8565_v55 = vpack.c.bf16 %v4873_v29, %v4872_v34 }
 0x75a   :  { %v4999_v26 = vsel %vm179_vm0, %v6391_v18, 0  ;;  %v4310_v33 = vsel %vm266_vm4, %v4305_v17, %v4309_v9  ;;  %v4901_v32 = vshrl.u32 %v8563_v35, 16  ;;  %v4903_v1 = vshll.u32 %v8563_v35, 16 }
 0x75b   :  { %6340 = vmatmul.msk.bf16.gmra.mxu1 %vm109_vm1, %v8510_v4  ;;  %5008 = vmatpush.bf16.msra.mxu3 %v4999_v26  ;;  %v4875_v4 = vld [vmem:[#allocation5 + $0xc0] sm:$0xff]  ;;  %v8572_v17 = vshrl.u32 %v8565_v55, 16  ;;  %v8577_v28 = vshll.u32 %v8565_v55, 16  ;;  %v3983_v57 = vor.u32 %v3981_v7, %v3979_v49  ;;  %v4315_v36 = vsel %vm266_vm4, %v4309_v9, %v4314_v10 }
 0x75c   :  { %v8568_v39 = vpack.c.bf16 %v4875_v4, %v4874_v24  ;;  %v5261_v14 = vrot.slane %v4901_v32, 1  ;;  %v5262_v43 = vrot.slane %v4903_v1, 2  ;;  %v5528_v7 = vrot.slane %v4903_v1, 3 }
 0x75d   :  { %v5264_v45 = vrot.slane %v8572_v17, 1  ;;  %v5265_v61 = vrot.slane %v8577_v28, 2  ;;  %v5530_v49 = vrot.slane %v8572_v17, 2  ;;  %v5531_v34 = vrot.slane %v8577_v28, 3 }
 0x75e   :  { %6349 = vmatmul.msk.bf16.gmra.mxu2 %vm109_vm1, %v4170_v44  ;;  %v8580_v42 = vshll.u32 %v8568_v39, 16  ;;  %v8583_v16 = vshrl.u32 %v8568_v39, 16  ;;  %v5263_v44 = vor.u32 %v5262_v43, %v5261_v14 }
 0x75f   :  { %v5266_v27 = vor.u32 %v5265_v61, %v5264_v45  ;;  %v5532_v43 = vor.u32 %v5531_v34, %v5530_v49  ;;  %v4876_v61 = vld [vmem:[#allocation5 + $0xc8] sm:$0xff] }
 0x760   :  { %6330 = vmatmul.msk.bf16.gmra.mxu0 %vm109_vm1, %v3980_v12  ;;  %v4100_v31 = vpop.f32.mrf.mxu1  ;;  %v5268_v18 = vrot.slane %v8583_v16, 1  ;;  %v5269_v12 = vrot.slane %v8580_v42, 2  ;;  %v5534_v29 = vrot.slane %v8583_v16, 2  ;;  %v5535_v9 = vrot.slane %v8580_v42, 3 }
 0x761   :  { %v8595_v58 = vsel %vm266_vm4, %v5263_v44, %v5266_v27 }
 0x762   :  { %6359 = vmatmul.msk.bf16.gmra.mxu3 %vm109_vm1, %v4310_v33  ;;  %v5270_v48 = vor.u32 %v5269_v12, %v5268_v18  ;;  %v5536_v45 = vor.u32 %v5535_v9, %v5534_v29 }
 0x764   :  { %v8613_v18 = vsel %vm342_vm5, %v5532_v43, %v5536_v45 }
 0x765   :  { %9355 = vst [vmem:[#allocation7_spill] sm:$0xff] %v8613_v18 }
 0x768   :  { %v4103_v5 = vpop.f32.mrf.mxu1 }
 0x76b   :  { %6372 = vmatmul.msk.bf16.vlgmr.msra.gmra.mxu1 %vm109_vm1, %v8328_v50 }
 0x76d   :  { %v4023_v20 = vpop.f32.mrf.mxu0 }
 0x76e   :  { %v4099_v50 = vadd.f32 %v4098_v53, %v4023_v20  ;;  %6350 = vmatmul.msk.bf16.gmra.mxu2 %vm109_vm1, %v4169_v3  ;;  %v5527_v53 = vrot.slane %v4901_v32, 2  ;;  %v8599_v3 = vsel %vm266_vm4, %v5266_v27, %v5270_v48 }
 0x770   :  { %6331 = vmatmul.msk.bf16.gmra.mxu0 %vm109_vm1, %v3983_v57  ;;  %v4105_v26 = vpop.f32.mrf.mxu1  ;;  %v5529_v24 = vor.u32 %v5528_v7, %v5527_v53 }
 0x771   :  { %v4210_v33 = vpop.f32.mrf.mxu2 }
 0x772   :  { %v4255_v0 = vadd.f32 %v4210_v33, %v4099_v50  ;;  %6360 = vmatmul.msk.bf16.gmra.mxu3 %vm109_vm1, %v4315_v36  ;;  %v4877_v50 = vld [vmem:[#allocation5 + $0xd0] sm:$0xff]  ;;  %v8608_v57 = vsel %vm342_vm5, %v5529_v24, %v5532_v43  ;;  %v4905_v33 = vrot.slane %v4903_v1, 1 }
 0x773   :  { %9354 = vst [vmem:[#allocation6_spill] sm:$0xff] %v8608_v57  ;;  %v8610_v27 = vpack.c.bf16 %v4877_v50, %v4876_v61 }
 0x774   :  { %v4906_v34 = vor.u32 %v4905_v33, %v4901_v32 }
 0x775   :  { %v4025_v4 = vpop.f32.mrf.mxu0  ;;  %v4355_v14 = vpop.f32.mrf.mxu3  ;;  %v8616_v53 = vshll.u32 %v8610_v27, 16 }
 0x776   :  { %v4101_v20 = vadd.f32 %v4100_v31, %v4025_v4  ;;  %v8605_v10 = vadd.f32 %v4355_v14, %v4255_v0  ;;  %v8619_v31 = vshrl.u32 %v8610_v27, 16  ;;  %v4910_v14 = vrot.slane %v8577_v28, 1 }
 0x777   :  { %v5273_v29 = vrot.slane %v8616_v53, 2  ;;  %v5539_v4 = vrot.slane %v8616_v53, 3 }
 0x778   :  { %v4108_v44 = vpop.f32.mrf.mxu1  ;;  %v5272_v0 = vrot.slane %v8619_v31, 1  ;;  %v5538_v24 = vrot.slane %v8619_v31, 2  ;;  %v4911_v61 = vsel %vm158_vm3, %v4906_v34, %v4910_v14 }
 0x779   :  { %v4212_v12 = vpop.f32.mrf.mxu2 }
 0x77a   :  { %v4256_v36 = vadd.f32 %v4212_v12, %v4101_v20  ;;  %v5540_v32 = vor.u32 %v5539_v4, %v5538_v24  ;;  %v4914_v4 = vor.u32 %v8572_v17, %v4910_v14 }
 0x77b   :  { %6373 = vmatmul.msk.bf16.gmra.mxu1 %vm109_vm1, %v8356_v22  ;;  %v5274_v22 = vor.u32 %v5273_v29, %v5272_v0  ;;  %v4878_v0 = vld [vmem:[#allocation5 + $0xd8] sm:$0xff] }
 0x77d   :  { %v4028_v7 = vpop.f32.mrf.mxu0  ;;  %v4357_v49 = vpop.f32.mrf.mxu3 }
 0x77e   :  { %v4104_v1 = vadd.f32 %v4103_v5, %v4028_v7  ;;  %v8626_v9 = vadd.f32 %v4357_v49, %v4256_v36  ;;  %6382 = vmatmul.msk.bf16.vlgmr.msra.gmra.mxu2 %vm109_vm1, %v8316_v60  ;;  %v8636_v5 = vsel %vm266_vm4, %v5270_v48, %v5274_v22  ;;  %v8640_v60 = vsel %vm342_vm5, %v5536_v45, %v5540_v32 }
 0x77f   :  { %9356 = vst [vmem:[#allocation8_spill] sm:$0xff] %v8640_v60 }
 0x780   :  { %v4110_v43 = vpop.f32.mrf.mxu1  ;;  %6362 = vmatmul.msk.bf16.vlgmr.msra.gmra.mxu0 %vm109_vm1, %v8319_v52  ;;  %v4879_v52 = vld [vmem:[#allocation5 + $0xe0] sm:$0xff] }
 0x781   :  { %v4215_v20 = vpop.f32.mrf.mxu2  ;;  %v8644_v49 = vpack.c.bf16 %v4879_v52, %v4878_v0 }
 0x782   :  { %v4257_v50 = vadd.f32 %v4215_v20, %v4104_v1  ;;  %6392 = vmatmul.msk.bf16.vlgmr.msra.gmra.mxu3 %vm109_vm1, %v4911_v61  ;;  %v4918_v20 = vrot.slane %v8580_v42, 1 }
 0x783   :  { %v8647_v48 = vshll.u32 %v8644_v49, 16  ;;  %v8650_v24 = vshrl.u32 %v8644_v49, 16 }
 0x784   :  { %v4919_v42 = vsel %vm158_vm3, %v4914_v4, %v4918_v20 }
 0x785   :  { %v4030_v12 = vpop.f32.mrf.mxu0  ;;  %v4360_v28 = vpop.f32.mrf.mxu3  ;;  %v5277_v61 = vrot.slane %v8647_v48, 2 }
 0x786   :  { %v4106_v33 = vadd.f32 %v4105_v26, %v4030_v12  ;;  %v8642_v36 = vadd.f32 %v4360_v28, %v4257_v50  ;;  %v5276_v26 = vrot.slane %v8650_v24, 1  ;;  %v5542_v50 = vrot.slane %v8650_v24, 2 }
 0x788   :  { %v4113_v7 = vpop.f32.mrf.mxu1 }
 0x789   :  { %v4217_v34 = vpop.f32.mrf.mxu2 }
 0x78a   :  { %v4258_v29 = vadd.f32 %v4217_v34, %v4106_v33  ;;  %v5278_v33 = vor.u32 %v5277_v61, %v5276_v26 }
 0x78b   :  { %6374 = vmatmul.msk.bf16.gmra.mxu1 %vm109_vm1, %v8392_v54  ;;  %v5543_v54 = vrot.slane %v8647_v48, 3 }
 0x78c   :  { %v8668_v52 = vsel %vm266_vm4, %v5274_v22, %v5278_v33 }
 0x78d   :  { %v4033_v45 = vpop.f32.mrf.mxu0  ;;  %v4362_v1 = vpop.f32.mrf.mxu3  ;;  %v5544_v17 = vor.u32 %v5543_v54, %v5542_v50 }
 0x78e   :  { %v4109_v12 = vadd.f32 %v4108_v44, %v4033_v45  ;;  %v8659_v28 = vadd.f32 %v4362_v1, %v4258_v29  ;;  %6383 = vmatmul.msk.bf16.gmra.mxu2 %vm109_vm1, %v8344_v25  ;;  %v4880_v1 = vld [vmem:[#allocation5 + $0xe8] sm:$0xff] }
 0x78f   :  { %v8672_v34 = vsel %vm342_vm5, %v5540_v32, %v5544_v17 }
 0x790   :  { %v4115_v0 = vpop.f32.mrf.mxu1  ;;  %6363 = vmatmul.msk.bf16.gmra.mxu0 %vm109_vm1, %v8347_v19  ;;  %9357 = vst [vmem:[#allocation9_spill] sm:$0xff] %v8672_v34  ;;  %v4881_v19 = vld [vmem:[#allocation5 + $0xf0] sm:$0xff] }
 0x791   :  { %v4220_v14 = vpop.f32.mrf.mxu2  ;;  %v8676_v50 = vpack.c.bf16 %v4881_v19, %v4880_v1 }
 0x792   :  { %v4259_v44 = vadd.f32 %v4220_v14, %v4109_v12  ;;  %6393 = vmatmul.msk.bf16.gmra.mxu3 %vm109_vm1, %v4919_v42  ;;  %v4922_v42 = vor.u32 %v8583_v16, %v4918_v20  ;;  %v6410_v16 = vld [vmem:[%s9332_s19 + $0x8] sm:$0xf] }
 0x793   :  { %v8679_v22 = vshll.u32 %v8676_v50, 16  ;;  %v8682_v12 = vshrl.u32 %v8676_v50, 16  ;;  %v5185_v19 = vsel %vm179_vm0, %v6410_v16, 0 }
 0x794   :  { %5194 = vmatpush.bf16.msrb.mxu1 %v5185_v19 }
 0x795   :  { %v4035_v25 = vpop.f32.mrf.mxu0  ;;  %v4365_v29 = vpop.f32.mrf.mxu3 }
 0x796   :  { %v4111_v26 = vadd.f32 %v4110_v43, %v4035_v25  ;;  %v8674_v45 = vadd.f32 %v4365_v29, %v4259_v44  ;;  %v5280_v43 = vrot.slane %v8682_v12, 1  ;;  %v4926_v44 = vrot.slane %v8616_v53, 1 }
 0x797   :  { %v5281_v25 = vrot.slane %v8679_v22, 2  ;;  %v5546_v29 = vrot.slane %v8682_v12, 2  ;;  %v5547_v53 = vrot.slane %v8679_v22, 3 }
 0x798   :  { %v4118_v61 = vpop.f32.mrf.mxu1 }
 0x799   :  { %v4222_v4 = vpop.f32.mrf.mxu2 }
 0x79a   :  { %v4260_v54 = vadd.f32 %v4222_v4, %v4111_v26 }
 0x79b   :  { %6375 = vmatmul.msk.bf16.gmra.mxu1 %vm109_vm1, %v8420_v23  ;;  %v4898_v23 = vld [vmem:[%s9332_s19] sm:$0xf] }
 0x79c   :  { %v5074_v20 = vsel %vm179_vm0, %v4898_v23, 0 }
 0x79d   :  { %v4038_v32 = vpop.f32.mrf.mxu0  ;;  %v4367_v14 = vpop.f32.mrf.mxu3  ;;  %5083 = vmatpush.bf16.msrb.mxu0 %v5074_v20 }
 0x79e   :  { %v4114_v26 = vadd.f32 %v4113_v7, %v4038_v32  ;;  %v8691_v1 = vadd.f32 %v4367_v14, %v4260_v54  ;;  %6384 = vmatmul.msk.bf16.gmra.mxu2 %vm109_vm1, %v8376_v47  ;;  %v5282_v7 = vor.u32 %v5281_v25, %v5280_v43  ;;  %v5548_v47 = vor.u32 %v5547_v53, %v5546_v29  ;;  %v4883_v29 = vld [vmem:[#allocation5 + $0x100] sm:$0xff] }
 0x79f   :  { %v4927_v32 = vsel %vm158_vm3, %v4922_v42, %v4926_v44 }
 0x7a0   :  { %v4120_v4 = vpop.f32.mrf.mxu1  ;;  %6364 = vmatmul.msk.bf16.gmra.mxu0 %vm109_vm1, %v8379_v59  ;;  %v8708_v14 = vsel %vm266_vm4, %v5278_v33, %v5282_v7  ;;  %v8712_v23 = vsel %vm342_vm5, %v5544_v17, %v5548_v47  ;;  %v4882_v59 = vld [vmem:[#allocation5 + $0xf8] sm:$0xff] }
 0x7a1   :  { %v4225_v54 = vpop.f32.mrf.mxu2  ;;  %9358 = vst [vmem:[#allocation10_spill] sm:$0xff] %v8712_v23  ;;  %v8716_v19 = vpack.c.bf16 %v4883_v29, %v4882_v59 }
 0x7a2   :  { %v4261_v34 = vadd.f32 %v4225_v54, %v4114_v26  ;;  %6394 = vmatmul.msk.bf16.gmra.mxu3 %vm109_vm1, %v4927_v32  ;;  %v4930_v54 = vor.u32 %v8619_v31, %v4926_v44  ;;  %v4934_v32 = vrot.slane %v8647_v48, 1 }
 0x7a3   :  { %v8719_v33 = vshll.u32 %v8716_v19, 16  ;;  %v8722_v26 = vshrl.u32 %v8716_v19, 16 }
 0x7a4   :  { %v4935_v48 = vsel %vm158_vm3, %v4930_v54, %v4934_v32 }
 0x7a5   :  { %v4040_v43 = vpop.f32.mrf.mxu0  ;;  %v4370_v25 = vpop.f32.mrf.mxu3 }
 0x7a6   :  { %v4116_v16 = vadd.f32 %v4115_v0, %v4040_v43  ;;  %v8714_v60 = vadd.f32 %v4370_v25, %v4261_v34  ;;  %v5284_v0 = vrot.slane %v8722_v26, 1  ;;  %v5285_v43 = vrot.slane %v8719_v33, 2 }
 0x7a7   :  { %v5550_v25 = vrot.slane %v8722_v26, 2 }
 0x7a8   :  { %v4123_v53 = vpop.f32.mrf.mxu1  ;;  %v5286_v29 = vor.u32 %v5285_v43, %v5284_v0  ;;  %v4884_v43 = vld [vmem:[#allocation5 + $0x108] sm:$0xff] }
 0x7a9   :  { %v4227_v42 = vpop.f32.mrf.mxu2 }
 0x7aa   :  { %v4262_v20 = vadd.f32 %v4227_v42, %v4116_v16  ;;  %v8740_v23 = vsel %vm266_vm4, %v5282_v7, %v5286_v29 }
 0x7ab   :  { %6376 = vmatmul.msk.bf16.gmra.mxu1 %vm109_vm1, %v8448_v41  ;;  %v5551_v41 = vrot.slane %v8719_v33, 3 }
 0x7ad   :  { %v4043_v17 = vpop.f32.mrf.mxu0  ;;  %v4372_v34 = vpop.f32.mrf.mxu3  ;;  %v5552_v31 = vor.u32 %v5551_v41, %v5550_v25 }
 0x7ae   :  { %v4119_v16 = vadd.f32 %v4118_v61, %v4043_v17  ;;  %v8731_v59 = vadd.f32 %v4372_v34, %v4262_v20  ;;  %6385 = vmatmul.msk.bf16.gmra.mxu2 %vm109_vm1, %v8408_v51 }
 0x7af   :  { %v8744_v20 = vsel %vm342_vm5, %v5548_v47, %v5552_v31 }
 0x7b0   :  { %v4125_v42 = vpop.f32.mrf.mxu1  ;;  %6365 = vmatmul.msk.bf16.gmra.mxu0 %vm109_vm1, %v8411_v21  ;;  %9359 = vst [vmem:[#allocation11_spill] sm:$0xff] %v8744_v20  ;;  %v4885_v21 = vld [vmem:[#allocation5 + $0x110] sm:$0xff] }
 0x7b1   :  { %v4230_v44 = vpop.f32.mrf.mxu2  ;;  %v8748_v41 = vpack.c.bf16 %v4885_v21, %v4884_v43 }
 0x7b2   :  { %v4263_v61 = vadd.f32 %v4230_v44, %v4119_v16  ;;  %6395 = vmatmul.msk.bf16.gmra.mxu3 %vm109_vm1, %v4935_v48  ;;  %v4938_v48 = vor.u32 %v8650_v24, %v4934_v32 }
 0x7b3   :  { %v8751_v7 = vshll.u32 %v8748_v41, 16  ;;  %v8754_v16 = vshrl.u32 %v8748_v41, 16 }
 0x7b5   :  { %v4045_v51 = vpop.f32.mrf.mxu0  ;;  %v4375_v17 = vpop.f32.mrf.mxu3 }
 0x7b6   :  { %v4121_v0 = vadd.f32 %v4120_v4, %v4045_v51  ;;  %v8746_v34 = vadd.f32 %v4375_v17, %v4263_v61  ;;  %v5288_v4 = vrot.slane %v8754_v16, 1  ;;  %v4942_v61 = vrot.slane %v8679_v22, 1 }
 0x7b7   :  { %v5289_v51 = vrot.slane %v8751_v7, 2  ;;  %v5554_v17 = vrot.slane %v8754_v16, 2 }
 0x7b8   :  { %v4128_v25 = vpop.f32.mrf.mxu1  ;;  %v4943_v22 = vsel %vm158_vm3, %v4938_v48, %v4942_v61 }
 0x7b9   :  { %v4232_v54 = vpop.f32.mrf.mxu2  ;;  %v5290_v21 = vor.u32 %v5289_v51, %v5288_v4  ;;  %v4886_v51 = vld [vmem:[#allocation5 + $0x118] sm:$0xff] }
 0x7ba   :  { %v4264_v18 = vadd.f32 %v4232_v54, %v4121_v0 }
 0x7bb   :  { %6377 = vmatmul.msk.bf16.gmra.mxu1 %vm109_vm1, %v8478_v46  ;;  %v5555_v46 = vrot.slane %v8751_v7, 3  ;;  %v8772_v20 = vsel %vm266_vm4, %v5286_v29, %v5290_v21 }
 0x7bd   :  { %v4048_v47 = vpop.f32.mrf.mxu0  ;;  %v4377_v44 = vpop.f32.mrf.mxu3  ;;  %v5556_v24 = vor.u32 %v5555_v46, %v5554_v17 }
 0x7be   :  { %v4124_v0 = vadd.f32 %v4123_v53, %v4048_v47  ;;  %v8763_v43 = vadd.f32 %v4377_v44, %v4264_v18  ;;  %6386 = vmatmul.msk.bf16.gmra.mxu2 %vm109_vm1, %v8436_v6 }
 0x7bf   :  { %v8776_v18 = vsel %vm342_vm5, %v5552_v31, %v5556_v24 }
 0x7c0   :  { %v4130_v54 = vpop.f32.mrf.mxu1  ;;  %6366 = vmatmul.msk.bf16.gmra.mxu0 %vm109_vm1, %v8439_v40  ;;  %9360 = vst [vmem:[#allocation12_spill] sm:$0xff] %v8776_v18  ;;  %v4887_v40 = vld [vmem:[#allocation5 + $0x120] sm:$0xff] }
 0x7c1   :  { %v4235_v32 = vpop.f32.mrf.mxu2  ;;  %v8780_v46 = vpack.c.bf16 %v4887_v40, %v4886_v51 }
 0x7c2   :  { %v4265_v53 = vadd.f32 %v4235_v32, %v4124_v0  ;;  %6396 = vmatmul.msk.bf16.gmra.mxu3 %vm109_vm1, %v4943_v22  ;;  %v4946_v22 = vor.u32 %v8682_v12, %v4942_v61 }
 0x7c3   :  { %v8783_v29 = vshll.u32 %v8780_v46, 16  ;;  %v8786_v0 = vshrl.u32 %v8780_v46, 16 }
 0x7c5   :  { %v4050_v6 = vpop.f32.mrf.mxu0  ;;  %v4380_v47 = vpop.f32.mrf.mxu3 }
 0x7c6   :  { %v4126_v4 = vadd.f32 %v4125_v42, %v4050_v6  ;;  %v8778_v44 = vadd.f32 %v4380_v47, %v4265_v53  ;;  %v5292_v42 = vrot.slane %v8786_v0, 1  ;;  %v4950_v53 = vrot.slane %v8719_v33, 1 }
 0x7c7   :  { %v5293_v6 = vrot.slane %v8783_v29, 2  ;;  %v5558_v47 = vrot.slane %v8786_v0, 2 }
 0x7c8   :  { %v4133_v17 = vpop.f32.mrf.mxu1  ;;  %v4951_v61 = vsel %vm158_vm3, %v4946_v22, %v4950_v53 }
 0x7c9   :  { %v4237_v48 = vpop.f32.mrf.mxu2  ;;  %v8800_v40 = vor.u32 %v5293_v6, %v5292_v42 }
 0x7ca   :  { %v4266_v57 = vadd.f32 %v4237_v48, %v4126_v4 }
 0x7cb   :  { %6378 = vmatmul.msk.bf16.gmra.mxu1 %vm109_vm1, %v8515_v15  ;;  %v5559_v15 = vrot.slane %v8783_v29, 3 }
 0x7cd   :  { %v4053_v31 = vpop.f32.mrf.mxu0  ;;  %v4382_v32 = vpop.f32.mrf.mxu3  ;;  %v5560_v12 = vor.u32 %v5559_v15, %v5558_v47 }
 0x7ce   :  { %v4129_v4 = vadd.f32 %v4128_v25, %v4053_v31  ;;  %v8795_v51 = vadd.f32 %v4382_v32, %v4266_v57  ;;  %6387 = vmatmul.msk.bf16.gmra.mxu2 %vm109_vm1, %v8466_v37  ;;  %v8807_v25 = vsel %vm266_vm4, %v5290_v21, %v8800_v40 }
 0x7cf   :  { %v8811_v37 = vsel %vm342_vm5, %v5556_v24, %v5560_v12 }
 0x7d0   :  { %v4135_v48 = vpop.f32.mrf.mxu1  ;;  %6367 = vmatmul.msk.bf16.gmra.mxu0 %vm109_vm1, %v8469_v13  ;;  %9361 = vst [vmem:[#allocation13_spill] sm:$0xff] %v8811_v37  ;;  %v4888_v13 = vld [vmem:[#allocation5 + $0x128] sm:$0xf] }
 0x7d1   :  { %v4240_v33 = vpop.f32.mrf.mxu2  ;;  %v8815_v15 = vpack.c.bf16 %v4888_v13, %v4888_v13 }
 0x7d2   :  { %v4267_v57 = vadd.f32 %v4240_v33, %v4129_v4  ;;  %6397 = vmatmul.msk.bf16.gmra.mxu3 %vm109_vm1, %v4951_v61  ;;  %v4954_v61 = vor.u32 %v8722_v26, %v4950_v53 }
 0x7d3   :  { %v9339_v21 = vshll.u32 %v8815_v15, 16  ;;  %v5562_v4 = vshrl.u32 %v8815_v15, 16 }
 0x7d5   :  { %v4055_v42 = vpop.f32.mrf.mxu0  ;;  %v4385_v31 = vpop.f32.mrf.mxu3  ;;  %v5565_v24 = vrot.slane %v9339_v21, 3 }
 0x7d6   :  { %v4131_v32 = vadd.f32 %v4130_v54, %v4055_v42  ;;  %v8813_v6 = vadd.f32 %v4385_v31, %v4267_v57  ;;  %v4958_v57 = vrot.slane %v8751_v7, 1  ;;  %v5564_v42 = vrot.slane %v5562_v4, 2 }
 0x7d8   :  { %v4138_v47 = vpop.f32.mrf.mxu1  ;;  %v4959_v21 = vsel %vm158_vm3, %v4954_v61, %v4958_v57 }
 0x7d9   :  { %v4242_v22 = vpop.f32.mrf.mxu2 }
 0x7da   :  { %v4268_v18 = vadd.f32 %v4242_v22, %v4131_v32  ;;  %v5566_v32 = vor.u32 %v5565_v24, %v5564_v42 }
 0x7db   :  { %6379 = vmatmul.msk.bf16.gmra.mxu1 %vm109_vm1, %v8541_v56 }
 0x7dc   :  { %v8833_v37 = vsel %vm342_vm5, %v5560_v12, %v5566_v32  ;;  %v4966_v12 = vrot.slane %v8783_v29, 1  ;;  %v5140_v29 = vrot.slane %v8563_v35, 1 }
 0x7dd   :  { %v4058_v33 = vpop.f32.mrf.mxu0  ;;  %v4387_v54 = vpop.f32.mrf.mxu3 }
 0x7de   :  { %v4134_v31 = vadd.f32 %v4133_v17, %v4058_v33  ;;  %v8825_v13 = vadd.f32 %v4387_v54, %v4268_v18  ;;  %6388 = vmatmul.msk.bf16.gmra.mxu2 %vm109_vm1, %v8502_v11  ;;  %v4962_v54 = vor.u32 %v8754_v16, %v4958_v57 }
 0x7e0   :  { %v4140_v56 = vpop.f32.mrf.mxu1  ;;  %6368 = vmatmul.msk.bf16.gmra.mxu0 %vm109_vm1, %v8505_v2 }
 0x7e1   :  { %v4245_v22 = vpop.f32.mrf.mxu2 }
 0x7e2   :  { %v4269_v26 = vadd.f32 %v4245_v22, %v4134_v31  ;;  %6398 = vmatmul.msk.bf16.gmra.mxu3 %vm109_vm1, %v4959_v21  ;;  %v4967_v31 = vsel %vm158_vm3, %v4962_v54, %v4966_v12  ;;  %vm4850_vm3 = vcmask 31744  }
 0x7e5   :  { %v4060_v7 = vpop.f32.mrf.mxu0  ;;  %v4390_v18 = vpop.f32.mrf.mxu3 }
 0x7e6   :  { %v4136_v17 = vadd.f32 %v4135_v48, %v4060_v7  ;;  %v8836_v53 = vadd.f32 %v4390_v18, %v4269_v26 }
 0x7e8   :  { %v4624_v11 = vpop.f32.mrf.mxu1 }
 0x7e9   :  { %v4247_v4 = vpop.f32.mrf.mxu2 }
 0x7ea   :  { %v4270_v24 = vadd.f32 %v4247_v4, %v4136_v17 }
 0x7eb   :  { %6380 = vmatmul.msk.bf16.gmra.mxu1 %vm109_vm1, %v8544_v63 }
 0x7ed   :  { %v4063_v2 = vpop.f32.mrf.mxu0  ;;  %v4392_v33 = vpop.f32.mrf.mxu3 }
 0x7ee   :  { %v4139_v61 = vadd.f32 %v4138_v47, %v4063_v2  ;;  %v8842_v42 = vadd.f32 %v4392_v33, %v4270_v24  ;;  %6389 = vmatmul.msk.bf16.gmra.mxu2 %vm109_vm1, %v8527_v62  ;;  %v5141_v47 = vrot.slane %v8565_v55, 1  ;;  %v6420_v62 = vld [vmem:[%s9332_s19 + $0xc] sm:$0xf] }
 0x7ef   :  { %v5329_v26 = vsel %vm179_vm0, %v6420_v62, 0 }
 0x7f0   :  { %6369 = vmatmul.msk.bf16.gmra.mxu0 %vm109_vm1, %v8530_v38  ;;  %v4626_v48 = vpop.f32.mrf.mxu1  ;;  %v6430_v38 = vld [vmem:[%s9332_s19 + $0x10] sm:$0xf]  ;;  %5338 = vmatpush.bf16.msrb.mxu2 %v5329_v26  ;;  %v5142_v24 = vsel %vm230_vm2, %v5140_v29, %v5141_v47 }
 0x7f1   :  { %v4250_v21 = vpop.f32.mrf.mxu2  ;;  %v5452_v7 = vsel %vm179_vm0, %v6430_v38, 0 }
 0x7f2   :  { %v4271_v63 = vadd.f32 %v4250_v21, %v4139_v61  ;;  %6399 = vmatmul.msk.bf16.gmra.mxu3 %vm109_vm1, %v4967_v31  ;;  %v8874_v31 = vld [vmem:[%s9333_s20] ss:$0 sm:$0xff] }
 0x7f3   :  { %5461 = vmatpush.bf16.msrb.mxu3 %v5452_v7  ;;  %v5405_v7 = vrot.slane %v8563_v35, 2 }
 0x7f5   :  { %v4065_v32 = vpop.f32.mrf.mxu0  ;;  %v4395_v16 = vpop.f32.mrf.mxu3 }
 0x7f6   :  { %v4141_v57 = vadd.f32 %v4140_v56, %v4065_v32  ;;  %v8858_v22 = vadd.f32 %v4395_v16, %v4271_v63  ;;  %v4970_v63 = vor.u32 %v8786_v0, %v4966_v12 }
 0x7f8   :  { %v4629_v18 = vpop.f32.mrf.mxu1 }
 0x7f9   :  { %v4252_v17 = vpop.f32.mrf.mxu2 }
 0x7fa   :  { %v4272_v4 = vadd.f32 %v4252_v17, %v4141_v57 }
 0x7fb   :  { %6411 = vmatmul.msk.bf16.vlgmr.msrb.gmra.mxu1 %vm109_vm1, %v5142_v24 }
 0x7fd   :  { %v4397_v2 = vpop.f32.mrf.mxu3  ;;  %v4479_v33 = vpop.f32.mrf.mxu0 }
 0x7fe   :  { %v8864_v54 = vadd.f32 %v4397_v2, %v4272_v4  ;;  %v4524_v56 = vadd.f32 %v4479_v33, %v8605_v10  ;;  %6390 = vmatmul.msk.bf16.gmra.mxu2 %vm109_vm1, %v8533_v8 }
 0x800   :  { %6370 = vmatmul.msk.bf16.gmra.mxu0 %vm109_vm1, %v8536_v30  ;;  %v4631_v61 = vpop.f32.mrf.mxu1  ;;  %v4669_v21 = vadd.f32 %v4624_v11, %v4524_v56  ;;  %v5143_v30 = vrot.slane %v8568_v39, 1 }
 0x801   :  { %v4747_v32 = vpop.f32.mrf.mxu2 }
 0x802   :  { %v4792_v16 = vadd.f32 %v4747_v32, %v4669_v21  ;;  %6400 = vmatmul.msk.bf16.gmra.mxu3 %vm109_vm1, %v4970_v63  ;;  %v5144_v26 = vsel %vm230_vm2, %v5141_v47, %v5143_v30 }
 0x804   :  { %v4814_v10 = vadd.f32 %v8874_v31, %v4792_v16 }
 0x805   :  { %v4481_v29 = vpop.f32.mrf.mxu0 }
 0x806   :  { %6546 = vtanh.f32 %v4814_v10  ;;  %v4525_v8 = vadd.f32 %v4481_v29, %v8626_v9 }
 0x808   :  { %v4634_v11 = vpop.f32.mrf.mxu1  ;;  %v4670_v62 = vadd.f32 %v4626_v48, %v4525_v8  ;;  %v5406_v48 = vrot.slane %v8565_v55, 2 }
 0x809   :  { %v4749_v38 = vpop.f32.mrf.mxu2 }
 0x80a   :  { %v4793_v57 = vadd.f32 %v4749_v38, %v4670_v62  ;;  %v5407_v2 = vsel %vm306_vm7, %v5405_v7, %v5406_v48  ;;  %v8919_v7 = vpop.f32.mrf.mxu3 }
 0x80b   :  { %6412 = vmatmul.msk.bf16.gmra.mxu1 %vm109_vm1, %v5144_v26 }
 0x80c   :  { %v6547_v0 = vpop.eup %6546  ;;  %v4815_v12 = vadd.f32 %v8874_v31, %v4793_v57 }
 0x80d   :  { %4851 = vst.msk [vmem:[%s9334_s21] sm:$0xff] %vm4850_vm3, %v6547_v0  ;;  %v4484_v9 = vpop.f32.mrf.mxu0 }
 0x80e   :  { %6548 = vtanh.f32 %v4815_v12  ;;  %v4526_v17 = vadd.f32 %v4484_v9, %v8642_v36  ;;  %6421 = vmatmul.msk.bf16.vlgmr.msrb.gmra.mxu2 %vm109_vm1, %v8595_v58 }
 0x810   :  { %v4636_v47 = vpop.f32.mrf.mxu1  ;;  %6401 = vmatmul.msk.bf16.vlgmr.msrb.gmra.mxu0 %vm109_vm1, %v8563_v35  ;;  %v4671_v4 = vadd.f32 %v4629_v18, %v4526_v17  ;;  %v5145_v18 = vrot.slane %v8610_v27, 1 }
 0x811   :  { %v4752_v24 = vpop.f32.mrf.mxu2 }
 0x812   :  { %v4794_v33 = vadd.f32 %v4752_v24, %v4671_v4  ;;  %6431 = vmatmul.msk.bf16.vlgmr.msrb.gmra.mxu3 %vm109_vm1, %v5407_v2  ;;  %v5146_v29 = vsel %vm230_vm2, %v5143_v30, %v5145_v18 }
 0x814   :  { %v6549_v56 = vpop.eup %6548  ;;  %v4816_v21 = vadd.f32 %v8874_v31, %v4794_v33 }
 0x815   :  { %4852 = vst.msk [vmem:[%s9334_s21 + $0x8] sm:$0xff] %vm4850_vm3, %v6549_v56  ;;  %v4486_v58 = vpop.f32.mrf.mxu0 }
 0x816   :  { %6550 = vtanh.f32 %v4816_v21  ;;  %v4527_v36 = vadd.f32 %v4486_v58, %v8659_v28  ;;  %v5408_v28 = vrot.slane %v8568_v39, 2 }
 0x818   :  { %v4639_v63 = vpop.f32.mrf.mxu1  ;;  %v4672_v32 = vadd.f32 %v4631_v61, %v4527_v36  ;;  %v5409_v0 = vsel %vm306_vm7, %v5406_v48, %v5408_v28  ;;  %v8936_v36 = vpop.f32.mrf.mxu3 }
 0x819   :  { %v4754_v16 = vpop.f32.mrf.mxu2 }
 0x81a   :  { %v4795_v10 = vadd.f32 %v4754_v16, %v4672_v32 }
 0x81b   :  { %6413 = vmatmul.msk.bf16.gmra.mxu1 %vm109_vm1, %v5146_v29 }
 0x81c   :  { %v6551_v8 = vpop.eup %6550  ;;  %v4817_v62 = vadd.f32 %v8874_v31, %v4795_v10 }
 0x81d   :  { %4853 = vst.msk [vmem:[%s9334_s21 + $0x10] sm:$0xff] %vm4850_vm3, %v6551_v8  ;;  %v4489_v38 = vpop.f32.mrf.mxu0 }
 0x81e   :  { %6552 = vtanh.f32 %v4817_v62  ;;  %v4528_v61 = vadd.f32 %v4489_v38, %v8674_v45  ;;  %6422 = vmatmul.msk.bf16.gmra.mxu2 %vm109_vm1, %v8599_v3  ;;  %v6450_v38 = vld [vmem:[%s9332_s19 + $0x18] sm:$0xf] }
 0x820   :  { %v4641_v30 = vpop.f32.mrf.mxu1  ;;  %6402 = vmatmul.msk.bf16.gmra.mxu0 %vm109_vm1, %v8565_v55  ;;  %v4673_v57 = vadd.f32 %v4634_v11, %v4528_v61  ;;  %v5147_v11 = vrot.slane %v8644_v49, 1 }
 0x821   :  { %v4757_v26 = vpop.f32.mrf.mxu2 }
 0x822   :  { %v4796_v12 = vadd.f32 %v4757_v26, %v4673_v57  ;;  %6432 = vmatmul.msk.bf16.gmra.mxu3 %vm109_vm1, %v5409_v0  ;;  %v5148_v33 = vsel %vm230_vm2, %v5145_v18, %v5147_v11  ;;  %v5718_v57 = vsel %vm179_vm0, %v6450_v38, 0  ;;  %v8960_v26 = vpop.f32.mrf.mxu3  ;;  %v5414_v38 = vrot.slane %v8676_v50, 2 }
 0x823   :  { %5727 = vmatpush.bf16.msra.mxu1 %v5718_v57 }
 0x824   :  { %v6553_v9 = vpop.eup %6552  ;;  %v4818_v17 = vadd.f32 %v8874_v31, %v4796_v12 }
 0x825   :  { %4854 = vst.msk [vmem:[%s9334_s21 + $0x18] sm:$0xff] %vm4850_vm3, %v6553_v9  ;;  %v4491_v3 = vpop.f32.mrf.mxu0 }
 0x826   :  { %6554 = vtanh.f32 %v4818_v17  ;;  %v4529_v45 = vadd.f32 %v4491_v3, %v8691_v1  ;;  %v5410_v1 = vrot.slane %v8610_v27, 2 }
 0x828   :  { %v4644_v48 = vpop.f32.mrf.mxu1  ;;  %v4674_v4 = vadd.f32 %v4636_v47, %v4529_v45  ;;  %v5411_v10 = vsel %vm306_vm7, %v5408_v28, %v5410_v1 }
 0x829   :  { %v4759_v24 = vpop.f32.mrf.mxu2 }
 0x82a   :  { %v4797_v2 = vadd.f32 %v4759_v24, %v4674_v4  ;;  %v5412_v24 = vrot.slane %v8644_v49, 2 }
 0x82b   :  { %6414 = vmatmul.msk.bf16.gmra.mxu1 %vm109_vm1, %v5148_v33 }
 0x82c   :  { %v6555_v56 = vpop.eup %6554  ;;  %v4819_v21 = vadd.f32 %v8874_v31, %v4797_v2  ;;  %v5415_v57 = vsel %vm306_vm7, %v5412_v24, %v5414_v38 }
 0x82d   :  { %4855 = vst.msk [vmem:[%s9334_s21 + $0x20] sm:$0xff] %vm4850_vm3, %v6555_v56  ;;  %v4494_v58 = vpop.f32.mrf.mxu0  ;;  %v5413_v56 = vsel %vm306_vm7, %v5410_v1, %v5412_v24 }
 0x82e   :  { %6556 = vtanh.f32 %v4819_v21  ;;  %v4530_v47 = vadd.f32 %v4494_v58, %v8714_v60  ;;  %6423 = vmatmul.msk.bf16.gmra.mxu2 %vm109_vm1, %v8636_v5  ;;  %v5149_v60 = vrot.slane %v8676_v50, 1  ;;  %v8976_v21 = vpop.f32.mrf.mxu3 }
 0x830   :  { %v4646_v18 = vpop.f32.mrf.mxu1  ;;  %6403 = vmatmul.msk.bf16.gmra.mxu0 %vm109_vm1, %v8568_v39  ;;  %v4675_v32 = vadd.f32 %v4639_v63, %v4530_v47  ;;  %v6440_v63 = vld [vmem:[%s9332_s19 + $0x14] sm:$0xf]  ;;  %v5150_v3 = vsel %vm230_vm2, %v5147_v11, %v5149_v60 }
 0x831   :  { %v4762_v16 = vpop.f32.mrf.mxu2  ;;  %v5596_v61 = vsel %vm179_vm0, %v6440_v63, 0  ;;  %vm4868_vm0 = vcmask 29696  }
 0x832   :  { %v4798_v29 = vadd.f32 %v4762_v16, %v4675_v32  ;;  %6433 = vmatmul.msk.bf16.gmra.mxu3 %vm109_vm1, %v5411_v10  ;;  %5605 = vmatpush.bf16.msra.mxu0 %v5596_v61 }
 0x834   :  { %v6557_v8 = vpop.eup %6556  ;;  %v4820_v62 = vadd.f32 %v8874_v31, %v4798_v29 }
 0x835   :  { %4856 = vst.msk [vmem:[%s9334_s21 + $0x28] sm:$0xff] %vm4850_vm3, %v6557_v8  ;;  %v4496_v5 = vpop.f32.mrf.mxu0 }
 0x836   :  { %6558 = vtanh.f32 %v4820_v62  ;;  %v4531_v28 = vadd.f32 %v4496_v5, %v8731_v59  ;;  %v8988_v5 = vpop.f32.mrf.mxu3 }
 0x838   :  { %v4649_v0 = vpop.f32.mrf.mxu1  ;;  %v4676_v12 = vadd.f32 %v4641_v30, %v4531_v28 }
 0x839   :  { %v4764_v9 = vpop.f32.mrf.mxu2 }
 0x83a   :  { %v4799_v17 = vadd.f32 %v4764_v9, %v4676_v12 }
 0x83b   :  { %6415 = vmatmul.msk.bf16.gmra.mxu1 %vm109_vm1, %v5150_v3  ;;  %v5153_v3 = vrot.slane %v8748_v41, 1 }
 0x83c   :  { %v6559_v45 = vpop.eup %6558  ;;  %v4821_v4 = vadd.f32 %v8874_v31, %v4799_v17 }
 0x83d   :  { %4857 = vst.msk [vmem:[%s9334_s21 + $0x30] sm:$0xff] %vm4850_vm3, %v6559_v45  ;;  %v4499_v59 = vpop.f32.mrf.mxu0 }
 0x83e   :  { %6560 = vtanh.f32 %v4821_v4  ;;  %v4532_v30 = vadd.f32 %v4499_v59, %v8746_v34  ;;  %6424 = vmatmul.msk.bf16.gmra.mxu2 %vm109_vm1, %v8668_v52 }
 0x840   :  { %v4651_v11 = vpop.f32.mrf.mxu1  ;;  %6404 = vmatmul.msk.bf16.gmra.mxu0 %vm109_vm1, %v8610_v27  ;;  %v4677_v2 = vadd.f32 %v4644_v48, %v4532_v30  ;;  %v5151_v48 = vrot.slane %v8716_v19, 1 }
 0x841   :  { %v4767_v33 = vpop.f32.mrf.mxu2 }
 0x842   :  { %v4800_v58 = vadd.f32 %v4767_v33, %v4677_v2  ;;  %6434 = vmatmul.msk.bf16.gmra.mxu3 %vm109_vm1, %v5413_v56  ;;  %v5152_v8 = vsel %vm230_vm2, %v5149_v60, %v5151_v48  ;;  %v5154_v30 = vsel %vm230_vm2, %v5151_v48, %v5153_v3 }
 0x844   :  { %v6561_v47 = vpop.eup %6560  ;;  %v4822_v32 = vadd.f32 %v8874_v31, %v4800_v58 }
 0x845   :  { %4858 = vst.msk [vmem:[%s9334_s21 + $0x38] sm:$0xff] %vm4850_vm3, %v6561_v47  ;;  %v4501_v52 = vpop.f32.mrf.mxu0 }
 0x846   :  { %6562 = vtanh.f32 %v4822_v32  ;;  %v4533_v34 = vadd.f32 %v4501_v52, %v8763_v43 }
 0x848   :  { %v4654_v1 = vpop.f32.mrf.mxu1  ;;  %v4678_v16 = vadd.f32 %v4646_v18, %v4533_v34 }
 0x849   :  { %v4769_v10 = vpop.f32.mrf.mxu2 }
 0x84a   :  { %v4801_v29 = vadd.f32 %v4769_v10, %v4678_v16 }
 0x84b   :  { %6416 = vmatmul.msk.bf16.gmra.mxu1 %vm109_vm1, %v5152_v8 }
 0x84c   :  { %v6563_v62 = vpop.eup %6562  ;;  %v4823_v63 = vadd.f32 %v8874_v31, %v4801_v29 }
 0x84d   :  { %4859 = vst.msk [vmem:[%s9334_s21 + $0x40] sm:$0xff] %vm4850_vm3, %v6563_v62  ;;  %v4504_v43 = vpop.f32.mrf.mxu0 }
 0x84e   :  { %6564 = vtanh.f32 %v4823_v63  ;;  %v4534_v18 = vadd.f32 %v4504_v43, %v8778_v44  ;;  %6425 = vmatmul.msk.bf16.gmra.mxu2 %vm109_vm1, %v8708_v14  ;;  %v9008_v44 = vpop.f32.mrf.mxu3 }
 0x850   :  { %v4656_v60 = vpop.f32.mrf.mxu1  ;;  %6405 = vmatmul.msk.bf16.gmra.mxu0 %vm109_vm1, %v8644_v49  ;;  %v4679_v28 = vadd.f32 %v4649_v0, %v4534_v18 }
 0x851   :  { %v4772_v61 = vpop.f32.mrf.mxu2 }
 0x852   :  { %v4802_v12 = vadd.f32 %v4772_v61, %v4679_v28  ;;  %6435 = vmatmul.msk.bf16.gmra.mxu3 %vm109_vm1, %v5415_v57  ;;  %v5418_v61 = vrot.slane %v8748_v41, 2 }
 0x854   :  { %v6565_v9 = vpop.eup %6564  ;;  %v4824_v17 = vadd.f32 %v8874_v31, %v4802_v12 }
 0x855   :  { %4860 = vst.msk [vmem:[%s9334_s21 + $0x48] sm:$0xff] %vm4850_vm3, %v6565_v9  ;;  %v4506_v14 = vpop.f32.mrf.mxu0 }
 0x856   :  { %6566 = vtanh.f32 %v4824_v17  ;;  %v4535_v0 = vadd.f32 %v4506_v14, %v8795_v51  ;;  %v5416_v51 = vrot.slane %v8716_v19, 2  ;;  %v9023_v58 = vpop.f32.mrf.mxu3 }
 0x858   :  { %v4659_v45 = vpop.f32.mrf.mxu1  ;;  %v4680_v4 = vadd.f32 %v4651_v11, %v4535_v0  ;;  %v5417_v34 = vsel %vm306_vm7, %v5414_v38, %v5416_v51  ;;  %v5419_v17 = vsel %vm306_vm7, %v5416_v51, %v5418_v61  ;;  %v5420_v51 = vrot.slane %v8780_v46, 2 }
 0x859   :  { %v4774_v59 = vpop.f32.mrf.mxu2 }
 0x85a   :  { %v4803_v24 = vadd.f32 %v4774_v59, %v4680_v4 }
 0x85b   :  { %6417 = vmatmul.msk.bf16.gmra.mxu1 %vm109_vm1, %v5154_v30 }
 0x85c   :  { %v6567_v2 = vpop.eup %6566  ;;  %v4825_v33 = vadd.f32 %v8874_v31, %v4803_v24 }
 0x85d   :  { %4861 = vst.msk [vmem:[%s9334_s21 + $0x50] sm:$0xff] %vm4850_vm3, %v6567_v2  ;;  %v4509_v56 = vpop.f32.mrf.mxu0 }
 0x85e   :  { %6568 = vtanh.f32 %v4825_v33  ;;  %v4536_v11 = vadd.f32 %v4509_v56, %v8813_v6  ;;  %6426 = vmatmul.msk.bf16.gmra.mxu2 %vm109_vm1, %v8740_v23  ;;  %v9036_v63 = vpop.f32.mrf.mxu3 }
 0x860   :  { %v4661_v47 = vpop.f32.mrf.mxu1  ;;  %6406 = vmatmul.msk.bf16.gmra.mxu0 %vm109_vm1, %v8676_v50  ;;  %v4681_v32 = vadd.f32 %v4654_v1, %v4536_v11  ;;  %v5155_v1 = vrot.slane %v8780_v46, 1 }
 0x861   :  { %v4777_v52 = vpop.f32.mrf.mxu2 }
 0x862   :  { %v4804_v48 = vadd.f32 %v4777_v52, %v4681_v32  ;;  %6436 = vmatmul.msk.bf16.gmra.mxu3 %vm109_vm1, %v5417_v34  ;;  %v5156_v38 = vsel %vm230_vm2, %v5153_v3, %v5155_v1  ;;  %v5421_v34 = vsel %vm306_vm7, %v5418_v61, %v5420_v51  ;;  %v5422_v61 = vrot.slane %v8815_v15, 2 }
 0x864   :  { %v6569_v16 = vpop.eup %6568  ;;  %v4826_v10 = vadd.f32 %v8874_v31, %v4804_v48 }
 0x865   :  { %4862 = vst.msk [vmem:[%s9334_s21 + $0x58] sm:$0xff] %vm4850_vm3, %v6569_v16  ;;  %v4511_v23 = vpop.f32.mrf.mxu0 }
 0x866   :  { %6570 = vtanh.f32 %v4826_v10  ;;  %v4537_v6 = vadd.f32 %v4511_v23, %v8825_v13  ;;  %v9053_v3 = vpop.f32.mrf.mxu3  ;;  %v5671_v23 = vrot.slane %v8563_v35, 3 }
 0x868   :  { %v4664_v29 = vpop.f32.mrf.mxu1  ;;  %v4682_v8 = vadd.f32 %v4656_v60, %v4537_v6  ;;  %v5672_v6 = vrot.slane %v8565_v55, 3 }
 0x869   :  { %v4779_v62 = vpop.f32.mrf.mxu2 }
 0x86a   :  { %v4805_v43 = vadd.f32 %v4779_v62, %v4682_v8 }
 0x86b   :  { %6418 = vmatmul.msk.bf16.gmra.mxu1 %vm109_vm1, %v5156_v38 }
 0x86c   :  { %v6571_v18 = vpop.eup %6570  ;;  %v4827_v28 = vadd.f32 %v8874_v31, %v4805_v43  ;;  %v9362_v43 = vshll.u32 %v8815_v15, 16 }
 0x86d   :  { %4863 = vst.msk [vmem:[%s9334_s21 + $0x60] sm:$0xff] %vm4850_vm3, %v6571_v18  ;;  %v4514_v13 = vpop.f32.mrf.mxu0 }
 0x86e   :  { %6572 = vtanh.f32 %v4827_v28  ;;  %v4538_v60 = vadd.f32 %v4514_v13, %v8836_v53  ;;  %6427 = vmatmul.msk.bf16.gmra.mxu2 %vm109_vm1, %v8772_v20  ;;  %v9068_v11 = vpop.f32.mrf.mxu3  ;;  %v5299_v38 = vrot.slane %v9362_v43, 2  ;;  %v5673_v28 = vsel %vm382_vm6, %v5671_v23, %v5672_v6 }
 0x870   :  { %v4666_v57 = vpop.f32.mrf.mxu1  ;;  %6407 = vmatmul.msk.bf16.gmra.mxu0 %vm109_vm1, %v8716_v19  ;;  %v4683_v12 = vadd.f32 %v4659_v45, %v4538_v60  ;;  %v5300_v55 = vsel %vm266_vm4, %v8800_v40, %v5299_v38 }
 0x871   :  { %v4782_v9 = vpop.f32.mrf.mxu2 }
 0x872   :  { %v4806_v14 = vadd.f32 %v4782_v9, %v4683_v12  ;;  %6437 = vmatmul.msk.bf16.gmra.mxu3 %vm109_vm1, %v5419_v17  ;;  %v5423_v12 = vsel %vm306_vm7, %v5420_v51, %v5422_v61  ;;  %v5682_v61 = vrot.slane %v8716_v19, 3 }
 0x874   :  { %v6573_v0 = vpop.eup %6572  ;;  %v4828_v4 = vadd.f32 %v8874_v31, %v4806_v14  ;;  %v5674_v14 = vrot.slane %v8568_v39, 3  ;;  %v5676_v39 = vrot.slane %v8610_v27, 3  ;;  %v5678_v27 = vrot.slane %v8644_v49, 3 }
 0x875   :  { %4864 = vst.msk [vmem:[%s9334_s21 + $0x68] sm:$0xff] %vm4850_vm3, %v6573_v0  ;;  %v4516_v20 = vpop.f32.mrf.mxu0 }
 0x876   :  { %6574 = vtanh.f32 %v4828_v4  ;;  %v4539_v53 = vadd.f32 %v4516_v20, %v8842_v42  ;;  %v5675_v20 = vsel %vm382_vm6, %v5672_v6, %v5674_v14  ;;  %v5677_v51 = vsel %vm382_vm6, %v5674_v14, %v5676_v39  ;;  %v9365_v6 = vld [vmem:[#allocation8_spill] sm:$0xff]  ;;  %v9367_v14 = vld [vmem:[#allocation10_spill] sm:$0xff] }
 0x878   :  { %v5196_v45 = vpop.f32.mrf.mxu1  ;;  %v4684_v59 = vadd.f32 %v4661_v47, %v4539_v53 }
 0x879   :  { %v4784_v24 = vpop.f32.mrf.mxu2 }
 0x87a   :  { %v4807_v30 = vadd.f32 %v4784_v24, %v4684_v59  ;;  %v9363_v24 = vld [vmem:[#allocation6_spill] sm:$0xff] }
 0x87b   :  { %6419 = vmatmul.msk.bf16.gmra.mxu1 %vm109_vm1, %v5155_v1  ;;  %v9085_v1 = vpop.f32.mrf.mxu3 }
 0x87c   :  { %v6575_v2 = vpop.eup %6574  ;;  %v4829_v33 = vadd.f32 %v8874_v31, %v4807_v30 }
 0x87d   :  { %4865 = vst.msk [vmem:[%s9334_s21 + $0x70] sm:$0xff] %vm4850_vm3, %v6575_v2  ;;  %v4519_v56 = vpop.f32.mrf.mxu0 }
 0x87e   :  { %6576 = vtanh.f32 %v4829_v33  ;;  %v4540_v42 = vadd.f32 %v4519_v56, %v8858_v22  ;;  %6428 = vmatmul.msk.bf16.gmra.mxu2 %vm109_vm1, %v8807_v25 }
 0x880   :  { %6408 = vmatmul.msk.bf16.gmra.mxu0 %vm109_vm1, %v8748_v41  ;;  %v5198_v47 = vpop.f32.mrf.mxu1  ;;  %v4685_v32 = vadd.f32 %v4664_v29, %v4540_v42 }
 0x881   :  { %v4787_v52 = vpop.f32.mrf.mxu2 }
 0x882   :  { %v4808_v48 = vadd.f32 %v4787_v52, %v4685_v32  ;;  %6438 = vmatmul.msk.bf16.gmra.mxu3 %vm109_vm1, %v5421_v34  ;;  %v9364_v32 = vld [vmem:[#allocation7_spill] sm:$0xff] }
 0x883   :  { %v9106_v9 = vpop.f32.mrf.mxu3 }
 0x884   :  { %v6577_v16 = vpop.eup %6576  ;;  %v4830_v10 = vadd.f32 %v8874_v31, %v4808_v48 }
 0x885   :  { %4866 = vst.msk [vmem:[%s9334_s21 + $0x78] sm:$0xff] %vm4850_vm3, %v6577_v16  ;;  %v4521_v25 = vpop.f32.mrf.mxu0 }
 0x886   :  { %6578 = vtanh.f32 %v4830_v10  ;;  %v4541_v22 = vadd.f32 %v4521_v25, %v8864_v54  ;;  %v5679_v10 = vsel %vm382_vm6, %v5676_v39, %v5678_v27 }
 0x888   :  { %v5201_v29 = vpop.f32.mrf.mxu1  ;;  %v4686_v8 = vadd.f32 %v4666_v57, %v4541_v22 }
 0x889   :  { %v4789_v62 = vpop.f32.mrf.mxu2 }
 0x88a   :  { %v4809_v18 = vadd.f32 %v4789_v62, %v4686_v8  ;;  %v5680_v62 = vrot.slane %v8676_v50, 3 }
 0x88b   :  { %6451 = vmatmul.msk.bf16.vlgmr.msra.gmra.mxu1 %vm109_vm1, %v5673_v28  ;;  %v5040_v25 = vpop.f32.mrf.mxu3 }
 0x88c   :  { %v6579_v13 = vpop.eup %6578  ;;  %v4831_v54 = vadd.f32 %v8874_v31, %v4809_v18  ;;  %v5681_v18 = vsel %vm382_vm6, %v5678_v27, %v5680_v62 }
 0x88d   :  { %4867 = vst.msk [vmem:[%s9334_s21 + $0x80] sm:$0xff] %vm4850_vm3, %v6579_v13  ;;  %v5085_v35 = vpop.f32.mrf.mxu0 }
 0x88e   :  { %6580 = vtanh.f32 %v4831_v54  ;;  %v5086_v60 = vadd.f32 %v5085_v35, %v8919_v7  ;;  %6429 = vmatmul.msk.bf16.gmra.mxu2 %vm109_vm1, %v5300_v55  ;;  %v9366_v35 = vld [vmem:[#allocation9_spill] sm:$0xff] }
 0x890   :  { %6409 = vmatmul.msk.bf16.gmra.mxu0 %vm109_vm1, %v8780_v46  ;;  %v5203_v31 = vpop.f32.mrf.mxu1  ;;  %v9103_v57 = vadd.f32 %v5196_v45, %v5086_v60 }
 0x892   :  { %6439 = vmatmul.msk.bf16.gmra.mxu3 %vm109_vm1, %v5423_v12 }
 0x894   :  { %v6581_v40 = vpop.eup %6580 }
 0x895   :  { %4869 = vst.msk [vmem:[%s9334_s21 + $0x88] sm:$0x3f] %vm4868_vm0, %v6581_v40  ;;  %v5087_v7 = vpop.f32.mrf.mxu0  ;;  %v5683_v40 = vsel %vm382_vm6, %v5680_v62, %v5682_v61 }
 0x896   :  { %v5088_v17 = vadd.f32 %v5087_v7, %v8936_v36 }
 0x898   :  { %v5206_v0 = vpop.f32.mrf.mxu1  ;;  %v9115_v4 = vadd.f32 %v5198_v47, %v5088_v17 }
 0x89b   :  { %6452 = vmatmul.msk.bf16.gmra.mxu1 %vm109_vm1, %v5675_v20 }
 0x89d   :  { %v5090_v53 = vpop.f32.mrf.mxu0 }
 0x89e   :  { %v5091_v45 = vadd.f32 %v5090_v53, %v8960_v26  ;;  %v5684_v53 = vrot.slane %v8748_v41, 3  ;;  %v5686_v41 = vrot.slane %v8780_v46, 3 }
 0x8a0   :  { %v5208_v59 = vpop.f32.mrf.mxu1  ;;  %6441 = vmatmul.msk.bf16.vlgmr.msra.gmra.mxu0 %vm109_vm1, %v9363_v24  ;;  %v9122_v30 = vadd.f32 %v5201_v29, %v5091_v45  ;;  %v5685_v24 = vsel %vm382_vm6, %v5682_v61, %v5684_v53 }
 0x8a5   :  { %v5092_v2 = vpop.f32.mrf.mxu0 }
 0x8a6   :  { %v5093_v36 = vadd.f32 %v5092_v2, %v8976_v21 }
 0x8a8   :  { %v5211_v33 = vpop.f32.mrf.mxu1  ;;  %v9126_v56 = vadd.f32 %v5203_v31, %v5093_v36 }
 0x8ab   :  { %6453 = vmatmul.msk.bf16.gmra.mxu1 %vm109_vm1, %v5677_v51 }
 0x8ad   :  { %v5095_v42 = vpop.f32.mrf.mxu0 }
 0x8ae   :  { %v5096_v26 = vadd.f32 %v5095_v42, %v8988_v5  ;;  %v5340_v42 = vpop.f32.mrf.mxu2 }
 0x8b0   :  { %v5213_v47 = vpop.f32.mrf.mxu1  ;;  %6442 = vmatmul.msk.bf16.gmra.mxu0 %vm109_vm1, %v9364_v32  ;;  %v9133_v52 = vadd.f32 %v5206_v0, %v5096_v26 }
 0x8b5   :  { %v5097_v34 = vpop.f32.mrf.mxu0 }
 0x8b6   :  { %v5098_v21 = vadd.f32 %v5097_v34, %v9008_v44  ;;  %v5042_v44 = vpop.f32.mrf.mxu3 }
 0x8b8   :  { %v5216_v48 = vpop.f32.mrf.mxu1  ;;  %v9137_v16 = vadd.f32 %v5208_v59, %v5098_v21  ;;  %v5687_v21 = vsel %vm382_vm6, %v5684_v53, %v5686_v41 }
 0x8bb   :  { %6454 = vmatmul.msk.bf16.gmra.mxu1 %vm109_vm1, %v5679_v10  ;;  %v5342_v10 = vpop.f32.mrf.mxu2 }
 0x8bd   :  { %v5100_v5 = vpop.f32.mrf.mxu0 }
 0x8be   :  { %v5101_v22 = vadd.f32 %v5100_v5, %v9023_v58  ;;  %v5045_v13 = vpop.f32.mrf.mxu3  ;;  %v9369_v5 = vld [vmem:[#allocation12_spill] sm:$0xff] }
 0x8c0   :  { %v5218_v23 = vpop.f32.mrf.mxu1  ;;  %6443 = vmatmul.msk.bf16.gmra.mxu0 %vm109_vm1, %v9365_v6  ;;  %v9144_v29 = vadd.f32 %v5211_v33, %v5101_v22  ;;  %v9368_v33 = vld [vmem:[#allocation11_spill] sm:$0xff] }
 0x8c3   :  { %v5345_v62 = vpop.f32.mrf.mxu2 }
 0x8c5   :  { %v5102_v8 = vpop.f32.mrf.mxu0 }
 0x8c6   :  { %v5103_v49 = vadd.f32 %v5102_v8, %v9036_v63  ;;  %v5047_v12 = vpop.f32.mrf.mxu3 }
 0x8c8   :  { %v5221_v43 = vpop.f32.mrf.mxu1  ;;  %v9148_v38 = vadd.f32 %v5213_v47, %v5103_v49 }
 0x8cb   :  { %6455 = vmatmul.msk.bf16.gmra.mxu1 %vm109_vm1, %v5681_v18 }
 0x8cd   :  { %v5105_v58 = vpop.f32.mrf.mxu0 }
 0x8ce   :  { %v5106_v28 = vadd.f32 %v5105_v58, %v9053_v3 }
 0x8d0   :  { %v5223_v54 = vpop.f32.mrf.mxu1  ;;  %6444 = vmatmul.msk.bf16.gmra.mxu0 %vm109_vm1, %v9366_v35  ;;  %v9155_v55 = vadd.f32 %v5216_v48, %v5106_v28 }
 0x8d5   :  { %v5107_v63 = vpop.f32.mrf.mxu0 }
 0x8d6   :  { %v5108_v50 = vadd.f32 %v5107_v63, %v9068_v11  ;;  %v5050_v11 = vpop.f32.mrf.mxu3  ;;  %v5347_v63 = vpop.f32.mrf.mxu2 }
 0x8d8   :  { %v5226_v60 = vpop.f32.mrf.mxu1  ;;  %v9159_v31 = vadd.f32 %v5218_v23, %v5108_v50 }
 0x8db   :  { %6456 = vmatmul.msk.bf16.gmra.mxu1 %vm109_vm1, %v5683_v40  ;;  %v5385_v40 = vadd.f32 %v5340_v42, %v9103_v57 }
 0x8dd   :  { %v5110_v3 = vpop.f32.mrf.mxu0 }
 0x8de   :  { %v5111_v7 = vadd.f32 %v5110_v3, %v9085_v1  ;;  %v5052_v1 = vpop.f32.mrf.mxu3 }
 0x8e0   :  { %v5228_v17 = vpop.f32.mrf.mxu1  ;;  %6445 = vmatmul.msk.bf16.gmra.mxu0 %vm109_vm1, %v9367_v14  ;;  %v9166_v0 = vadd.f32 %v5221_v43, %v5111_v7  ;;  %v5350_v7 = vpop.f32.mrf.mxu2 }
 0x8e5   :  { %v5112_v20 = vpop.f32.mrf.mxu0 }
 0x8e6   :  { %v5113_v19 = vadd.f32 %v5112_v20, %v9106_v9  ;;  %v5463_v47 = vpop.f32.mrf.mxu3 }
 0x8e7   :  { %v5508_v3 = vadd.f32 %v5463_v47, %v5385_v40 }
 0x8e8   :  { %v5231_v45 = vpop.f32.mrf.mxu1  ;;  %v9170_v59 = vadd.f32 %v5223_v54, %v5113_v19 }
 0x8eb   :  { %6457 = vmatmul.msk.bf16.gmra.mxu1 %vm109_vm1, %v5685_v24 }
 0x8ed   :  { %v5115_v2 = vpop.f32.mrf.mxu0 }
 0x8ee   :  { %v5116_v36 = vadd.f32 %v5115_v2, %v5040_v25  ;;  %v5465_v23 = vpop.f32.mrf.mxu3 }
 0x8f0   :  { %v5233_v39 = vpop.f32.mrf.mxu1  ;;  %6446 = vmatmul.msk.bf16.gmra.mxu0 %vm109_vm1, %v9368_v33  ;;  %v9176_v51 = vadd.f32 %v5226_v60, %v5116_v36  ;;  %v5352_v36 = vpop.f32.mrf.mxu2 }
 0x8f5   :  { %v5117_v9 = vpop.f32.mrf.mxu0 }
 0x8f6   :  { %v5118_v26 = vadd.f32 %v5117_v9, %v5042_v44  ;;  %v5688_v44 = vrot.slane %v8815_v15, 3  ;;  %v5468_v18 = vpop.f32.mrf.mxu3 }
 0x8f8   :  { %v5236_v32 = vpop.f32.mrf.mxu1  ;;  %v9179_v34 = vadd.f32 %v5228_v17, %v5118_v26  ;;  %v5689_v43 = vsel %vm382_vm6, %v5686_v41, %v5688_v44  ;;  %v5387_v26 = vadd.f32 %v5345_v62, %v9122_v30  ;;  %v5389_v62 = vadd.f32 %v5350_v7, %v9133_v52 }
 0x8fb   :  { %6458 = vmatmul.msk.bf16.gmra.mxu1 %vm109_vm1, %v5687_v21 }
 0x8fd   :  { %v5120_v27 = vpop.f32.mrf.mxu0 }
 0x8fe   :  { %v5121_v48 = vadd.f32 %v5120_v27, %v5045_v13  ;;  %v9370_v13 = vld [vmem:[#allocation13_spill] sm:$0xff]  ;;  %v5470_v50 = vpop.f32.mrf.mxu3  ;;  %v5355_v27 = vpop.f32.mrf.mxu2 }
 0x900   :  { %v5238_v25 = vpop.f32.mrf.mxu1  ;;  %6447 = vmatmul.msk.bf16.gmra.mxu0 %vm109_vm1, %v9369_v5  ;;  %v9185_v22 = vadd.f32 %v5231_v45, %v5121_v48  ;;  %v5386_v45 = vadd.f32 %v5342_v10, %v9115_v4  ;;  %v5388_v10 = vadd.f32 %v5347_v63, %v9126_v56 }
 0x902   :  { %v5509_v57 = vadd.f32 %v5465_v23, %v5386_v45  ;;  %v5511_v5 = vadd.f32 %v5470_v50, %v5388_v10  ;;  %v5390_v50 = vadd.f32 %v5352_v36, %v9137_v16 }
 0x905   :  { %v5122_v6 = vpop.f32.mrf.mxu0 }
 0x906   :  { %v5123_v46 = vadd.f32 %v5122_v6, %v5047_v12  ;;  %v5473_v20 = vpop.f32.mrf.mxu3  ;;  %v5357_v56 = vpop.f32.mrf.mxu2 }
 0x908   :  { %v5729_v8 = vpop.f32.mrf.mxu1  ;;  %v9188_v49 = vadd.f32 %v5233_v39, %v5123_v46 }
 0x90b   :  { %6459 = vmatmul.msk.bf16.gmra.mxu1 %vm109_vm1, %v5689_v43 }
 0x90d   :  { %v5125_v58 = vpop.f32.mrf.mxu0 }
 0x90e   :  { %v5126_v28 = vadd.f32 %v5125_v58, %v5050_v11  ;;  %v9202_v11 = vld [vmem:[%s9333_s20] ss:$0 sm:$0xff]  ;;  %v5475_v42 = vpop.f32.mrf.mxu3 }
 0x910   :  { %6448 = vmatmul.msk.bf16.gmra.mxu0 %vm109_vm1, %v9370_v13  ;;  %v5731_v54 = vpop.f32.mrf.mxu1  ;;  %v9194_v35 = vadd.f32 %v5236_v32, %v5126_v28 }
 0x915   :  { %v5127_v15 = vpop.f32.mrf.mxu0 }
 0x916   :  { %v5128_v61 = vadd.f32 %v5127_v15, %v5052_v1  ;;  %v5478_v30 = vpop.f32.mrf.mxu3 }
 0x918   :  { %v5734_v60 = vpop.f32.mrf.mxu1  ;;  %v9196_v12 = vadd.f32 %v5238_v25, %v5128_v61  ;;  %v5513_v61 = vadd.f32 %v5475_v42, %v5390_v50 }
 0x91d   :  { %v5607_v17 = vpop.f32.mrf.mxu0 }
 0x91e   :  { %v5652_v14 = vadd.f32 %v5607_v17, %v5508_v3  ;;  %v5480_v58 = vpop.f32.mrf.mxu3 }
 0x920   :  { %v5774_v19 = vadd.f32 %v5729_v8, %v5652_v14  ;;  %6449 = vmatmul.msk.bf16.gmra.mxu0 %vm109_vm1, %v8833_v37  ;;  %v5736_v53 = vpop.f32.mrf.mxu1  ;;  %v5510_v37 = vadd.f32 %v5468_v18, %v5387_v26  ;;  %v5512_v18 = vadd.f32 %v5473_v20, %v5389_v62  ;;  %v5391_v20 = vadd.f32 %v5355_v27, %v9144_v29 }
 0x922   :  { %v5796_v24 = vadd.f32 %v9202_v11, %v5774_v19  ;;  %v5514_v19 = vadd.f32 %v5478_v30, %v5391_v20 }
 0x924   :  { %6582 = vtanh.f32 %v5796_v24 }
 0x925   :  { %v5609_v1 = vpop.f32.mrf.mxu0 }
 0x926   :  { %v5653_v2 = vadd.f32 %v5609_v1, %v5509_v57  ;;  %v5483_v7 = vpop.f32.mrf.mxu3 }
 0x928   :  { %v5775_v39 = vadd.f32 %v5731_v54, %v5653_v2  ;;  %v5739_v33 = vpop.f32.mrf.mxu1 }
 0x92a   :  { %v6583_v9 = vpop.eup %6582  ;;  %v5797_v41 = vadd.f32 %v9202_v11, %v5775_v39  ;;  %v5392_v39 = vadd.f32 %v5357_v56, %v9148_v38 }
 0x92b   :  { %6460 = vst.msk [vmem:[%s9334_s21 + $0x90] sm:$0xff] %vm4850_vm3, %v6583_v9 }
 0x92c   :  { %6584 = vtanh.f32 %v5797_v41 }
 0x92d   :  { %v5612_v4 = vpop.f32.mrf.mxu0 }
 0x92e   :  { %v5654_v47 = vadd.f32 %v5612_v4, %v5510_v37  ;;  %v5485_v2 = vpop.f32.mrf.mxu3 }
 0x930   :  { %v5776_v32 = vadd.f32 %v5734_v60, %v5654_v47  ;;  %v5741_v21 = vpop.f32.mrf.mxu1  ;;  %v5360_v60 = vpop.f32.mrf.mxu2 }
 0x931   :  { %v5393_v47 = vadd.f32 %v5360_v60, %v9155_v55 }
 0x932   :  { %v6585_v48 = vpop.eup %6584  ;;  %v5798_v25 = vadd.f32 %v9202_v11, %v5776_v32 }
 0x933   :  { %6461 = vst.msk [vmem:[%s9334_s21 + $0x98] sm:$0xff] %vm4850_vm3, %v6585_v48 }
 0x934   :  { %6586 = vtanh.f32 %v5798_v25 }
 0x935   :  { %v5614_v23 = vpop.f32.mrf.mxu0 }
 0x936   :  { %v5655_v6 = vadd.f32 %v5614_v23, %v5511_v5  ;;  %v5488_v38 = vpop.f32.mrf.mxu3 }
 0x938   :  { %v5777_v46 = vadd.f32 %v5736_v53, %v5655_v6  ;;  %v5744_v44 = vpop.f32.mrf.mxu1  ;;  %v5362_v57 = vpop.f32.mrf.mxu2 }
 0x939   :  { %v5394_v5 = vadd.f32 %v5362_v57, %v9159_v31 }
 0x93a   :  { %v6587_v8 = vpop.eup %6586  ;;  %v5799_v43 = vadd.f32 %v9202_v11, %v5777_v46 }
 0x93b   :  { %6462 = vst.msk [vmem:[%s9334_s21 + $0xa0] sm:$0xff] %vm4850_vm3, %v6587_v8  ;;  %v5517_v6 = vadd.f32 %v5485_v2, %v5394_v5 }
 0x93c   :  { %6588 = vtanh.f32 %v5799_v43 }
 0x93d   :  { %v5617_v28 = vpop.f32.mrf.mxu0 }
 0x93e   :  { %v5656_v13 = vadd.f32 %v5617_v28, %v5512_v18  ;;  %v5490_v46 = vpop.f32.mrf.mxu3 }
 0x940   :  { %v5778_v54 = vadd.f32 %v5739_v33, %v5656_v13  ;;  %v5746_v52 = vpop.f32.mrf.mxu1  ;;  %v5515_v33 = vadd.f32 %v5480_v58, %v5392_v39  ;;  %v5365_v37 = vpop.f32.mrf.mxu2 }
 0x941   :  { %v5395_v56 = vadd.f32 %v5365_v37, %v9166_v0 }
 0x942   :  { %v6589_v63 = vpop.eup %6588  ;;  %v5800_v15 = vadd.f32 %v9202_v11, %v5778_v54 }
 0x943   :  { %6463 = vst.msk [vmem:[%s9334_s21 + $0xa8] sm:$0xff] %vm4850_vm3, %v6589_v63  ;;  %v5518_v58 = vadd.f32 %v5488_v38, %v5395_v56 }
 0x944   :  { %6590 = vtanh.f32 %v5800_v15 }
 0x945   :  { %v5619_v40 = vpop.f32.mrf.mxu0 }
 0x946   :  { %v5657_v3 = vadd.f32 %v5619_v40, %v5513_v61  ;;  %v5493_v63 = vpop.f32.mrf.mxu3 }
 0x948   :  { %v5779_v17 = vadd.f32 %v5741_v21, %v5657_v3  ;;  %v5749_v53 = vpop.f32.mrf.mxu1  ;;  %v5516_v21 = vadd.f32 %v5483_v7, %v5393_v47  ;;  %v5367_v55 = vpop.f32.mrf.mxu2 }
 0x94a   :  { %v6591_v14 = vpop.eup %6590  ;;  %v5801_v16 = vadd.f32 %v9202_v11, %v5779_v17 }
 0x94b   :  { %6464 = vst.msk [vmem:[%s9334_s21 + $0xb0] sm:$0xff] %vm4850_vm3, %v6591_v14 }
 0x94c   :  { %6592 = vtanh.f32 %v5801_v16 }
 0x94d   :  { %v5622_v45 = vpop.f32.mrf.mxu0 }
 0x94e   :  { %v5658_v24 = vadd.f32 %v5622_v45, %v5514_v19  ;;  %v5495_v14 = vpop.f32.mrf.mxu3 }
 0x950   :  { %v5780_v1 = vadd.f32 %v5744_v44, %v5658_v24  ;;  %v5751_v26 = vpop.f32.mrf.mxu1  ;;  %v5370_v28 = vpop.f32.mrf.mxu2 }
 0x951   :  { %v5397_v16 = vadd.f32 %v5370_v28, %v9176_v51 }
 0x952   :  { %v6593_v36 = vpop.eup %6592  ;;  %v5802_v29 = vadd.f32 %v9202_v11, %v5780_v1 }
 0x953   :  { %6465 = vst.msk [vmem:[%s9334_s21 + $0xb8] sm:$0xff] %vm4850_vm3, %v6593_v36  ;;  %v5520_v19 = vadd.f32 %v5493_v63, %v5397_v16 }
 0x954   :  { %6594 = vtanh.f32 %v5802_v29 }
 0x955   :  { %v5624_v42 = vpop.f32.mrf.mxu0 }
 0x956   :  { %v5659_v9 = vadd.f32 %v5624_v42, %v5515_v33  ;;  %v5498_v51 = vpop.f32.mrf.mxu3 }
 0x958   :  { %v5781_v41 = vadd.f32 %v5746_v52, %v5659_v9  ;;  %v5754_v25 = vpop.f32.mrf.mxu1  ;;  %v5396_v52 = vadd.f32 %v5367_v55, %v9170_v59  ;;  %v5372_v7 = vpop.f32.mrf.mxu2 }
 0x959   :  { %v5398_v36 = vadd.f32 %v5372_v7, %v9179_v34 }
 0x95a   :  { %v6595_v4 = vpop.eup %6594  ;;  %v5803_v32 = vadd.f32 %v9202_v11, %v5781_v41  ;;  %v5519_v61 = vadd.f32 %v5490_v46, %v5396_v52 }
 0x95b   :  { %6466 = vst.msk [vmem:[%s9334_s21 + $0xc0] sm:$0xff] %vm4850_vm3, %v6595_v4  ;;  %v5521_v29 = vadd.f32 %v5495_v14, %v5398_v36 }
 0x95c   :  { %6596 = vtanh.f32 %v5803_v32 }
 0x95d   :  { %v5627_v27 = vpop.f32.mrf.mxu0 }
 0x95e   :  { %v5660_v48 = vadd.f32 %v5627_v27, %v5516_v21  ;;  %v5500_v32 = vpop.f32.mrf.mxu3 }
 0x960   :  { %v5782_v10 = vadd.f32 %v5749_v53, %v5660_v48  ;;  %v5756_v31 = vpop.f32.mrf.mxu1  ;;  %v5375_v1 = vpop.f32.mrf.mxu2 }
 0x961   :  { %v5399_v37 = vadd.f32 %v5375_v1, %v9185_v22 }
 0x962   :  { %v6597_v30 = vpop.eup %6596  ;;  %v5804_v23 = vadd.f32 %v9202_v11, %v5782_v10 }
 0x963   :  { %6467 = vst.msk [vmem:[%s9334_s21 + $0xc8] sm:$0xff] %vm4850_vm3, %v6597_v30  ;;  %v5522_v47 = vadd.f32 %v5498_v51, %v5399_v37 }
 0x964   :  { %6598 = vtanh.f32 %v5804_v23 }
 0x965   :  { %v5629_v44 = vpop.f32.mrf.mxu0 }
 0x966   :  { %v5661_v8 = vadd.f32 %v5629_v44, %v5517_v6  ;;  %v5503_v6 = vpop.f32.mrf.mxu3 }
 0x968   :  { %v5783_v62 = vadd.f32 %v5751_v26, %v5661_v8  ;;  %v5759_v60 = vpop.f32.mrf.mxu1  ;;  %v5377_v34 = vpop.f32.mrf.mxu2 }
 0x969   :  { %v5400_v10 = vadd.f32 %v5377_v34, %v9188_v49 }
 0x96a   :  { %v6599_v43 = vpop.eup %6598  ;;  %v5805_v18 = vadd.f32 %v9202_v11, %v5783_v62 }
 0x96b   :  { %6468 = vst.msk [vmem:[%s9334_s21 + $0xd0] sm:$0xff] %vm4850_vm3, %v6599_v43  ;;  %v5523_v30 = vadd.f32 %v5500_v32, %v5400_v10 }
 0x96c   :  { %6600 = vtanh.f32 %v5805_v18 }
 0x96d   :  { %v5632_v13 = vpop.f32.mrf.mxu0 }
 0x96e   :  { %v5662_v54 = vadd.f32 %v5632_v13, %v5518_v58  ;;  %v5505_v28 = vpop.f32.mrf.mxu3 }
 0x970   :  { %v5784_v50 = vadd.f32 %v5754_v25, %v5662_v54  ;;  %v5761_v24 = vpop.f32.mrf.mxu1  ;;  %v5380_v5 = vpop.f32.mrf.mxu2 }
 0x971   :  { %v5401_v8 = vadd.f32 %v5380_v5, %v9194_v35 }
 0x972   :  { %v6601_v15 = vpop.eup %6600  ;;  %v5806_v0 = vadd.f32 %v9202_v11, %v5784_v50 }
 0x973   :  { %6469 = vst.msk [vmem:[%s9334_s21 + $0xd8] sm:$0xff] %vm4850_vm3, %v6601_v15  ;;  %v5524_v62 = vadd.f32 %v5503_v6, %v5401_v8 }
 0x974   :  { %6602 = vtanh.f32 %v5806_v0 }
 0x975   :  { %v5634_v40 = vpop.f32.mrf.mxu0 }
 0x976   :  { %v5663_v3 = vadd.f32 %v5634_v40, %v5519_v61 }
 0x978   :  { %v5785_v17 = vadd.f32 %v5756_v31, %v5663_v3  ;;  %v5764_v26 = vpop.f32.mrf.mxu1  ;;  %v5382_v31 = vpop.f32.mrf.mxu2 }
 0x979   :  { %v5402_v54 = vadd.f32 %v5382_v31, %v9196_v12 }
 0x97a   :  { %v6603_v20 = vpop.eup %6602  ;;  %v5807_v59 = vadd.f32 %v9202_v11, %v5785_v17 }
 0x97b   :  { %6470 = vst.msk [vmem:[%s9334_s21 + $0xe0] sm:$0xff] %vm4850_vm3, %v6603_v20  ;;  %v5525_v63 = vadd.f32 %v5505_v28, %v5402_v54 }
 0x97c   :  { %6604 = vtanh.f32 %v5807_v59 }
 0x97d   :  { %v5637_v53 = vpop.f32.mrf.mxu0 }
 0x97e   :  { %v5664_v45 = vadd.f32 %v5637_v53, %v5520_v19 }
 0x980   :  { %v5786_v57 = vadd.f32 %v5759_v60, %v5664_v45  ;;  %v5766_v22 = vpop.f32.mrf.mxu1 }
 0x982   :  { %v6605_v2 = vpop.eup %6604  ;;  %v5808_v39 = vadd.f32 %v9202_v11, %v5786_v57 }
 0x983   :  { %6471 = vst.msk [vmem:[%s9334_s21 + $0xe8] sm:$0xff] %vm4850_vm3, %v6605_v2 }
 0x984   :  { %6606 = vtanh.f32 %v5808_v39 }
 0x985   :  { %v5639_v33 = vpop.f32.mrf.mxu0 }
 0x986   :  { %v5665_v42 = vadd.f32 %v5639_v33, %v5521_v29 }
 0x988   :  { %v5787_v9 = vadd.f32 %v5761_v24, %v5665_v42  ;;  %v5769_v43 = vpop.f32.mrf.mxu1 }
 0x98a   :  { %v6607_v41 = vpop.eup %6606  ;;  %v5809_v4 = vadd.f32 %v9202_v11, %v5787_v9 }
 0x98b   :  { %6472 = vst.msk [vmem:[%s9334_s21 + $0xf0] sm:$0xff] %vm4850_vm3, %v6607_v41 }
 0x98c   :  { %6608 = vtanh.f32 %v5809_v4 }
 0x98d   :  { %v5642_v38 = vpop.f32.mrf.mxu0 }
 0x98e   :  { %v5666_v21 = vadd.f32 %v5642_v38, %v5522_v47 }
 0x990   :  { %v5788_v27 = vadd.f32 %v5764_v26, %v5666_v21  ;;  %v5771_v52 = vpop.f32.mrf.mxu1 }
 0x992   :  { %v6609_v48 = vpop.eup %6608  ;;  %v5810_v25 = vadd.f32 %v9202_v11, %v5788_v27 }
 0x993   :  { %6473 = vst.msk [vmem:[%s9334_s21 + $0xf8] sm:$0xff] %vm4850_vm3, %v6609_v48 }
 0x994   :  { %6610 = vtanh.f32 %v5810_v25 }
 0x995   :  { %v5644_v23 = vpop.f32.mrf.mxu0 }
 0x996   :  { %v5667_v55 = vadd.f32 %v5644_v23, %v5523_v30 }
 0x998   :  { %v5789_v46 = vadd.f32 %v5766_v22, %v5667_v55 }
 0x99a   :  { %v6611_v44 = vpop.eup %6610  ;;  %v5811_v49 = vadd.f32 %v9202_v11, %v5789_v46 }
 0x99b   :  { %6474 = vst.msk [vmem:[%s9334_s21 + $0x100] sm:$0xff] %vm4850_vm3, %v6611_v44 }
 0x99c   :  { %6612 = vtanh.f32 %v5811_v49 }
 0x99d   :  { %v5647_v56 = vpop.f32.mrf.mxu0 }
 0x99e   :  { %v5668_v18 = vadd.f32 %v5647_v56, %v5524_v62 }
 0x9a0   :  { %v5790_v58 = vadd.f32 %v5769_v43, %v5668_v18 }
 0x9a2   :  { %v6613_v13 = vpop.eup %6612  ;;  %v5812_v35 = vadd.f32 %v9202_v11, %v5790_v58 }
 0x9a3   :  { %6475 = vst.msk [vmem:[%s9334_s21 + $0x108] sm:$0xff] %vm4850_vm3, %v6613_v13 }
 0x9a4   :  { %6614 = vtanh.f32 %v5812_v35 }
 0x9a5   :  { %v5649_v50 = vpop.f32.mrf.mxu0 }
 0x9a6   :  { %v5669_v15 = vadd.f32 %v5649_v50, %v5525_v63 }
 0x9a8   :  { %v5791_v0 = vadd.f32 %v5771_v52, %v5669_v15 }
 0x9aa   :  { %v6615_v61 = vpop.eup %6614  ;;  %v5813_v60 = vadd.f32 %v9202_v11, %v5791_v0 }
 0x9ab   :  { %6476 = vst.msk [vmem:[%s9334_s21 + $0x110] sm:$0xff] %vm4850_vm3, %v6615_v61 }
 0x9ac   :  { %6616 = vtanh.f32 %v5813_v60 }
 0x9b2   :  { %v6617_v12 = vpop.eup %6616 }
 0x9b3   :  { %6477 = vst.msk [vmem:[%s9334_s21 + $0x118] sm:$0x3f] %vm4868_vm0, %v6617_v12 }

</bundles_post_ra>
